<compile_context>
chip_gen: v7x
topology: tpu7x:2x2x1
jax: 0.10.0
libtpu: 0.0.40
codegen_flags: <defaults>
</compile_context>

<pallas_src>
import functools

import jax
import jax.numpy as jnp
from jax.experimental import pallas as pl
from jax.experimental.pallas import tpu as pltpu


def _rup(x, m):
    return (x + m - 1) // m * m


def _act_fn(y, act):
    if act == "tanh":
        return jnp.tanh(y)
    if act == "relu":
        return jnp.maximum(y, 0.0)
    if act == "lrelu":
        return jnp.where(y > 0, y, 0.2 * y)
    return y


# ---------------------------------------------------------------------------
# Pallas kernel: transposed fused matmul + bias/activation epilogue
#                + per-channel batch statistics (for BatchNorm).
#   w:(N,K) bf16, a:(K,tm) bf16, b:(N,1) f32
#   o:(N,tm)            = act(w@a + b)        (stored in o's dtype, lane-dense)
#   sum/ssq:(N,128) f32 = per-row sum / sum-of-squares of the f32 value for this
#                         M tile (broadcast over 128 lanes; lane 0 is consumed).
# K and N are full-dimension blocks (no zero padding); a single grid axis tiles
# M ("parallel" -> megacore sharding on v7x, no block revisiting).
# ---------------------------------------------------------------------------
def _fused_mm_t_kernel(w_ref, a_ref, b_ref, o_ref, sum_ref, ssq_ref, *, act):
    y = jnp.dot(w_ref[...], a_ref[...], preferred_element_type=jnp.float32)
    y = y + b_ref[...]                 # per-output-channel bias (zeros if unused)
    y = _act_fn(y, act)                # fused final activation (e.g. tanh)
    o_ref[...] = y.astype(o_ref.dtype)
    # BatchNorm batch statistics, computed in f32 before the bf16 downcast.
    cs = jnp.sum(y, axis=1, keepdims=True)          # (N, 1)
    cq = jnp.sum(y * y, axis=1, keepdims=True)
    sum_ref[...] = jnp.broadcast_to(cs, sum_ref.shape)
    ssq_ref[...] = jnp.broadcast_to(cq, ssq_ref.shape)


_SMALL_M = 1024   # deep low-res layers: pallas launch overhead > any HBM saving


def fused_matmul_t(wm, at, bias=None, act="id", *, out_dtype=jnp.bfloat16, nblk=2):
    """out(N,M) = act(wm @ at + bias[:,None]) plus per-row (sum, sum_sq) of out.

    wm:(N,K), at:(K,M); operands are cast to bf16, accumulation/epilogue are f32.
    Returns (out (N,M) out_dtype, row_sum (N,) f32, row_ssq (N,) f32).
    """
    N, K = wm.shape
    K2, M = at.shape
    assert K == K2
    wm = wm.astype(jnp.bfloat16)
    at = at.astype(jnp.bfloat16)
    b2d = (jnp.zeros((N, 1), jnp.float32) if bias is None
           else bias.reshape(N, 1).astype(jnp.float32))

    if M <= _SMALL_M:
        # Tiny (deep) layers: one fused XLA op beats a pallas_call launch.
        y = jnp.dot(wm, at, preferred_element_type=jnp.float32) + b2d
        y = _act_fn(y, act)
        return y.astype(out_dtype), jnp.sum(y, axis=1), jnp.sum(y * y, axis=1)

    Mp = _rup(M, nblk * 128)
    tm = Mp // nblk
    if Mp != M:
        # Zero-padded columns leave the statistics unchanged only when bias==0
        # and act=="id" -- the only configuration whose stats are consumed.
        assert bias is None and act == "id"
        at = jnp.pad(at, ((0, 0), (0, Mp - M)))

    out, psum, pssq = pl.pallas_call(
        functools.partial(_fused_mm_t_kernel, act=act),
        out_shape=(jax.ShapeDtypeStruct((N, Mp), out_dtype),
                   jax.ShapeDtypeStruct((N, nblk * 128), jnp.float32),
                   jax.ShapeDtypeStruct((N, nblk * 128), jnp.float32)),
        grid_spec=pltpu.PrefetchScalarGridSpec(
            num_scalar_prefetch=0,
            grid=(nblk,),
            in_specs=[pl.BlockSpec((N, K), lambda i: (0, 0)),
                      pl.BlockSpec((K, tm), lambda i: (0, i)),
                      pl.BlockSpec((N, 1), lambda i: (0, 0))],
            out_specs=(pl.BlockSpec((N, tm), lambda i: (0, i)),
                       pl.BlockSpec((N, 128), lambda i: (0, i)),
                       pl.BlockSpec((N, 128), lambda i: (0, i)))),
        compiler_params=pltpu.CompilerParams(
            dimension_semantics=("parallel",)),
    )(wm, at, b2d)

    if Mp != M:
        out = out[:, :M]
    row_sum = psum.reshape(N, nblk, 128)[:, :, 0].sum(axis=1)
    row_ssq = pssq.reshape(N, nblk, 128)[:, :, 0].sum(axis=1)
    return out, row_sum, row_ssq


# ---------------------------------------------------------------------------
# Conv2d(k=4, s=2, p=1, bias=False), channels-first.  x:(Cin, Nb, H, W).
# The caller's pending BN affine / LeakyReLU is folded into x as a lazy jnp
# expression, so XLA fuses it into the (bf16) tap gather.
# ---------------------------------------------------------------------------
def conv2d_k4s2p1_cf(x, wm):
    Cin, Nb, H, W = x.shape
    Cout = wm.shape[0]
    Ho, Wo = H // 2, W // 2
    xp = jnp.pad(x, ((0, 0), (0, 0), (1, 1), (1, 1))).astype(jnp.bfloat16)
    taps = [xp[:, :, ky:ky + 2 * Ho:2, kx:kx + 2 * Wo:2].reshape(Cin, Nb * Ho * Wo)
            for ky in range(4) for kx in range(4)]
    at = jnp.concatenate(taps, axis=0)                      # (16*Cin, M)
    out, s, ss = fused_matmul_t(wm, at, None, "id")
    return out.reshape(Cout, Nb, Ho, Wo), s, ss


# ---------------------------------------------------------------------------
# ConvTranspose2d(k=4, s=2, p=1): 4-output-phase decomposition sharing one
# 3x3-window gather of the (pad=1) input.  Phase p=2*py+px of output pixel
# (2u+py, 2v+px) only sees the 2x2 sub-window {dy,dx} listed in _TAP.
# ---------------------------------------------------------------------------
_TAP = {0: {0: 3, 1: 1},   # output phase parity 0 (even): dy -> ky
        1: {1: 2, 2: 0}}   # output phase parity 1 (odd):  dy -> ky


def _convT_phase_weight(w_iohw):
    """(Cin, Cout, 4, 4) PyTorch ConvTranspose2d weight -> (4*Cout, 9*Cin)."""
    Cin, Cout = w_iohw.shape[0], w_iohw.shape[1]
    w = jnp.transpose(w_iohw, (2, 3, 0, 1))        # (ky, kx, Cin, Cout)
    Wc = jnp.zeros((4, Cout, 3, 3, Cin), jnp.float32)
    for py in (0, 1):
        for px in (0, 1):
            p = 2 * py + px
            for dy, ky in _TAP[py].items():
                for dx, kx in _TAP[px].items():
                    Wc = Wc.at[p, :, dy, dx, :].set(w[ky, kx].T)
    return Wc.reshape(4 * Cout, 9 * Cin)


def conv_transpose2d_cf(h, wc, bias4=None, act="id", out_dtype=jnp.bfloat16):
    """h:(Cin, Nb, H, W).  Returns (ph (4*Cout, Nb*H*W), row_sum, row_ssq)."""
    Cin, Nb, H, W = h.shape
    xp = jnp.pad(h, ((0, 0), (0, 0), (1, 1), (1, 1))).astype(jnp.bfloat16)
    taps = [xp[:, :, dy:dy + H, dx:dx + W].reshape(Cin, Nb * H * W)
            for dy in range(3) for dx in range(3)]
    at = jnp.concatenate(taps, axis=0)                      # (9*Cin, M)
    return fused_matmul_t(wc, at, bias4, act, out_dtype=out_dtype)


def unphase_cf(ph, Nb, H, W, Cout, scale=None, shift=None):
    """(4*Cout, Nb*H*W) phase layout -> (Cout, Nb, 2H, 2W).  The optional
    per-channel BatchNorm affine is fused into this un-interleave copy."""
    ph = ph.astype(jnp.float32)
    if scale is not None:
        ph = ph * jnp.tile(scale, 4)[:, None] + jnp.tile(shift, 4)[:, None]
    y = ph.reshape(2, 2, Cout, Nb, H, W)           # (py, px, co, n, h, w)
    y = jnp.transpose(y, (2, 3, 4, 0, 5, 1))       # (co, n, h, py, w, px)
    return y.reshape(Cout, Nb, 2 * H, 2 * W)


def bn_affine(col_sum, col_ssq, count, gamma, beta, eps=1e-5):
    # PyTorch BatchNorm2d training mode: biased batch statistics.
    mean = col_sum / count
    var = jnp.maximum(col_ssq / count - mean * mean, 0.0)
    scale = gamma * jax.lax.rsqrt(var + eps)
    shift = beta - mean * scale
    return scale, shift


def _resolve(x, pend):
    """Apply a pending per-channel BN affine lazily (fuses into consumers)."""
    if pend is None:
        return x
    scale, shift = pend
    return x * scale[:, None, None, None] + shift[:, None, None, None]


# ---------------------------------------------------------------------------
# U-Net structure (mirrors UnetSkipConnectionBlock nesting)
# ---------------------------------------------------------------------------
def make_configs(input_nc, output_nc, nf):
    return [
        dict(kind="outermost", outer=output_nc, inner=nf,     inp=input_nc),
        dict(kind="mid",       outer=nf,        inner=nf * 2, inp=nf),
        dict(kind="mid",       outer=nf * 2,    inner=nf * 4, inp=nf * 2),
        dict(kind="mid",       outer=nf * 4,    inner=nf * 8, inp=nf * 4),
        dict(kind="mid",       outer=nf * 8,    inner=nf * 8, inp=nf * 8),
        dict(kind="mid",       outer=nf * 8,    inner=nf * 8, inp=nf * 8),
        dict(kind="mid",       outer=nf * 8,    inner=nf * 8, inp=nf * 8),
        dict(kind="innermost", outer=nf * 8,    inner=nf * 8, inp=nf * 8),
    ]


def init_params(key, cfgs):
    params = []
    for cfg in cfgs:
        key, *ks = jax.random.split(key, 8)
        p = {}
        p["down_w"] = 0.05 * jax.random.normal(
            ks[0], (cfg["inner"], cfg["inp"], 4, 4), jnp.float32)
        if cfg["kind"] == "mid":
            p["dn_g"] = 1.0 + 0.1 * jax.random.normal(ks[1], (cfg["inner"],), jnp.float32)
            p["dn_b"] = 0.1 * jax.random.normal(ks[2], (cfg["inner"],), jnp.float32)
        up_in = cfg["inner"] if cfg["kind"] == "innermost" else cfg["inner"] * 2
        p["up_w"] = 0.05 * jax.random.normal(
            ks[3], (up_in, cfg["outer"], 4, 4), jnp.float32)
        if cfg["kind"] == "outermost":
            p["up_b"] = 0.05 * jax.random.normal(ks[4], (cfg["outer"],), jnp.float32)
        else:
            p["un_g"] = 1.0 + 0.1 * jax.random.normal(ks[5], (cfg["outer"],), jnp.float32)
            p["un_b"] = 0.1 * jax.random.normal(ks[6], (cfg["outer"],), jnp.float32)
        params.append(p)
    return params


def prepare_params(params, cfgs):
    """Hoisted weight preparation (runs once per parameter set, outside jit):
    conv weight -> (Cout, 16*Cin) bf16; convT weight -> phase matrix (4*Cout, 9*Cin)
    bf16; outermost bias tiled over the 4 phases."""
    prepped = []
    for cfg, p in zip(cfgs, params):
        q = {}
        q["down_wm"] = (jnp.transpose(p["down_w"], (0, 2, 3, 1))
                        .reshape(cfg["inner"], 16 * cfg["inp"])
                        .astype(jnp.bfloat16))
        q["up_wc"] = _convT_phase_weight(p["up_w"]).astype(jnp.bfloat16)
        if "up_b" in p:
            q["up_b4"] = jnp.tile(p["up_b"], 4).astype(jnp.float32)
        for k in ("dn_g", "dn_b", "un_g", "un_b"):
            if k in p:
                q[k] = p[k]
        prepped.append(q)
    return prepped


def block_fwd(x, pend, cfgs, prepped, i):
    """x: (C, Nb, H, W) channels-first tensor; pend: optional (scale, shift)
    BatchNorm affine of the parent's down path, applied lazily so it fuses into
    this block's gather and skip concat instead of costing its own HBM pass."""
    cfg, p = cfgs[i], prepped[i]
    _, Nb, H, W = x.shape
    Ho, Wo = H // 2, W // 2

    if cfg["kind"] == "outermost":
        h, _, _ = conv2d_k4s2p1_cf(x, p["down_wm"])          # downconv (no act/BN)
        h = block_fwd(h, None, cfgs, prepped, i + 1)
        h = jnp.maximum(h.astype(jnp.float32), 0.0)          # uprelu (fused into gather)
        ph, _, _ = conv_transpose2d_cf(h, p["up_wc"], p["up_b4"], "tanh",
                                       out_dtype=jnp.float32)
        return unphase_cf(ph, Nb, Ho, Wo, cfg["outer"])

    xin = _resolve(x.astype(jnp.float32), pend)              # parent BN affine
    a = jnp.where(xin > 0, xin, 0.2 * xin)                   # downrelu (fused into gather)

    if cfg["kind"] == "innermost":
        h, _, _ = conv2d_k4s2p1_cf(a, p["down_wm"])          # no downnorm
    else:
        h, s, ss = conv2d_k4s2p1_cf(a, p["down_wm"])
        dn_scale, dn_shift = bn_affine(
            s, ss, float(Nb * Ho * Wo), p["dn_g"], p["dn_b"])
        h = block_fwd(h, (dn_scale, dn_shift), cfgs, prepped, i + 1)

    h = jnp.maximum(h.astype(jnp.float32), 0.0)              # uprelu (fused into gather)
    ph, cs, cq = conv_transpose2d_cf(h, p["up_wc"])          # upconv (bias=False)
    Cout = cfg["outer"]
    s_ch = cs.reshape(4, Cout).sum(axis=0)                   # merge the 4 phases
    q_ch = cq.reshape(4, Cout).sum(axis=0)
    un_scale, un_shift = bn_affine(s_ch, q_ch, float(Nb * H * W), p["un_g"], p["un_b"])
    hh = unphase_cf(ph, Nb, Ho, Wo, Cout, un_scale, un_shift)   # upnorm fused here
    return jnp.concatenate([xin, hh], axis=0)                # skip connection


def unet_forward(x_nchw, prepped, cfgs):
    x = jnp.transpose(x_nchw, (1, 0, 2, 3))   # NCHW -> (C, Nb, H, W) channels-first
    y = block_fwd(x, None, cfgs, prepped, 0)
    return jnp.transpose(y, (1, 0, 2, 3)).astype(jnp.float32)


# ---------------------------------------------------------------------------
if __name__ == "__main__":
    # The 8 stride-2 stages require a 256x256 spatial input (smallest legal).
    INPUT_NC, OUTPUT_NC, NF = 1, 1, 4
    Nb, H, W = 1, 256, 256

    key = jax.random.PRNGKey(0)
    kp, kx = jax.random.split(key)

    cfgs = make_configs(INPUT_NC, OUTPUT_NC, NF)
    params = init_params(kp, cfgs)
    prepped = prepare_params(params, cfgs)        # hoisted: once per parameter set
    x = jax.random.normal(kx, (Nb, INPUT_NC, H, W), jnp.float32)

    fwd = jax.jit(functools.partial(unet_forward, cfgs=cfgs))
    out = jax.block_until_ready(fwd(x, prepped))

    assert out.shape == (Nb, OUTPUT_NC, H, W), out.shape
    assert bool(jnp.all(jnp.isfinite(out)))
    print("KERNEL_OK")
</pallas_src>

<mosaic_0001>
module attributes {stable_mosaic.version = 11 : i64} {
  func.func @_fused_mm_t_kernel(%arg0: i32, %arg1: memref<4x16xbf16, #tpu.memory_space<vmem>>, %arg2: memref<16x8192xbf16, #tpu.memory_space<vmem>>, %arg3: memref<4x1xf32, #tpu.memory_space<vmem>>, %arg4: memref<4x8192xbf16, #tpu.memory_space<vmem>>, %arg5: memref<4x128xf32, #tpu.memory_space<vmem>>, %arg6: memref<4x128xf32, #tpu.memory_space<vmem>>) attributes {dimension_semantics = [#tpu.dimension_semantics<parallel>], iteration_bounds = array<i64: 2>, scalar_prefetch = 0 : i64, scratch_operands = 0 : i64, tpu.core_type = #tpu.core_type<tc>, window_params = [{pipeline_mode = #tpu.pipeline_mode<synchronous>, transform_indices = @transform_0, window_bounds = array<i64: 4, 16>}, {transform_indices = @transform_1, window_bounds = array<i64: 16, 8192>}, {pipeline_mode = #tpu.pipeline_mode<synchronous>, transform_indices = @transform_2, window_bounds = array<i64: 4, 1>}, {transform_indices = @transform_3, window_bounds = array<i64: 4, 8192>}, {transform_indices = @transform_4, window_bounds = array<i64: 4, 128>}, {transform_indices = @transform_5, window_bounds = array<i64: 4, 128>}]} {
    %c0 = arith.constant 0 : index
    %c0_0 = arith.constant 0 : index
    %0 = vector.load %arg1[%c0, %c0_0] : memref<4x16xbf16, #tpu.memory_space<vmem>>, vector<4x16xbf16>
    %c0_1 = arith.constant 0 : index
    %c0_2 = arith.constant 0 : index
    %1 = vector.load %arg2[%c0_1, %c0_2] : memref<16x8192xbf16, #tpu.memory_space<vmem>>, vector<16x8192xbf16>
    %cst = arith.constant dense<0.000000e+00> : vector<4x8192xf32>
    %2 = tpu.matmul %0, %1, %cst {dimension_numbers = #tpu.dot_dimension_numbers<[1], [0], [0], [1], [0, 0, 1, 1], [], []>} : vector<4x16xbf16>, vector<16x8192xbf16>, vector<4x8192xf32> -> vector<4x8192xf32>
    %c0_3 = arith.constant 0 : index
    %c0_4 = arith.constant 0 : index
    %3 = vector.load %arg3[%c0_3, %c0_4] : memref<4x1xf32, #tpu.memory_space<vmem>>, vector<4x1xf32>
    %4 = vector.broadcast %3 : vector<4x1xf32> to vector<4x8192xf32>
    %5 = arith.addf %2, %4 : vector<4x8192xf32>
    %6 = arith.truncf %5 : vector<4x8192xf32> to vector<4x8192xbf16>
    %c0_5 = arith.constant 0 : index
    %c0_6 = arith.constant 0 : index
    %7 = vector.load %arg4[%c0_5, %c0_6] : memref<4x8192xbf16, #tpu.memory_space<vmem>>, vector<4x8192xbf16>
    tpu.vector_store %arg4[%c0_5, %c0_6], %6 {strides = array<i32>} : memref<4x8192xbf16, #tpu.memory_space<vmem>>, vector<4x8192xbf16>,
    %cst_7 = arith.constant dense<0.000000e+00> : vector<4xf32>
    %8 = vector.multi_reduction <add>, %5, %cst_7 [1] : vector<4x8192xf32> to vector<4xf32>
    %9 = vector.shape_cast %8 : vector<4xf32> to vector<4x1xf32>
    %10 = arith.mulf %5, %5 : vector<4x8192xf32>
    %cst_8 = arith.constant dense<0.000000e+00> : vector<4xf32>
    %11 = vector.multi_reduction <add>, %10, %cst_8 [1] : vector<4x8192xf32> to vector<4xf32>
    %12 = vector.shape_cast %11 : vector<4xf32> to vector<4x1xf32>
    %13 = vector.shape_cast %9 : vector<4x1xf32> to vector<4x1xf32>
    %14 = vector.broadcast %13 : vector<4x1xf32> to vector<4x128xf32>
    %c0_9 = arith.constant 0 : index
    %c0_10 = arith.constant 0 : index
    %15 = vector.load %arg5[%c0_9, %c0_10] : memref<4x128xf32, #tpu.memory_space<vmem>>, vector<4x128xf32>
    tpu.vector_store %arg5[%c0_9, %c0_10], %14 {strides = array<i32>} : memref<4x128xf32, #tpu.memory_space<vmem>>, vector<4x128xf32>,
    %16 = vector.shape_cast %12 : vector<4x1xf32> to vector<4x1xf32>
    %17 = vector.broadcast %16 : vector<4x1xf32> to vector<4x128xf32>
    %c0_11 = arith.constant 0 : index
    %c0_12 = arith.constant 0 : index
    %18 = vector.load %arg6[%c0_11, %c0_12] : memref<4x128xf32, #tpu.memory_space<vmem>>, vector<4x128xf32>
    tpu.vector_store %arg6[%c0_11, %c0_12], %17 {strides = array<i32>} : memref<4x128xf32, #tpu.memory_space<vmem>>, vector<4x128xf32>,
    return
  }
  func.func @transform_0(%arg0: i32) -> (i32, i32) {
    %c0_i32 = arith.constant 0 : i32
    %c0_i32_0 = arith.constant 0 : i32
    %c0_i32_1 = arith.constant 0 : i32
    return %c0_i32, %c0_i32_0 : i32, i32
  }
  func.func @transform_1(%arg0: i32) -> (i32, i32) {
    %c0_i32 = arith.constant 0 : i32
    %c0_i32_0 = arith.constant 0 : i32
    return %c0_i32, %arg0 : i32, i32
  }
  func.func @transform_2(%arg0: i32) -> (i32, i32) {
    %c0_i32 = arith.constant 0 : i32
    %c0_i32_0 = arith.constant 0 : i32
    %c0_i32_1 = arith.constant 0 : i32
    return %c0_i32, %c0_i32_0 : i32, i32
  }
  func.func @transform_3(%arg0: i32) -> (i32, i32) {
    %c0_i32 = arith.constant 0 : i32
    %c0_i32_0 = arith.constant 0 : i32
    return %c0_i32, %arg0 : i32, i32
  }
  func.func @transform_4(%arg0: i32) -> (i32, i32) {
    %c0_i32 = arith.constant 0 : i32
    %c0_i32_0 = arith.constant 0 : i32
    return %c0_i32, %arg0 : i32, i32
  }
  func.func @transform_5(%arg0: i32) -> (i32, i32) {
    %c0_i32 = arith.constant 0 : i32
    %c0_i32_0 = arith.constant 0 : i32
    return %c0_i32, %arg0 : i32, i32
  }
}

module attributes {stable_mosaic.version = 11 : i64} {
  func.func @_fused_mm_t_kernel(%arg0: i32, %arg1: memref<8x64xbf16, #tpu.memory_space<vmem>>, %arg2: memref<64x2048xbf16, #tpu.memory_space<vmem>>, %arg3: memref<8x1xf32, #tpu.memory_space<vmem>>, %arg4: memref<8x2048xbf16, #tpu.memory_space<vmem>>, %arg5: memref<8x128xf32, #tpu.memory_space<vmem>>, %arg6: memref<8x128xf32, #tpu.memory_space<vmem>>) attributes {dimension_semantics = [#tpu.dimension_semantics<parallel>], iteration_bounds = array<i64: 2>, scalar_prefetch = 0 : i64, scratch_operands = 0 : i64, tpu.core_type = #tpu.core_type<tc>, window_params = [{pipeline_mode = #tpu.pipeline_mode<synchronous>, transform_indices = @transform_0, window_bounds = array<i64: 8, 64>}, {transform_indices = @transform_1, window_bounds = array<i64: 64, 2048>}, {pipeline_mode = #tpu.pipeline_mode<synchronous>, transform_indices = @transform_2, window_bounds = array<i64: 8, 1>}, {transform_indices = @transform_3, window_bounds = array<i64: 8, 2048>}, {transform_indices = @transform_4, window_bounds = array<i64: 8, 128>}, {transform_indices = @transform_5, window_bounds = array<i64: 8, 128>}]} {
    %c0 = arith.constant 0 : index
    %c0_0 = arith.constant 0 : index
    %0 = vector.load %arg1[%c0, %c0_0] : memref<8x64xbf16, #tpu.memory_space<vmem>>, vector<8x64xbf16>
    %c0_1 = arith.constant 0 : index
    %c0_2 = arith.constant 0 : index
    %1 = vector.load %arg2[%c0_1, %c0_2] : memref<64x2048xbf16, #tpu.memory_space<vmem>>, vector<64x2048xbf16>
    %cst = arith.constant dense<0.000000e+00> : vector<8x2048xf32>
    %2 = tpu.matmul %0, %1, %cst {dimension_numbers = #tpu.dot_dimension_numbers<[1], [0], [0], [1], [0, 0, 1, 1], [], []>} : vector<8x64xbf16>, vector<64x2048xbf16>, vector<8x2048xf32> -> vector<8x2048xf32>
    %c0_3 = arith.constant 0 : index
    %c0_4 = arith.constant 0 : index
    %3 = vector.load %arg3[%c0_3, %c0_4] : memref<8x1xf32, #tpu.memory_space<vmem>>, vector<8x1xf32>
    %4 = vector.broadcast %3 : vector<8x1xf32> to vector<8x2048xf32>
    %5 = arith.addf %2, %4 : vector<8x2048xf32>
    %6 = arith.truncf %5 : vector<8x2048xf32> to vector<8x2048xbf16>
    %c0_5 = arith.constant 0 : index
    %c0_6 = arith.constant 0 : index
    %7 = vector.load %arg4[%c0_5, %c0_6] : memref<8x2048xbf16, #tpu.memory_space<vmem>>, vector<8x2048xbf16>
    tpu.vector_store %arg4[%c0_5, %c0_6], %6 {strides = array<i32>} : memref<8x2048xbf16, #tpu.memory_space<vmem>>, vector<8x2048xbf16>,
    %cst_7 = arith.constant dense<0.000000e+00> : vector<8xf32>
    %8 = vector.multi_reduction <add>, %5, %cst_7 [1] : vector<8x2048xf32> to vector<8xf32>
    %9 = vector.shape_cast %8 : vector<8xf32> to vector<8x1xf32>
    %10 = arith.mulf %5, %5 : vector<8x2048xf32>
    %cst_8 = arith.constant dense<0.000000e+00> : vector<8xf32>
    %11 = vector.multi_reduction <add>, %10, %cst_8 [1] : vector<8x2048xf32> to vector<8xf32>
    %12 = vector.shape_cast %11 : vector<8xf32> to vector<8x1xf32>
    %13 = vector.shape_cast %9 : vector<8x1xf32> to vector<8x1xf32>
    %14 = vector.broadcast %13 : vector<8x1xf32> to vector<8x128xf32>
    %c0_9 = arith.constant 0 : index
    %c0_10 = arith.constant 0 : index
    %15 = vector.load %arg5[%c0_9, %c0_10] : memref<8x128xf32, #tpu.memory_space<vmem>>, vector<8x128xf32>
    tpu.vector_store %arg5[%c0_9, %c0_10], %14 {strides = array<i32>} : memref<8x128xf32, #tpu.memory_space<vmem>>, vector<8x128xf32>,
    %16 = vector.shape_cast %12 : vector<8x1xf32> to vector<8x1xf32>
    %17 = vector.broadcast %16 : vector<8x1xf32> to vector<8x128xf32>
    %c0_11 = arith.constant 0 : index
    %c0_12 = arith.constant 0 : index
    %18 = vector.load %arg6[%c0_11, %c0_12] : memref<8x128xf32, #tpu.memory_space<vmem>>, vector<8x128xf32>
    tpu.vector_store %arg6[%c0_11, %c0_12], %17 {strides = array<i32>} : memref<8x128xf32, #tpu.memory_space<vmem>>, vector<8x128xf32>,
    return
  }
  func.func @transform_0(%arg0: i32) -> (i32, i32) {
    %c0_i32 = arith.constant 0 : i32
    %c0_i32_0 = arith.constant 0 : i32
    %c0_i32_1 = arith.constant 0 : i32
    return %c0_i32, %c0_i32_0 : i32, i32
  }
  func.func @transform_1(%arg0: i32) -> (i32, i32) {
    %c0_i32 = arith.constant 0 : i32
    %c0_i32_0 = arith.constant 0 : i32
    return %c0_i32, %arg0 : i32, i32
  }
  func.func @transform_2(%arg0: i32) -> (i32, i32) {
    %c0_i32 = arith.constant 0 : i32
    %c0_i32_0 = arith.constant 0 : i32
    %c0_i32_1 = arith.constant 0 : i32
    return %c0_i32, %c0_i32_0 : i32, i32
  }
  func.func @transform_3(%arg0: i32) -> (i32, i32) {
    %c0_i32 = arith.constant 0 : i32
    %c0_i32_0 = arith.constant 0 : i32
    return %c0_i32, %arg0 : i32, i32
  }
  func.func @transform_4(%arg0: i32) -> (i32, i32) {
    %c0_i32 = arith.constant 0 : i32
    %c0_i32_0 = arith.constant 0 : i32
    return %c0_i32, %arg0 : i32, i32
  }
  func.func @transform_5(%arg0: i32) -> (i32, i32) {
    %c0_i32 = arith.constant 0 : i32
    %c0_i32_0 = arith.constant 0 : i32
    return %c0_i32, %arg0 : i32, i32
  }
}

module attributes {stable_mosaic.version = 11 : i64} {
  func.func @_fused_mm_t_kernel(%arg0: i32, %arg1: memref<16x144xbf16, #tpu.memory_space<vmem>>, %arg2: memref<144x2048xbf16, #tpu.memory_space<vmem>>, %arg3: memref<16x1xf32, #tpu.memory_space<vmem>>, %arg4: memref<16x2048xbf16, #tpu.memory_space<vmem>>, %arg5: memref<16x128xf32, #tpu.memory_space<vmem>>, %arg6: memref<16x128xf32, #tpu.memory_space<vmem>>) attributes {dimension_semantics = [#tpu.dimension_semantics<parallel>], iteration_bounds = array<i64: 2>, scalar_prefetch = 0 : i64, scratch_operands = 0 : i64, tpu.core_type = #tpu.core_type<tc>, window_params = [{pipeline_mode = #tpu.pipeline_mode<synchronous>, transform_indices = @transform_0, window_bounds = array<i64: 16, 144>}, {transform_indices = @transform_1, window_bounds = array<i64: 144, 2048>}, {pipeline_mode = #tpu.pipeline_mode<synchronous>, transform_indices = @transform_2, window_bounds = array<i64: 16, 1>}, {transform_indices = @transform_3, window_bounds = array<i64: 16, 2048>}, {transform_indices = @transform_4, window_bounds = array<i64: 16, 128>}, {transform_indices = @transform_5, window_bounds = array<i64: 16, 128>}]} {
    %c0 = arith.constant 0 : index
    %c0_0 = arith.constant 0 : index
    %0 = vector.load %arg1[%c0, %c0_0] : memref<16x144xbf16, #tpu.memory_space<vmem>>, vector<16x144xbf16>
    %c0_1 = arith.constant 0 : index
    %c0_2 = arith.constant 0 : index
    %1 = vector.load %arg2[%c0_1, %c0_2] : memref<144x2048xbf16, #tpu.memory_space<vmem>>, vector<144x2048xbf16>
    %cst = arith.constant dense<0.000000e+00> : vector<16x2048xf32>
    %2 = tpu.matmul %0, %1, %cst {dimension_numbers = #tpu.dot_dimension_numbers<[1], [0], [0], [1], [0, 0, 1, 1], [], []>} : vector<16x144xbf16>, vector<144x2048xbf16>, vector<16x2048xf32> -> vector<16x2048xf32>
    %c0_3 = arith.constant 0 : index
    %c0_4 = arith.constant 0 : index
    %3 = vector.load %arg3[%c0_3, %c0_4] : memref<16x1xf32, #tpu.memory_space<vmem>>, vector<16x1xf32>
    %4 = vector.broadcast %3 : vector<16x1xf32> to vector<16x2048xf32>
    %5 = arith.addf %2, %4 : vector<16x2048xf32>
    %6 = arith.truncf %5 : vector<16x2048xf32> to vector<16x2048xbf16>
    %c0_5 = arith.constant 0 : index
    %c0_6 = arith.constant 0 : index
    %7 = vector.load %arg4[%c0_5, %c0_6] : memref<16x2048xbf16, #tpu.memory_space<vmem>>, vector<16x2048xbf16>
    tpu.vector_store %arg4[%c0_5, %c0_6], %6 {strides = array<i32>} : memref<16x2048xbf16, #tpu.memory_space<vmem>>, vector<16x2048xbf16>,
    %cst_7 = arith.constant dense<0.000000e+00> : vector<16xf32>
    %8 = vector.multi_reduction <add>, %5, %cst_7 [1] : vector<16x2048xf32> to vector<16xf32>
    %9 = vector.shape_cast %8 : vector<16xf32> to vector<16x1xf32>
    %10 = arith.mulf %5, %5 : vector<16x2048xf32>
    %cst_8 = arith.constant dense<0.000000e+00> : vector<16xf32>
    %11 = vector.multi_reduction <add>, %10, %cst_8 [1] : vector<16x2048xf32> to vector<16xf32>
    %12 = vector.shape_cast %11 : vector<16xf32> to vector<16x1xf32>
    %13 = vector.shape_cast %9 : vector<16x1xf32> to vector<16x1xf32>
    %14 = vector.broadcast %13 : vector<16x1xf32> to vector<16x128xf32>
    %c0_9 = arith.constant 0 : index
    %c0_10 = arith.constant 0 : index
    %15 = vector.load %arg5[%c0_9, %c0_10] : memref<16x128xf32, #tpu.memory_space<vmem>>, vector<16x128xf32>
    tpu.vector_store %arg5[%c0_9, %c0_10], %14 {strides = array<i32>} : memref<16x128xf32, #tpu.memory_space<vmem>>, vector<16x128xf32>,
    %16 = vector.shape_cast %12 : vector<16x1xf32> to vector<16x1xf32>
    %17 = vector.broadcast %16 : vector<16x1xf32> to vector<16x128xf32>
    %c0_11 = arith.constant 0 : index
    %c0_12 = arith.constant 0 : index
    %18 = vector.load %arg6[%c0_11, %c0_12] : memref<16x128xf32, #tpu.memory_space<vmem>>, vector<16x128xf32>
    tpu.vector_store %arg6[%c0_11, %c0_12], %17 {strides = array<i32>} : memref<16x128xf32, #tpu.memory_space<vmem>>, vector<16x128xf32>,
    return
  }
  func.func @transform_0(%arg0: i32) -> (i32, i32) {
    %c0_i32 = arith.constant 0 : i32
    %c0_i32_0 = arith.constant 0 : i32
    %c0_i32_1 = arith.constant 0 : i32
    return %c0_i32, %c0_i32_0 : i32, i32
  }
  func.func @transform_1(%arg0: i32) -> (i32, i32) {
    %c0_i32 = arith.constant 0 : i32
    %c0_i32_0 = arith.constant 0 : i32
    return %c0_i32, %arg0 : i32, i32
  }
  func.func @transform_2(%arg0: i32) -> (i32, i32) {
    %c0_i32 = arith.constant 0 : i32
    %c0_i32_0 = arith.constant 0 : i32
    %c0_i32_1 = arith.constant 0 : i32
    return %c0_i32, %c0_i32_0 : i32, i32
  }
  func.func @transform_3(%arg0: i32) -> (i32, i32) {
    %c0_i32 = arith.constant 0 : i32
    %c0_i32_0 = arith.constant 0 : i32
    return %c0_i32, %arg0 : i32, i32
  }
  func.func @transform_4(%arg0: i32) -> (i32, i32) {
    %c0_i32 = arith.constant 0 : i32
    %c0_i32_0 = arith.constant 0 : i32
    return %c0_i32, %arg0 : i32, i32
  }
  func.func @transform_5(%arg0: i32) -> (i32, i32) {
    %c0_i32 = arith.constant 0 : i32
    %c0_i32_0 = arith.constant 0 : i32
    return %c0_i32, %arg0 : i32, i32
  }
}

module attributes {stable_mosaic.version = 11 : i64} {
  func.func @_fused_mm_t_kernel(%arg0: i32, %arg1: memref<4x72xbf16, #tpu.memory_space<vmem>>, %arg2: memref<72x8192xbf16, #tpu.memory_space<vmem>>, %arg3: memref<4x1xf32, #tpu.memory_space<vmem>>, %arg4: memref<4x8192xf32, #tpu.memory_space<vmem>>, %arg5: memref<4x128xf32, #tpu.memory_space<vmem>>, %arg6: memref<4x128xf32, #tpu.memory_space<vmem>>) attributes {dimension_semantics = [#tpu.dimension_semantics<parallel>], iteration_bounds = array<i64: 2>, scalar_prefetch = 0 : i64, scratch_operands = 0 : i64, tpu.core_type = #tpu.core_type<tc>, window_params = [{pipeline_mode = #tpu.pipeline_mode<synchronous>, transform_indices = @transform_0, window_bounds = array<i64: 4, 72>}, {transform_indices = @transform_1, window_bounds = array<i64: 72, 8192>}, {pipeline_mode = #tpu.pipeline_mode<synchronous>, transform_indices = @transform_2, window_bounds = array<i64: 4, 1>}, {transform_indices = @transform_3, window_bounds = array<i64: 4, 8192>}, {transform_indices = @transform_4, window_bounds = array<i64: 4, 128>}, {transform_indices = @transform_5, window_bounds = array<i64: 4, 128>}]} {
    %c0 = arith.constant 0 : index
    %c0_0 = arith.constant 0 : index
    %0 = vector.load %arg1[%c0, %c0_0] : memref<4x72xbf16, #tpu.memory_space<vmem>>, vector<4x72xbf16>
    %c0_1 = arith.constant 0 : index
    %c0_2 = arith.constant 0 : index
    %1 = vector.load %arg2[%c0_1, %c0_2] : memref<72x8192xbf16, #tpu.memory_space<vmem>>, vector<72x8192xbf16>
    %cst = arith.constant dense<0.000000e+00> : vector<4x8192xf32>
    %2 = tpu.matmul %0, %1, %cst {dimension_numbers = #tpu.dot_dimension_numbers<[1], [0], [0], [1], [0, 0, 1, 1], [], []>} : vector<4x72xbf16>, vector<72x8192xbf16>, vector<4x8192xf32> -> vector<4x8192xf32>
    %c0_3 = arith.constant 0 : index
    %c0_4 = arith.constant 0 : index
    %3 = vector.load %arg3[%c0_3, %c0_4] : memref<4x1xf32, #tpu.memory_space<vmem>>, vector<4x1xf32>
    %4 = vector.broadcast %3 : vector<4x1xf32> to vector<4x8192xf32>
    %5 = arith.addf %2, %4 : vector<4x8192xf32>
    %6 = math.tanh %5 : vector<4x8192xf32>
    %c0_5 = arith.constant 0 : index
    %c0_6 = arith.constant 0 : index
    %7 = vector.load %arg4[%c0_5, %c0_6] : memref<4x8192xf32, #tpu.memory_space<vmem>>, vector<4x8192xf32>
    tpu.vector_store %arg4[%c0_5, %c0_6], %6 {strides = array<i32>} : memref<4x8192xf32, #tpu.memory_space<vmem>>, vector<4x8192xf32>,
    %cst_7 = arith.constant dense<0.000000e+00> : vector<4xf32>
    %8 = vector.multi_reduction <add>, %6, %cst_7 [1] : vector<4x8192xf32> to vector<4xf32>
    %9 = vector.shape_cast %8 : vector<4xf32> to vector<4x1xf32>
    %10 = arith.mulf %6, %6 : vector<4x8192xf32>
    %cst_8 = arith.constant dense<0.000000e+00> : vector<4xf32>
    %11 = vector.multi_reduction <add>, %10, %cst_8 [1] : vector<4x8192xf32> to vector<4xf32>
    %12 = vector.shape_cast %11 : vector<4xf32> to vector<4x1xf32>
    %13 = vector.shape_cast %9 : vector<4x1xf32> to vector<4x1xf32>
    %14 = vector.broadcast %13 : vector<4x1xf32> to vector<4x128xf32>
    %c0_9 = arith.constant 0 : index
    %c0_10 = arith.constant 0 : index
    %15 = vector.load %arg5[%c0_9, %c0_10] : memref<4x128xf32, #tpu.memory_space<vmem>>, vector<4x128xf32>
    tpu.vector_store %arg5[%c0_9, %c0_10], %14 {strides = array<i32>} : memref<4x128xf32, #tpu.memory_space<vmem>>, vector<4x128xf32>,
    %16 = vector.shape_cast %12 : vector<4x1xf32> to vector<4x1xf32>
    %17 = vector.broadcast %16 : vector<4x1xf32> to vector<4x128xf32>
    %c0_11 = arith.constant 0 : index
    %c0_12 = arith.constant 0 : index
    %18 = vector.load %arg6[%c0_11, %c0_12] : memref<4x128xf32, #tpu.memory_space<vmem>>, vector<4x128xf32>
    tpu.vector_store %arg6[%c0_11, %c0_12], %17 {strides = array<i32>} : memref<4x128xf32, #tpu.memory_space<vmem>>, vector<4x128xf32>,
    return
  }
  func.func @transform_0(%arg0: i32) -> (i32, i32) {
    %c0_i32 = arith.constant 0 : i32
    %c0_i32_0 = arith.constant 0 : i32
    %c0_i32_1 = arith.constant 0 : i32
    return %c0_i32, %c0_i32_0 : i32, i32
  }
  func.func @transform_1(%arg0: i32) -> (i32, i32) {
    %c0_i32 = arith.constant 0 : i32
    %c0_i32_0 = arith.constant 0 : i32
    return %c0_i32, %arg0 : i32, i32
  }
  func.func @transform_2(%arg0: i32) -> (i32, i32) {
    %c0_i32 = arith.constant 0 : i32
    %c0_i32_0 = arith.constant 0 : i32
    %c0_i32_1 = arith.constant 0 : i32
    return %c0_i32, %c0_i32_0 : i32, i32
  }
  func.func @transform_3(%arg0: i32) -> (i32, i32) {
    %c0_i32 = arith.constant 0 : i32
    %c0_i32_0 = arith.constant 0 : i32
    return %c0_i32, %arg0 : i32, i32
  }
  func.func @transform_4(%arg0: i32) -> (i32, i32) {
    %c0_i32 = arith.constant 0 : i32
    %c0_i32_0 = arith.constant 0 : i32
    return %c0_i32, %arg0 : i32, i32
  }
  func.func @transform_5(%arg0: i32) -> (i32, i32) {
    %c0_i32 = arith.constant 0 : i32
    %c0_i32_0 = arith.constant 0 : i32
    return %c0_i32, %arg0 : i32, i32
  }
}

</mosaic_0001>

<bundles_post_ra>
// kernel: unet_forward.4
= control target key start
LH: loop header
LB: loop body
LE: loop exit
PB: predicated region body
PF: predicated region fallthrough
CT: control target
= control target key end

     0   :  { %11 = vsyncpa [#allocation4], 0  ;;  %s4050_s0 = inlined_call_operand.vmem [shape: bf16[4,16], index: 0, kind: input, shape index: {}]   ;;  %s4051_s1 = inlined_call_operand.vmem [shape: bf16[16,16384], index: 1, kind: input, shape index: {}]   ;;  %s4052_s2 = inlined_call_operand.vmem [shape: f32[4,1], index: 2, kind: input, shape index: {}]   ;;  %s4053_s3 = inlined_call_operand.vmem [shape: bf16[4,16384], index: 3, kind: output, shape index: {0}]   ;;  %s4054_s4 = inlined_call_operand.hbm [shape: f32[4,256], index: 4, kind: output, shape index: {1}]   ;;  %s4055_s5 = inlined_call_operand.hbm [shape: f32[4,256], index: 5, kind: output, shape index: {2}]  }
   0x1   :  { %13 = vsyncpa [#allocation4 + $0x1], 0 }
   0x2   :  { %14 = vsyncpa [#allocation6], 0 }
   0x3   :  { %16 = vsyncpa [#allocation6 + $0x1], 0  ;;  %s3346_s18 = smov 0   ;;  %s3348_s19 = smov 0  }
   0x4   :  { %s3350_s20 = smov 0   ;;  %s3352_s21 = smov 0  }
   0x5 LB: > { %s3021_s22 = sadd.s32 4294967295, %s3310_s21   ;;  %s3022_s23 = sadd.s32 4294967294, %s3310_s21   ;;  %s3310_s21 = sphi %s3352_s21, %s4061_s21   ;;  %s3306_s20 = sphi %s3350_s20, %s4060_s20   ;;  %s3302_s19 = sphi %s3348_s19, %s4059_s19   ;;  %s3298_s18 = sphi %s3346_s18, %s4058_s18  }
   0x6   : > { %s3369_s24 = sadd.s32 1, %s3310_s21   ;;  %s50_s25 = sadd.s32 1, %s3306_s20 }
   0x7   : > { %s47_s26 = ssub.s32 %s3310_s21, %s3369_s24  ;;  %p57_p0 = scmp.ne.s32.totalorder %s3306_s20, %s3302_s19 }
   0x8   : > { %p48_p1 = scmp.eq.s32.totalorder %s47_s26, 0  ;;  %p58_p2 = scmp.eq.s32.totalorder %s3310_s21, 0 }
   0x9   : > { %p134_p3 = scmp.eq.s32.totalorder %s3021_s22, 1  ;;  %p139_p4 = scmp.ne.s32.totalorder %s3302_s19, %s3298_s18 }
   0xa   : > { %s3382_s27 = scalar_select %p48_p1, %s3306_s20, %s50_s25  }
   0xb   : > { %p59_p5 = por %p58_p2, %p57_p0  ;;  %p3384_p6 = por %p134_p3, %p57_p0 }
   0xc   : > { %p140_p7 = scmp.eq.s32.totalorder %s3022_s23, 1  ;;  %p3024_p9 = scmp.ge.s32.totalorder %s3310_s21, 2 }
   0xe   : > { %p3388_p8 = por %p140_p7, %p139_p4  ;;  %188 = sbr.rel (%p3024_p9) target bundleno = 57 (0x39), region = 24 }
  0x15   : > { %191 = sbr.rel (!%p59_p5) target bundleno = 57 (0x39), region = 28  ;;  %s193_s30 = sand.u32 (%p59_p5), 1, %s3306_s20  }
  0x16   : > { %s3168_s6 = sshll.u32 (%p59_p5), %s3310_s21, 8  ;;  %s3025_s7 = sshll.u32 (%p59_p5), %s193_s30, 9 }
  0x17   : > { %s3400_s10 = scalar_lea.vmem (%p59_p5), %s4051_s1, %s3168_s6  ;;  %s3405_s11 = scalar_lea.vmem (%p59_p5), [#allocation2], %s3025_s7 }
  0x18   : > { %v211_v0 = vld [vmem:[%s3400_s10] sm:$0xff] (%p59_p5)  ;;  %v213_v1 = vld [vmem:[%s3400_s10 + $0x8] sm:$0xff] (%p59_p5)  ;;  %v215_v2 = vld [vmem:[%s3400_s10 + $0x10] sm:$0xff] (%p59_p5) }
  0x19   : > { %212 = vst [vmem:[%s3405_s11] sm:$0xff] (%p59_p5), %v211_v0  ;;  %214 = vst [vmem:[%s3405_s11 + $0x8] sm:$0xff] (%p59_p5), %v213_v1  ;;  %v217_v3 = vld [vmem:[%s3400_s10 + $0x18] sm:$0xff] (%p59_p5)  ;;  %v219_v4 = vld [vmem:[%s3400_s10 + $0x20] sm:$0xff] (%p59_p5) }
  0x1a   : > { %216 = vst [vmem:[%s3405_s11 + $0x10] sm:$0xff] (%p59_p5), %v215_v2  ;;  %v221_v5 = vld [vmem:[%s3400_s10 + $0x28] sm:$0xff] (%p59_p5)  ;;  %218 = vst [vmem:[%s3405_s11 + $0x18] sm:$0xff] (%p59_p5), %v217_v3  ;;  %v223_v6 = vld [vmem:[%s3400_s10 + $0x30] sm:$0xff] (%p59_p5) }
  0x1b   : > { %220 = vst [vmem:[%s3405_s11 + $0x20] sm:$0xff] (%p59_p5), %v219_v4  ;;  %222 = vst [vmem:[%s3405_s11 + $0x28] sm:$0xff] (%p59_p5), %v221_v5  ;;  %v225_v7 = vld [vmem:[%s3400_s10 + $0x38] sm:$0xff] (%p59_p5)  ;;  %v227_v8 = vld [vmem:[%s3400_s10 + $0x40] sm:$0xff] (%p59_p5) }
  0x1c   : > { %224 = vst [vmem:[%s3405_s11 + $0x30] sm:$0xff] %v223_v6  ;;  %226 = vst [vmem:[%s3405_s11 + $0x38] sm:$0xff] %v225_v7  ;;  %v229_v9 = vld [vmem:[%s3400_s10 + $0x48] sm:$0xff]  ;;  %v231_v10 = vld [vmem:[%s3400_s10 + $0x50] sm:$0xff] }
  0x1d   : > { %228 = vst [vmem:[%s3405_s11 + $0x40] sm:$0xff] %v227_v8  ;;  %v233_v11 = vld [vmem:[%s3400_s10 + $0x58] sm:$0xff]  ;;  %230 = vst [vmem:[%s3405_s11 + $0x48] sm:$0xff] %v229_v9  ;;  %v235_v12 = vld [vmem:[%s3400_s10 + $0x60] sm:$0xff] }
  0x1e   : > { %232 = vst [vmem:[%s3405_s11 + $0x50] sm:$0xff] %v231_v10  ;;  %234 = vst [vmem:[%s3405_s11 + $0x58] sm:$0xff] %v233_v11  ;;  %v237_v13 = vld [vmem:[%s3400_s10 + $0x68] sm:$0xff]  ;;  %v239_v14 = vld [vmem:[%s3400_s10 + $0x70] sm:$0xff] }
  0x1f   : > { %236 = vst [vmem:[%s3405_s11 + $0x60] sm:$0xff] %v235_v12  ;;  %238 = vst [vmem:[%s3405_s11 + $0x68] sm:$0xff] %v237_v13  ;;  %v241_v15 = vld [vmem:[%s3400_s10 + $0x78] sm:$0xff]  ;;  %v243_v16 = vld [vmem:[%s3400_s10 + $0x80] sm:$0xff] }
  0x20   : > { %240 = vst [vmem:[%s3405_s11 + $0x70] sm:$0xff] %v239_v14  ;;  %v245_v17 = vld [vmem:[%s3400_s10 + $0x88] sm:$0xff]  ;;  %242 = vst [vmem:[%s3405_s11 + $0x78] sm:$0xff] %v241_v15  ;;  %v247_v18 = vld [vmem:[%s3400_s10 + $0x90] sm:$0xff] }
  0x21   : > { %244 = vst [vmem:[%s3405_s11 + $0x80] sm:$0xff] %v243_v16  ;;  %246 = vst [vmem:[%s3405_s11 + $0x88] sm:$0xff] %v245_v17  ;;  %v249_v19 = vld [vmem:[%s3400_s10 + $0x98] sm:$0xff]  ;;  %v251_v20 = vld [vmem:[%s3400_s10 + $0xa0] sm:$0xff] }
  0x22   : > { %248 = vst [vmem:[%s3405_s11 + $0x90] sm:$0xff] %v247_v18  ;;  %250 = vst [vmem:[%s3405_s11 + $0x98] sm:$0xff] %v249_v19  ;;  %v253_v21 = vld [vmem:[%s3400_s10 + $0xa8] sm:$0xff]  ;;  %v255_v22 = vld [vmem:[%s3400_s10 + $0xb0] sm:$0xff] }
  0x23   : > { %252 = vst [vmem:[%s3405_s11 + $0xa0] sm:$0xff] %v251_v20  ;;  %v257_v23 = vld [vmem:[%s3400_s10 + $0xb8] sm:$0xff]  ;;  %254 = vst [vmem:[%s3405_s11 + $0xa8] sm:$0xff] %v253_v21  ;;  %v259_v24 = vld [vmem:[%s3400_s10 + $0xc0] sm:$0xff] }
  0x24   : > { %256 = vst [vmem:[%s3405_s11 + $0xb0] sm:$0xff] %v255_v22  ;;  %258 = vst [vmem:[%s3405_s11 + $0xb8] sm:$0xff] %v257_v23  ;;  %v261_v25 = vld [vmem:[%s3400_s10 + $0xc8] sm:$0xff]  ;;  %v263_v26 = vld [vmem:[%s3400_s10 + $0xd0] sm:$0xff] }
  0x25   : > { %260 = vst [vmem:[%s3405_s11 + $0xc0] sm:$0xff] %v259_v24  ;;  %262 = vst [vmem:[%s3405_s11 + $0xc8] sm:$0xff] %v261_v25  ;;  %v265_v27 = vld [vmem:[%s3400_s10 + $0xd8] sm:$0xff]  ;;  %v267_v28 = vld [vmem:[%s3400_s10 + $0xe0] sm:$0xff] }
  0x26   : > { %264 = vst [vmem:[%s3405_s11 + $0xd0] sm:$0xff] %v263_v26  ;;  %v269_v29 = vld [vmem:[%s3400_s10 + $0xe8] sm:$0xff]  ;;  %266 = vst [vmem:[%s3405_s11 + $0xd8] sm:$0xff] %v265_v27  ;;  %v271_v30 = vld [vmem:[%s3400_s10 + $0xf0] sm:$0xff] }
  0x27   : > { %268 = vst [vmem:[%s3405_s11 + $0xe0] sm:$0xff] %v267_v28  ;;  %270 = vst [vmem:[%s3405_s11 + $0xe8] sm:$0xff] %v269_v29  ;;  %v273_v31 = vld [vmem:[%s3400_s10 + $0xf8] sm:$0xff]  ;;  %v275_v32 = vld [vmem:[%s3400_s10 + $0x200] sm:$0xff] }
  0x28   : > { %272 = vst [vmem:[%s3405_s11 + $0xf0] sm:$0xff] %v271_v30  ;;  %274 = vst [vmem:[%s3405_s11 + $0xf8] sm:$0xff] %v273_v31  ;;  %v277_v33 = vld [vmem:[%s3400_s10 + $0x208] sm:$0xff]  ;;  %v279_v34 = vld [vmem:[%s3400_s10 + $0x210] sm:$0xff] }
  0x29   : > { %276 = vst [vmem:[%s3405_s11 + $0x100] sm:$0xff] %v275_v32  ;;  %v281_v35 = vld [vmem:[%s3400_s10 + $0x218] sm:$0xff]  ;;  %278 = vst [vmem:[%s3405_s11 + $0x108] sm:$0xff] %v277_v33  ;;  %v283_v36 = vld [vmem:[%s3400_s10 + $0x220] sm:$0xff] }
  0x2a   : > { %280 = vst [vmem:[%s3405_s11 + $0x110] sm:$0xff] %v279_v34  ;;  %282 = vst [vmem:[%s3405_s11 + $0x118] sm:$0xff] %v281_v35  ;;  %v285_v37 = vld [vmem:[%s3400_s10 + $0x228] sm:$0xff]  ;;  %v287_v38 = vld [vmem:[%s3400_s10 + $0x230] sm:$0xff] }
  0x2b   : > { %284 = vst [vmem:[%s3405_s11 + $0x120] sm:$0xff] %v283_v36  ;;  %286 = vst [vmem:[%s3405_s11 + $0x128] sm:$0xff] %v285_v37  ;;  %v289_v39 = vld [vmem:[%s3400_s10 + $0x238] sm:$0xff]  ;;  %v291_v40 = vld [vmem:[%s3400_s10 + $0x240] sm:$0xff] }
  0x2c   : > { %288 = vst [vmem:[%s3405_s11 + $0x130] sm:$0xff] %v287_v38  ;;  %v293_v41 = vld [vmem:[%s3400_s10 + $0x248] sm:$0xff]  ;;  %290 = vst [vmem:[%s3405_s11 + $0x138] sm:$0xff] %v289_v39  ;;  %v295_v42 = vld [vmem:[%s3400_s10 + $0x250] sm:$0xff] }
  0x2d   : > { %292 = vst [vmem:[%s3405_s11 + $0x140] sm:$0xff] %v291_v40  ;;  %294 = vst [vmem:[%s3405_s11 + $0x148] sm:$0xff] %v293_v41  ;;  %v297_v43 = vld [vmem:[%s3400_s10 + $0x258] sm:$0xff]  ;;  %v299_v44 = vld [vmem:[%s3400_s10 + $0x260] sm:$0xff] }
  0x2e   : > { %296 = vst [vmem:[%s3405_s11 + $0x150] sm:$0xff] %v295_v42  ;;  %298 = vst [vmem:[%s3405_s11 + $0x158] sm:$0xff] %v297_v43  ;;  %v301_v45 = vld [vmem:[%s3400_s10 + $0x268] sm:$0xff]  ;;  %v303_v46 = vld [vmem:[%s3400_s10 + $0x270] sm:$0xff] }
  0x2f   : > { %300 = vst [vmem:[%s3405_s11 + $0x160] sm:$0xff] %v299_v44  ;;  %v305_v47 = vld [vmem:[%s3400_s10 + $0x278] sm:$0xff]  ;;  %302 = vst [vmem:[%s3405_s11 + $0x168] sm:$0xff] %v301_v45  ;;  %v307_v48 = vld [vmem:[%s3400_s10 + $0x280] sm:$0xff] }
  0x30   : > { %304 = vst [vmem:[%s3405_s11 + $0x170] sm:$0xff] %v303_v46  ;;  %306 = vst [vmem:[%s3405_s11 + $0x178] sm:$0xff] %v305_v47  ;;  %v309_v49 = vld [vmem:[%s3400_s10 + $0x288] sm:$0xff]  ;;  %v311_v50 = vld [vmem:[%s3400_s10 + $0x290] sm:$0xff] }
  0x31   : > { %308 = vst [vmem:[%s3405_s11 + $0x180] sm:$0xff] %v307_v48  ;;  %310 = vst [vmem:[%s3405_s11 + $0x188] sm:$0xff] %v309_v49  ;;  %v313_v51 = vld [vmem:[%s3400_s10 + $0x298] sm:$0xff]  ;;  %v315_v52 = vld [vmem:[%s3400_s10 + $0x2a0] sm:$0xff] }
  0x32   : > { %312 = vst [vmem:[%s3405_s11 + $0x190] sm:$0xff] %v311_v50  ;;  %v317_v53 = vld [vmem:[%s3400_s10 + $0x2a8] sm:$0xff]  ;;  %314 = vst [vmem:[%s3405_s11 + $0x198] sm:$0xff] %v313_v51  ;;  %v319_v54 = vld [vmem:[%s3400_s10 + $0x2b0] sm:$0xff] }
  0x33   : > { %316 = vst [vmem:[%s3405_s11 + $0x1a0] sm:$0xff] %v315_v52  ;;  %318 = vst [vmem:[%s3405_s11 + $0x1a8] sm:$0xff] %v317_v53  ;;  %v321_v55 = vld [vmem:[%s3400_s10 + $0x2b8] sm:$0xff]  ;;  %v323_v56 = vld [vmem:[%s3400_s10 + $0x2c0] sm:$0xff] }
  0x34   : > { %320 = vst [vmem:[%s3405_s11 + $0x1b0] sm:$0xff] %v319_v54  ;;  %322 = vst [vmem:[%s3405_s11 + $0x1b8] sm:$0xff] %v321_v55  ;;  %v325_v57 = vld [vmem:[%s3400_s10 + $0x2c8] sm:$0xff]  ;;  %v327_v58 = vld [vmem:[%s3400_s10 + $0x2d0] sm:$0xff] }
  0x35   : > { %324 = vst [vmem:[%s3405_s11 + $0x1c0] sm:$0xff] %v323_v56  ;;  %v329_v59 = vld [vmem:[%s3400_s10 + $0x2d8] sm:$0xff]  ;;  %326 = vst [vmem:[%s3405_s11 + $0x1c8] sm:$0xff] %v325_v57  ;;  %v331_v60 = vld [vmem:[%s3400_s10 + $0x2e0] sm:$0xff] }
  0x36   : > { %328 = vst [vmem:[%s3405_s11 + $0x1d0] sm:$0xff] %v327_v58  ;;  %330 = vst [vmem:[%s3405_s11 + $0x1d8] sm:$0xff] %v329_v59  ;;  %v333_v61 = vld [vmem:[%s3400_s10 + $0x2e8] sm:$0xff]  ;;  %v335_v62 = vld [vmem:[%s3400_s10 + $0x2f0] sm:$0xff] }
  0x37   : > { %332 = vst [vmem:[%s3405_s11 + $0x1e0] sm:$0xff] %v331_v60  ;;  %334 = vst [vmem:[%s3405_s11 + $0x1e8] sm:$0xff] %v333_v61  ;;  %v337_v63 = vld [vmem:[%s3400_s10 + $0x2f8] sm:$0xff] }
  0x38   : > { %336 = vst [vmem:[%s3405_s11 + $0x1f0] sm:$0xff] %v335_v62  ;;  %338 = vst [vmem:[%s3405_s11 + $0x1f8] sm:$0xff] %v337_v63 }
  0x39 PF: > { %p3028_p10 = scmp.ge.s32.totalorder %s3310_s21, 1  ;;  %p343_p11 = scmp.lt.s32.totalorder %s3310_s21, 3 }
  0x3b   : > { %p344_p12 = pnand %p3028_p10, %p343_p11 }
  0x3c   : > { %s3535_s12 = sand.u32 (!%p344_p12), 1, %s3302_s19   ;;  %v3312_v0 = vmov (!%p344_p12), 0   ;;  %v460_v1 = vld [vmem:[%s4052_s2] sm:$0xf] (!%p344_p12)  ;;  %vm786_vm0 = vcmask (!%p344_p12), 130048   ;;  %s3711_s25 = sshll.u32 (!%p344_p12), %s3021_s22, 6 }
  0x3d   : > { %347 = sbr.rel (%p344_p12) target bundleno = 593 (0x251), region = 51  ;;  %s3029_s13 = sshll.u32 (!%p344_p12), %s3535_s12, 9  ;;  %822 = vmatprep.mubr.bf16.mxu0 (!%p344_p12), %v3312_v0  ;;  %863 = vmatprep.mubr.bf16.mxu1 (!%p344_p12), %v3312_v0  ;;  %v3559_v18 = vld [vmem:[%s4050_s0] sm:$0x3] (!%p344_p12)  ;;  %vm2534_vm1 = vcmask (!%p344_p12), 1043456  }
  0x3e   : > { %3215 = vset.pattern.permute.xlu0 (!%p344_p12), %v3312_v0  ;;  %s3544_s16 = scalar_lea.vmem (!%p344_p12), [#allocation2], %s3029_s13  ;;  %p389_p13 = scmp.lt.s32.totalorder (!%p344_p12), %s3711_s25, 127 }
  0x3f   : > { %v396_v2 = vld [vmem:[%s3544_s16] sm:$0xff] (!%p344_p12)  ;;  %v397_v4 = vld [vmem:[%s3544_s16 + $0x8] sm:$0xff] (!%p344_p12)  ;;  %463 = vperm.xlu0 (!%p344_p12), %3215, %v460_v1   ;;  %v398_v8 = vld [vmem:[%s3544_s16 + $0x10] sm:$0xff] (!%p344_p12)  ;;  %s3030_s8 = sshll.u32 (!%p344_p12), %s3535_s12, 2  ;;  %s2865_s17 = scalar_lea.sflag (!%p344_p12), [#allocation4], %s3535_s12 }
  0x40   : > { %v428_v3 = vld [vmem:[%s3544_s16 + $0x100] sm:$0xff] (!%p344_p12)  ;;  %v429_v6 = vld [vmem:[%s3544_s16 + $0x108] sm:$0xff] (!%p344_p12)  ;;  %v430_v9 = vld [vmem:[%s3544_s16 + $0x110] sm:$0xff] (!%p344_p12)  ;;  %s379_s9 = scalar_lea.vmem (!%p344_p12), [#allocation3], %s3030_s8  ;;  %s3970_s11 = scalar_lea.vmem (!%p344_p12), [#allocation5], %s3030_s8 }
  0x41   : > { %v3035_v5 = vcombine.high (!%p344_p12), %v396_v2, %v428_v3  ;;  %v3034_v7 = vcombine.low (!%p344_p12), %v396_v2, %v428_v3  ;;  %v3037_v10 = vcombine.high (!%p344_p12), %v397_v4, %v429_v6  ;;  %v3036_v11 = vcombine.low (!%p344_p12), %v397_v4, %v429_v6  ;;  %v399_v13 = vld [vmem:[%s3544_s16 + $0x18] sm:$0xff] (!%p344_p12)  ;;  %v400_v16 = vld [vmem:[%s3544_s16 + $0x20] sm:$0xff] (!%p344_p12)  ;;  %v401_v20 = vld [vmem:[%s3544_s16 + $0x28] sm:$0xff] (!%p344_p12)  ;;  %s2887_s10 = sshll.u32 (!%p344_p12), %s379_s9, 4  ;;  %s2900_s13 = sshll.u32 (!%p344_p12), %s3970_s11, 4  ;;  %s3968_s10 = int_to_ptr.vmem [resolvable:$true] %s2887_s10  ;;  %s3979_s13 = int_to_ptr.vmem [resolvable:$true] %s2900_s13 }
  0x42   : > { %v3039_v12 = vcombine.high (!%p344_p12), %v398_v8, %v430_v9  ;;  %v431_v14 = vld [vmem:[%s3544_s16 + $0x118] sm:$0xff] (!%p344_p12)  ;;  %v432_v17 = vld [vmem:[%s3544_s16 + $0x120] sm:$0xff] (!%p344_p12)  ;;  %v3038_v19 = vcombine.low (!%p344_p12), %v398_v8, %v430_v9  ;;  %v433_v21 = vld [vmem:[%s3544_s16 + $0x128] sm:$0xff] (!%p344_p12)  ;;  %s3216_s23 = scalar_lea.vmem (!%p344_p12), %s3968_s10, 64 }
  0x43   : > { %790 = vmatprep.subr.bf16.mxu0 (!%p344_p12), %v3035_v5  ;;  %v3041_v15 = vcombine.high (!%p344_p12), %v399_v13, %v431_v14  ;;  %831 = vmatprep.subr.bf16.mxu1 (!%p344_p12), %v3037_v10  ;;  %v3040_v22 = vcombine.low (!%p344_p12), %v399_v13, %v431_v14  ;;  %v3043_v23 = vcombine.high (!%p344_p12), %v400_v16, %v432_v17  ;;  %v402_v25 = vld [vmem:[%s3544_s16 + $0x30] sm:$0xff] (!%p344_p12)  ;;  %v403_v28 = vld [vmem:[%s3544_s16 + $0x38] sm:$0xff] (!%p344_p12)  ;;  %v404_v33 = vld [vmem:[%s3544_s16 + $0x40] sm:$0xff] (!%p344_p12)  ;;  %p3217_p0 = scmp.ne.s32.totalorder (!%p344_p12), %s3968_s10, %s3216_s23 }
  0x44   : > { %791 = vmatpush1.bf16.msra.mxu0 %v3034_v7  ;;  %832 = vmatpush1.bf16.msra.mxu1 %v3036_v11  ;;  %v3045_v24 = vcombine.high %v401_v20, %v433_v21  ;;  %v434_v26 = vld [vmem:[%s3544_s16 + $0x130] sm:$0xff]  ;;  %v3042_v27 = vcombine.low %v400_v16, %v432_v17  ;;  %v435_v29 = vld [vmem:[%s3544_s16 + $0x138] sm:$0xff]  ;;  %v3044_v30 = vcombine.low %v401_v20, %v433_v21  ;;  %v436_v34 = vld [vmem:[%s3544_s16 + $0x140] sm:$0xff]  ;;  %s3718_s26 = scalar_select %p389_p13, %s3711_s25, 127 }
  0x45   : > { %872 = vmatprep.subr.bf16.mxu0 %v3039_v12  ;;  %913 = vmatprep.subr.bf16.mxu1 %v3041_v15  ;;  %v3047_v31 = vcombine.high %v402_v25, %v434_v26  ;;  %v3049_v32 = vcombine.high %v403_v28, %v435_v29  ;;  %v3046_v35 = vcombine.low %v402_v25, %v434_v26  ;;  %v405_v36 = vld [vmem:[%s3544_s16 + $0x48] sm:$0xff]  ;;  %v406_v41 = vld [vmem:[%s3544_s16 + $0x50] sm:$0xff]  ;;  %v407_v44 = vld [vmem:[%s3544_s16 + $0x58] sm:$0xff]  ;;  %p3218_p1 = pnand %p3217_p0, %p3384_p6 }
  0x46   : > { %v437_v37 = vld [vmem:[%s3544_s16 + $0x148] sm:$0xff]  ;;  %v3048_v38 = vcombine.low %v403_v28, %v435_v29  ;;  %v3051_v39 = vcombine.high %v404_v33, %v436_v34  ;;  %v438_v42 = vld [vmem:[%s3544_s16 + $0x150] sm:$0xff]  ;;  %v3050_v43 = vcombine.low %v404_v33, %v436_v34  ;;  %v439_v45 = vld [vmem:[%s3544_s16 + $0x158] sm:$0xff]  ;;  %s3033_s22 = sshll.u32 %s3718_s26, 1  ;;  %s3314_s26 = smov [#allocation3]  }
  0x47   : > { %3098 = vmatmul.mubr.msk.bf16.vlgmr.msra.gmra.mrb[0].mxu0 %vm786_vm0, %v3559_v18  ;;  %3099 = vmatmul.mubr.msk.bf16.vlgmr.msra.gmra.mrb[0].mxu1 %vm786_vm0, %v3559_v18  ;;  %v3053_v40 = vcombine.high %v405_v36, %v437_v37  ;;  %v3052_v46 = vcombine.low %v405_v36, %v437_v37  ;;  %v3055_v47 = vcombine.high %v406_v41, %v438_v42  ;;  %v408_v49 = vld [vmem:[%s3544_s16 + $0x60] sm:$0xff]  ;;  %v409_v52 = vld [vmem:[%s3544_s16 + $0x68] sm:$0xff]  ;;  %v410_v57 = vld [vmem:[%s3544_s16 + $0x70] sm:$0xff]  ;;  %s3738_s7 = scalar_lea.vmem %s4053_s3, %s3033_s22  ;;  %p3219_p2 = pneg %p3218_p1 }
  0x48   : > { %873 = vmatpush1.bf16.msra.mxu0 %v3038_v19  ;;  %914 = vmatpush1.bf16.msra.mxu1 %v3040_v22  ;;  %v3057_v48 = vcombine.high %v407_v44, %v439_v45  ;;  %v440_v50 = vld [vmem:[%s3544_s16 + $0x160] sm:$0xff]  ;;  %v3054_v51 = vcombine.low %v406_v41, %v438_v42  ;;  %v441_v53 = vld [vmem:[%s3544_s16 + $0x168] sm:$0xff]  ;;  %v3056_v54 = vcombine.low %v407_v44, %v439_v45  ;;  %v442_v58 = vld [vmem:[%s3544_s16 + $0x170] sm:$0xff]  ;;  %s3220_s22 = sshll.u32 %s3314_s26, 4  ;;  %s3221_s22 = int_to_ptr.vmem [resolvable:$false] %s3220_s22 }
  0x49   : > { %904 = vmatprep.mubr.bf16.mxu0 %v3312_v0  ;;  %945 = vmatprep.mubr.bf16.mxu1 %v3312_v0  ;;  %v3059_v55 = vcombine.high %v408_v49, %v440_v50  ;;  %v3061_v56 = vcombine.high %v409_v52, %v441_v53  ;;  %v3058_v59 = vcombine.low %v408_v49, %v440_v50  ;;  %v411_v60 = vld [vmem:[%s3544_s16 + $0x78] sm:$0xff]  ;;  %v412_v2 = vld [vmem:[%s3544_s16 + $0x80] sm:$0xff]  ;;  %v413_v5 = vld [vmem:[%s3544_s16 + $0x88] sm:$0xff]  ;;  %s3222_s30 = scalar_lea.vmem %s3221_s22, 128  ;;  %p3223_p3 = scmp.lt.s32.totalorder %s3968_s10, %s3221_s22 }
  0x4a   : > { %954 = vmatprep.subr.bf16.mxu0 %v3043_v23  ;;  %995 = vmatprep.subr.bf16.mxu1 %v3045_v24  ;;  %v443_v61 = vld [vmem:[%s3544_s16 + $0x178] sm:$0xff]  ;;  %v3060_v62 = vcombine.low %v409_v52, %v441_v53  ;;  %v3063_v63 = vcombine.high %v410_v57, %v442_v58  ;;  %v444_v3 = vld [vmem:[%s3544_s16 + $0x180] sm:$0xff]  ;;  %v3062_v4 = vcombine.low %v410_v57, %v442_v58  ;;  %v445_v6 = vld [vmem:[%s3544_s16 + $0x188] sm:$0xff]  ;;  %p3224_p4 = scmp.lt.s32.totalorder %s3222_s30, %s3216_s23 }
  0x4b   : > { %v3065_v1 = vcombine.high %v411_v60, %v443_v61  ;;  %v3064_v7 = vcombine.low %v411_v60, %v443_v61  ;;  %v3067_v8 = vcombine.high %v412_v2, %v444_v3  ;;  %v3069_v9 = vcombine.high %v413_v5, %v445_v6  ;;  %v414_v10 = vld [vmem:[%s3544_s16 + $0x90] sm:$0xff]  ;;  %v415_v13 = vld [vmem:[%s3544_s16 + $0x98] sm:$0xff]  ;;  %v416_v19 = vld [vmem:[%s3544_s16 + $0xa0] sm:$0xff] }
  0x4c   : > { %v446_v11 = vld [vmem:[%s3544_s16 + $0x190] sm:$0xff]  ;;  %v3066_v12 = vcombine.low %v412_v2, %v444_v3  ;;  %v447_v14 = vld [vmem:[%s3544_s16 + $0x198] sm:$0xff]  ;;  %v3068_v15 = vcombine.low %v413_v5, %v445_v6  ;;  %v448_v20 = vld [vmem:[%s3544_s16 + $0x1a0] sm:$0xff]  ;;  %v3313_v6 = vmov 1983009808   ;;  %p3225_p5 = por %p3224_p4, %p3223_p3 }
  0x4d   : > { %v3071_v16 = vcombine.high %v414_v10, %v446_v11  ;;  %v3073_v17 = vcombine.high %v415_v13, %v447_v14  ;;  %v3070_v21 = vcombine.low %v414_v10, %v446_v11  ;;  %v417_v22 = vld [vmem:[%s3544_s16 + $0xa8] sm:$0xff]  ;;  %v3072_v24 = vcombine.low %v415_v13, %v447_v14  ;;  %v450_v28 = vld [vmem:[%s3544_s16 + $0x1b0] sm:$0xff]  ;;  %v452_v36 = vld [vmem:[%s3544_s16 + $0x1c0] sm:$0xff] }
  0x4e   : > { %v449_v23 = vld [vmem:[%s3544_s16 + $0x1a8] sm:$0xff]  ;;  %v3075_v25 = vcombine.high %v416_v19, %v448_v20  ;;  %v3074_v29 = vcombine.low %v416_v19, %v448_v20  ;;  %v454_v44 = vld [vmem:[%s3544_s16 + $0x1d0] sm:$0xff]  ;;  %v456_v52 = vld [vmem:[%s3544_s16 + $0x1e0] sm:$0xff]  ;;  %p3226_p7 = pnand %p3225_p5, %p3219_p2 }
  0x4f   : > { %3100 = vmatmul.mubr.msk.bf16.vlgmr.msra.gmra.mrb[4].mxu0 %vm786_vm0, %v3559_v18  ;;  %3101 = vmatmul.mubr.msk.bf16.vlgmr.msra.gmra.mrb[4].mxu1 %vm786_vm0, %v3559_v18  ;;  %v3077_v26 = vcombine.high %v417_v22, %v449_v23  ;;  %v458_v60 = vld [vmem:[%s3544_s16 + $0x1f0] sm:$0xff] }
  0x50   : > { %955 = vmatpush1.bf16.msra.mxu0 %v3042_v27  ;;  %996 = vmatpush1.bf16.msra.mxu1 %v3044_v30  ;;  %v418_v27 = vld [vmem:[%s3544_s16 + $0xb0] sm:$0xff]  ;;  %v419_v30 = vld [vmem:[%s3544_s16 + $0xb8] sm:$0xff] }
  0x51   : > { %986 = vmatprep.mubr.bf16.mxu0 %v3312_v0  ;;  %1027 = vmatprep.mubr.bf16.mxu1 %v3312_v0  ;;  %v3079_v33 = vcombine.high %v418_v27, %v450_v28  ;;  %v3078_v37 = vcombine.low %v418_v27, %v450_v28 }
  0x52   : > { %1036 = vmatprep.subr.bf16.mxu0 %v3047_v31  ;;  %1077 = vmatprep.subr.bf16.mxu1 %v3049_v32  ;;  %v451_v31 = vld [vmem:[%s3544_s16 + $0x1b8] sm:$0xff]  ;;  %v3076_v32 = vcombine.low %v417_v22, %v449_v23 }
  0x53   : > { %v3081_v34 = vcombine.high %v419_v30, %v451_v31 }
  0x57   : > { %3102 = vmatmul.mubr.msk.bf16.vlgmr.msra.gmra.mrb[8].mxu0 %vm786_vm0, %v3559_v18  ;;  %3103 = vmatmul.mubr.msk.bf16.vlgmr.msra.gmra.mrb[8].mxu1 %vm786_vm0, %v3559_v18 }
  0x58   : > { %1037 = vmatpush1.bf16.msra.mxu0 %v3046_v35  ;;  %1078 = vmatpush1.bf16.msra.mxu1 %v3048_v38  ;;  %v420_v35 = vld [vmem:[%s3544_s16 + $0xc0] sm:$0xff]  ;;  %v421_v38 = vld [vmem:[%s3544_s16 + $0xc8] sm:$0xff] }
  0x59   : > { %1068 = vmatprep.mubr.bf16.mxu0 %v3312_v0  ;;  %1109 = vmatprep.mubr.bf16.mxu1 %v3312_v0  ;;  %v3083_v41 = vcombine.high %v420_v35, %v452_v36  ;;  %v3082_v45 = vcombine.low %v420_v35, %v452_v36 }
  0x5a   : > { %1118 = vmatprep.subr.bf16.mxu0 %v3051_v39  ;;  %1159 = vmatprep.subr.bf16.mxu1 %v3053_v40  ;;  %v453_v39 = vld [vmem:[%s3544_s16 + $0x1c8] sm:$0xff]  ;;  %v3080_v40 = vcombine.low %v419_v30, %v451_v31 }
  0x5b   : > { %v3085_v42 = vcombine.high %v421_v38, %v453_v39 }
  0x5f   : > { %3104 = vmatmul.mubr.msk.bf16.vlgmr.msra.gmra.mrb[12].mxu0 %vm786_vm0, %v3559_v18  ;;  %3105 = vmatmul.mubr.msk.bf16.vlgmr.msra.gmra.mrb[12].mxu1 %vm786_vm0, %v3559_v18 }
  0x60   : > { %1119 = vmatpush1.bf16.msra.mxu0 %v3050_v43  ;;  %1160 = vmatpush1.bf16.msra.mxu1 %v3052_v46  ;;  %v422_v43 = vld [vmem:[%s3544_s16 + $0xd0] sm:$0xff]  ;;  %v423_v46 = vld [vmem:[%s3544_s16 + $0xd8] sm:$0xff] }
  0x61   : > { %1150 = vmatprep.mubr.bf16.mxu0 %v3312_v0  ;;  %1191 = vmatprep.mubr.bf16.mxu1 %v3312_v0  ;;  %v3087_v49 = vcombine.high %v422_v43, %v454_v44  ;;  %v3086_v53 = vcombine.low %v422_v43, %v454_v44 }
  0x62   : > { %1200 = vmatprep.subr.bf16.mxu0 %v3055_v47  ;;  %1241 = vmatprep.subr.bf16.mxu1 %v3057_v48  ;;  %v455_v47 = vld [vmem:[%s3544_s16 + $0x1d8] sm:$0xff]  ;;  %v3084_v48 = vcombine.low %v421_v38, %v453_v39 }
  0x63   : > { %v3089_v50 = vcombine.high %v423_v46, %v455_v47 }
  0x67   : > { %3106 = vmatmul.mubr.msk.bf16.vlgmr.msra.gmra.mrb[16].mxu0 %vm786_vm0, %v3559_v18  ;;  %3107 = vmatmul.mubr.msk.bf16.vlgmr.msra.gmra.mrb[16].mxu1 %vm786_vm0, %v3559_v18 }
  0x68   : > { %1201 = vmatpush1.bf16.msra.mxu0 %v3054_v51  ;;  %1242 = vmatpush1.bf16.msra.mxu1 %v3056_v54  ;;  %v424_v51 = vld [vmem:[%s3544_s16 + $0xe0] sm:$0xff]  ;;  %v425_v54 = vld [vmem:[%s3544_s16 + $0xe8] sm:$0xff] }
  0x69   : > { %1232 = vmatprep.mubr.bf16.mxu0 %v3312_v0  ;;  %1273 = vmatprep.mubr.bf16.mxu1 %v3312_v0  ;;  %v3091_v57 = vcombine.high %v424_v51, %v456_v52  ;;  %v3090_v61 = vcombine.low %v424_v51, %v456_v52 }
  0x6a   : > { %1282 = vmatprep.subr.bf16.mxu0 %v3059_v55  ;;  %1323 = vmatprep.subr.bf16.mxu1 %v3061_v56  ;;  %v457_v55 = vld [vmem:[%s3544_s16 + $0x1e8] sm:$0xff]  ;;  %v3088_v56 = vcombine.low %v423_v46, %v455_v47 }
  0x6b   : > { %v3093_v58 = vcombine.high %v425_v54, %v457_v55 }
  0x6f   : > { %3108 = vmatmul.mubr.msk.bf16.vlgmr.msra.gmra.mrb[20].mxu0 %vm786_vm0, %v3559_v18  ;;  %3109 = vmatmul.mubr.msk.bf16.vlgmr.msra.gmra.mrb[20].mxu1 %vm786_vm0, %v3559_v18 }
  0x70   : > { %1283 = vmatpush1.bf16.msra.mxu0 %v3058_v59  ;;  %1324 = vmatpush1.bf16.msra.mxu1 %v3060_v62  ;;  %v426_v59 = vld [vmem:[%s3544_s16 + $0xf0] sm:$0xff]  ;;  %v427_v62 = vld [vmem:[%s3544_s16 + $0xf8] sm:$0xff] }
  0x71   : > { %1314 = vmatprep.mubr.bf16.mxu0 %v3312_v0  ;;  %1355 = vmatprep.mubr.bf16.mxu1 %v3312_v0  ;;  %v3095_v2 = vcombine.high %v426_v59, %v458_v60 }
  0x72   : > { %1364 = vmatprep.subr.bf16.mxu0 %v3063_v63  ;;  %1405 = vmatprep.subr.bf16.mxu1 %v3065_v1  ;;  %v459_v63 = vld [vmem:[%s3544_s16 + $0x1f8] sm:$0xff]  ;;  %v3092_v1 = vcombine.low %v425_v54, %v457_v55  ;;  %s3977_s16 = scalar_lea.hbm %s4054_s4, %s3711_s25 }
  0x73   : > { %v3097_v3 = vcombine.high %v427_v62, %v459_v63  ;;  %v3096_v5 = vcombine.low %v427_v62, %v459_v63 }
  0x77   : > { %3110 = vmatmul.mubr.msk.bf16.vlgmr.msra.gmra.mrb[24].mxu0 %vm786_vm0, %v3559_v18  ;;  %3111 = vmatmul.mubr.msk.bf16.vlgmr.msra.gmra.mrb[24].mxu1 %vm786_vm0, %v3559_v18 }
  0x78   : > { %1365 = vmatpush1.bf16.msra.mxu0 %v3062_v4  ;;  %1406 = vmatpush1.bf16.msra.mxu1 %v3064_v7  ;;  %v3094_v4 = vcombine.low %v426_v59, %v458_v60  ;;  %v2233_v7 = vunpack.c.l.s4 %v3313_v6 }
  0x79   : > { %1396 = vmatprep.mubr.bf16.mxu0 %v3312_v0  ;;  %1437 = vmatprep.mubr.bf16.mxu1 %v3312_v0 }
  0x7a   : > { %1446 = vmatprep.subr.bf16.mxu0 %v3067_v8  ;;  %1487 = vmatprep.subr.bf16.mxu1 %v3069_v9  ;;  %v2235_v8 = vlaneseq  ;;  %v2234_v10 = vunpack.c.0.s8 %v2233_v7 }
  0x7c   : > { %v2236_v11 = vshrl.u32 %v2235_v8, 7 }
  0x7f   : > { %3112 = vmatmul.mubr.msk.bf16.vlgmr.msra.gmra.mrb[28].mxu0 %vm786_vm0, %v3559_v18  ;;  %3113 = vmatmul.mubr.msk.bf16.vlgmr.msra.gmra.mrb[28].mxu1 %vm786_vm0, %v3559_v18 }
  0x80   : > { %1447 = vmatpush1.bf16.msra.mxu0 %v3066_v12  ;;  %1488 = vmatpush1.bf16.msra.mxu1 %v3068_v15 }
  0x81   : > { %1478 = vmatprep.mubr.bf16.mxu0 %v3312_v0  ;;  %1519 = vmatprep.mubr.bf16.mxu1 %v3312_v0 }
  0x82   : > { %1528 = vmatprep.subr.bf16.mxu0 %v3071_v16  ;;  %1569 = vmatprep.subr.bf16.mxu1 %v3073_v17  ;;  %v3722_v16 = vsub.s32 %v2234_v10, %v2236_v11 }
  0x87   : > { %3114 = vmatmul.mubr.msk.bf16.vlgmr.msra.gmra.mrb[32].mxu0 %vm786_vm0, %v3559_v18  ;;  %3115 = vmatmul.mubr.msk.bf16.vlgmr.msra.gmra.mrb[32].mxu1 %vm786_vm0, %v3559_v18 }
  0x88   : > { %1529 = vmatpush1.bf16.msra.mxu0 %v3070_v21  ;;  %1570 = vmatpush1.bf16.msra.mxu1 %v3072_v24 }
  0x89   : > { %1560 = vmatprep.mubr.bf16.mxu0 %v3312_v0  ;;  %1601 = vmatprep.mubr.bf16.mxu1 %v3312_v0 }
  0x8a   : > { %1610 = vmatprep.subr.bf16.mxu0 %v3075_v25  ;;  %1651 = vmatprep.subr.bf16.mxu1 %v3077_v26 }
  0x8f   : > { %3116 = vmatmul.mubr.msk.bf16.vlgmr.msra.gmra.mrb[36].mxu0 %vm786_vm0, %v3559_v18  ;;  %3117 = vmatmul.mubr.msk.bf16.vlgmr.msra.gmra.mrb[36].mxu1 %vm786_vm0, %v3559_v18 }
  0x90   : > { %1611 = vmatpush1.bf16.msra.mxu0 %v3074_v29  ;;  %1652 = vmatpush1.bf16.msra.mxu1 %v3076_v32 }
  0x91   : > { %1642 = vmatprep.mubr.bf16.mxu0 %v3312_v0  ;;  %1683 = vmatprep.mubr.bf16.mxu1 %v3312_v0 }
  0x92   : > { %1692 = vmatprep.subr.bf16.mxu0 %v3079_v33  ;;  %1733 = vmatprep.subr.bf16.mxu1 %v3081_v34 }
  0x97   : > { %3118 = vmatmul.mubr.msk.bf16.vlgmr.msra.gmra.mrb[40].mxu0 %vm786_vm0, %v3559_v18  ;;  %3119 = vmatmul.mubr.msk.bf16.vlgmr.msra.gmra.mrb[40].mxu1 %vm786_vm0, %v3559_v18 }
  0x98   : > { %1693 = vmatpush1.bf16.msra.mxu0 %v3078_v37  ;;  %1734 = vmatpush1.bf16.msra.mxu1 %v3080_v40 }
  0x99   : > { %1724 = vmatprep.mubr.bf16.mxu0 %v3312_v0  ;;  %1765 = vmatprep.mubr.bf16.mxu1 %v3312_v0 }
  0x9a   : > { %1774 = vmatprep.subr.bf16.mxu0 %v3083_v41  ;;  %1815 = vmatprep.subr.bf16.mxu1 %v3085_v42 }
  0x9f   : > { %3120 = vmatmul.mubr.msk.bf16.vlgmr.msra.gmra.mrb[44].mxu0 %vm786_vm0, %v3559_v18  ;;  %3121 = vmatmul.mubr.msk.bf16.vlgmr.msra.gmra.mrb[44].mxu1 %vm786_vm0, %v3559_v18 }
  0xa0   : > { %1775 = vmatpush1.bf16.msra.mxu0 %v3082_v45  ;;  %1816 = vmatpush1.bf16.msra.mxu1 %v3084_v48 }
  0xa1   : > { %1806 = vmatprep.mubr.bf16.mxu0 %v3312_v0  ;;  %1847 = vmatprep.mubr.bf16.mxu1 %v3312_v0 }
  0xa2   : > { %1856 = vmatprep.subr.bf16.mxu0 %v3087_v49  ;;  %1897 = vmatprep.subr.bf16.mxu1 %v3089_v50 }
  0xa7   : > { %3122 = vmatmul.mubr.msk.bf16.vlgmr.msra.gmra.mrb[48].mxu0 %vm786_vm0, %v3559_v18  ;;  %3123 = vmatmul.mubr.msk.bf16.vlgmr.msra.gmra.mrb[48].mxu1 %vm786_vm0, %v3559_v18 }
  0xa8   : > { %1857 = vmatpush1.bf16.msra.mxu0 %v3086_v53  ;;  %1898 = vmatpush1.bf16.msra.mxu1 %v3088_v56 }
  0xa9   : > { %1888 = vmatprep.mubr.bf16.mxu0 %v3312_v0  ;;  %1929 = vmatprep.mubr.bf16.mxu1 %v3312_v0 }
  0xaa   : > { %1938 = vmatprep.subr.bf16.mxu0 %v3091_v57  ;;  %1979 = vmatprep.subr.bf16.mxu1 %v3093_v58 }
  0xaf   : > { %3124 = vmatmul.mubr.msk.bf16.vlgmr.msra.gmra.mrb[52].mxu0 %vm786_vm0, %v3559_v18  ;;  %3125 = vmatmul.mubr.msk.bf16.vlgmr.msra.gmra.mrb[52].mxu1 %vm786_vm0, %v3559_v18 }
  0xb0   : > { %1939 = vmatpush1.bf16.msra.mxu0 %v3090_v61  ;;  %1980 = vmatpush1.bf16.msra.mxu1 %v3092_v1 }
  0xb1   : > { %1970 = vmatprep.mubr.bf16.mxu0 %v3312_v0  ;;  %2011 = vmatprep.mubr.bf16.mxu1 %v3312_v0 }
  0xb2   : > { %2020 = vmatprep.subr.bf16.mxu0 %v3095_v2  ;;  %2061 = vmatprep.subr.bf16.mxu1 %v3097_v3 }
  0xb7   : > { %3126 = vmatmul.mubr.msk.bf16.vlgmr.msra.gmra.mrb[56].mxu0 %vm786_vm0, %v3559_v18  ;;  %3127 = vmatmul.mubr.msk.bf16.vlgmr.msra.gmra.mrb[56].mxu1 %vm786_vm0, %v3559_v18 }
  0xb8   : > { %2021 = vmatpush1.bf16.msra.mxu0 %v3094_v4  ;;  %2062 = vmatpush1.bf16.msra.mxu1 %v3096_v5 }
  0xb9   : > { %2052 = vmatprep.mubr.bf16.mxu0 %v3312_v0  ;;  %2093 = vmatprep.mubr.bf16.mxu1 %v3312_v0 }
  0xbe   : > { %v3714_v9 = vpop.permute.xlu0 %463 }
  0xbf   : > { %3128 = vmatmul.mubr.msk.bf16.vlgmr.msra.gmra.mrb[60].mxu0 %vm786_vm0, %v3559_v18  ;;  %3129 = vmatmul.mubr.msk.bf16.vlgmr.msra.gmra.mrb[60].mxu1 %vm786_vm0, %v3559_v18 }
 0x11a   : > { %v824_v0 = vpop.f32.mrb[0].mxu0  ;;  %v865_v12 = vpop.f32.mrb[0].mxu1 }
 0x11b   : > { %v825_v13 = vadd.f32 %v824_v0, %v3714_v9  ;;  %v826_v14 = vpop.f32.mrb[1].mxu0  ;;  %v866_v15 = vadd.f32 %v865_v12, %v3714_v9  ;;  %v867_v17 = vpop.f32.mrb[1].mxu1 }
 0x11c   : > { %v827_v18 = vadd.f32 %v826_v14, %v3714_v9  ;;  %v828_v19 = vpop.f32.mrb[2].mxu0  ;;  %v868_v22 = vadd.f32 %v867_v17, %v3714_v9  ;;  %v869_v24 = vpop.f32.mrb[2].mxu1 }
 0x11d   : > { %v2535_v20 = vsel %vm2534_vm1, %v825_v13, 0.0  ;;  %v2664_v21 = vmul.f32 %v825_v13, %v825_v13  ;;  %v829_v23 = vpop.f32.mrb[3].mxu0  ;;  %v2538_v27 = vsel %vm2534_vm1, %v866_v15, 0.0  ;;  %v870_v29 = vpop.f32.mrb[3].mxu1  ;;  %v2666_v31 = vmul.f32 %v866_v15, %v866_v15 }
 0x11e   : > { %v3130_v25 = vpack.c.bf16 %v827_v18, %v825_v13  ;;  %v2536_v26 = vsel %vm2534_vm1, %v827_v18, 0.0  ;;  %v2665_v28 = vmul.f32 %v827_v18, %v827_v18  ;;  %v3131_v33 = vpack.c.bf16 %v868_v22, %v866_v15 }
 0x11f   : > { %v2537_v30 = vadd.f32 %v2536_v26, %v2535_v20  ;;  %v2728_v32 = vsel %vm2534_vm1, %v2664_v21, 0.0  ;;  %v2667_v36 = vmul.f32 %v868_v22, %v868_v22  ;;  %v2731_v39 = vsel %vm2534_vm1, %v2666_v31, 0.0 }
 0x120   : > { %v2238_v34 = vrot.slane %v3130_v25, %v3722_v16  ;;  %v2729_v35 = vsel %vm2534_vm1, %v2665_v28, 0.0  ;;  %v2245_v40 = vrot.slane %v3131_v33, %v3722_v16  ;;  %v2540_v41 = vsel %vm2534_vm1, %v868_v22, 0.0 }
 0x121   : > { %v2539_v37 = vadd.f32 %v2538_v27, %v2537_v30  ;;  %v2730_v38 = vadd.f32 %v2729_v35, %v2728_v32  ;;  %v2733_v49 = vsel %vm2534_vm1, %v2667_v36, 0.0 }
 0x122   : > { %v906_v42 = vpop.f32.mrb[4].mxu0  ;;  %v2246_v44 = vcombine.low %v2238_v34, %v2245_v40  ;;  %v947_v47 = vpop.f32.mrb[4].mxu1 }
 0x123   : > { %v2732_v43 = vadd.f32 %v2731_v39, %v2730_v38  ;;  %v2541_v45 = vadd.f32 %v2540_v41, %v2539_v37  ;;  %v907_v46 = vadd.f32 %v906_v42, %v3714_v9  ;;  %v908_v48 = vpop.f32.mrb[5].mxu0  ;;  %v948_v50 = vadd.f32 %v947_v47, %v3714_v9  ;;  %v949_v52 = vpop.f32.mrb[5].mxu1 }
 0x124   : > { %v909_v51 = vadd.f32 %v908_v48, %v3714_v9  ;;  %v910_v53 = vpop.f32.mrb[6].mxu0  ;;  %v950_v57 = vadd.f32 %v949_v52, %v3714_v9  ;;  %v951_v59 = vpop.f32.mrb[6].mxu1  ;;  %2518 = vst [vmem:[%s3738_s7] sm:$0xff] %v2246_v44 }
 0x125   : > { %v2734_v54 = vadd.f32 %v2733_v49, %v2732_v43  ;;  %v2542_v55 = vsel %vm2534_vm1, %v907_v46, 0.0  ;;  %v2668_v56 = vmul.f32 %v907_v46, %v907_v46  ;;  %v911_v58 = vpop.f32.mrb[7].mxu0  ;;  %v2670_v61 = vmul.f32 %v948_v50, %v948_v50  ;;  %v952_v63 = vpop.f32.mrb[7].mxu1 }
 0x126   : > { %v2543_v60 = vadd.f32 %v2542_v55, %v2541_v45  ;;  %v3132_v62 = vpack.c.bf16 %v909_v51, %v907_v46  ;;  %v2544_v2 = vsel %vm2534_vm1, %v909_v51, 0.0  ;;  %v2669_v3 = vmul.f32 %v909_v51, %v909_v51 }
 0x127   : > { %v2735_v1 = vsel %vm2534_vm1, %v2668_v56, 0.0  ;;  %v3133_v4 = vpack.c.bf16 %v950_v57, %v948_v50  ;;  %v2546_v8 = vsel %vm2534_vm1, %v948_v50, 0.0  ;;  %v2671_v0 = vmul.f32 %v950_v57, %v950_v57 }
 0x128   : > { %v2736_v5 = vadd.f32 %v2735_v1, %v2734_v54  ;;  %v2255_v6 = vrot.slane %v3132_v62, %v3722_v16  ;;  %v2545_v7 = vadd.f32 %v2544_v2, %v2543_v60  ;;  %v2737_v10 = vsel %vm2534_vm1, %v2669_v3, 0.0 }
 0x129   : > { %v2262_v11 = vrot.slane %v3133_v4, %v3722_v16  ;;  %v2739_v18 = vsel %vm2534_vm1, %v2670_v61, 0.0  ;;  %v2548_v17 = vsel %vm2534_vm1, %v950_v57, 0.0  ;;  %v2741_v28 = vsel %vm2534_vm1, %v2671_v0, 0.0 }
 0x12a   : > { %v2547_v12 = vadd.f32 %v2546_v8, %v2545_v7  ;;  %v2738_v13 = vadd.f32 %v2737_v10, %v2736_v5  ;;  %v988_v14 = vpop.f32.mrb[8].mxu0  ;;  %v1029_v20 = vpop.f32.mrb[8].mxu1 }
 0x12b   : > { %v2263_v15 = vcombine.low %v2255_v6, %v2262_v11  ;;  %v989_v19 = vadd.f32 %v988_v14, %v3714_v9  ;;  %v990_v21 = vpop.f32.mrb[9].mxu0  ;;  %v1030_v24 = vadd.f32 %v1029_v20, %v3714_v9  ;;  %v1031_v26 = vpop.f32.mrb[9].mxu1 }
 0x12c   : > { %v2740_v22 = vadd.f32 %v2739_v18, %v2738_v13  ;;  %v2549_v23 = vadd.f32 %v2548_v17, %v2547_v12  ;;  %v991_v25 = vadd.f32 %v990_v21, %v3714_v9  ;;  %v992_v27 = vpop.f32.mrb[10].mxu0  ;;  %v1032_v31 = vadd.f32 %v1031_v26, %v3714_v9  ;;  %v1033_v33 = vpop.f32.mrb[10].mxu1 }
 0x12d   : > { %v2550_v29 = vsel %vm2534_vm1, %v989_v19, 0.0  ;;  %v2672_v30 = vmul.f32 %v989_v19, %v989_v19  ;;  %v993_v32 = vpop.f32.mrb[11].mxu0  ;;  %2519 = vst [vmem:[%s3738_s7 + $0x8] sm:$0xff] %v2263_v15  ;;  %v2674_v36 = vmul.f32 %v1030_v24, %v1030_v24  ;;  %v1034_v37 = vpop.f32.mrb[11].mxu1  ;;  %v2554_v45 = vsel %vm2534_vm1, %v1030_v24, 0.0 }
 0x12e   : > { %v2742_v34 = vadd.f32 %v2741_v28, %v2740_v22  ;;  %v2551_v35 = vadd.f32 %v2550_v29, %v2549_v23  ;;  %v3134_v39 = vpack.c.bf16 %v991_v25, %v989_v19  ;;  %v2552_v40 = vsel %vm2534_vm1, %v991_v25, 0.0 }
 0x12f   : > { %v2743_v38 = vsel %vm2534_vm1, %v2672_v30, 0.0  ;;  %v2673_v41 = vmul.f32 %v991_v25, %v991_v25  ;;  %v3135_v44 = vpack.c.bf16 %v1032_v31, %v1030_v24  ;;  %v2675_v48 = vmul.f32 %v1032_v31, %v1032_v31 }
 0x130   : > { %v2744_v42 = vadd.f32 %v2743_v38, %v2742_v34  ;;  %v2553_v43 = vadd.f32 %v2552_v40, %v2551_v35  ;;  %v2272_v46 = vrot.slane %v3134_v39, %v3722_v16  ;;  %v2747_v53 = vsel %vm2534_vm1, %v2674_v36, 0.0 }
 0x131   : > { %v2745_v47 = vsel %vm2534_vm1, %v2673_v41, 0.0  ;;  %v2279_v51 = vrot.slane %v3135_v44, %v3722_v16  ;;  %v2556_v54 = vsel %vm2534_vm1, %v1032_v31, 0.0  ;;  %v2749_v55 = vsel %vm2534_vm1, %v2675_v48, 0.0 }
 0x132   : > { %v2555_v49 = vadd.f32 %v2554_v45, %v2553_v43  ;;  %v2746_v50 = vadd.f32 %v2745_v47, %v2744_v42  ;;  %v1070_v52 = vpop.f32.mrb[12].mxu0  ;;  %v1111_v57 = vpop.f32.mrb[12].mxu1 }
 0x133   : > { %v1071_v56 = vadd.f32 %v1070_v52, %v3714_v9  ;;  %v1072_v58 = vpop.f32.mrb[13].mxu0  ;;  %v2280_v60 = vcombine.low %v2272_v46, %v2279_v51  ;;  %v1112_v62 = vadd.f32 %v1111_v57, %v3714_v9  ;;  %v1113_v63 = vpop.f32.mrb[13].mxu1 }
 0x134   : > { %v2748_v59 = vadd.f32 %v2747_v53, %v2746_v50  ;;  %v2557_v61 = vadd.f32 %v2556_v54, %v2555_v49  ;;  %v1074_v1 = vpop.f32.mrb[14].mxu0  ;;  %v1073_v4 = vadd.f32 %v1072_v58, %v3714_v9  ;;  %v1114_v5 = vadd.f32 %v1113_v63, %v3714_v9  ;;  %v1115_v7 = vpop.f32.mrb[14].mxu1 }
 0x135   : > { %v2558_v2 = vsel %vm2534_vm1, %v1071_v56, 0.0  ;;  %v2676_v3 = vmul.f32 %v1071_v56, %v1071_v56  ;;  %v1075_v6 = vpop.f32.mrb[15].mxu0  ;;  %v2678_v11 = vmul.f32 %v1112_v62, %v1112_v62  ;;  %v1116_v0 = vpop.f32.mrb[15].mxu1  ;;  %2520 = vst [vmem:[%s3738_s7 + $0x10] sm:$0xff] %v2280_v60  ;;  %v2562_v20 = vsel %vm2534_vm1, %v1112_v62, 0.0 }
 0x136   : > { %v2750_v8 = vadd.f32 %v2749_v55, %v2748_v59  ;;  %v2559_v10 = vadd.f32 %v2558_v2, %v2557_v61  ;;  %v3136_v13 = vpack.c.bf16 %v1073_v4, %v1071_v56  ;;  %v2560_v14 = vsel %vm2534_vm1, %v1073_v4, 0.0 }
 0x137   : > { %v2751_v12 = vsel %vm2534_vm1, %v2676_v3, 0.0  ;;  %v2677_v18 = vmul.f32 %v1073_v4, %v1073_v4  ;;  %v3137_v19 = vpack.c.bf16 %v1114_v5, %v1112_v62  ;;  %v2679_v23 = vmul.f32 %v1114_v5, %v1114_v5 }
 0x138   : > { %v2752_v15 = vadd.f32 %v2751_v12, %v2750_v8  ;;  %v2561_v17 = vadd.f32 %v2560_v14, %v2559_v10  ;;  %v2289_v21 = vrot.slane %v3136_v13, %v3722_v16  ;;  %v2755_v28 = vsel %vm2534_vm1, %v2678_v11, 0.0 }
 0x139   : > { %v2753_v22 = vsel %vm2534_vm1, %v2677_v18, 0.0  ;;  %v2296_v26 = vrot.slane %v3137_v19, %v3722_v16  ;;  %v2564_v29 = vsel %vm2534_vm1, %v1114_v5, 0.0  ;;  %v2757_v30 = vsel %vm2534_vm1, %v2679_v23, 0.0 }
 0x13a   : > { %v2563_v24 = vadd.f32 %v2562_v20, %v2561_v17  ;;  %v2754_v25 = vadd.f32 %v2753_v22, %v2752_v15  ;;  %v1152_v27 = vpop.f32.mrb[16].mxu0  ;;  %v1193_v32 = vpop.f32.mrb[16].mxu1 }
 0x13b   : > { %v1153_v31 = vadd.f32 %v1152_v27, %v3714_v9  ;;  %v1154_v33 = vpop.f32.mrb[17].mxu0  ;;  %v2297_v35 = vcombine.low %v2289_v21, %v2296_v26  ;;  %v1194_v37 = vadd.f32 %v1193_v32, %v3714_v9  ;;  %v1195_v38 = vpop.f32.mrb[17].mxu1 }
 0x13c   : > { %v2756_v34 = vadd.f32 %v2755_v28, %v2754_v25  ;;  %v2565_v36 = vadd.f32 %v2564_v29, %v2563_v24  ;;  %v1156_v39 = vpop.f32.mrb[18].mxu0  ;;  %v1155_v42 = vadd.f32 %v1154_v33, %v3714_v9  ;;  %v1196_v43 = vadd.f32 %v1195_v38, %v3714_v9  ;;  %v1197_v45 = vpop.f32.mrb[18].mxu1 }
 0x13d   : > { %v2566_v40 = vsel %vm2534_vm1, %v1153_v31, 0.0  ;;  %v2680_v41 = vmul.f32 %v1153_v31, %v1153_v31  ;;  %v1157_v44 = vpop.f32.mrb[19].mxu0  ;;  %v2682_v48 = vmul.f32 %v1194_v37, %v1194_v37  ;;  %v1198_v49 = vpop.f32.mrb[19].mxu1  ;;  %2521 = vst [vmem:[%s3738_s7 + $0x18] sm:$0xff] %v2297_v35  ;;  %v2570_v57 = vsel %vm2534_vm1, %v1194_v37, 0.0 }
 0x13e   : > { %v2758_v46 = vadd.f32 %v2757_v30, %v2756_v34  ;;  %v2567_v47 = vadd.f32 %v2566_v40, %v2565_v36  ;;  %v3138_v51 = vpack.c.bf16 %v1155_v42, %v1153_v31  ;;  %v2568_v52 = vsel %vm2534_vm1, %v1155_v42, 0.0 }
 0x13f   : > { %v2759_v50 = vsel %vm2534_vm1, %v2680_v41, 0.0  ;;  %v2681_v53 = vmul.f32 %v1155_v42, %v1155_v42  ;;  %v3139_v56 = vpack.c.bf16 %v1196_v43, %v1194_v37  ;;  %v2683_v60 = vmul.f32 %v1196_v43, %v1196_v43 }
 0x140   : > { %v2760_v54 = vadd.f32 %v2759_v50, %v2758_v46  ;;  %v2569_v55 = vadd.f32 %v2568_v52, %v2567_v47  ;;  %v2306_v58 = vrot.slane %v3138_v51, %v3722_v16  ;;  %v2763_v2 = vsel %vm2534_vm1, %v2682_v48, 0.0 }
 0x141   : > { %v2761_v59 = vsel %vm2534_vm1, %v2681_v53, 0.0  ;;  %v2313_v63 = vrot.slane %v3139_v56, %v3722_v16  ;;  %v2572_v3 = vsel %vm2534_vm1, %v1196_v43, 0.0  ;;  %v2765_v4 = vsel %vm2534_vm1, %v2683_v60, 0.0 }
 0x142   : > { %v2571_v61 = vadd.f32 %v2570_v57, %v2569_v55  ;;  %v2762_v62 = vadd.f32 %v2761_v59, %v2760_v54  ;;  %v1234_v1 = vpop.f32.mrb[20].mxu0  ;;  %v1275_v6 = vpop.f32.mrb[20].mxu1 }
 0x143   : > { %v1235_v5 = vadd.f32 %v1234_v1, %v3714_v9  ;;  %v1236_v7 = vpop.f32.mrb[21].mxu0  ;;  %v2314_v10 = vcombine.low %v2306_v58, %v2313_v63  ;;  %v1276_v0 = vadd.f32 %v1275_v6, %v3714_v9  ;;  %v1277_v12 = vpop.f32.mrb[21].mxu1 }
 0x144   : > { %v2764_v8 = vadd.f32 %v2763_v2, %v2762_v62  ;;  %v2573_v11 = vadd.f32 %v2572_v3, %v2571_v61  ;;  %v1238_v13 = vpop.f32.mrb[22].mxu0  ;;  %v1237_v15 = vadd.f32 %v1236_v7, %v3714_v9  ;;  %v1278_v17 = vadd.f32 %v1277_v12, %v3714_v9  ;;  %v1279_v20 = vpop.f32.mrb[22].mxu1 }
 0x145   : > { %v2574_v14 = vsel %vm2534_vm1, %v1235_v5, 0.0  ;;  %v2684_v18 = vmul.f32 %v1235_v5, %v1235_v5  ;;  %v1239_v19 = vpop.f32.mrb[23].mxu0  ;;  %v2686_v23 = vmul.f32 %v1276_v0, %v1276_v0  ;;  %v1280_v24 = vpop.f32.mrb[23].mxu1  ;;  %2522 = vst [vmem:[%s3738_s7 + $0x20] sm:$0xff] %v2314_v10  ;;  %v2578_v32 = vsel %vm2534_vm1, %v1276_v0, 0.0 }
 0x146   : > { %v2766_v21 = vadd.f32 %v2765_v4, %v2764_v8  ;;  %v2575_v22 = vadd.f32 %v2574_v14, %v2573_v11  ;;  %v3140_v26 = vpack.c.bf16 %v1237_v15, %v1235_v5  ;;  %v2576_v27 = vsel %vm2534_vm1, %v1237_v15, 0.0 }
 0x147   : > { %v2767_v25 = vsel %vm2534_vm1, %v2684_v18, 0.0  ;;  %v2685_v28 = vmul.f32 %v1237_v15, %v1237_v15  ;;  %v3141_v31 = vpack.c.bf16 %v1278_v17, %v1276_v0  ;;  %v2687_v35 = vmul.f32 %v1278_v17, %v1278_v17 }
 0x148   : > { %v2768_v29 = vadd.f32 %v2767_v25, %v2766_v21  ;;  %v2577_v30 = vadd.f32 %v2576_v27, %v2575_v22  ;;  %v2323_v33 = vrot.slane %v3140_v26, %v3722_v16  ;;  %v2771_v40 = vsel %vm2534_vm1, %v2686_v23, 0.0 }
 0x149   : > { %v2769_v34 = vsel %vm2534_vm1, %v2685_v28, 0.0  ;;  %v2330_v37 = vrot.slane %v3141_v31, %v3722_v16  ;;  %v2580_v41 = vsel %vm2534_vm1, %v1278_v17, 0.0  ;;  %v2773_v42 = vsel %vm2534_vm1, %v2687_v35, 0.0 }
 0x14a   : > { %v2770_v36 = vadd.f32 %v2769_v34, %v2768_v29  ;;  %v2579_v38 = vadd.f32 %v2578_v32, %v2577_v30  ;;  %v1316_v39 = vpop.f32.mrb[24].mxu0  ;;  %v1357_v44 = vpop.f32.mrb[24].mxu1 }
 0x14b   : > { %v1317_v43 = vadd.f32 %v1316_v39, %v3714_v9  ;;  %v1318_v45 = vpop.f32.mrb[25].mxu0  ;;  %v2331_v46 = vcombine.low %v2323_v33, %v2330_v37  ;;  %v1358_v49 = vadd.f32 %v1357_v44, %v3714_v9  ;;  %v1359_v50 = vpop.f32.mrb[25].mxu1 }
 0x14c   : > { %v2581_v47 = vadd.f32 %v2580_v41, %v2579_v38  ;;  %v2772_v48 = vadd.f32 %v2771_v40, %v2770_v36  ;;  %v1320_v51 = vpop.f32.mrb[26].mxu0  ;;  %v1319_v54 = vadd.f32 %v1318_v45, %v3714_v9  ;;  %v1360_v55 = vadd.f32 %v1359_v50, %v3714_v9  ;;  %v1361_v57 = vpop.f32.mrb[26].mxu1 }
 0x14d   : > { %v2582_v52 = vsel %vm2534_vm1, %v1317_v43, 0.0  ;;  %v2688_v53 = vmul.f32 %v1317_v43, %v1317_v43  ;;  %v1321_v56 = vpop.f32.mrb[27].mxu0  ;;  %v2690_v60 = vmul.f32 %v1358_v49, %v1358_v49  ;;  %v1362_v61 = vpop.f32.mrb[27].mxu1  ;;  %2523 = vst [vmem:[%s3738_s7 + $0x28] sm:$0xff] %v2331_v46  ;;  %v2586_v6 = vsel %vm2534_vm1, %v1358_v49, 0.0 }
 0x14e   : > { %v2774_v58 = vadd.f32 %v2773_v42, %v2772_v48  ;;  %v2583_v59 = vadd.f32 %v2582_v52, %v2581_v47  ;;  %v3142_v63 = vpack.c.bf16 %v1319_v54, %v1317_v43  ;;  %v2584_v1 = vsel %vm2534_vm1, %v1319_v54, 0.0 }
 0x14f   : > { %v2775_v62 = vsel %vm2534_vm1, %v2688_v53, 0.0  ;;  %v2689_v2 = vmul.f32 %v1319_v54, %v1319_v54  ;;  %v3143_v5 = vpack.c.bf16 %v1360_v55, %v1358_v49  ;;  %v2691_v10 = vmul.f32 %v1360_v55, %v1360_v55 }
 0x150   : > { %v2776_v3 = vadd.f32 %v2775_v62, %v2774_v58  ;;  %v2585_v4 = vadd.f32 %v2584_v1, %v2583_v59  ;;  %v2340_v7 = vrot.slane %v3142_v63, %v3722_v16  ;;  %v2779_v14 = vsel %vm2534_vm1, %v2690_v60, 0.0 }
 0x151   : > { %v2777_v8 = vsel %vm2534_vm1, %v2689_v2, 0.0  ;;  %v2347_v0 = vrot.slane %v3143_v5, %v3722_v16  ;;  %v2588_v18 = vsel %vm2534_vm1, %v1360_v55, 0.0  ;;  %v2781_v15 = vsel %vm2534_vm1, %v2691_v10, 0.0 }
 0x152   : > { %v2778_v11 = vadd.f32 %v2777_v8, %v2776_v3  ;;  %v2587_v12 = vadd.f32 %v2586_v6, %v2585_v4  ;;  %v1398_v13 = vpop.f32.mrb[28].mxu0  ;;  %v1439_v19 = vpop.f32.mrb[28].mxu1 }
 0x153   : > { %v1399_v17 = vadd.f32 %v1398_v13, %v3714_v9  ;;  %v1400_v20 = vpop.f32.mrb[29].mxu0  ;;  %v2348_v21 = vcombine.low %v2340_v7, %v2347_v0  ;;  %v1440_v24 = vadd.f32 %v1439_v19, %v3714_v9  ;;  %v1441_v25 = vpop.f32.mrb[29].mxu1 }
 0x154   : > { %v2589_v22 = vadd.f32 %v2588_v18, %v2587_v12  ;;  %v2780_v23 = vadd.f32 %v2779_v14, %v2778_v11  ;;  %v1402_v26 = vpop.f32.mrb[30].mxu0  ;;  %v1401_v29 = vadd.f32 %v1400_v20, %v3714_v9  ;;  %v1442_v30 = vadd.f32 %v1441_v25, %v3714_v9  ;;  %v1443_v32 = vpop.f32.mrb[30].mxu1 }
 0x155   : > { %v2590_v27 = vsel %vm2534_vm1, %v1399_v17, 0.0  ;;  %v2692_v28 = vmul.f32 %v1399_v17, %v1399_v17  ;;  %v1403_v31 = vpop.f32.mrb[31].mxu0  ;;  %v2694_v35 = vmul.f32 %v1440_v24, %v1440_v24  ;;  %v1444_v36 = vpop.f32.mrb[31].mxu1  ;;  %2524 = vst [vmem:[%s3738_s7 + $0x30] sm:$0xff] %v2348_v21  ;;  %v2594_v44 = vsel %vm2534_vm1, %v1440_v24, 0.0 }
 0x156   : > { %v2782_v33 = vadd.f32 %v2781_v15, %v2780_v23  ;;  %v2591_v34 = vadd.f32 %v2590_v27, %v2589_v22  ;;  %v3144_v38 = vpack.c.bf16 %v1401_v29, %v1399_v17  ;;  %v2592_v39 = vsel %vm2534_vm1, %v1401_v29, 0.0 }
 0x157   : > { %v2783_v37 = vsel %vm2534_vm1, %v2692_v28, 0.0  ;;  %v2693_v40 = vmul.f32 %v1401_v29, %v1401_v29  ;;  %v3145_v43 = vpack.c.bf16 %v1442_v30, %v1440_v24  ;;  %v2695_v47 = vmul.f32 %v1442_v30, %v1442_v30 }
 0x158   : > { %v2784_v41 = vadd.f32 %v2783_v37, %v2782_v33  ;;  %v2593_v42 = vadd.f32 %v2592_v39, %v2591_v34  ;;  %v2357_v45 = vrot.slane %v3144_v38, %v3722_v16  ;;  %v2787_v52 = vsel %vm2534_vm1, %v2694_v35, 0.0 }
 0x159   : > { %v2785_v46 = vsel %vm2534_vm1, %v2693_v40, 0.0  ;;  %v2364_v49 = vrot.slane %v3145_v43, %v3722_v16  ;;  %v2596_v53 = vsel %vm2534_vm1, %v1442_v30, 0.0  ;;  %v2789_v54 = vsel %vm2534_vm1, %v2695_v47, 0.0 }
 0x15a   : > { %v2786_v48 = vadd.f32 %v2785_v46, %v2784_v41  ;;  %v2595_v50 = vadd.f32 %v2594_v44, %v2593_v42  ;;  %v1480_v51 = vpop.f32.mrb[32].mxu0  ;;  %v1521_v56 = vpop.f32.mrb[32].mxu1 }
 0x15b   : > { %v1481_v55 = vadd.f32 %v1480_v51, %v3714_v9  ;;  %v1482_v57 = vpop.f32.mrb[33].mxu0  ;;  %v2365_v58 = vcombine.low %v2357_v45, %v2364_v49  ;;  %v1522_v61 = vadd.f32 %v1521_v56, %v3714_v9  ;;  %v1523_v62 = vpop.f32.mrb[33].mxu1 }
 0x15c   : > { %v2597_v59 = vadd.f32 %v2596_v53, %v2595_v50  ;;  %v2788_v60 = vadd.f32 %v2787_v52, %v2786_v48  ;;  %v1484_v63 = vpop.f32.mrb[34].mxu0  ;;  %v1483_v3 = vadd.f32 %v1482_v57, %v3714_v9  ;;  %v1524_v4 = vadd.f32 %v1523_v62, %v3714_v9  ;;  %v1525_v6 = vpop.f32.mrb[34].mxu1 }
 0x15d   : > { %v2598_v1 = vsel %vm2534_vm1, %v1481_v55, 0.0  ;;  %v2696_v2 = vmul.f32 %v1481_v55, %v1481_v55  ;;  %v1485_v5 = vpop.f32.mrb[35].mxu0  ;;  %v2698_v10 = vmul.f32 %v1522_v61, %v1522_v61  ;;  %v1526_v11 = vpop.f32.mrb[35].mxu1  ;;  %2525 = vst [vmem:[%s3738_s7 + $0x38] sm:$0xff] %v2365_v58  ;;  %v2602_v19 = vsel %vm2534_vm1, %v1522_v61, 0.0 }
 0x15e   : > { %v2790_v7 = vadd.f32 %v2789_v54, %v2788_v60  ;;  %v2599_v8 = vadd.f32 %v2598_v1, %v2597_v59  ;;  %v3146_v12 = vpack.c.bf16 %v1483_v3, %v1481_v55  ;;  %v2600_v13 = vsel %vm2534_vm1, %v1483_v3, 0.0 }
 0x15f   : > { %v2791_v0 = vsel %vm2534_vm1, %v2696_v2, 0.0  ;;  %v2697_v14 = vmul.f32 %v1483_v3, %v1483_v3  ;;  %v3147_v17 = vpack.c.bf16 %v1524_v4, %v1522_v61  ;;  %v2699_v22 = vmul.f32 %v1524_v4, %v1524_v4 }
 0x160   : > { %v2792_v18 = vadd.f32 %v2791_v0, %v2790_v7  ;;  %v2601_v15 = vadd.f32 %v2600_v13, %v2599_v8  ;;  %v2374_v20 = vrot.slane %v3146_v12, %v3722_v16  ;;  %v2795_v27 = vsel %vm2534_vm1, %v2698_v10, 0.0 }
 0x161   : > { %v2793_v21 = vsel %vm2534_vm1, %v2697_v14, 0.0  ;;  %v2381_v24 = vrot.slane %v3147_v17, %v3722_v16  ;;  %v2604_v28 = vsel %vm2534_vm1, %v1524_v4, 0.0  ;;  %v2797_v29 = vsel %vm2534_vm1, %v2699_v22, 0.0 }
 0x162   : > { %v2794_v23 = vadd.f32 %v2793_v21, %v2792_v18  ;;  %v2603_v25 = vadd.f32 %v2602_v19, %v2601_v15  ;;  %v1562_v26 = vpop.f32.mrb[36].mxu0  ;;  %v1603_v31 = vpop.f32.mrb[36].mxu1 }
 0x163   : > { %v1563_v30 = vadd.f32 %v1562_v26, %v3714_v9  ;;  %v1564_v32 = vpop.f32.mrb[37].mxu0  ;;  %v2382_v33 = vcombine.low %v2374_v20, %v2381_v24  ;;  %v1604_v36 = vadd.f32 %v1603_v31, %v3714_v9  ;;  %v1605_v37 = vpop.f32.mrb[37].mxu1 }
 0x164   : > { %v2605_v34 = vadd.f32 %v2604_v28, %v2603_v25  ;;  %v2796_v35 = vadd.f32 %v2795_v27, %v2794_v23  ;;  %v1566_v38 = vpop.f32.mrb[38].mxu0  ;;  %v1565_v41 = vadd.f32 %v1564_v32, %v3714_v9  ;;  %v1606_v42 = vadd.f32 %v1605_v37, %v3714_v9  ;;  %v1607_v44 = vpop.f32.mrb[38].mxu1 }
 0x165   : > { %v2606_v39 = vsel %vm2534_vm1, %v1563_v30, 0.0  ;;  %v2700_v40 = vmul.f32 %v1563_v30, %v1563_v30  ;;  %v1567_v43 = vpop.f32.mrb[39].mxu0  ;;  %v2702_v47 = vmul.f32 %v1604_v36, %v1604_v36  ;;  %v1608_v48 = vpop.f32.mrb[39].mxu1  ;;  %2526 = vst [vmem:[%s3738_s7 + $0x40] sm:$0xff] %v2382_v33  ;;  %v2610_v56 = vsel %vm2534_vm1, %v1604_v36, 0.0 }
 0x166   : > { %v2798_v45 = vadd.f32 %v2797_v29, %v2796_v35  ;;  %v2607_v46 = vadd.f32 %v2606_v39, %v2605_v34  ;;  %v3148_v50 = vpack.c.bf16 %v1565_v41, %v1563_v30  ;;  %v2608_v51 = vsel %vm2534_vm1, %v1565_v41, 0.0 }
 0x167   : > { %v2799_v49 = vsel %vm2534_vm1, %v2700_v40, 0.0  ;;  %v2701_v52 = vmul.f32 %v1565_v41, %v1565_v41  ;;  %v3149_v55 = vpack.c.bf16 %v1606_v42, %v1604_v36  ;;  %v2703_v59 = vmul.f32 %v1606_v42, %v1606_v42 }
 0x168   : > { %v2800_v53 = vadd.f32 %v2799_v49, %v2798_v45  ;;  %v2609_v54 = vadd.f32 %v2608_v51, %v2607_v46  ;;  %v2391_v57 = vrot.slane %v3148_v50, %v3722_v16  ;;  %v2803_v1 = vsel %vm2534_vm1, %v2702_v47, 0.0 }
 0x169   : > { %v2801_v58 = vsel %vm2534_vm1, %v2701_v52, 0.0  ;;  %v2398_v61 = vrot.slane %v3149_v55, %v3722_v16  ;;  %v2612_v2 = vsel %vm2534_vm1, %v1606_v42, 0.0  ;;  %v2805_v3 = vsel %vm2534_vm1, %v2703_v59, 0.0 }
 0x16a   : > { %v2802_v60 = vadd.f32 %v2801_v58, %v2800_v53  ;;  %v2611_v62 = vadd.f32 %v2610_v56, %v2609_v54  ;;  %v1644_v63 = vpop.f32.mrb[40].mxu0  ;;  %v1685_v5 = vpop.f32.mrb[40].mxu1 }
 0x16b   : > { %v1645_v4 = vadd.f32 %v1644_v63, %v3714_v9  ;;  %v1646_v6 = vpop.f32.mrb[41].mxu0  ;;  %v2399_v7 = vcombine.low %v2391_v57, %v2398_v61  ;;  %v1686_v11 = vadd.f32 %v1685_v5, %v3714_v9  ;;  %v1687_v0 = vpop.f32.mrb[41].mxu1 }
 0x16c   : > { %v2613_v8 = vadd.f32 %v2612_v2, %v2611_v62  ;;  %v2804_v10 = vadd.f32 %v2803_v1, %v2802_v60  ;;  %v1648_v12 = vpop.f32.mrb[42].mxu0  ;;  %v1647_v18 = vadd.f32 %v1646_v6, %v3714_v9  ;;  %v1688_v15 = vadd.f32 %v1687_v0, %v3714_v9  ;;  %v1689_v19 = vpop.f32.mrb[42].mxu1 }
 0x16d   : > { %v2614_v13 = vsel %vm2534_vm1, %v1645_v4, 0.0  ;;  %v2704_v14 = vmul.f32 %v1645_v4, %v1645_v4  ;;  %v1649_v17 = vpop.f32.mrb[43].mxu0  ;;  %v2706_v22 = vmul.f32 %v1686_v11, %v1686_v11  ;;  %v1690_v23 = vpop.f32.mrb[43].mxu1  ;;  %2527 = vst [vmem:[%s3738_s7 + $0x48] sm:$0xff] %v2399_v7  ;;  %v2618_v31 = vsel %vm2534_vm1, %v1686_v11, 0.0 }
 0x16e   : > { %v2806_v20 = vadd.f32 %v2805_v3, %v2804_v10  ;;  %v2615_v21 = vadd.f32 %v2614_v13, %v2613_v8  ;;  %v3150_v25 = vpack.c.bf16 %v1647_v18, %v1645_v4  ;;  %v2616_v26 = vsel %vm2534_vm1, %v1647_v18, 0.0 }
 0x16f   : > { %v2807_v24 = vsel %vm2534_vm1, %v2704_v14, 0.0  ;;  %v2705_v27 = vmul.f32 %v1647_v18, %v1647_v18  ;;  %v3151_v30 = vpack.c.bf16 %v1688_v15, %v1686_v11  ;;  %v2707_v34 = vmul.f32 %v1688_v15, %v1688_v15 }
 0x170   : > { %v2808_v28 = vadd.f32 %v2807_v24, %v2806_v20  ;;  %v2617_v29 = vadd.f32 %v2616_v26, %v2615_v21  ;;  %v2408_v32 = vrot.slane %v3150_v25, %v3722_v16  ;;  %v2811_v39 = vsel %vm2534_vm1, %v2706_v22, 0.0 }
 0x171   : > { %v2809_v33 = vsel %vm2534_vm1, %v2705_v27, 0.0  ;;  %v2415_v36 = vrot.slane %v3151_v30, %v3722_v16  ;;  %v2620_v40 = vsel %vm2534_vm1, %v1688_v15, 0.0  ;;  %v2813_v41 = vsel %vm2534_vm1, %v2707_v34, 0.0 }
 0x172   : > { %v2810_v35 = vadd.f32 %v2809_v33, %v2808_v28  ;;  %v2619_v37 = vadd.f32 %v2618_v31, %v2617_v29  ;;  %v1726_v38 = vpop.f32.mrb[44].mxu0  ;;  %v1767_v43 = vpop.f32.mrb[44].mxu1 }
 0x173   : > { %v1727_v42 = vadd.f32 %v1726_v38, %v3714_v9  ;;  %v1728_v44 = vpop.f32.mrb[45].mxu0  ;;  %v2416_v45 = vcombine.low %v2408_v32, %v2415_v36  ;;  %v1768_v48 = vadd.f32 %v1767_v43, %v3714_v9  ;;  %v1769_v49 = vpop.f32.mrb[45].mxu1 }
 0x174   : > { %v2621_v46 = vadd.f32 %v2620_v40, %v2619_v37  ;;  %v2812_v47 = vadd.f32 %v2811_v39, %v2810_v35  ;;  %v1730_v50 = vpop.f32.mrb[46].mxu0  ;;  %v1729_v53 = vadd.f32 %v1728_v44, %v3714_v9  ;;  %v1770_v54 = vadd.f32 %v1769_v49, %v3714_v9  ;;  %v1771_v56 = vpop.f32.mrb[46].mxu1 }
 0x175   : > { %v2622_v51 = vsel %vm2534_vm1, %v1727_v42, 0.0  ;;  %v2708_v52 = vmul.f32 %v1727_v42, %v1727_v42  ;;  %v1731_v55 = vpop.f32.mrb[47].mxu0  ;;  %v2710_v59 = vmul.f32 %v1768_v48, %v1768_v48  ;;  %v1772_v60 = vpop.f32.mrb[47].mxu1  ;;  %2528 = vst [vmem:[%s3738_s7 + $0x50] sm:$0xff] %v2416_v45  ;;  %v2626_v5 = vsel %vm2534_vm1, %v1768_v48, 0.0 }
 0x176   : > { %v2814_v57 = vadd.f32 %v2813_v41, %v2812_v47  ;;  %v2623_v58 = vadd.f32 %v2622_v51, %v2621_v46  ;;  %v3152_v62 = vpack.c.bf16 %v1729_v53, %v1727_v42  ;;  %v2624_v63 = vsel %vm2534_vm1, %v1729_v53, 0.0 }
 0x177   : > { %v2815_v61 = vsel %vm2534_vm1, %v2708_v52, 0.0  ;;  %v2709_v1 = vmul.f32 %v1729_v53, %v1729_v53  ;;  %v3153_v4 = vpack.c.bf16 %v1770_v54, %v1768_v48  ;;  %v2711_v8 = vmul.f32 %v1770_v54, %v1770_v54 }
 0x178   : > { %v2816_v2 = vadd.f32 %v2815_v61, %v2814_v57  ;;  %v2625_v3 = vadd.f32 %v2624_v63, %v2623_v58  ;;  %v2425_v6 = vrot.slane %v3152_v62, %v3722_v16  ;;  %v2819_v13 = vsel %vm2534_vm1, %v2710_v59, 0.0 }
 0x179   : > { %v2817_v7 = vsel %vm2534_vm1, %v2709_v1, 0.0  ;;  %v2432_v11 = vrot.slane %v3153_v4, %v3722_v16  ;;  %v2628_v14 = vsel %vm2534_vm1, %v1770_v54, 0.0  ;;  %v2821_v18 = vsel %vm2534_vm1, %v2711_v8, 0.0 }
 0x17a   : > { %v2818_v10 = vadd.f32 %v2817_v7, %v2816_v2  ;;  %v2627_v0 = vadd.f32 %v2626_v5, %v2625_v3  ;;  %v1808_v12 = vpop.f32.mrb[48].mxu0  ;;  %v1849_v17 = vpop.f32.mrb[48].mxu1 }
 0x17b   : > { %v1809_v15 = vadd.f32 %v1808_v12, %v3714_v9  ;;  %v1810_v19 = vpop.f32.mrb[49].mxu0  ;;  %v2433_v20 = vcombine.low %v2425_v6, %v2432_v11  ;;  %v1850_v23 = vadd.f32 %v1849_v17, %v3714_v9  ;;  %v1851_v24 = vpop.f32.mrb[49].mxu1 }
 0x17c   : > { %v2629_v21 = vadd.f32 %v2628_v14, %v2627_v0  ;;  %v2820_v22 = vadd.f32 %v2819_v13, %v2818_v10  ;;  %v1812_v25 = vpop.f32.mrb[50].mxu0  ;;  %v1811_v28 = vadd.f32 %v1810_v19, %v3714_v9  ;;  %v1852_v29 = vadd.f32 %v1851_v24, %v3714_v9  ;;  %v1853_v31 = vpop.f32.mrb[50].mxu1 }
 0x17d   : > { %v2630_v26 = vsel %vm2534_vm1, %v1809_v15, 0.0  ;;  %v2712_v27 = vmul.f32 %v1809_v15, %v1809_v15  ;;  %v1813_v30 = vpop.f32.mrb[51].mxu0  ;;  %v2714_v34 = vmul.f32 %v1850_v23, %v1850_v23  ;;  %v1854_v35 = vpop.f32.mrb[51].mxu1  ;;  %2529 = vst [vmem:[%s3738_s7 + $0x58] sm:$0xff] %v2433_v20  ;;  %v2634_v43 = vsel %vm2534_vm1, %v1850_v23, 0.0 }
 0x17e   : > { %v2822_v32 = vadd.f32 %v2821_v18, %v2820_v22  ;;  %v2631_v33 = vadd.f32 %v2630_v26, %v2629_v21  ;;  %v3154_v37 = vpack.c.bf16 %v1811_v28, %v1809_v15  ;;  %v2632_v38 = vsel %vm2534_vm1, %v1811_v28, 0.0 }
 0x17f   : > { %v2823_v36 = vsel %vm2534_vm1, %v2712_v27, 0.0  ;;  %v2713_v39 = vmul.f32 %v1811_v28, %v1811_v28  ;;  %v3155_v42 = vpack.c.bf16 %v1852_v29, %v1850_v23  ;;  %v2715_v46 = vmul.f32 %v1852_v29, %v1852_v29 }
 0x180   : > { %v2824_v40 = vadd.f32 %v2823_v36, %v2822_v32  ;;  %v2633_v41 = vadd.f32 %v2632_v38, %v2631_v33  ;;  %v2442_v44 = vrot.slane %v3154_v37, %v3722_v16  ;;  %v2827_v51 = vsel %vm2534_vm1, %v2714_v34, 0.0 }
 0x181   : > { %v2825_v45 = vsel %vm2534_vm1, %v2713_v39, 0.0  ;;  %v2449_v48 = vrot.slane %v3155_v42, %v3722_v16  ;;  %v2636_v52 = vsel %vm2534_vm1, %v1852_v29, 0.0  ;;  %v2829_v53 = vsel %vm2534_vm1, %v2715_v46, 0.0 }
 0x182   : > { %v2826_v47 = vadd.f32 %v2825_v45, %v2824_v40  ;;  %v2635_v49 = vadd.f32 %v2634_v43, %v2633_v41  ;;  %v1890_v50 = vpop.f32.mrb[52].mxu0  ;;  %v1931_v55 = vpop.f32.mrb[52].mxu1 }
 0x183   : > { %v1891_v54 = vadd.f32 %v1890_v50, %v3714_v9  ;;  %v1892_v56 = vpop.f32.mrb[53].mxu0  ;;  %v2450_v57 = vcombine.low %v2442_v44, %v2449_v48  ;;  %v1932_v60 = vadd.f32 %v1931_v55, %v3714_v9  ;;  %v1933_v61 = vpop.f32.mrb[53].mxu1 }
 0x184   : > { %v2637_v58 = vadd.f32 %v2636_v52, %v2635_v49  ;;  %v2828_v59 = vadd.f32 %v2827_v51, %v2826_v47  ;;  %v1894_v62 = vpop.f32.mrb[54].mxu0  ;;  %v1893_v2 = vadd.f32 %v1892_v56, %v3714_v9  ;;  %v1934_v3 = vadd.f32 %v1933_v61, %v3714_v9  ;;  %v1935_v5 = vpop.f32.mrb[54].mxu1 }
 0x185   : > { %v2638_v63 = vsel %vm2534_vm1, %v1891_v54, 0.0  ;;  %v2716_v1 = vmul.f32 %v1891_v54, %v1891_v54  ;;  %v1895_v4 = vpop.f32.mrb[55].mxu0  ;;  %v2718_v8 = vmul.f32 %v1932_v60, %v1932_v60  ;;  %v1936_v10 = vpop.f32.mrb[55].mxu1  ;;  %2530 = vst [vmem:[%s3738_s7 + $0x60] sm:$0xff] %v2450_v57  ;;  %v2642_v17 = vsel %vm2534_vm1, %v1932_v60, 0.0 }
 0x186   : > { %v2830_v6 = vadd.f32 %v2829_v53, %v2828_v59  ;;  %v2639_v7 = vadd.f32 %v2638_v63, %v2637_v58  ;;  %v3156_v0 = vpack.c.bf16 %v1893_v2, %v1891_v54  ;;  %v2640_v12 = vsel %vm2534_vm1, %v1893_v2, 0.0 }
 0x187   : > { %v2831_v11 = vsel %vm2534_vm1, %v2716_v1, 0.0  ;;  %v2717_v13 = vmul.f32 %v1893_v2, %v1893_v2  ;;  %v3157_v15 = vpack.c.bf16 %v1934_v3, %v1932_v60  ;;  %v2719_v21 = vmul.f32 %v1934_v3, %v1934_v3 }
 0x188   : > { %v2832_v14 = vadd.f32 %v2831_v11, %v2830_v6  ;;  %v2641_v18 = vadd.f32 %v2640_v12, %v2639_v7  ;;  %v2459_v19 = vrot.slane %v3156_v0, %v3722_v16  ;;  %v2835_v26 = vsel %vm2534_vm1, %v2718_v8, 0.0 }
 0x189   : > { %v2833_v20 = vsel %vm2534_vm1, %v2717_v13, 0.0  ;;  %v2466_v23 = vrot.slane %v3157_v15, %v3722_v16  ;;  %v2644_v27 = vsel %vm2534_vm1, %v1934_v3, 0.0  ;;  %v2837_v28 = vsel %vm2534_vm1, %v2719_v21, 0.0 }
 0x18a   : > { %v2834_v22 = vadd.f32 %v2833_v20, %v2832_v14  ;;  %v2643_v24 = vadd.f32 %v2642_v17, %v2641_v18  ;;  %v1972_v25 = vpop.f32.mrb[56].mxu0  ;;  %v2013_v30 = vpop.f32.mrb[56].mxu1 }
 0x18b   : > { %v1973_v29 = vadd.f32 %v1972_v25, %v3714_v9  ;;  %v1974_v31 = vpop.f32.mrb[57].mxu0  ;;  %v2467_v32 = vcombine.low %v2459_v19, %v2466_v23  ;;  %v2014_v35 = vadd.f32 %v2013_v30, %v3714_v9  ;;  %v2015_v36 = vpop.f32.mrb[57].mxu1 }
 0x18c   : > { %v2645_v33 = vadd.f32 %v2644_v27, %v2643_v24  ;;  %v2836_v34 = vadd.f32 %v2835_v26, %v2834_v22  ;;  %v1976_v37 = vpop.f32.mrb[58].mxu0  ;;  %v1975_v40 = vadd.f32 %v1974_v31, %v3714_v9  ;;  %v2016_v41 = vadd.f32 %v2015_v36, %v3714_v9  ;;  %v2017_v43 = vpop.f32.mrb[58].mxu1 }
 0x18d   : > { %v2646_v38 = vsel %vm2534_vm1, %v1973_v29, 0.0  ;;  %v2720_v39 = vmul.f32 %v1973_v29, %v1973_v29  ;;  %v1977_v42 = vpop.f32.mrb[59].mxu0  ;;  %v2722_v46 = vmul.f32 %v2014_v35, %v2014_v35  ;;  %v2018_v47 = vpop.f32.mrb[59].mxu1  ;;  %2531 = vst [vmem:[%s3738_s7 + $0x68] sm:$0xff] %v2467_v32  ;;  %v2650_v55 = vsel %vm2534_vm1, %v2014_v35, 0.0 }
 0x18e   : > { %v2838_v44 = vadd.f32 %v2837_v28, %v2836_v34  ;;  %v2647_v45 = vadd.f32 %v2646_v38, %v2645_v33  ;;  %v3158_v49 = vpack.c.bf16 %v1975_v40, %v1973_v29  ;;  %v2648_v50 = vsel %vm2534_vm1, %v1975_v40, 0.0 }
 0x18f   : > { %v2839_v48 = vsel %vm2534_vm1, %v2720_v39, 0.0  ;;  %v2721_v51 = vmul.f32 %v1975_v40, %v1975_v40  ;;  %v3159_v54 = vpack.c.bf16 %v2016_v41, %v2014_v35  ;;  %v2843_v62 = vsel %vm2534_vm1, %v2722_v46, 0.0 }
 0x190   : > { %v2840_v52 = vadd.f32 %v2839_v48, %v2838_v44  ;;  %v2649_v53 = vadd.f32 %v2648_v50, %v2647_v45  ;;  %v2476_v56 = vrot.slane %v3158_v49, %v3722_v16  ;;  %v2652_v63 = vsel %vm2534_vm1, %v2016_v41, 0.0 }
 0x191   : > { %v2841_v57 = vsel %vm2534_vm1, %v2721_v51, 0.0  ;;  %v2483_v59 = vrot.slane %v3159_v54, %v3722_v16  ;;  %v2723_v1 = vmul.f32 %v2016_v41, %v2016_v41 }
 0x192   : > { %v2842_v58 = vadd.f32 %v2841_v57, %v2840_v52  ;;  %v2651_v60 = vadd.f32 %v2650_v55, %v2649_v53  ;;  %v2054_v61 = vpop.f32.mrb[60].mxu0  ;;  %v2095_v3 = vpop.f32.mrb[60].mxu1 }
 0x193   : > { %v2055_v2 = vadd.f32 %v2054_v61, %v3714_v9  ;;  %v2056_v4 = vpop.f32.mrb[61].mxu0  ;;  %v2484_v5 = vcombine.low %v2476_v56, %v2483_v59  ;;  %v2096_v7 = vadd.f32 %v2095_v3, %v3714_v9  ;;  %v2097_v10 = vpop.f32.mrb[61].mxu1  ;;  %v2845_v23 = vsel %vm2534_vm1, %v2723_v1, 0.0 }
 0x194   : > { %v2653_v6 = vadd.f32 %v2652_v63, %v2651_v60  ;;  %v2057_v8 = vadd.f32 %v2056_v4, %v3714_v9  ;;  %v2058_v11 = vpop.f32.mrb[62].mxu0  ;;  %v2098_v13 = vadd.f32 %v2097_v10, %v3714_v9  ;;  %v2099_v18 = vpop.f32.mrb[62].mxu1  ;;  %v2844_v15 = vadd.f32 %v2843_v62, %v2842_v58 }
 0x195   : > { %v2654_v0 = vsel %vm2534_vm1, %v2055_v2, 0.0  ;;  %v2724_v12 = vmul.f32 %v2055_v2, %v2055_v2  ;;  %v2059_v14 = vpop.f32.mrb[63].mxu0  ;;  %v2100_v22 = vpop.f32.mrb[63].mxu1  ;;  %2532 = vst [vmem:[%s3738_s7 + $0x70] sm:$0xff] %v2484_v5  ;;  %v2658_v27 = vsel %vm2534_vm1, %v2096_v7, 0.0  ;;  %v2726_v29 = vmul.f32 %v2096_v7, %v2096_v7 }
 0x196   : > { %v2655_v17 = vadd.f32 %v2654_v0, %v2653_v6  ;;  %v3160_v19 = vpack.c.bf16 %v2057_v8, %v2055_v2  ;;  %v2656_v20 = vsel %vm2534_vm1, %v2057_v8, 0.0  ;;  %v2725_v21 = vmul.f32 %v2057_v8, %v2057_v8 }
 0x197   : > { %v3161_v24 = vpack.c.bf16 %v2098_v13, %v2096_v7  ;;  %v2846_v9 = vadd.f32 %v2845_v23, %v2844_v15  ;;  %v2847_v30 = vsel %vm2534_vm1, %v2724_v12, 0.0  ;;  %v2660_v35 = vsel %vm2534_vm1, %v2098_v13, 0.0 }
 0x198   : > { %v2493_v25 = vrot.slane %v3160_v19, %v3722_v16  ;;  %v2657_v26 = vadd.f32 %v2656_v20, %v2655_v17  ;;  %v2849_v31 = vsel %vm2534_vm1, %v2725_v21, 0.0  ;;  %v2727_v36 = vmul.f32 %v2098_v13, %v2098_v13 }
 0x199   : > { %v2500_v28 = vrot.slane %v3161_v24, %v3722_v16  ;;  %v2848_v33 = vadd.f32 %v2847_v30, %v2846_v9  ;;  %v2851_v39 = vsel %vm2534_vm1, %v2726_v29, 0.0 }
 0x19a   : > { %v2659_v32 = vadd.f32 %v2658_v27, %v2657_v26  ;;  %v2853_v40 = vsel %vm2534_vm1, %v2727_v36, 0.0 }
 0x19b   : > { %v2501_v34 = vcombine.low %v2493_v25, %v2500_v28  ;;  %v2850_v38 = vadd.f32 %v2849_v31, %v2848_v33 }
 0x19c   : > { %v2661_v37 = vadd.f32 %v2660_v35, %v2659_v32 }
 0x19d   : > { %2533 = vst [vmem:[%s3738_s7 + $0x78] sm:$0xff] %v2501_v34  ;;  %v2852_v16 = vadd.f32 %v2851_v39, %v2850_v38 }
 0x19e   : > { %2662 = vadd.xlane.f32.xlu0 %v2661_v37 }
 0x19f   : > { %v2854_v41 = vadd.f32 %v2853_v40, %v2852_v16 }
 0x1a1   : > { %2855 = vadd.xlane.f32.xlu1 %v2854_v41 }
 0x22b   : > { %v2663_v42 = vpop.xlane.xlu0 %2662 }
 0x22c   : > { %2857 = vst [vmem:[%s379_s9] sm:$0xf] %v2663_v42 }
 0x22d   : > { %3229 = shalt.err (!%p3226_p7)
}
 0x22e   : > { %s3230_s6 = scalar_lea.hbm %s3977_s16, 64  ;;  %s3234_s9 = scalar_lea.hbm %s4054_s4, 128 }
 0x22f   : > { %p3231_p10 = scmp.ne.s32.totalorder %s3977_s16, %s3230_s6  ;;  %p3235_p13 = scmp.lt.u32.totalorder %s3977_s16, %s4054_s4 }
 0x230   : > { %p3236_p0 = scmp.lt.u32.totalorder %s3234_s9, %s3230_s6  ;;  %p3238_p2 = scmp.lt.u32.totalorder %s3230_s6, %s3977_s16 }
 0x231   : > { %p3232_p11 = pnand %p3231_p10, %p3384_p6 }
 0x232   : > { %p3237_p1 = por %p3236_p0, %p3235_p13 }
 0x233   : > { %p3233_p12 = pneg %p3232_p11 }
 0x234   : > { %p3239_p3 = por %p3238_p2, %p3237_p1 }
 0x236   : > { %p3240_p4 = pnand %p3239_p3, %p3233_p12 }
 0x238   : > { %3243 = shalt.err (!%p3240_p4)
}
 0x239   : > { %3169 = dma.vmem_to_hbm [thread:$0]  (%p3384_p6), %s3968_s10, 64, %s3977_s16, %s2865_s17   ;;  %v2856_v43 = vpop.xlane.xlu1 %2855 }
 0x23a   : > { %s4007_s22 = scalar_lea.hbm %s4055_s5, %s3711_s25  ;;  %2858 = vst [vmem:[%s3970_s11] sm:$0xf] %v2856_v43  ;;  %s2870_s30 = scalar_lea.sflag [#allocation6], %s3535_s12 }
 0x23b   : > { %s3244_s6 = scalar_lea.vmem %s3979_s13, 64  ;;  %s3315_s7 = smov [#allocation5]  }
 0x23c   : > { %p3245_p5 = scmp.ne.s32.totalorder %s3979_s13, %s3244_s6  ;;  %s3248_s8 = sshll.u32 %s3315_s7, 4  ;;  %s3249_s8 = int_to_ptr.vmem [resolvable:$false] %s3248_s8 }
 0x23d   : > { %s3250_s9 = scalar_lea.vmem %s3249_s8, 128  ;;  %p3251_p11 = scmp.lt.s32.totalorder %s3979_s13, %s3249_s8 }
 0x23e   : > { %p3246_p7 = pnand %p3245_p5, %p3384_p6  ;;  %p3252_p12 = scmp.lt.s32.totalorder %s3250_s9, %s3244_s6 }
 0x240   : > { %p3247_p10 = pneg %p3246_p7  ;;  %p3253_p13 = por %p3252_p12, %p3251_p11 }
 0x242   : > { %p3254_p0 = pnand %p3253_p13, %p3247_p10 }
 0x244   : > { %3257 = shalt.err (!%p3254_p0)
}
 0x245   : > { %s3258_s12 = scalar_lea.hbm %s4007_s22, 64  ;;  %s3262_s11 = scalar_lea.hbm %s4055_s5, 128 }
 0x246   : > { %p3259_p1 = scmp.ne.s32.totalorder %s4007_s22, %s3258_s12  ;;  %p3263_p4 = scmp.lt.u32.totalorder %s4007_s22, %s4055_s5 }
 0x247   : > { %p3264_p5 = scmp.lt.u32.totalorder %s3262_s11, %s3258_s12  ;;  %p3266_p10 = scmp.lt.u32.totalorder %s3258_s12, %s4007_s22 }
 0x248   : > { %p3260_p2 = pnand %p3259_p1, %p3384_p6 }
 0x249   : > { %p3265_p7 = por %p3264_p5, %p3263_p4 }
 0x24a   : > { %p3261_p3 = pneg %p3260_p2 }
 0x24b   : > { %p3267_p11 = por %p3266_p10, %p3265_p7 }
 0x24d   : > { %p3268_p12 = pnand %p3267_p11, %p3261_p3 }
 0x24f   : > { %3271 = shalt.err (!%p3268_p12)
}
 0x250   : > { %3170 = dma.vmem_to_hbm [thread:$0]  (%p3384_p6), %s3979_s13, 64, %s4007_s22, %s2870_s30  }
 0x251 PF: > { %s2920_s14 = sand.u32 1, %s3298_s18   ;;  %p3174_p13 = pnand %p3024_p9, %p3388_p8 }
 0x252   : > { %s2921_s15 = scalar_lea.sflag [#allocation4], %s2920_s14 }
 0x253   : > { %3289 = dma.done.wait (!%p3174_p13), %s2921_s15, 64  }
 0x254   : > { %3291 = vsyncadd (!%p3174_p13), %s2921_s15, 4294967232  ;;  %s2930_s23 = scalar_lea.sflag [#allocation6], %s2920_s14 }
 0x255   : > { %3293 = dma.done.wait (!%p3174_p13), %s2930_s23, 64  }
 0x256   : > { %3295 = vsyncadd (!%p3174_p13), %s2930_s23, 4294967232  ;;  %p19_p6 = scmp.ge.s32.totalorder %s3369_s24, 4   ;;  %s4058_s18 = smov %s3302_s19 }
 0x257   : > { %s4059_s19 = smov %s3306_s20  ;;  %s4060_s20 = smov %s3382_s27 }
 0x258   : > { %s4061_s21 = smov %s3369_s24  ;;  %21 = sbr.rel (!%p19_p6) target bundleno = 5 (0x5), region = 124 }
 0x25f   :  { %2935 = vsyncpa [#allocation4], 1 }
 0x260   :  { %2937 = vsyncpa [#allocation4 + $0x1], 1 }
 0x261   :  { %2938 = vsyncpa [#allocation6], 1 }
 0x262   :  { %2940 = vsyncpa [#allocation6 + $0x1], 1 }

// kernel: unet_forward.5
= control target key start
LH: loop header
LB: loop body
LE: loop exit
PB: predicated region body
PF: predicated region fallthrough
CT: control target
= control target key end

     0   :  { %s1551_s18 = smov 0   ;;  %s1553_s19 = smov 0   ;;  %s1871_s0 = inlined_call_operand.vmem [shape: bf16[8,64], index: 0, kind: input, shape index: {}]   ;;  %s1872_s1 = inlined_call_operand.vmem [shape: bf16[64,4096], index: 1, kind: input, shape index: {}]   ;;  %s1873_s2 = inlined_call_operand.vmem [shape: f32[8,1], index: 2, kind: input, shape index: {}]   ;;  %s1874_s3 = inlined_call_operand.vmem [shape: bf16[8,4096], index: 3, kind: output, shape index: {0}]   ;;  %s1875_s4 = inlined_call_operand.vmem [shape: f32[8,256], index: 4, kind: output, shape index: {1}]   ;;  %s1876_s5 = inlined_call_operand.vmem [shape: f32[8,256], index: 5, kind: output, shape index: {2}]  }
   0x1   :  { %s1555_s20 = smov 0  }
   0x2 LB: > { %s1567_s21 = sadd.s32 4294967295, %s1518_s20   ;;  %s1570_s22 = sadd.s32 1, %s1518_s20   ;;  %s1518_s20 = sphi %s1555_s20, %s1879_s20   ;;  %s1514_s19 = sphi %s1553_s19, %s1878_s19   ;;  %s1510_s18 = sphi %s1551_s18, %s1877_s18  }
   0x3   : > { %s41_s23 = ssub.s32 %s1518_s20, %s1570_s22  ;;  %s44_s24 = sadd.s32 1, %s1514_s19 }
   0x4   : > { %p42_p0 = scmp.eq.s32.totalorder %s41_s23, 0  ;;  %p51_p1 = scmp.ne.s32.totalorder %s1514_s19, %s1510_s18 }
   0x5   : > { %p52_p2 = scmp.eq.s32.totalorder %s1518_s20, 0  ;;  %p1369_p4 = scmp.ge.s32.totalorder %s1518_s20, 2 }
   0x6   : > { %s1579_s25 = scalar_select %p42_p0, %s1514_s19, %s44_s24  }
   0x7   : > { %p53_p3 = por %p52_p2, %p51_p1  ;;  %182 = sbr.rel (%p1369_p4) target bundleno = 50 (0x32), region = 24 }
   0xe   : > { %185 = sbr.rel (!%p53_p3) target bundleno = 50 (0x32), region = 28  ;;  %s187_s26 = sand.u32 (%p53_p3), 1, %s1514_s19  }
   0xf   : > { %s1461_s27 = sshll.u32 (%p53_p3), %s1518_s20, 6  ;;  %s1370_s28 = sshll.u32 (%p53_p3), %s187_s26, 9 }
  0x10   : > { %s1587_s6 = scalar_lea.vmem (%p53_p3), %s1872_s1, %s1461_s27  ;;  %s1592_s7 = scalar_lea.vmem (%p53_p3), [#allocation2], %s1370_s28 }
  0x11   : > { %v205_v0 = vld [vmem:[%s1587_s6] sm:$0xff] (%p53_p3)  ;;  %v207_v1 = vld [vmem:[%s1587_s6 + $0x8] sm:$0xff] (%p53_p3)  ;;  %v209_v2 = vld [vmem:[%s1587_s6 + $0x10] sm:$0xff] (%p53_p3) }
  0x12   : > { %206 = vst [vmem:[%s1592_s7] sm:$0xff] (%p53_p3), %v205_v0  ;;  %208 = vst [vmem:[%s1592_s7 + $0x8] sm:$0xff] (%p53_p3), %v207_v1  ;;  %v211_v3 = vld [vmem:[%s1587_s6 + $0x18] sm:$0xff] (%p53_p3)  ;;  %v213_v4 = vld [vmem:[%s1587_s6 + $0x20] sm:$0xff] (%p53_p3) }
  0x13   : > { %210 = vst [vmem:[%s1592_s7 + $0x10] sm:$0xff] (%p53_p3), %v209_v2  ;;  %v215_v5 = vld [vmem:[%s1587_s6 + $0x28] sm:$0xff] (%p53_p3)  ;;  %212 = vst [vmem:[%s1592_s7 + $0x18] sm:$0xff] (%p53_p3), %v211_v3  ;;  %v217_v6 = vld [vmem:[%s1587_s6 + $0x30] sm:$0xff] (%p53_p3) }
  0x14   : > { %214 = vst [vmem:[%s1592_s7 + $0x20] sm:$0xff] (%p53_p3), %v213_v4  ;;  %216 = vst [vmem:[%s1592_s7 + $0x28] sm:$0xff] (%p53_p3), %v215_v5  ;;  %v219_v7 = vld [vmem:[%s1587_s6 + $0x38] sm:$0xff] (%p53_p3)  ;;  %v221_v8 = vld [vmem:[%s1587_s6 + $0x80] sm:$0xff] (%p53_p3) }
  0x15   : > { %218 = vst [vmem:[%s1592_s7 + $0x30] sm:$0xff] %v217_v6  ;;  %220 = vst [vmem:[%s1592_s7 + $0x38] sm:$0xff] %v219_v7  ;;  %v223_v9 = vld [vmem:[%s1587_s6 + $0x88] sm:$0xff]  ;;  %v225_v10 = vld [vmem:[%s1587_s6 + $0x90] sm:$0xff] }
  0x16   : > { %222 = vst [vmem:[%s1592_s7 + $0x40] sm:$0xff] %v221_v8  ;;  %v227_v11 = vld [vmem:[%s1587_s6 + $0x98] sm:$0xff]  ;;  %224 = vst [vmem:[%s1592_s7 + $0x48] sm:$0xff] %v223_v9  ;;  %v229_v12 = vld [vmem:[%s1587_s6 + $0xa0] sm:$0xff] }
  0x17   : > { %226 = vst [vmem:[%s1592_s7 + $0x50] sm:$0xff] %v225_v10  ;;  %228 = vst [vmem:[%s1592_s7 + $0x58] sm:$0xff] %v227_v11  ;;  %v231_v13 = vld [vmem:[%s1587_s6 + $0xa8] sm:$0xff]  ;;  %v233_v14 = vld [vmem:[%s1587_s6 + $0xb0] sm:$0xff] }
  0x18   : > { %230 = vst [vmem:[%s1592_s7 + $0x60] sm:$0xff] %v229_v12  ;;  %232 = vst [vmem:[%s1592_s7 + $0x68] sm:$0xff] %v231_v13  ;;  %v235_v15 = vld [vmem:[%s1587_s6 + $0xb8] sm:$0xff]  ;;  %v237_v16 = vld [vmem:[%s1587_s6 + $0x100] sm:$0xff] }
  0x19   : > { %234 = vst [vmem:[%s1592_s7 + $0x70] sm:$0xff] %v233_v14  ;;  %v239_v17 = vld [vmem:[%s1587_s6 + $0x108] sm:$0xff]  ;;  %236 = vst [vmem:[%s1592_s7 + $0x78] sm:$0xff] %v235_v15  ;;  %v241_v18 = vld [vmem:[%s1587_s6 + $0x110] sm:$0xff] }
  0x1a   : > { %238 = vst [vmem:[%s1592_s7 + $0x80] sm:$0xff] %v237_v16  ;;  %240 = vst [vmem:[%s1592_s7 + $0x88] sm:$0xff] %v239_v17  ;;  %v243_v19 = vld [vmem:[%s1587_s6 + $0x118] sm:$0xff]  ;;  %v245_v20 = vld [vmem:[%s1587_s6 + $0x120] sm:$0xff] }
  0x1b   : > { %242 = vst [vmem:[%s1592_s7 + $0x90] sm:$0xff] %v241_v18  ;;  %244 = vst [vmem:[%s1592_s7 + $0x98] sm:$0xff] %v243_v19  ;;  %v247_v21 = vld [vmem:[%s1587_s6 + $0x128] sm:$0xff]  ;;  %v249_v22 = vld [vmem:[%s1587_s6 + $0x130] sm:$0xff] }
  0x1c   : > { %246 = vst [vmem:[%s1592_s7 + $0xa0] sm:$0xff] %v245_v20  ;;  %v251_v23 = vld [vmem:[%s1587_s6 + $0x138] sm:$0xff]  ;;  %248 = vst [vmem:[%s1592_s7 + $0xa8] sm:$0xff] %v247_v21  ;;  %v253_v24 = vld [vmem:[%s1587_s6 + $0x180] sm:$0xff] }
  0x1d   : > { %250 = vst [vmem:[%s1592_s7 + $0xb0] sm:$0xff] %v249_v22  ;;  %252 = vst [vmem:[%s1592_s7 + $0xb8] sm:$0xff] %v251_v23  ;;  %v255_v25 = vld [vmem:[%s1587_s6 + $0x188] sm:$0xff]  ;;  %v257_v26 = vld [vmem:[%s1587_s6 + $0x190] sm:$0xff] }
  0x1e   : > { %254 = vst [vmem:[%s1592_s7 + $0xc0] sm:$0xff] %v253_v24  ;;  %256 = vst [vmem:[%s1592_s7 + $0xc8] sm:$0xff] %v255_v25  ;;  %v259_v27 = vld [vmem:[%s1587_s6 + $0x198] sm:$0xff]  ;;  %v261_v28 = vld [vmem:[%s1587_s6 + $0x1a0] sm:$0xff] }
  0x1f   : > { %258 = vst [vmem:[%s1592_s7 + $0xd0] sm:$0xff] %v257_v26  ;;  %v263_v29 = vld [vmem:[%s1587_s6 + $0x1a8] sm:$0xff]  ;;  %260 = vst [vmem:[%s1592_s7 + $0xd8] sm:$0xff] %v259_v27  ;;  %v265_v30 = vld [vmem:[%s1587_s6 + $0x1b0] sm:$0xff] }
  0x20   : > { %262 = vst [vmem:[%s1592_s7 + $0xe0] sm:$0xff] %v261_v28  ;;  %264 = vst [vmem:[%s1592_s7 + $0xe8] sm:$0xff] %v263_v29  ;;  %v267_v31 = vld [vmem:[%s1587_s6 + $0x1b8] sm:$0xff]  ;;  %v269_v32 = vld [vmem:[%s1587_s6 + $0x200] sm:$0xff] }
  0x21   : > { %266 = vst [vmem:[%s1592_s7 + $0xf0] sm:$0xff] %v265_v30  ;;  %268 = vst [vmem:[%s1592_s7 + $0xf8] sm:$0xff] %v267_v31  ;;  %v271_v33 = vld [vmem:[%s1587_s6 + $0x208] sm:$0xff]  ;;  %v273_v34 = vld [vmem:[%s1587_s6 + $0x210] sm:$0xff] }
  0x22   : > { %270 = vst [vmem:[%s1592_s7 + $0x100] sm:$0xff] %v269_v32  ;;  %v275_v35 = vld [vmem:[%s1587_s6 + $0x218] sm:$0xff]  ;;  %272 = vst [vmem:[%s1592_s7 + $0x108] sm:$0xff] %v271_v33  ;;  %v277_v36 = vld [vmem:[%s1587_s6 + $0x220] sm:$0xff] }
  0x23   : > { %274 = vst [vmem:[%s1592_s7 + $0x110] sm:$0xff] %v273_v34  ;;  %276 = vst [vmem:[%s1592_s7 + $0x118] sm:$0xff] %v275_v35  ;;  %v279_v37 = vld [vmem:[%s1587_s6 + $0x228] sm:$0xff]  ;;  %v281_v38 = vld [vmem:[%s1587_s6 + $0x230] sm:$0xff] }
  0x24   : > { %278 = vst [vmem:[%s1592_s7 + $0x120] sm:$0xff] %v277_v36  ;;  %280 = vst [vmem:[%s1592_s7 + $0x128] sm:$0xff] %v279_v37  ;;  %v283_v39 = vld [vmem:[%s1587_s6 + $0x238] sm:$0xff]  ;;  %v285_v40 = vld [vmem:[%s1587_s6 + $0x280] sm:$0xff] }
  0x25   : > { %282 = vst [vmem:[%s1592_s7 + $0x130] sm:$0xff] %v281_v38  ;;  %v287_v41 = vld [vmem:[%s1587_s6 + $0x288] sm:$0xff]  ;;  %284 = vst [vmem:[%s1592_s7 + $0x138] sm:$0xff] %v283_v39  ;;  %v289_v42 = vld [vmem:[%s1587_s6 + $0x290] sm:$0xff] }
  0x26   : > { %286 = vst [vmem:[%s1592_s7 + $0x140] sm:$0xff] %v285_v40  ;;  %288 = vst [vmem:[%s1592_s7 + $0x148] sm:$0xff] %v287_v41  ;;  %v291_v43 = vld [vmem:[%s1587_s6 + $0x298] sm:$0xff]  ;;  %v293_v44 = vld [vmem:[%s1587_s6 + $0x2a0] sm:$0xff] }
  0x27   : > { %290 = vst [vmem:[%s1592_s7 + $0x150] sm:$0xff] %v289_v42  ;;  %292 = vst [vmem:[%s1592_s7 + $0x158] sm:$0xff] %v291_v43  ;;  %v295_v45 = vld [vmem:[%s1587_s6 + $0x2a8] sm:$0xff]  ;;  %v297_v46 = vld [vmem:[%s1587_s6 + $0x2b0] sm:$0xff] }
  0x28   : > { %294 = vst [vmem:[%s1592_s7 + $0x160] sm:$0xff] %v293_v44  ;;  %v299_v47 = vld [vmem:[%s1587_s6 + $0x2b8] sm:$0xff]  ;;  %296 = vst [vmem:[%s1592_s7 + $0x168] sm:$0xff] %v295_v45  ;;  %v301_v48 = vld [vmem:[%s1587_s6 + $0x300] sm:$0xff] }
  0x29   : > { %298 = vst [vmem:[%s1592_s7 + $0x170] sm:$0xff] %v297_v46  ;;  %300 = vst [vmem:[%s1592_s7 + $0x178] sm:$0xff] %v299_v47  ;;  %v303_v49 = vld [vmem:[%s1587_s6 + $0x308] sm:$0xff]  ;;  %v305_v50 = vld [vmem:[%s1587_s6 + $0x310] sm:$0xff] }
  0x2a   : > { %302 = vst [vmem:[%s1592_s7 + $0x180] sm:$0xff] %v301_v48  ;;  %304 = vst [vmem:[%s1592_s7 + $0x188] sm:$0xff] %v303_v49  ;;  %v307_v51 = vld [vmem:[%s1587_s6 + $0x318] sm:$0xff]  ;;  %v309_v52 = vld [vmem:[%s1587_s6 + $0x320] sm:$0xff] }
  0x2b   : > { %306 = vst [vmem:[%s1592_s7 + $0x190] sm:$0xff] %v305_v50  ;;  %v311_v53 = vld [vmem:[%s1587_s6 + $0x328] sm:$0xff]  ;;  %308 = vst [vmem:[%s1592_s7 + $0x198] sm:$0xff] %v307_v51  ;;  %v313_v54 = vld [vmem:[%s1587_s6 + $0x330] sm:$0xff] }
  0x2c   : > { %310 = vst [vmem:[%s1592_s7 + $0x1a0] sm:$0xff] %v309_v52  ;;  %312 = vst [vmem:[%s1592_s7 + $0x1a8] sm:$0xff] %v311_v53  ;;  %v315_v55 = vld [vmem:[%s1587_s6 + $0x338] sm:$0xff]  ;;  %v317_v56 = vld [vmem:[%s1587_s6 + $0x380] sm:$0xff] }
  0x2d   : > { %314 = vst [vmem:[%s1592_s7 + $0x1b0] sm:$0xff] %v313_v54  ;;  %316 = vst [vmem:[%s1592_s7 + $0x1b8] sm:$0xff] %v315_v55  ;;  %v319_v57 = vld [vmem:[%s1587_s6 + $0x388] sm:$0xff]  ;;  %v321_v58 = vld [vmem:[%s1587_s6 + $0x390] sm:$0xff] }
  0x2e   : > { %318 = vst [vmem:[%s1592_s7 + $0x1c0] sm:$0xff] %v317_v56  ;;  %v323_v59 = vld [vmem:[%s1587_s6 + $0x398] sm:$0xff]  ;;  %320 = vst [vmem:[%s1592_s7 + $0x1c8] sm:$0xff] %v319_v57  ;;  %v325_v60 = vld [vmem:[%s1587_s6 + $0x3a0] sm:$0xff] }
  0x2f   : > { %322 = vst [vmem:[%s1592_s7 + $0x1d0] sm:$0xff] %v321_v58  ;;  %324 = vst [vmem:[%s1592_s7 + $0x1d8] sm:$0xff] %v323_v59  ;;  %v327_v61 = vld [vmem:[%s1587_s6 + $0x3a8] sm:$0xff]  ;;  %v329_v62 = vld [vmem:[%s1587_s6 + $0x3b0] sm:$0xff] }
  0x30   : > { %326 = vst [vmem:[%s1592_s7 + $0x1e0] sm:$0xff] %v325_v60  ;;  %328 = vst [vmem:[%s1592_s7 + $0x1e8] sm:$0xff] %v327_v61  ;;  %v331_v63 = vld [vmem:[%s1587_s6 + $0x3b8] sm:$0xff] }
  0x31   : > { %330 = vst [vmem:[%s1592_s7 + $0x1f0] sm:$0xff] %v329_v62  ;;  %332 = vst [vmem:[%s1592_s7 + $0x1f8] sm:$0xff] %v331_v63 }
  0x32 PF: > { %p1373_p5 = scmp.ge.s32.totalorder %s1518_s20, 1  ;;  %p337_p6 = scmp.lt.s32.totalorder %s1518_s20, 3 }
  0x34   : > { %p338_p7 = pnand %p1373_p5, %p337_p6 }
  0x35   : > { %s344_s8 = sand.u32 (!%p338_p7), 1, %s1510_s18   ;;  %v460_v0 = vld [vmem:[%s1873_s2] sm:$0xff] (!%p338_p7)  ;;  %v1520_v1 = vmov (!%p338_p7), 0   ;;  %vm786_vm0 = vcmask (!%p338_p7), 523264   ;;  %s1375_s15 = sshll.u32 (!%p338_p7), %s1567_s21, 4 }
  0x36   : > { %341 = sbr.rel (%p338_p7) target bundleno = 491 (0x1eb), region = 51  ;;  %s1374_s11 = sshll.u32 (!%p338_p7), %s344_s8, 9  ;;  %822 = vmatprep.mubr.bf16.mxu0 (!%p338_p7), %v1520_v1  ;;  %863 = vmatprep.mubr.bf16.mxu1 (!%p338_p7), %v1520_v1  ;;  %v1757_v44 = vld [vmem:[%s1871_s0] sm:$0xf] (!%p338_p7) }
  0x37   : > { %1495 = vset.pattern.permute.xlu0 (!%p338_p7), %v1520_v1  ;;  %s1728_s12 = scalar_lea.vmem (!%p338_p7), [#allocation2], %s1374_s11  ;;  %p381_p8 = scmp.lt.s32.totalorder (!%p338_p7), %s1375_s15, 31 }
  0x38   : > { %v396_v2 = vld [vmem:[%s1728_s12] sm:$0xff] (!%p338_p7)  ;;  %v397_v4 = vld [vmem:[%s1728_s12 + $0x8] sm:$0xff] (!%p338_p7)  ;;  %463 = vperm.xlu0 (!%p338_p7), %1495, %v460_v0   ;;  %v398_v32 = vld [vmem:[%s1728_s12 + $0x10] sm:$0xff] (!%p338_p7)  ;;  %p386_p9 = scmp.lt.s32.totalorder (!%p338_p7), %s1567_s21, 1 }
  0x39   : > { %v404_v3 = vld [vmem:[%s1728_s12 + $0x40] sm:$0xff] (!%p338_p7)  ;;  %v405_v6 = vld [vmem:[%s1728_s12 + $0x48] sm:$0xff] (!%p338_p7)  ;;  %v406_v33 = vld [vmem:[%s1728_s12 + $0x50] sm:$0xff] (!%p338_p7) }
  0x3a   : > { %v1380_v5 = vcombine.high (!%p338_p7), %v396_v2, %v404_v3  ;;  %v1379_v7 = vcombine.low (!%p338_p7), %v396_v2, %v404_v3  ;;  %v412_v8 = vld [vmem:[%s1728_s12 + $0x80] sm:$0xff] (!%p338_p7)  ;;  %v1382_v10 = vcombine.high (!%p338_p7), %v397_v4, %v405_v6  ;;  %v1381_v11 = vcombine.low (!%p338_p7), %v397_v4, %v405_v6  ;;  %v413_v13 = vld [vmem:[%s1728_s12 + $0x88] sm:$0xff] (!%p338_p7)  ;;  %v399_v34 = vld [vmem:[%s1728_s12 + $0x18] sm:$0xff] (!%p338_p7) }
  0x3b   : > { %v420_v9 = vld [vmem:[%s1728_s12 + $0xc0] sm:$0xff] (!%p338_p7)  ;;  %v421_v14 = vld [vmem:[%s1728_s12 + $0xc8] sm:$0xff] (!%p338_p7)  ;;  %v407_v35 = vld [vmem:[%s1728_s12 + $0x58] sm:$0xff] (!%p338_p7)  ;;  %v1384_v38 = vcombine.high (!%p338_p7), %v398_v32, %v406_v33  ;;  %v1383_v45 = vcombine.low (!%p338_p7), %v398_v32, %v406_v33 }
  0x3c   : > { %v1396_v12 = vcombine.high (!%p338_p7), %v412_v8, %v420_v9  ;;  %v428_v15 = vld [vmem:[%s1728_s12 + $0x100] sm:$0xff] (!%p338_p7)  ;;  %790 = vmatprep.subr.bf16.mxu0 (!%p338_p7), %v1380_v5  ;;  %v1398_v16 = vcombine.high (!%p338_p7), %v413_v13, %v421_v14  ;;  %v429_v18 = vld [vmem:[%s1728_s12 + $0x108] sm:$0xff] (!%p338_p7)  ;;  %831 = vmatprep.subr.bf16.mxu1 (!%p338_p7), %v1382_v10  ;;  %v1395_v20 = vcombine.low (!%p338_p7), %v412_v8, %v420_v9  ;;  %v414_v40 = vld [vmem:[%s1728_s12 + $0x90] sm:$0xff] (!%p338_p7) }
  0x3d   : > { %v436_v17 = vld [vmem:[%s1728_s12 + $0x140] sm:$0xff]  ;;  %v437_v19 = vld [vmem:[%s1728_s12 + $0x148] sm:$0xff]  ;;  %791 = vmatpush1.bf16.msra.mxu0 %v1379_v7  ;;  %832 = vmatpush1.bf16.msra.mxu1 %v1381_v11  ;;  %v1397_v21 = vcombine.low %v413_v13, %v421_v14  ;;  %v1386_v39 = vcombine.high %v399_v34, %v407_v35  ;;  %v422_v41 = vld [vmem:[%s1728_s12 + $0xd0] sm:$0xff]  ;;  %v1385_v46 = vcombine.low %v399_v34, %v407_v35  ;;  %s1881_s15 = smov (!%p381_p8, %s1375_s15), 31  ;;  %s1883_s21 = smov (!%p386_p9, %s1567_s21), 1 }
  0x3e   : > { %792 = vmatprep.subr.bf16.mxu0 %v1396_v12  ;;  %v1412_v22 = vcombine.high %v428_v15, %v436_v17  ;;  %833 = vmatprep.subr.bf16.mxu1 %v1398_v16  ;;  %v1414_v23 = vcombine.high %v429_v18, %v437_v19  ;;  %v444_v24 = vld [vmem:[%s1728_s12 + $0x180] sm:$0xff]  ;;  %v445_v26 = vld [vmem:[%s1728_s12 + $0x188] sm:$0xff]  ;;  %v1411_v28 = vcombine.low %v428_v15, %v436_v17  ;;  %v415_v42 = vld [vmem:[%s1728_s12 + $0x98] sm:$0xff]  ;;  %s1376_s16 = sshll.u32 %s1881_s15, 2  ;;  %s1377_s23 = sshll.u32 %s1883_s21, 3 }
  0x3f   : > { %v452_v25 = vld [vmem:[%s1728_s12 + $0x1c0] sm:$0xff]  ;;  %v453_v27 = vld [vmem:[%s1728_s12 + $0x1c8] sm:$0xff]  ;;  %v1413_v29 = vcombine.low %v429_v18, %v437_v19  ;;  %v423_v43 = vld [vmem:[%s1728_s12 + $0xd8] sm:$0xff]  ;;  %v1400_v47 = vcombine.high %v414_v40, %v422_v41  ;;  %v1399_v53 = vcombine.low %v414_v40, %v422_v41  ;;  %s1830_s20 = scalar_lea.vmem %s1874_s3, %s1376_s16  ;;  %s389_s27 = scalar_lea.vmem %s1875_s4, %s1377_s23 }
  0x40   : > { %v1428_v30 = vcombine.high %v444_v24, %v452_v25  ;;  %v1430_v31 = vcombine.high %v445_v26, %v453_v27  ;;  %v1427_v36 = vcombine.low %v444_v24, %v452_v25  ;;  %v1429_v37 = vcombine.low %v445_v26, %v453_v27  ;;  %v430_v49 = vld [vmem:[%s1728_s12 + $0x110] sm:$0xff]  ;;  %v431_v51 = vld [vmem:[%s1728_s12 + $0x118] sm:$0xff]  ;;  %v400_v2 = vld [vmem:[%s1728_s12 + $0x20] sm:$0xff]  ;;  %s393_s30 = scalar_lea.vmem %s1876_s5, %s1377_s23 }
  0x41   : > { %793 = vmatpush1.bf16.msra.mxu0 %v1395_v20  ;;  %834 = vmatpush1.bf16.msra.mxu1 %v1397_v21  ;;  %v1402_v48 = vcombine.high %v415_v42, %v423_v43  ;;  %v438_v50 = vld [vmem:[%s1728_s12 + $0x150] sm:$0xff]  ;;  %v439_v52 = vld [vmem:[%s1728_s12 + $0x158] sm:$0xff]  ;;  %v1401_v54 = vcombine.low %v415_v42, %v423_v43  ;;  %v408_v3 = vld [vmem:[%s1728_s12 + $0x60] sm:$0xff] }
  0x42   : > { %794 = vmatprep.subr.bf16.mxu0 %v1412_v22  ;;  %835 = vmatprep.subr.bf16.mxu1 %v1414_v23  ;;  %v1416_v55 = vcombine.high %v430_v49, %v438_v50  ;;  %v1418_v56 = vcombine.high %v431_v51, %v439_v52  ;;  %v446_v57 = vld [vmem:[%s1728_s12 + $0x190] sm:$0xff]  ;;  %v447_v59 = vld [vmem:[%s1728_s12 + $0x198] sm:$0xff]  ;;  %v1415_v61 = vcombine.low %v430_v49, %v438_v50  ;;  %v401_v4 = vld [vmem:[%s1728_s12 + $0x28] sm:$0xff] }
  0x43   : > { %v454_v58 = vld [vmem:[%s1728_s12 + $0x1d0] sm:$0xff]  ;;  %v455_v60 = vld [vmem:[%s1728_s12 + $0x1d8] sm:$0xff]  ;;  %v1417_v62 = vcombine.low %v431_v51, %v439_v52  ;;  %v409_v5 = vld [vmem:[%s1728_s12 + $0x68] sm:$0xff]  ;;  %v1388_v8 = vcombine.high %v400_v2, %v408_v3  ;;  %v1387_v14 = vcombine.low %v400_v2, %v408_v3 }
  0x44   : > { %v1432_v63 = vcombine.high %v446_v57, %v454_v58  ;;  %v1434_v0 = vcombine.high %v447_v59, %v455_v60  ;;  %v1431_v6 = vcombine.low %v446_v57, %v454_v58  ;;  %v1433_v7 = vcombine.low %v447_v59, %v455_v60  ;;  %v416_v10 = vld [vmem:[%s1728_s12 + $0xa0] sm:$0xff]  ;;  %v417_v12 = vld [vmem:[%s1728_s12 + $0xa8] sm:$0xff]  ;;  %v402_v34 = vld [vmem:[%s1728_s12 + $0x30] sm:$0xff] }
  0x45   : > { %795 = vmatpush1.bf16.msra.mxu0 %v1411_v28  ;;  %836 = vmatpush1.bf16.msra.mxu1 %v1413_v29  ;;  %v1390_v9 = vcombine.high %v401_v4, %v409_v5  ;;  %v424_v11 = vld [vmem:[%s1728_s12 + $0xe0] sm:$0xff]  ;;  %v425_v13 = vld [vmem:[%s1728_s12 + $0xe8] sm:$0xff]  ;;  %v1389_v15 = vcombine.low %v401_v4, %v409_v5  ;;  %v410_v35 = vld [vmem:[%s1728_s12 + $0x70] sm:$0xff] }
  0x46   : > { %796 = vmatprep.subr.bf16.mxu0 %v1428_v30  ;;  %837 = vmatprep.subr.bf16.mxu1 %v1430_v31  ;;  %v1404_v16 = vcombine.high %v416_v10, %v424_v11  ;;  %v1406_v17 = vcombine.high %v417_v12, %v425_v13  ;;  %v432_v18 = vld [vmem:[%s1728_s12 + $0x120] sm:$0xff]  ;;  %v433_v20 = vld [vmem:[%s1728_s12 + $0x128] sm:$0xff]  ;;  %v1403_v22 = vcombine.low %v416_v10, %v424_v11  ;;  %v418_v42 = vld [vmem:[%s1728_s12 + $0xb0] sm:$0xff] }
  0x47   : > { %v440_v19 = vld [vmem:[%s1728_s12 + $0x160] sm:$0xff]  ;;  %v441_v21 = vld [vmem:[%s1728_s12 + $0x168] sm:$0xff]  ;;  %v1405_v23 = vcombine.low %v417_v12, %v425_v13  ;;  %v1392_v40 = vcombine.high %v402_v34, %v410_v35  ;;  %v426_v43 = vld [vmem:[%s1728_s12 + $0xf0] sm:$0xff] }
  0x48   : > { %v1420_v24 = vcombine.high %v432_v18, %v440_v19  ;;  %v1422_v25 = vcombine.high %v433_v20, %v441_v21  ;;  %v448_v26 = vld [vmem:[%s1728_s12 + $0x1a0] sm:$0xff]  ;;  %v449_v28 = vld [vmem:[%s1728_s12 + $0x1a8] sm:$0xff]  ;;  %v1419_v30 = vcombine.low %v432_v18, %v440_v19  ;;  %v1421_v31 = vcombine.low %v433_v20, %v441_v21  ;;  %v434_v51 = vld [vmem:[%s1728_s12 + $0x130] sm:$0xff] }
  0x49   : > { %797 = vmatpush1.bf16.msra.mxu0 %v1427_v36  ;;  %838 = vmatpush1.bf16.msra.mxu1 %v1429_v37  ;;  %v456_v27 = vld [vmem:[%s1728_s12 + $0x1e0] sm:$0xff]  ;;  %v457_v29 = vld [vmem:[%s1728_s12 + $0x1e8] sm:$0xff]  ;;  %v403_v36 = vld [vmem:[%s1728_s12 + $0x38] sm:$0xff]  ;;  %v1408_v49 = vcombine.high %v418_v42, %v426_v43 }
  0x4a   : > { %872 = vmatprep.subr.bf16.mxu0 %v1384_v38  ;;  %913 = vmatprep.subr.bf16.mxu1 %v1386_v39  ;;  %v1436_v32 = vcombine.high %v448_v26, %v456_v27  ;;  %v1438_v33 = vcombine.high %v449_v28, %v457_v29  ;;  %v411_v37 = vld [vmem:[%s1728_s12 + $0x78] sm:$0xff]  ;;  %v1435_v38 = vcombine.low %v448_v26, %v456_v27  ;;  %v442_v52 = vld [vmem:[%s1728_s12 + $0x170] sm:$0xff] }
  0x4b   : > { %v1437_v39 = vcombine.low %v449_v28, %v457_v29  ;;  %v1394_v41 = vcombine.high %v403_v36, %v411_v37  ;;  %v1424_v57 = vcombine.high %v434_v51, %v442_v52  ;;  %v450_v59 = vld [vmem:[%s1728_s12 + $0x1b0] sm:$0xff] }
  0x4c   : > { %1443 = vmatmul.mubr.msk.bf16.vlgmr.msra.gmra.mrb[0].mxu0 %vm786_vm0, %v1757_v44  ;;  %1444 = vmatmul.mubr.msk.bf16.vlgmr.msra.gmra.mrb[0].mxu1 %vm786_vm0, %v1757_v44  ;;  %v458_v60 = vld [vmem:[%s1728_s12 + $0x1f0] sm:$0xff] }
  0x4d   : > { %873 = vmatpush1.bf16.msra.mxu0 %v1383_v45  ;;  %914 = vmatpush1.bf16.msra.mxu1 %v1385_v46  ;;  %v419_v45 = vld [vmem:[%s1728_s12 + $0xb8] sm:$0xff]  ;;  %v1440_v2 = vcombine.high %v450_v59, %v458_v60  ;;  %v1439_v4 = vcombine.low %v450_v59, %v458_v60 }
  0x4e   : > { %874 = vmatprep.subr.bf16.mxu0 %v1400_v47  ;;  %915 = vmatprep.subr.bf16.mxu1 %v1402_v48  ;;  %v427_v46 = vld [vmem:[%s1728_s12 + $0xf8] sm:$0xff]  ;;  %v1391_v47 = vcombine.low %v402_v34, %v410_v35  ;;  %v1393_v48 = vcombine.low %v403_v36, %v411_v37 }
  0x4f   : > { %904 = vmatprep.mubr.bf16.mxu0 %v1520_v1  ;;  %945 = vmatprep.mubr.bf16.mxu1 %v1520_v1  ;;  %v1410_v50 = vcombine.high %v419_v45, %v427_v46 }
  0x51   : > { %875 = vmatpush1.bf16.msra.mxu0 %v1399_v53  ;;  %916 = vmatpush1.bf16.msra.mxu1 %v1401_v54  ;;  %v435_v53 = vld [vmem:[%s1728_s12 + $0x138] sm:$0xff] }
  0x52   : > { %876 = vmatprep.subr.bf16.mxu0 %v1416_v55  ;;  %917 = vmatprep.subr.bf16.mxu1 %v1418_v56  ;;  %v443_v54 = vld [vmem:[%s1728_s12 + $0x178] sm:$0xff]  ;;  %v1407_v55 = vcombine.low %v418_v42, %v426_v43  ;;  %v1409_v56 = vcombine.low %v419_v45, %v427_v46 }
  0x53   : > { %v1426_v58 = vcombine.high %v435_v53, %v443_v54 }
  0x55   : > { %877 = vmatpush1.bf16.msra.mxu0 %v1415_v61  ;;  %918 = vmatpush1.bf16.msra.mxu1 %v1417_v62  ;;  %v451_v61 = vld [vmem:[%s1728_s12 + $0x1b8] sm:$0xff] }
  0x56   : > { %878 = vmatprep.subr.bf16.mxu0 %v1432_v63  ;;  %919 = vmatprep.subr.bf16.mxu1 %v1434_v0  ;;  %v459_v62 = vld [vmem:[%s1728_s12 + $0x1f8] sm:$0xff]  ;;  %v1423_v63 = vcombine.low %v434_v51, %v442_v52  ;;  %v1425_v0 = vcombine.low %v435_v53, %v443_v54 }
  0x57   : > { %v1442_v3 = vcombine.high %v451_v61, %v459_v62  ;;  %v1441_v5 = vcombine.low %v451_v61, %v459_v62 }
  0x59   : > { %879 = vmatpush1.bf16.msra.mxu0 %v1431_v6  ;;  %920 = vmatpush1.bf16.msra.mxu1 %v1433_v7 }
  0x5a   : > { %954 = vmatprep.subr.bf16.mxu0 %v1388_v8  ;;  %995 = vmatprep.subr.bf16.mxu1 %v1390_v9 }
  0x5c   : > { %1445 = vmatmul.mubr.msk.bf16.vlgmr.msra.gmra.mrb[4].mxu0 %vm786_vm0, %v1757_v44  ;;  %1446 = vmatmul.mubr.msk.bf16.vlgmr.msra.gmra.mrb[4].mxu1 %vm786_vm0, %v1757_v44 }
  0x5d   : > { %955 = vmatpush1.bf16.msra.mxu0 %v1387_v14  ;;  %996 = vmatpush1.bf16.msra.mxu1 %v1389_v15 }
  0x5e   : > { %956 = vmatprep.subr.bf16.mxu0 %v1404_v16  ;;  %997 = vmatprep.subr.bf16.mxu1 %v1406_v17 }
  0x5f   : > { %986 = vmatprep.mubr.bf16.mxu0 %v1520_v1  ;;  %1027 = vmatprep.mubr.bf16.mxu1 %v1520_v1 }
  0x61   : > { %957 = vmatpush1.bf16.msra.mxu0 %v1403_v22  ;;  %998 = vmatpush1.bf16.msra.mxu1 %v1405_v23 }
  0x62   : > { %958 = vmatprep.subr.bf16.mxu0 %v1420_v24  ;;  %999 = vmatprep.subr.bf16.mxu1 %v1422_v25 }
  0x65   : > { %959 = vmatpush1.bf16.msra.mxu0 %v1419_v30  ;;  %1000 = vmatpush1.bf16.msra.mxu1 %v1421_v31 }
  0x66   : > { %960 = vmatprep.subr.bf16.mxu0 %v1436_v32  ;;  %1001 = vmatprep.subr.bf16.mxu1 %v1438_v33 }
  0x69   : > { %961 = vmatpush1.bf16.msra.mxu0 %v1435_v38  ;;  %1002 = vmatpush1.bf16.msra.mxu1 %v1437_v39 }
  0x6a   : > { %1036 = vmatprep.subr.bf16.mxu0 %v1392_v40  ;;  %1077 = vmatprep.subr.bf16.mxu1 %v1394_v41 }
  0x6c   : > { %1447 = vmatmul.mubr.msk.bf16.vlgmr.msra.gmra.mrb[8].mxu0 %vm786_vm0, %v1757_v44  ;;  %1448 = vmatmul.mubr.msk.bf16.vlgmr.msra.gmra.mrb[8].mxu1 %vm786_vm0, %v1757_v44 }
  0x6d   : > { %1037 = vmatpush1.bf16.msra.mxu0 %v1391_v47  ;;  %1078 = vmatpush1.bf16.msra.mxu1 %v1393_v48 }
  0x6e   : > { %1038 = vmatprep.subr.bf16.mxu0 %v1408_v49  ;;  %1079 = vmatprep.subr.bf16.mxu1 %v1410_v50 }
  0x6f   : > { %1068 = vmatprep.mubr.bf16.mxu0 %v1520_v1  ;;  %1109 = vmatprep.mubr.bf16.mxu1 %v1520_v1 }
  0x71   : > { %1039 = vmatpush1.bf16.msra.mxu0 %v1407_v55  ;;  %1080 = vmatpush1.bf16.msra.mxu1 %v1409_v56 }
  0x72   : > { %1040 = vmatprep.subr.bf16.mxu0 %v1424_v57  ;;  %1081 = vmatprep.subr.bf16.mxu1 %v1426_v58 }
  0x75   : > { %1041 = vmatpush1.bf16.msra.mxu0 %v1423_v63  ;;  %1082 = vmatpush1.bf16.msra.mxu1 %v1425_v0 }
  0x76   : > { %1042 = vmatprep.subr.bf16.mxu0 %v1440_v2  ;;  %1083 = vmatprep.subr.bf16.mxu1 %v1442_v3 }
  0x79   : > { %1043 = vmatpush1.bf16.msra.mxu0 %v1439_v4  ;;  %1084 = vmatpush1.bf16.msra.mxu1 %v1441_v5 }
  0x7c   : > { %1449 = vmatmul.mubr.msk.bf16.vlgmr.msra.gmra.mrb[12].mxu0 %vm786_vm0, %v1757_v44  ;;  %1450 = vmatmul.mubr.msk.bf16.vlgmr.msra.gmra.mrb[12].mxu1 %vm786_vm0, %v1757_v44 }
  0xb7   : > { %v1822_v1 = vpop.permute.xlu0 %463 }
 0x11f   : > { %v824_v6 = vpop.f32.mrb[0].mxu0  ;;  %v865_v9 = vpop.f32.mrb[0].mxu1 }
 0x120   : > { %v825_v7 = vadd.f32 %v824_v6, %v1822_v1  ;;  %v826_v8 = vpop.f32.mrb[1].mxu0  ;;  %v866_v12 = vadd.f32 %v865_v9, %v1822_v1  ;;  %v867_v13 = vpop.f32.mrb[1].mxu1 }
 0x121   : > { %v827_v10 = vadd.f32 %v826_v8, %v1822_v1  ;;  %v828_v11 = vpop.f32.mrb[2].mxu0  ;;  %v868_v15 = vadd.f32 %v867_v13, %v1822_v1  ;;  %v869_v16 = vpop.f32.mrb[2].mxu1 }
 0x122   : > { %v1207_v44 = vmul.f32 %v825_v7, %v825_v7  ;;  %v829_v14 = vpop.f32.mrb[3].mxu0  ;;  %v1209_v20 = vmul.f32 %v866_v12, %v866_v12  ;;  %v870_v21 = vpop.f32.mrb[3].mxu1 }
 0x123   : > { %v1462_v17 = vpack.c.bf16 %v827_v10, %v825_v7  ;;  %v1190_v18 = vadd.f32 %v827_v10, %v825_v7  ;;  %v1208_v19 = vmul.f32 %v827_v10, %v827_v10  ;;  %v1463_v22 = vpack.c.bf16 %v868_v15, %v866_v12 }
 0x124   : > { %v1210_v25 = vmul.f32 %v868_v15, %v868_v15 }
 0x125   : > { %1182 = vst [vmem:[%s1830_s20] sm:$0xff] %v1462_v17  ;;  %v1223_v23 = vadd.f32 %v1208_v19, %v1207_v44  ;;  %v1191_v24 = vadd.f32 %v1190_v18, %v866_v12  ;;  %1183 = vst [vmem:[%s1830_s20 + $0x8] sm:$0xff] %v1463_v22 }
 0x127   : > { %v1224_v26 = vadd.f32 %v1223_v23, %v1209_v20  ;;  %v1192_v27 = vadd.f32 %v1191_v24, %v868_v15 }
 0x129   : > { %v1225_v28 = vadd.f32 %v1224_v26, %v1210_v25 }
 0x12f   : > { %v906_v29 = vpop.f32.mrb[4].mxu0  ;;  %v947_v32 = vpop.f32.mrb[4].mxu1 }
 0x130   : > { %v907_v30 = vadd.f32 %v906_v29, %v1822_v1  ;;  %v908_v31 = vpop.f32.mrb[5].mxu0  ;;  %v948_v35 = vadd.f32 %v947_v32, %v1822_v1  ;;  %v949_v36 = vpop.f32.mrb[5].mxu1 }
 0x131   : > { %v909_v33 = vadd.f32 %v908_v31, %v1822_v1  ;;  %v910_v34 = vpop.f32.mrb[6].mxu0  ;;  %v950_v40 = vadd.f32 %v949_v36, %v1822_v1  ;;  %v951_v41 = vpop.f32.mrb[6].mxu1 }
 0x132   : > { %v1193_v37 = vadd.f32 %v1192_v27, %v907_v30  ;;  %v1211_v38 = vmul.f32 %v907_v30, %v907_v30  ;;  %v911_v39 = vpop.f32.mrb[7].mxu0  ;;  %v952_v45 = vpop.f32.mrb[7].mxu1  ;;  %v1213_v48 = vmul.f32 %v948_v35, %v948_v35 }
 0x133   : > { %v1464_v42 = vpack.c.bf16 %v909_v33, %v907_v30  ;;  %v1212_v43 = vmul.f32 %v909_v33, %v909_v33  ;;  %v1465_v49 = vpack.c.bf16 %v950_v40, %v948_v35  ;;  %v1214_v52 = vmul.f32 %v950_v40, %v950_v40 }
 0x134   : > { %v1226_v46 = vadd.f32 %v1225_v28, %v1211_v38  ;;  %v1194_v47 = vadd.f32 %v1193_v37, %v909_v33 }
 0x135   : > { %1184 = vst [vmem:[%s1830_s20 + $0x10] sm:$0xff] %v1464_v42  ;;  %1185 = vst [vmem:[%s1830_s20 + $0x18] sm:$0xff] %v1465_v49 }
 0x136   : > { %v1227_v50 = vadd.f32 %v1226_v46, %v1212_v43  ;;  %v1195_v51 = vadd.f32 %v1194_v47, %v948_v35 }
 0x138   : > { %v1228_v53 = vadd.f32 %v1227_v50, %v1213_v48  ;;  %v1196_v54 = vadd.f32 %v1195_v51, %v950_v40 }
 0x13a   : > { %v1229_v55 = vadd.f32 %v1228_v53, %v1214_v52 }
 0x13f   : > { %v988_v56 = vpop.f32.mrb[8].mxu0  ;;  %v1029_v58 = vpop.f32.mrb[8].mxu1 }
 0x140   : > { %v989_v57 = vadd.f32 %v988_v56, %v1822_v1  ;;  %v990_v59 = vpop.f32.mrb[9].mxu0  ;;  %v1030_v60 = vadd.f32 %v1029_v58, %v1822_v1  ;;  %v1031_v62 = vpop.f32.mrb[9].mxu1 }
 0x141   : > { %v991_v61 = vadd.f32 %v990_v59, %v1822_v1  ;;  %v992_v63 = vpop.f32.mrb[10].mxu0  ;;  %v1032_v3 = vadd.f32 %v1031_v62, %v1822_v1  ;;  %v1033_v5 = vpop.f32.mrb[10].mxu1 }
 0x142   : > { %v1197_v0 = vadd.f32 %v1196_v54, %v989_v57  ;;  %v1215_v2 = vmul.f32 %v989_v57, %v989_v57  ;;  %v993_v4 = vpop.f32.mrb[11].mxu0  ;;  %v1034_v8 = vpop.f32.mrb[11].mxu1  ;;  %v1217_v12 = vmul.f32 %v1030_v60, %v1030_v60 }
 0x143   : > { %v1466_v6 = vpack.c.bf16 %v991_v61, %v989_v57  ;;  %v1216_v7 = vmul.f32 %v991_v61, %v991_v61  ;;  %v1467_v11 = vpack.c.bf16 %v1032_v3, %v1030_v60  ;;  %v1218_v15 = vmul.f32 %v1032_v3, %v1032_v3 }
 0x144   : > { %v1230_v9 = vadd.f32 %v1229_v55, %v1215_v2  ;;  %v1198_v10 = vadd.f32 %v1197_v0, %v991_v61 }
 0x145   : > { %1186 = vst [vmem:[%s1830_s20 + $0x20] sm:$0xff] %v1466_v6  ;;  %1187 = vst [vmem:[%s1830_s20 + $0x28] sm:$0xff] %v1467_v11 }
 0x146   : > { %v1231_v13 = vadd.f32 %v1230_v9, %v1216_v7  ;;  %v1199_v44 = vadd.f32 %v1198_v10, %v1030_v60 }
 0x148   : > { %v1200_v14 = vadd.f32 %v1199_v44, %v1032_v3  ;;  %v1232_v16 = vadd.f32 %v1231_v13, %v1217_v12 }
 0x14a   : > { %v1233_v17 = vadd.f32 %v1232_v16, %v1218_v15 }
 0x14f   : > { %v1070_v18 = vpop.f32.mrb[12].mxu0  ;;  %v1111_v20 = vpop.f32.mrb[12].mxu1 }
 0x150   : > { %v1071_v19 = vadd.f32 %v1070_v18, %v1822_v1  ;;  %v1072_v21 = vpop.f32.mrb[13].mxu0  ;;  %v1112_v22 = vadd.f32 %v1111_v20, %v1822_v1  ;;  %v1113_v24 = vpop.f32.mrb[13].mxu1 }
 0x151   : > { %v1073_v23 = vadd.f32 %v1072_v21, %v1822_v1  ;;  %v1074_v25 = vpop.f32.mrb[14].mxu0  ;;  %v1114_v28 = vadd.f32 %v1113_v24, %v1822_v1  ;;  %v1115_v30 = vpop.f32.mrb[14].mxu1 }
 0x152   : > { %v1201_v26 = vadd.f32 %v1200_v14, %v1071_v19  ;;  %v1219_v27 = vmul.f32 %v1071_v19, %v1071_v19  ;;  %v1075_v29 = vpop.f32.mrb[15].mxu0  ;;  %v1116_v33 = vpop.f32.mrb[15].mxu1  ;;  %v1221_v38 = vmul.f32 %v1112_v22, %v1112_v22 }
 0x153   : > { %v1468_v31 = vpack.c.bf16 %v1073_v23, %v1071_v19  ;;  %v1220_v32 = vmul.f32 %v1073_v23, %v1073_v23  ;;  %v1469_v35 = vpack.c.bf16 %v1114_v28, %v1112_v22  ;;  %v1222_v41 = vmul.f32 %v1114_v28, %v1114_v28 }
 0x154   : > { %v1202_v34 = vadd.f32 %v1201_v26, %v1073_v23  ;;  %v1234_v36 = vadd.f32 %v1233_v17, %v1219_v27 }
 0x155   : > { %1188 = vst [vmem:[%s1830_s20 + $0x30] sm:$0xff] %v1468_v31  ;;  %1189 = vst [vmem:[%s1830_s20 + $0x38] sm:$0xff] %v1469_v35 }
 0x156   : > { %v1203_v37 = vadd.f32 %v1202_v34, %v1112_v22  ;;  %v1235_v39 = vadd.f32 %v1234_v36, %v1220_v32 }
 0x158   : > { %v1204_v40 = vadd.f32 %v1203_v37, %v1114_v28  ;;  %v1236_v42 = vadd.f32 %v1235_v39, %v1221_v38 }
 0x15a   : > { %1205 = vadd.xlane.f32.xlu0 %v1204_v40  ;;  %v1237_v1 = vadd.f32 %v1236_v42, %v1222_v41 }
 0x15c   : > { %1238 = vadd.xlane.f32.xlu1 %v1237_v1 }
 0x1e7   : > { %v1206_v43 = vpop.xlane.xlu0 %1205 }
 0x1e8   : > { %1240 = vst [vmem:[%s389_s27] sm:$0xff] %v1206_v43 }
 0x1e9   : > { %v1239_v45 = vpop.xlane.xlu1 %1238 }
 0x1ea   : > { %1241 = vst [vmem:[%s393_s30] sm:$0xff] %v1239_v45 }
 0x1eb PF: > { %p13_p10 = scmp.ge.s32.totalorder %s1570_s22, 4   ;;  %s1877_s18 = smov %s1514_s19 }
 0x1ec   : > { %s1878_s19 = smov %s1579_s25  ;;  %s1879_s20 = smov %s1570_s22 }
 0x1ed   :  { %15 = sbr.rel (!%p13_p10) target bundleno = 2 (0x2), region = 114 }

// kernel: tile.88
= control target key start
LH: loop header
LB: loop body
LE: loop exit
PB: predicated region body
PF: predicated region fallthrough
CT: control target
= control target key end

     0   :  { %s22_s0 = inlined_call_operand.vmem [shape: f32[32], index: 0, kind: input, shape index: {}]   ;;  %s23_s1 = inlined_call_operand.vmem [shape: f32[4,32], index: 1, kind: output, shape index: {}]  }
   0x1   :  { %v4_v0 = vld [vmem:[%s22_s0] ss:$0 sm:$0xff] }
   0x2   :  { %5 = vst [vmem:[%s23_s1] sm:$0xf] %v4_v0 }

// kernel: tile.118
= control target key start
LH: loop header
LB: loop body
LE: loop exit
PB: predicated region body
PF: predicated region fallthrough
CT: control target
= control target key end

     0   :  { %s22_s0 = inlined_call_operand.vmem [shape: f32[16], index: 0, kind: input, shape index: {}]   ;;  %s23_s1 = inlined_call_operand.vmem [shape: f32[4,16], index: 1, kind: output, shape index: {}]  }
   0x1   :  { %v4_v0 = vld [vmem:[%s22_s0] ss:$0 sm:$0xff] }
   0x2   :  { %5 = vst [vmem:[%s23_s1] sm:$0xf] %v4_v0 }

// kernel: tile.128
= control target key start
LH: loop header
LB: loop body
LE: loop exit
PB: predicated region body
PF: predicated region fallthrough
CT: control target
= control target key end

     0   :  { %s22_s0 = inlined_call_operand.vmem [shape: f32[8], index: 0, kind: input, shape index: {}]   ;;  %s23_s1 = inlined_call_operand.vmem [shape: f32[4,8], index: 1, kind: output, shape index: {}]  }
   0x1   :  { %v4_v0 = vld [vmem:[%s22_s0] ss:$0 sm:$0xff] }
   0x2   :  { %5 = vst [vmem:[%s23_s1] sm:$0xf] %v4_v0 }

// kernel: tile.138
= control target key start
LH: loop header
LB: loop body
LE: loop exit
PB: predicated region body
PF: predicated region fallthrough
CT: control target
= control target key end

     0   :  { %s22_s0 = inlined_call_operand.vmem [shape: f32[4], index: 0, kind: input, shape index: {}]   ;;  %s23_s1 = inlined_call_operand.vmem [shape: f32[4,4], index: 1, kind: output, shape index: {}]  }
   0x1   :  { %v4_v0 = vld [vmem:[%s22_s0] ss:$0 sm:$0xff] }
   0x2   :  { %5 = vst [vmem:[%s23_s1] sm:$0xf] %v4_v0 }

// kernel: unet_forward.6
= control target key start
LH: loop header
LB: loop body
LE: loop exit
PB: predicated region body
PF: predicated region fallthrough
CT: control target
= control target key end

     0   :  { %s2544_s18 = smov 0   ;;  %s2546_s19 = smov 0   ;;  %s3181_s0 = inlined_call_operand.vmem [shape: bf16[16,144], index: 0, kind: input, shape index: {}]   ;;  %s3182_s1 = inlined_call_operand.vmem [shape: bf16[144,4096], index: 1, kind: input, shape index: {}]   ;;  %s3183_s2 = inlined_call_operand.vmem [shape: f32[16,1], index: 2, kind: input, shape index: {}]   ;;  %s3184_s3 = inlined_call_operand.vmem [shape: bf16[16,4096], index: 3, kind: output, shape index: {0}]   ;;  %s3185_s4 = inlined_call_operand.vmem [shape: f32[16,256], index: 4, kind: output, shape index: {1}]   ;;  %s3186_s5 = inlined_call_operand.vmem [shape: f32[16,256], index: 5, kind: output, shape index: {2}]  }
   0x1   :  { %s2548_s20 = smov 0  }
   0x2 LB: > { %s2560_s21 = sadd.s32 4294967295, %s2511_s20   ;;  %s2563_s22 = sadd.s32 1, %s2511_s20   ;;  %s2511_s20 = sphi %s2548_s20, %s3190_s20   ;;  %s2507_s19 = sphi %s2546_s19, %s3189_s19   ;;  %s2503_s18 = sphi %s2544_s18, %s3188_s18  }
   0x3   : > { %s41_s23 = ssub.s32 %s2511_s20, %s2563_s22  ;;  %s44_s24 = sadd.s32 1, %s2507_s19 }
   0x4   : > { %p42_p0 = scmp.eq.s32.totalorder %s41_s23, 0  ;;  %p51_p1 = scmp.ne.s32.totalorder %s2507_s19, %s2503_s18 }
   0x5   : > { %p52_p2 = scmp.eq.s32.totalorder %s2511_s20, 0  ;;  %p102_p3 = scmp.eq.s32.totalorder %s2560_s21, 1 }
   0x6   : > { %s2573_s25 = scalar_select %p42_p0, %s2507_s19, %s44_s24  }
   0x7   : > { %p53_p4 = por %p52_p2, %p51_p1  ;;  %p2575_p5 = por %p102_p3, %p51_p1 }
   0x8   : > { %p2254_p6 = scmp.ge.s32.totalorder %s2511_s20, 2 }
   0xa   : > { %182 = sbr.rel (%p2254_p6) target bundleno = 94 (0x5e), region = 24 }
  0x11   : > { %185 = sbr.rel (!%p53_p4) target bundleno = 94 (0x5e), region = 28  ;;  %s187_s27 = sand.u32 (%p53_p4), 1, %s2507_s19  }
  0x12   : > { %s2440_s28 = sshll.u32 (%p53_p4), %s2511_s20, 6  ;;  %s2458_s29 = smul.u32 (%p53_p4), 1152, %s187_s27 }
  0x13   : > { %s2585_s7 = scalar_lea.vmem (%p53_p4), %s3182_s1, %s2440_s28 }
  0x14   : > { %v205_v0 = vld [vmem:[%s2585_s7] sm:$0xff] (%p53_p4)  ;;  %v207_v1 = vld [vmem:[%s2585_s7 + $0x8] sm:$0xff] (%p53_p4)  ;;  %v209_v2 = vld [vmem:[%s2585_s7 + $0x10] sm:$0xff] (%p53_p4)  ;;  %s2593_s8 = scalar_lea.vmem (%p53_p4), [#allocation2], %s2458_s29 }
  0x15   : > { %v211_v3 = vld [vmem:[%s2585_s7 + $0x18] sm:$0xff] (%p53_p4)  ;;  %v213_v4 = vld [vmem:[%s2585_s7 + $0x20] sm:$0xff] (%p53_p4)  ;;  %v215_v5 = vld [vmem:[%s2585_s7 + $0x28] sm:$0xff] (%p53_p4)  ;;  %206 = vst [vmem:[%s2593_s8] sm:$0xff] (%p53_p4), %v205_v0 }
  0x16   : > { %208 = vst [vmem:[%s2593_s8 + $0x8] sm:$0xff] (%p53_p4), %v207_v1  ;;  %210 = vst [vmem:[%s2593_s8 + $0x10] sm:$0xff] (%p53_p4), %v209_v2  ;;  %v217_v6 = vld [vmem:[%s2585_s7 + $0x30] sm:$0xff] (%p53_p4)  ;;  %v219_v7 = vld [vmem:[%s2585_s7 + $0x38] sm:$0xff] (%p53_p4) }
  0x17   : > { %212 = vst [vmem:[%s2593_s8 + $0x18] sm:$0xff] (%p53_p4), %v211_v3  ;;  %214 = vst [vmem:[%s2593_s8 + $0x20] sm:$0xff] (%p53_p4), %v213_v4  ;;  %v221_v8 = vld [vmem:[%s2585_s7 + $0x80] sm:$0xff] (%p53_p4)  ;;  %v223_v9 = vld [vmem:[%s2585_s7 + $0x88] sm:$0xff] (%p53_p4) }
  0x18   : > { %216 = vst [vmem:[%s2593_s8 + $0x28] sm:$0xff] %v215_v5  ;;  %218 = vst [vmem:[%s2593_s8 + $0x30] sm:$0xff] %v217_v6  ;;  %v225_v10 = vld [vmem:[%s2585_s7 + $0x90] sm:$0xff]  ;;  %v227_v11 = vld [vmem:[%s2585_s7 + $0x98] sm:$0xff] }
  0x19   : > { %220 = vst [vmem:[%s2593_s8 + $0x38] sm:$0xff] %v219_v7  ;;  %222 = vst [vmem:[%s2593_s8 + $0x40] sm:$0xff] %v221_v8  ;;  %v229_v12 = vld [vmem:[%s2585_s7 + $0xa0] sm:$0xff]  ;;  %v231_v13 = vld [vmem:[%s2585_s7 + $0xa8] sm:$0xff] }
  0x1a   : > { %224 = vst [vmem:[%s2593_s8 + $0x48] sm:$0xff] %v223_v9  ;;  %226 = vst [vmem:[%s2593_s8 + $0x50] sm:$0xff] %v225_v10  ;;  %v233_v14 = vld [vmem:[%s2585_s7 + $0xb0] sm:$0xff]  ;;  %v235_v15 = vld [vmem:[%s2585_s7 + $0xb8] sm:$0xff] }
  0x1b   : > { %228 = vst [vmem:[%s2593_s8 + $0x58] sm:$0xff] %v227_v11  ;;  %230 = vst [vmem:[%s2593_s8 + $0x60] sm:$0xff] %v229_v12  ;;  %v237_v16 = vld [vmem:[%s2585_s7 + $0x100] sm:$0xff]  ;;  %v239_v17 = vld [vmem:[%s2585_s7 + $0x108] sm:$0xff] }
  0x1c   : > { %232 = vst [vmem:[%s2593_s8 + $0x68] sm:$0xff] %v231_v13  ;;  %234 = vst [vmem:[%s2593_s8 + $0x70] sm:$0xff] %v233_v14  ;;  %v241_v18 = vld [vmem:[%s2585_s7 + $0x110] sm:$0xff]  ;;  %v243_v19 = vld [vmem:[%s2585_s7 + $0x118] sm:$0xff] }
  0x1d   : > { %236 = vst [vmem:[%s2593_s8 + $0x78] sm:$0xff] %v235_v15  ;;  %238 = vst [vmem:[%s2593_s8 + $0x80] sm:$0xff] %v237_v16  ;;  %v245_v20 = vld [vmem:[%s2585_s7 + $0x120] sm:$0xff]  ;;  %v247_v21 = vld [vmem:[%s2585_s7 + $0x128] sm:$0xff] }
  0x1e   : > { %240 = vst [vmem:[%s2593_s8 + $0x88] sm:$0xff] %v239_v17  ;;  %242 = vst [vmem:[%s2593_s8 + $0x90] sm:$0xff] %v241_v18  ;;  %v249_v22 = vld [vmem:[%s2585_s7 + $0x130] sm:$0xff]  ;;  %v251_v23 = vld [vmem:[%s2585_s7 + $0x138] sm:$0xff] }
  0x1f   : > { %244 = vst [vmem:[%s2593_s8 + $0x98] sm:$0xff] %v243_v19  ;;  %246 = vst [vmem:[%s2593_s8 + $0xa0] sm:$0xff] %v245_v20  ;;  %v253_v24 = vld [vmem:[%s2585_s7 + $0x180] sm:$0xff]  ;;  %v255_v25 = vld [vmem:[%s2585_s7 + $0x188] sm:$0xff] }
  0x20   : > { %248 = vst [vmem:[%s2593_s8 + $0xa8] sm:$0xff] %v247_v21  ;;  %250 = vst [vmem:[%s2593_s8 + $0xb0] sm:$0xff] %v249_v22  ;;  %v257_v26 = vld [vmem:[%s2585_s7 + $0x190] sm:$0xff]  ;;  %v259_v27 = vld [vmem:[%s2585_s7 + $0x198] sm:$0xff] }
  0x21   : > { %252 = vst [vmem:[%s2593_s8 + $0xb8] sm:$0xff] %v251_v23  ;;  %254 = vst [vmem:[%s2593_s8 + $0xc0] sm:$0xff] %v253_v24  ;;  %v261_v28 = vld [vmem:[%s2585_s7 + $0x1a0] sm:$0xff]  ;;  %v263_v29 = vld [vmem:[%s2585_s7 + $0x1a8] sm:$0xff] }
  0x22   : > { %256 = vst [vmem:[%s2593_s8 + $0xc8] sm:$0xff] %v255_v25  ;;  %258 = vst [vmem:[%s2593_s8 + $0xd0] sm:$0xff] %v257_v26  ;;  %v265_v30 = vld [vmem:[%s2585_s7 + $0x1b0] sm:$0xff]  ;;  %v267_v31 = vld [vmem:[%s2585_s7 + $0x1b8] sm:$0xff] }
  0x23   : > { %260 = vst [vmem:[%s2593_s8 + $0xd8] sm:$0xff] %v259_v27  ;;  %262 = vst [vmem:[%s2593_s8 + $0xe0] sm:$0xff] %v261_v28  ;;  %v269_v32 = vld [vmem:[%s2585_s7 + $0x200] sm:$0xff]  ;;  %v271_v33 = vld [vmem:[%s2585_s7 + $0x208] sm:$0xff] }
  0x24   : > { %264 = vst [vmem:[%s2593_s8 + $0xe8] sm:$0xff] %v263_v29  ;;  %266 = vst [vmem:[%s2593_s8 + $0xf0] sm:$0xff] %v265_v30  ;;  %v273_v34 = vld [vmem:[%s2585_s7 + $0x210] sm:$0xff]  ;;  %v275_v35 = vld [vmem:[%s2585_s7 + $0x218] sm:$0xff] }
  0x25   : > { %268 = vst [vmem:[%s2593_s8 + $0xf8] sm:$0xff] %v267_v31  ;;  %270 = vst [vmem:[%s2593_s8 + $0x100] sm:$0xff] %v269_v32  ;;  %v277_v36 = vld [vmem:[%s2585_s7 + $0x220] sm:$0xff]  ;;  %v279_v37 = vld [vmem:[%s2585_s7 + $0x228] sm:$0xff] }
  0x26   : > { %272 = vst [vmem:[%s2593_s8 + $0x108] sm:$0xff] %v271_v33  ;;  %274 = vst [vmem:[%s2593_s8 + $0x110] sm:$0xff] %v273_v34  ;;  %v281_v38 = vld [vmem:[%s2585_s7 + $0x230] sm:$0xff]  ;;  %v283_v39 = vld [vmem:[%s2585_s7 + $0x238] sm:$0xff] }
  0x27   : > { %276 = vst [vmem:[%s2593_s8 + $0x118] sm:$0xff] %v275_v35  ;;  %278 = vst [vmem:[%s2593_s8 + $0x120] sm:$0xff] %v277_v36  ;;  %v285_v40 = vld [vmem:[%s2585_s7 + $0x280] sm:$0xff]  ;;  %v287_v41 = vld [vmem:[%s2585_s7 + $0x288] sm:$0xff] }
  0x28   : > { %280 = vst [vmem:[%s2593_s8 + $0x128] sm:$0xff] %v279_v37  ;;  %282 = vst [vmem:[%s2593_s8 + $0x130] sm:$0xff] %v281_v38  ;;  %v289_v42 = vld [vmem:[%s2585_s7 + $0x290] sm:$0xff]  ;;  %v291_v43 = vld [vmem:[%s2585_s7 + $0x298] sm:$0xff] }
  0x29   : > { %284 = vst [vmem:[%s2593_s8 + $0x138] sm:$0xff] %v283_v39  ;;  %286 = vst [vmem:[%s2593_s8 + $0x140] sm:$0xff] %v285_v40  ;;  %v293_v44 = vld [vmem:[%s2585_s7 + $0x2a0] sm:$0xff]  ;;  %v295_v45 = vld [vmem:[%s2585_s7 + $0x2a8] sm:$0xff] }
  0x2a   : > { %288 = vst [vmem:[%s2593_s8 + $0x148] sm:$0xff] %v287_v41  ;;  %290 = vst [vmem:[%s2593_s8 + $0x150] sm:$0xff] %v289_v42  ;;  %v297_v46 = vld [vmem:[%s2585_s7 + $0x2b0] sm:$0xff]  ;;  %v299_v47 = vld [vmem:[%s2585_s7 + $0x2b8] sm:$0xff] }
  0x2b   : > { %292 = vst [vmem:[%s2593_s8 + $0x158] sm:$0xff] %v291_v43  ;;  %294 = vst [vmem:[%s2593_s8 + $0x160] sm:$0xff] %v293_v44  ;;  %v301_v48 = vld [vmem:[%s2585_s7 + $0x300] sm:$0xff]  ;;  %v303_v49 = vld [vmem:[%s2585_s7 + $0x308] sm:$0xff] }
  0x2c   : > { %296 = vst [vmem:[%s2593_s8 + $0x168] sm:$0xff] %v295_v45  ;;  %298 = vst [vmem:[%s2593_s8 + $0x170] sm:$0xff] %v297_v46  ;;  %v305_v50 = vld [vmem:[%s2585_s7 + $0x310] sm:$0xff]  ;;  %v307_v51 = vld [vmem:[%s2585_s7 + $0x318] sm:$0xff] }
  0x2d   : > { %300 = vst [vmem:[%s2593_s8 + $0x178] sm:$0xff] %v299_v47  ;;  %302 = vst [vmem:[%s2593_s8 + $0x180] sm:$0xff] %v301_v48  ;;  %v309_v52 = vld [vmem:[%s2585_s7 + $0x320] sm:$0xff]  ;;  %v311_v53 = vld [vmem:[%s2585_s7 + $0x328] sm:$0xff] }
  0x2e   : > { %304 = vst [vmem:[%s2593_s8 + $0x188] sm:$0xff] %v303_v49  ;;  %306 = vst [vmem:[%s2593_s8 + $0x190] sm:$0xff] %v305_v50  ;;  %v313_v54 = vld [vmem:[%s2585_s7 + $0x330] sm:$0xff]  ;;  %v315_v55 = vld [vmem:[%s2585_s7 + $0x338] sm:$0xff] }
  0x2f   : > { %308 = vst [vmem:[%s2593_s8 + $0x198] sm:$0xff] %v307_v51  ;;  %310 = vst [vmem:[%s2593_s8 + $0x1a0] sm:$0xff] %v309_v52  ;;  %v317_v56 = vld [vmem:[%s2585_s7 + $0x380] sm:$0xff]  ;;  %v319_v57 = vld [vmem:[%s2585_s7 + $0x388] sm:$0xff] }
  0x30   : > { %312 = vst [vmem:[%s2593_s8 + $0x1a8] sm:$0xff] %v311_v53  ;;  %314 = vst [vmem:[%s2593_s8 + $0x1b0] sm:$0xff] %v313_v54  ;;  %v321_v58 = vld [vmem:[%s2585_s7 + $0x390] sm:$0xff]  ;;  %v323_v59 = vld [vmem:[%s2585_s7 + $0x398] sm:$0xff] }
  0x31   : > { %316 = vst [vmem:[%s2593_s8 + $0x1b8] sm:$0xff] %v315_v55  ;;  %318 = vst [vmem:[%s2593_s8 + $0x1c0] sm:$0xff] %v317_v56  ;;  %v325_v60 = vld [vmem:[%s2585_s7 + $0x3a0] sm:$0xff]  ;;  %v327_v61 = vld [vmem:[%s2585_s7 + $0x3a8] sm:$0xff] }
  0x32   : > { %320 = vst [vmem:[%s2593_s8 + $0x1c8] sm:$0xff] %v319_v57  ;;  %322 = vst [vmem:[%s2593_s8 + $0x1d0] sm:$0xff] %v321_v58  ;;  %v329_v62 = vld [vmem:[%s2585_s7 + $0x3b0] sm:$0xff]  ;;  %v331_v63 = vld [vmem:[%s2585_s7 + $0x3b8] sm:$0xff] }
  0x33   : > { %324 = vst [vmem:[%s2593_s8 + $0x1d8] sm:$0xff] %v323_v59  ;;  %326 = vst [vmem:[%s2593_s8 + $0x1e0] sm:$0xff] %v325_v60  ;;  %v333_v0 = vld [vmem:[%s2585_s7 + $0x400] sm:$0xff]  ;;  %v335_v1 = vld [vmem:[%s2585_s7 + $0x408] sm:$0xff] }
  0x34   : > { %328 = vst [vmem:[%s2593_s8 + $0x1e8] sm:$0xff] %v327_v61  ;;  %330 = vst [vmem:[%s2593_s8 + $0x1f0] sm:$0xff] %v329_v62  ;;  %v337_v2 = vld [vmem:[%s2585_s7 + $0x410] sm:$0xff]  ;;  %v339_v3 = vld [vmem:[%s2585_s7 + $0x418] sm:$0xff] }
  0x35   : > { %332 = vst [vmem:[%s2593_s8 + $0x1f8] sm:$0xff] %v331_v63  ;;  %334 = vst [vmem:[%s2593_s8 + $0x200] sm:$0xff] %v333_v0  ;;  %v341_v4 = vld [vmem:[%s2585_s7 + $0x420] sm:$0xff]  ;;  %v343_v5 = vld [vmem:[%s2585_s7 + $0x428] sm:$0xff] }
  0x36   : > { %336 = vst [vmem:[%s2593_s8 + $0x208] sm:$0xff] %v335_v1  ;;  %338 = vst [vmem:[%s2593_s8 + $0x210] sm:$0xff] %v337_v2  ;;  %v345_v6 = vld [vmem:[%s2585_s7 + $0x430] sm:$0xff]  ;;  %v347_v7 = vld [vmem:[%s2585_s7 + $0x438] sm:$0xff] }
  0x37   : > { %340 = vst [vmem:[%s2593_s8 + $0x218] sm:$0xff] %v339_v3  ;;  %342 = vst [vmem:[%s2593_s8 + $0x220] sm:$0xff] %v341_v4  ;;  %v349_v8 = vld [vmem:[%s2585_s7 + $0x480] sm:$0xff]  ;;  %v351_v9 = vld [vmem:[%s2585_s7 + $0x488] sm:$0xff] }
  0x38   : > { %344 = vst [vmem:[%s2593_s8 + $0x228] sm:$0xff] %v343_v5  ;;  %346 = vst [vmem:[%s2593_s8 + $0x230] sm:$0xff] %v345_v6  ;;  %v353_v10 = vld [vmem:[%s2585_s7 + $0x490] sm:$0xff]  ;;  %v355_v11 = vld [vmem:[%s2585_s7 + $0x498] sm:$0xff] }
  0x39   : > { %348 = vst [vmem:[%s2593_s8 + $0x238] sm:$0xff] %v347_v7  ;;  %350 = vst [vmem:[%s2593_s8 + $0x240] sm:$0xff] %v349_v8  ;;  %v357_v12 = vld [vmem:[%s2585_s7 + $0x4a0] sm:$0xff]  ;;  %v359_v13 = vld [vmem:[%s2585_s7 + $0x4a8] sm:$0xff] }
  0x3a   : > { %352 = vst [vmem:[%s2593_s8 + $0x248] sm:$0xff] %v351_v9  ;;  %354 = vst [vmem:[%s2593_s8 + $0x250] sm:$0xff] %v353_v10  ;;  %v361_v14 = vld [vmem:[%s2585_s7 + $0x4b0] sm:$0xff]  ;;  %v363_v15 = vld [vmem:[%s2585_s7 + $0x4b8] sm:$0xff] }
  0x3b   : > { %356 = vst [vmem:[%s2593_s8 + $0x258] sm:$0xff] %v355_v11  ;;  %358 = vst [vmem:[%s2593_s8 + $0x260] sm:$0xff] %v357_v12  ;;  %v365_v16 = vld [vmem:[%s2585_s7 + $0x500] sm:$0xff]  ;;  %v367_v17 = vld [vmem:[%s2585_s7 + $0x508] sm:$0xff] }
  0x3c   : > { %360 = vst [vmem:[%s2593_s8 + $0x268] sm:$0xff] %v359_v13  ;;  %362 = vst [vmem:[%s2593_s8 + $0x270] sm:$0xff] %v361_v14  ;;  %v369_v18 = vld [vmem:[%s2585_s7 + $0x510] sm:$0xff]  ;;  %v371_v19 = vld [vmem:[%s2585_s7 + $0x518] sm:$0xff] }
  0x3d   : > { %364 = vst [vmem:[%s2593_s8 + $0x278] sm:$0xff] %v363_v15  ;;  %366 = vst [vmem:[%s2593_s8 + $0x280] sm:$0xff] %v365_v16  ;;  %v373_v20 = vld [vmem:[%s2585_s7 + $0x520] sm:$0xff]  ;;  %v375_v21 = vld [vmem:[%s2585_s7 + $0x528] sm:$0xff] }
  0x3e   : > { %368 = vst [vmem:[%s2593_s8 + $0x288] sm:$0xff] %v367_v17  ;;  %370 = vst [vmem:[%s2593_s8 + $0x290] sm:$0xff] %v369_v18  ;;  %v377_v22 = vld [vmem:[%s2585_s7 + $0x530] sm:$0xff]  ;;  %v379_v23 = vld [vmem:[%s2585_s7 + $0x538] sm:$0xff] }
  0x3f   : > { %372 = vst [vmem:[%s2593_s8 + $0x298] sm:$0xff] %v371_v19  ;;  %374 = vst [vmem:[%s2593_s8 + $0x2a0] sm:$0xff] %v373_v20  ;;  %v381_v24 = vld [vmem:[%s2585_s7 + $0x580] sm:$0xff]  ;;  %v383_v25 = vld [vmem:[%s2585_s7 + $0x588] sm:$0xff] }
  0x40   : > { %376 = vst [vmem:[%s2593_s8 + $0x2a8] sm:$0xff] %v375_v21  ;;  %378 = vst [vmem:[%s2593_s8 + $0x2b0] sm:$0xff] %v377_v22  ;;  %v385_v26 = vld [vmem:[%s2585_s7 + $0x590] sm:$0xff]  ;;  %v387_v27 = vld [vmem:[%s2585_s7 + $0x598] sm:$0xff] }
  0x41   : > { %380 = vst [vmem:[%s2593_s8 + $0x2b8] sm:$0xff] %v379_v23  ;;  %382 = vst [vmem:[%s2593_s8 + $0x2c0] sm:$0xff] %v381_v24  ;;  %v389_v28 = vld [vmem:[%s2585_s7 + $0x5a0] sm:$0xff]  ;;  %v391_v29 = vld [vmem:[%s2585_s7 + $0x5a8] sm:$0xff] }
  0x42   : > { %384 = vst [vmem:[%s2593_s8 + $0x2c8] sm:$0xff] %v383_v25  ;;  %386 = vst [vmem:[%s2593_s8 + $0x2d0] sm:$0xff] %v385_v26  ;;  %v393_v30 = vld [vmem:[%s2585_s7 + $0x5b0] sm:$0xff]  ;;  %v395_v31 = vld [vmem:[%s2585_s7 + $0x5b8] sm:$0xff] }
  0x43   : > { %388 = vst [vmem:[%s2593_s8 + $0x2d8] sm:$0xff] %v387_v27  ;;  %390 = vst [vmem:[%s2593_s8 + $0x2e0] sm:$0xff] %v389_v28  ;;  %v397_v32 = vld [vmem:[%s2585_s7 + $0x600] sm:$0xff]  ;;  %v399_v33 = vld [vmem:[%s2585_s7 + $0x608] sm:$0xff] }
  0x44   : > { %392 = vst [vmem:[%s2593_s8 + $0x2e8] sm:$0xff] %v391_v29  ;;  %394 = vst [vmem:[%s2593_s8 + $0x2f0] sm:$0xff] %v393_v30  ;;  %v401_v34 = vld [vmem:[%s2585_s7 + $0x610] sm:$0xff]  ;;  %v403_v35 = vld [vmem:[%s2585_s7 + $0x618] sm:$0xff] }
  0x45   : > { %396 = vst [vmem:[%s2593_s8 + $0x2f8] sm:$0xff] %v395_v31  ;;  %398 = vst [vmem:[%s2593_s8 + $0x300] sm:$0xff] %v397_v32  ;;  %v405_v36 = vld [vmem:[%s2585_s7 + $0x620] sm:$0xff]  ;;  %v407_v37 = vld [vmem:[%s2585_s7 + $0x628] sm:$0xff] }
  0x46   : > { %400 = vst [vmem:[%s2593_s8 + $0x308] sm:$0xff] %v399_v33  ;;  %402 = vst [vmem:[%s2593_s8 + $0x310] sm:$0xff] %v401_v34  ;;  %v409_v38 = vld [vmem:[%s2585_s7 + $0x630] sm:$0xff]  ;;  %v411_v39 = vld [vmem:[%s2585_s7 + $0x638] sm:$0xff] }
  0x47   : > { %404 = vst [vmem:[%s2593_s8 + $0x318] sm:$0xff] %v403_v35  ;;  %406 = vst [vmem:[%s2593_s8 + $0x320] sm:$0xff] %v405_v36  ;;  %v413_v40 = vld [vmem:[%s2585_s7 + $0x680] sm:$0xff]  ;;  %v415_v41 = vld [vmem:[%s2585_s7 + $0x688] sm:$0xff] }
  0x48   : > { %408 = vst [vmem:[%s2593_s8 + $0x328] sm:$0xff] %v407_v37  ;;  %410 = vst [vmem:[%s2593_s8 + $0x330] sm:$0xff] %v409_v38  ;;  %v417_v42 = vld [vmem:[%s2585_s7 + $0x690] sm:$0xff]  ;;  %v419_v43 = vld [vmem:[%s2585_s7 + $0x698] sm:$0xff] }
  0x49   : > { %412 = vst [vmem:[%s2593_s8 + $0x338] sm:$0xff] %v411_v39  ;;  %414 = vst [vmem:[%s2593_s8 + $0x340] sm:$0xff] %v413_v40  ;;  %v421_v44 = vld [vmem:[%s2585_s7 + $0x6a0] sm:$0xff]  ;;  %v423_v45 = vld [vmem:[%s2585_s7 + $0x6a8] sm:$0xff] }
  0x4a   : > { %416 = vst [vmem:[%s2593_s8 + $0x348] sm:$0xff] %v415_v41  ;;  %418 = vst [vmem:[%s2593_s8 + $0x350] sm:$0xff] %v417_v42  ;;  %v425_v46 = vld [vmem:[%s2585_s7 + $0x6b0] sm:$0xff]  ;;  %v427_v47 = vld [vmem:[%s2585_s7 + $0x6b8] sm:$0xff] }
  0x4b   : > { %420 = vst [vmem:[%s2593_s8 + $0x358] sm:$0xff] %v419_v43  ;;  %422 = vst [vmem:[%s2593_s8 + $0x360] sm:$0xff] %v421_v44  ;;  %v429_v48 = vld [vmem:[%s2585_s7 + $0x700] sm:$0xff]  ;;  %v431_v49 = vld [vmem:[%s2585_s7 + $0x708] sm:$0xff] }
  0x4c   : > { %424 = vst [vmem:[%s2593_s8 + $0x368] sm:$0xff] %v423_v45  ;;  %426 = vst [vmem:[%s2593_s8 + $0x370] sm:$0xff] %v425_v46  ;;  %v433_v50 = vld [vmem:[%s2585_s7 + $0x710] sm:$0xff]  ;;  %v435_v51 = vld [vmem:[%s2585_s7 + $0x718] sm:$0xff] }
  0x4d   : > { %428 = vst [vmem:[%s2593_s8 + $0x378] sm:$0xff] %v427_v47  ;;  %430 = vst [vmem:[%s2593_s8 + $0x380] sm:$0xff] %v429_v48  ;;  %v437_v52 = vld [vmem:[%s2585_s7 + $0x720] sm:$0xff]  ;;  %v439_v53 = vld [vmem:[%s2585_s7 + $0x728] sm:$0xff] }
  0x4e   : > { %432 = vst [vmem:[%s2593_s8 + $0x388] sm:$0xff] %v431_v49  ;;  %434 = vst [vmem:[%s2593_s8 + $0x390] sm:$0xff] %v433_v50  ;;  %v441_v54 = vld [vmem:[%s2585_s7 + $0x730] sm:$0xff]  ;;  %v443_v55 = vld [vmem:[%s2585_s7 + $0x738] sm:$0xff] }
  0x4f   : > { %436 = vst [vmem:[%s2593_s8 + $0x398] sm:$0xff] %v435_v51  ;;  %438 = vst [vmem:[%s2593_s8 + $0x3a0] sm:$0xff] %v437_v52  ;;  %v445_v56 = vld [vmem:[%s2585_s7 + $0x780] sm:$0xff]  ;;  %v447_v57 = vld [vmem:[%s2585_s7 + $0x788] sm:$0xff] }
  0x50   : > { %440 = vst [vmem:[%s2593_s8 + $0x3a8] sm:$0xff] %v439_v53  ;;  %442 = vst [vmem:[%s2593_s8 + $0x3b0] sm:$0xff] %v441_v54  ;;  %v449_v58 = vld [vmem:[%s2585_s7 + $0x790] sm:$0xff]  ;;  %v451_v59 = vld [vmem:[%s2585_s7 + $0x798] sm:$0xff] }
  0x51   : > { %444 = vst [vmem:[%s2593_s8 + $0x3b8] sm:$0xff] %v443_v55  ;;  %446 = vst [vmem:[%s2593_s8 + $0x3c0] sm:$0xff] %v445_v56  ;;  %v453_v60 = vld [vmem:[%s2585_s7 + $0x7a0] sm:$0xff]  ;;  %v455_v61 = vld [vmem:[%s2585_s7 + $0x7a8] sm:$0xff] }
  0x52   : > { %448 = vst [vmem:[%s2593_s8 + $0x3c8] sm:$0xff] %v447_v57  ;;  %450 = vst [vmem:[%s2593_s8 + $0x3d0] sm:$0xff] %v449_v58  ;;  %v457_v62 = vld [vmem:[%s2585_s7 + $0x7b0] sm:$0xff]  ;;  %v459_v63 = vld [vmem:[%s2585_s7 + $0x7b8] sm:$0xff] }
  0x53   : > { %452 = vst [vmem:[%s2593_s8 + $0x3d8] sm:$0xff] %v451_v59  ;;  %454 = vst [vmem:[%s2593_s8 + $0x3e0] sm:$0xff] %v453_v60  ;;  %v461_v0 = vld [vmem:[%s2585_s7 + $0x800] sm:$0xff]  ;;  %v463_v1 = vld [vmem:[%s2585_s7 + $0x808] sm:$0xff] }
  0x54   : > { %456 = vst [vmem:[%s2593_s8 + $0x3e8] sm:$0xff] %v455_v61  ;;  %458 = vst [vmem:[%s2593_s8 + $0x3f0] sm:$0xff] %v457_v62  ;;  %v465_v2 = vld [vmem:[%s2585_s7 + $0x810] sm:$0xff]  ;;  %v467_v3 = vld [vmem:[%s2585_s7 + $0x818] sm:$0xff] }
  0x55   : > { %460 = vst [vmem:[%s2593_s8 + $0x3f8] sm:$0xff] %v459_v63  ;;  %462 = vst [vmem:[%s2593_s8 + $0x400] sm:$0xff] %v461_v0  ;;  %v469_v4 = vld [vmem:[%s2585_s7 + $0x820] sm:$0xff]  ;;  %v471_v5 = vld [vmem:[%s2585_s7 + $0x828] sm:$0xff] }
  0x56   : > { %464 = vst [vmem:[%s2593_s8 + $0x408] sm:$0xff] %v463_v1  ;;  %466 = vst [vmem:[%s2593_s8 + $0x410] sm:$0xff] %v465_v2  ;;  %v473_v6 = vld [vmem:[%s2585_s7 + $0x830] sm:$0xff]  ;;  %v475_v7 = vld [vmem:[%s2585_s7 + $0x838] sm:$0xff] }
  0x57   : > { %468 = vst [vmem:[%s2593_s8 + $0x418] sm:$0xff] %v467_v3  ;;  %470 = vst [vmem:[%s2593_s8 + $0x420] sm:$0xff] %v469_v4  ;;  %v477_v8 = vld [vmem:[%s2585_s7 + $0x880] sm:$0xff]  ;;  %v479_v9 = vld [vmem:[%s2585_s7 + $0x888] sm:$0xff] }
  0x58   : > { %472 = vst [vmem:[%s2593_s8 + $0x428] sm:$0xff] %v471_v5  ;;  %474 = vst [vmem:[%s2593_s8 + $0x430] sm:$0xff] %v473_v6  ;;  %v481_v10 = vld [vmem:[%s2585_s7 + $0x890] sm:$0xff]  ;;  %v483_v11 = vld [vmem:[%s2585_s7 + $0x898] sm:$0xff] }
  0x59   : > { %476 = vst [vmem:[%s2593_s8 + $0x438] sm:$0xff] %v475_v7  ;;  %478 = vst [vmem:[%s2593_s8 + $0x440] sm:$0xff] %v477_v8  ;;  %v485_v12 = vld [vmem:[%s2585_s7 + $0x8a0] sm:$0xff]  ;;  %v487_v13 = vld [vmem:[%s2585_s7 + $0x8a8] sm:$0xff] }
  0x5a   : > { %480 = vst [vmem:[%s2593_s8 + $0x448] sm:$0xff] %v479_v9  ;;  %482 = vst [vmem:[%s2593_s8 + $0x450] sm:$0xff] %v481_v10  ;;  %v489_v14 = vld [vmem:[%s2585_s7 + $0x8b0] sm:$0xff]  ;;  %v491_v15 = vld [vmem:[%s2585_s7 + $0x8b8] sm:$0xff] }
  0x5b   : > { %484 = vst [vmem:[%s2593_s8 + $0x458] sm:$0xff] %v483_v11  ;;  %486 = vst [vmem:[%s2593_s8 + $0x460] sm:$0xff] %v485_v12 }
  0x5c   : > { %488 = vst [vmem:[%s2593_s8 + $0x468] sm:$0xff] %v487_v13  ;;  %490 = vst [vmem:[%s2593_s8 + $0x470] sm:$0xff] %v489_v14 }
  0x5d   : > { %492 = vst [vmem:[%s2593_s8 + $0x478] sm:$0xff] %v491_v15 }
  0x5e PF: > { %p2257_p7 = scmp.ge.s32.totalorder %s2511_s20, 1  ;;  %p497_p8 = scmp.lt.s32.totalorder %s2511_s20, 3 }
  0x60   : > { %p498_p9 = pnand %p2257_p7, %p497_p8 }
  0x61   : > { %s2880_s9 = sand.u32 (!%p498_p9), 1, %s2503_s18   ;;  %v2885_v16 = vld [vmem:[%s3181_s0 + $0x4] ss:$8 sps:$4 sm:$0xff] (!%p498_p9)   ;;  %vm1428_vm0 = vcmask (!%p498_p9), 130048   ;;  %v2513_v18 = vmov (!%p498_p9), 0  }
  0x62   : > { %501 = sbr.rel (%p498_p9) target bundleno = 638 (0x27e), region = 51  ;;  %v687_v17 = vld [vmem:[%s3183_s2] sm:$0xff] (!%p498_p9)  ;;  %2407 = vmatprep.mubr.msk.bf16.mxu0 (!%p498_p9), %vm1428_vm0, %v2885_v16  ;;  %2408 = vmatprep.mubr.msk.bf16.mxu1 (!%p498_p9), %vm1428_vm0, %v2885_v16  ;;  %v688_v38 = vld [vmem:[%s3183_s2 + $0x8] sm:$0xff] (!%p498_p9)  ;;  %s2258_s23 = sshll.u32 (!%p498_p9), %s2880_s9, 7 }
  0x63   : > { %s2459_s12 = smul.u32 (!%p498_p9), 1152, %s2880_s9  ;;  %2485 = vset.pattern.permute.xlu0 (!%p498_p9), %v2513_v18  ;;  %s3080_s24 = scalar_lea.vmem (!%p498_p9), [#allocation3], %s2258_s23 }
  0x64   : > { %691 = vperm.xlu0 (!%p498_p9), %2485, %v687_v17   ;;  %s2259_s27 = sshll.u32 (!%p498_p9), %s2880_s9, 4 }
  0x65   : > { %s2895_s15 = scalar_lea.vmem (!%p498_p9), [#allocation2], %s2459_s12  ;;  %s3125_s28 = scalar_lea.vmem (!%p498_p9), [#allocation4], %s2259_s27 }
  0x66   : > { %v543_v19 = vld [vmem:[%s2895_s15] sm:$0xff] (!%p498_p9)  ;;  %v544_v21 = vld [vmem:[%s2895_s15 + $0x8] sm:$0xff] (!%p498_p9)  ;;  %s3128_s29 = scalar_lea.vmem (!%p498_p9), [#allocation5], %s2259_s27 }
  0x67   : > { %v551_v20 = vld [vmem:[%s2895_s15 + $0x40] sm:$0xff] (!%p498_p9)  ;;  %v552_v23 = vld [vmem:[%s2895_s15 + $0x48] sm:$0xff] (!%p498_p9) }
  0x68   : > { %v2264_v22 = vcombine.high (!%p498_p9), %v543_v19, %v551_v20  ;;  %v2263_v24 = vcombine.low (!%p498_p9), %v543_v19, %v551_v20  ;;  %v559_v25 = vld [vmem:[%s2895_s15 + $0x80] sm:$0xff] (!%p498_p9)  ;;  %v2266_v27 = vcombine.high (!%p498_p9), %v544_v21, %v552_v23  ;;  %v2265_v28 = vcombine.low (!%p498_p9), %v544_v21, %v552_v23  ;;  %v560_v30 = vld [vmem:[%s2895_s15 + $0x88] sm:$0xff] (!%p498_p9)  ;;  %696 = vperm.xlu0 (!%p498_p9), %2485, %v688_v38   ;;  %v562_v38 = vld [vmem:[%s2895_s15 + $0x98] sm:$0xff] (!%p498_p9) }
  0x69   : > { %v567_v26 = vld [vmem:[%s2895_s15 + $0xc0] sm:$0xff]  ;;  %v568_v31 = vld [vmem:[%s2895_s15 + $0xc8] sm:$0xff]  ;;  %s2457_s30 = sshll.u32 (%p2575_p5), %s2560_s21, 6 }
  0x6a   : > { %v2280_v29 = vcombine.high %v559_v25, %v567_v26  ;;  %v575_v32 = vld [vmem:[%s2895_s15 + $0x100] sm:$0xff]  ;;  %1432 = vmatprep.subr.bf16.mxu0 %v2264_v22  ;;  %v2282_v33 = vcombine.high %v560_v30, %v568_v31  ;;  %v576_v35 = vld [vmem:[%s2895_s15 + $0x108] sm:$0xff]  ;;  %1475 = vmatprep.subr.bf16.mxu1 %v2266_v27  ;;  %v2279_v37 = vcombine.low %v559_v25, %v567_v26  ;;  %v545_v27 = vld [vmem:[%s2895_s15 + $0x10] sm:$0xff]  ;;  %s2009_s8 = scalar_lea.vmem (%p2575_p5), %s3184_s3, %s2457_s30 }
  0x6b   : > { %v583_v34 = vld [vmem:[%s2895_s15 + $0x140] sm:$0xff]  ;;  %v584_v36 = vld [vmem:[%s2895_s15 + $0x148] sm:$0xff]  ;;  %1433 = vmatpush1.bf16.msra.mxu0 %v2263_v24  ;;  %1476 = vmatpush1.bf16.msra.mxu1 %v2265_v28  ;;  %v2281_v39 = vcombine.low %v560_v30, %v568_v31  ;;  %v553_v28 = vld [vmem:[%s2895_s15 + $0x50] sm:$0xff] }
  0x6c   : > { %1434 = vmatprep.subr.bf16.mxu0 %v2280_v29  ;;  %v2296_v40 = vcombine.high %v575_v32, %v583_v34  ;;  %1477 = vmatprep.subr.bf16.mxu1 %v2282_v33  ;;  %v2298_v41 = vcombine.high %v576_v35, %v584_v36  ;;  %v591_v42 = vld [vmem:[%s2895_s15 + $0x180] sm:$0xff]  ;;  %v592_v44 = vld [vmem:[%s2895_s15 + $0x188] sm:$0xff]  ;;  %v2295_v46 = vcombine.low %v575_v32, %v583_v34  ;;  %v546_v29 = vld [vmem:[%s2895_s15 + $0x18] sm:$0xff] }
  0x6d   : > { %v599_v43 = vld [vmem:[%s2895_s15 + $0x1c0] sm:$0xff]  ;;  %v600_v45 = vld [vmem:[%s2895_s15 + $0x1c8] sm:$0xff]  ;;  %v2297_v47 = vcombine.low %v576_v35, %v584_v36  ;;  %v554_v30 = vld [vmem:[%s2895_s15 + $0x58] sm:$0xff]  ;;  %v2268_v33 = vcombine.high %v545_v27, %v553_v28 }
  0x6e   : > { %v2312_v48 = vcombine.high %v591_v42, %v599_v43  ;;  %v2314_v49 = vcombine.high %v592_v44, %v600_v45  ;;  %v607_v50 = vld [vmem:[%s2895_s15 + $0x200] sm:$0xff]  ;;  %v608_v52 = vld [vmem:[%s2895_s15 + $0x208] sm:$0xff]  ;;  %v2311_v54 = vcombine.low %v591_v42, %v599_v43  ;;  %v2313_v55 = vcombine.low %v592_v44, %v600_v45  ;;  %v561_v35 = vld [vmem:[%s2895_s15 + $0x90] sm:$0xff] }
  0x6f   : > { %1435 = vmatpush1.bf16.msra.mxu0 %v2279_v37  ;;  %1478 = vmatpush1.bf16.msra.mxu1 %v2281_v39  ;;  %v615_v51 = vld [vmem:[%s2895_s15 + $0x240] sm:$0xff]  ;;  %v616_v53 = vld [vmem:[%s2895_s15 + $0x248] sm:$0xff]  ;;  %v2270_v34 = vcombine.high %v546_v29, %v554_v30  ;;  %v569_v36 = vld [vmem:[%s2895_s15 + $0xd0] sm:$0xff] }
  0x70   : > { %1436 = vmatprep.subr.bf16.mxu0 %v2296_v40  ;;  %1479 = vmatprep.subr.bf16.mxu1 %v2298_v41  ;;  %v2328_v56 = vcombine.high %v607_v50, %v615_v51  ;;  %v2330_v57 = vcombine.high %v608_v52, %v616_v53  ;;  %v623_v58 = vld [vmem:[%s2895_s15 + $0x280] sm:$0xff]  ;;  %v624_v60 = vld [vmem:[%s2895_s15 + $0x288] sm:$0xff]  ;;  %v2327_v62 = vcombine.low %v607_v50, %v615_v51  ;;  %v570_v39 = vld [vmem:[%s2895_s15 + $0xd8] sm:$0xff] }
  0x71   : > { %v631_v59 = vld [vmem:[%s2895_s15 + $0x2c0] sm:$0xff]  ;;  %v632_v61 = vld [vmem:[%s2895_s15 + $0x2c8] sm:$0xff]  ;;  %v2329_v63 = vcombine.low %v608_v52, %v616_v53  ;;  %v2267_v40 = vcombine.low %v545_v27, %v553_v28  ;;  %v2269_v41 = vcombine.low %v546_v29, %v554_v30  ;;  %v2284_v42 = vcombine.high %v561_v35, %v569_v36  ;;  %v577_v44 = vld [vmem:[%s2895_s15 + $0x110] sm:$0xff] }
  0x72   : > { %v2344_v0 = vcombine.high %v623_v58, %v631_v59  ;;  %v2346_v1 = vcombine.high %v624_v60, %v632_v61  ;;  %v639_v2 = vld [vmem:[%s2895_s15 + $0x300] sm:$0xff]  ;;  %v640_v4 = vld [vmem:[%s2895_s15 + $0x308] sm:$0xff]  ;;  %v2343_v6 = vcombine.low %v623_v58, %v631_v59  ;;  %v2345_v7 = vcombine.low %v624_v60, %v632_v61  ;;  %v585_v45 = vld [vmem:[%s2895_s15 + $0x150] sm:$0xff] }
  0x73   : > { %1437 = vmatpush1.bf16.msra.mxu0 %v2295_v46  ;;  %1480 = vmatpush1.bf16.msra.mxu1 %v2297_v47  ;;  %v647_v3 = vld [vmem:[%s2895_s15 + $0x340] sm:$0xff]  ;;  %v648_v5 = vld [vmem:[%s2895_s15 + $0x348] sm:$0xff]  ;;  %v2286_v43 = vcombine.high %v562_v38, %v570_v39  ;;  %v578_v46 = vld [vmem:[%s2895_s15 + $0x118] sm:$0xff]  ;;  %v2300_v50 = vcombine.high %v577_v44, %v585_v45 }
  0x74   : > { %1438 = vmatprep.subr.bf16.mxu0 %v2312_v48  ;;  %1481 = vmatprep.subr.bf16.mxu1 %v2314_v49  ;;  %v2360_v8 = vcombine.high %v639_v2, %v647_v3  ;;  %v2362_v9 = vcombine.high %v640_v4, %v648_v5  ;;  %v655_v10 = vld [vmem:[%s2895_s15 + $0x380] sm:$0xff]  ;;  %v656_v12 = vld [vmem:[%s2895_s15 + $0x388] sm:$0xff]  ;;  %v2359_v14 = vcombine.low %v639_v2, %v647_v3  ;;  %v586_v47 = vld [vmem:[%s2895_s15 + $0x158] sm:$0xff] }
  0x75   : > { %v663_v11 = vld [vmem:[%s2895_s15 + $0x3c0] sm:$0xff]  ;;  %v664_v13 = vld [vmem:[%s2895_s15 + $0x3c8] sm:$0xff]  ;;  %v2361_v15 = vcombine.low %v640_v4, %v648_v5  ;;  %v2283_v48 = vcombine.low %v561_v35, %v569_v36  ;;  %v2285_v49 = vcombine.low %v562_v38, %v570_v39  ;;  %v2302_v51 = vcombine.high %v578_v46, %v586_v47  ;;  %v593_v52 = vld [vmem:[%s2895_s15 + $0x190] sm:$0xff] }
  0x76   : > { %v2376_v17 = vcombine.high %v655_v10, %v663_v11  ;;  %v2378_v18 = vcombine.high %v656_v12, %v664_v13  ;;  %v671_v19 = vld [vmem:[%s2895_s15 + $0x400] sm:$0xff]  ;;  %v672_v21 = vld [vmem:[%s2895_s15 + $0x408] sm:$0xff]  ;;  %v2375_v23 = vcombine.low %v655_v10, %v663_v11  ;;  %v2377_v24 = vcombine.low %v656_v12, %v664_v13  ;;  %v601_v53 = vld [vmem:[%s2895_s15 + $0x1d0] sm:$0xff] }
  0x77   : > { %1439 = vmatpush1.bf16.msra.mxu0 %v2311_v54  ;;  %1482 = vmatpush1.bf16.msra.mxu1 %v2313_v55  ;;  %v679_v20 = vld [vmem:[%s2895_s15 + $0x440] sm:$0xff]  ;;  %v680_v22 = vld [vmem:[%s2895_s15 + $0x448] sm:$0xff]  ;;  %v594_v54 = vld [vmem:[%s2895_s15 + $0x198] sm:$0xff]  ;;  %v2316_v58 = vcombine.high %v593_v52, %v601_v53 }
  0x78   : > { %1440 = vmatprep.subr.bf16.mxu0 %v2328_v56  ;;  %1483 = vmatprep.subr.bf16.mxu1 %v2330_v57  ;;  %v2392_v25 = vcombine.high %v671_v19, %v679_v20  ;;  %v2394_v26 = vcombine.high %v672_v21, %v680_v22  ;;  %v2391_v31 = vcombine.low %v671_v19, %v679_v20  ;;  %v2945_v37 = vld [vmem:[%s3181_s0] ss:$8 sps:$4 sm:$0xff]   ;;  %v602_v55 = vld [vmem:[%s2895_s15 + $0x1d8] sm:$0xff]  ;;  %v609_v60 = vld [vmem:[%s2895_s15 + $0x210] sm:$0xff] }
  0x79   : > { %v2393_v32 = vcombine.low %v672_v21, %v680_v22  ;;  %v2299_v56 = vcombine.low %v577_v44, %v585_v45  ;;  %v2301_v57 = vcombine.low %v578_v46, %v586_v47  ;;  %v2318_v59 = vcombine.high %v594_v54, %v602_v55  ;;  %v617_v61 = vld [vmem:[%s2895_s15 + $0x250] sm:$0xff]  ;;  %v547_v38 = vld [vmem:[%s2895_s15 + $0x20] sm:$0xff] }
  0x7a   : > { %v2332_v2 = vcombine.high %v609_v60, %v617_v61  ;;  %v625_v4 = vld [vmem:[%s2895_s15 + $0x290] sm:$0xff]  ;;  %v555_v39 = vld [vmem:[%s2895_s15 + $0x60] sm:$0xff] }
  0x7b   : > { %1441 = vmatpush1.bf16.msra.mxu0 %v2327_v62  ;;  %1484 = vmatpush1.bf16.msra.mxu1 %v2329_v63  ;;  %v610_v62 = vld [vmem:[%s2895_s15 + $0x218] sm:$0xff]  ;;  %v633_v5 = vld [vmem:[%s2895_s15 + $0x2d0] sm:$0xff]  ;;  %v2272_v44 = vcombine.high %v547_v38, %v555_v39  ;;  %v563_v46 = vld [vmem:[%s2895_s15 + $0xa0] sm:$0xff] }
  0x7c   : > { %1442 = vmatprep.subr.bf16.mxu0 %v2344_v0  ;;  %1485 = vmatprep.subr.bf16.mxu1 %v2346_v1  ;;  %v618_v63 = vld [vmem:[%s2895_s15 + $0x258] sm:$0xff]  ;;  %v2315_v0 = vcombine.low %v593_v52, %v601_v53  ;;  %v2317_v1 = vcombine.low %v594_v54, %v602_v55  ;;  %v2348_v10 = vcombine.high %v625_v4, %v633_v5  ;;  %v641_v12 = vld [vmem:[%s2895_s15 + $0x310] sm:$0xff]  ;;  %v571_v47 = vld [vmem:[%s2895_s15 + $0xe0] sm:$0xff] }
  0x7d   : > { %v2334_v3 = vcombine.high %v610_v62, %v618_v63  ;;  %v649_v13 = vld [vmem:[%s2895_s15 + $0x350] sm:$0xff]  ;;  %v2288_v52 = vcombine.high %v563_v46, %v571_v47  ;;  %v579_v54 = vld [vmem:[%s2895_s15 + $0x120] sm:$0xff] }
  0x7e   : > { %v2364_v19 = vcombine.high %v641_v12, %v649_v13  ;;  %v657_v21 = vld [vmem:[%s2895_s15 + $0x390] sm:$0xff]  ;;  %v587_v55 = vld [vmem:[%s2895_s15 + $0x160] sm:$0xff] }
  0x7f   : > { %1443 = vmatpush1.bf16.msra.mxu0 %v2343_v6  ;;  %1486 = vmatpush1.bf16.msra.mxu1 %v2345_v7  ;;  %v626_v6 = vld [vmem:[%s2895_s15 + $0x298] sm:$0xff]  ;;  %v665_v22 = vld [vmem:[%s2895_s15 + $0x3d0] sm:$0xff] }
  0x80   : > { %1444 = vmatprep.subr.bf16.mxu0 %v2360_v8  ;;  %1487 = vmatprep.subr.bf16.mxu1 %v2362_v9  ;;  %v634_v7 = vld [vmem:[%s2895_s15 + $0x2d8] sm:$0xff]  ;;  %v2331_v8 = vcombine.low %v609_v60, %v617_v61  ;;  %v2333_v9 = vcombine.low %v610_v62, %v618_v63  ;;  %v2380_v27 = vcombine.high %v657_v21, %v665_v22  ;;  %v673_v29 = vld [vmem:[%s2895_s15 + $0x410] sm:$0xff]  ;;  %v595_v62 = vld [vmem:[%s2895_s15 + $0x1a0] sm:$0xff] }
  0x81   : > { %v2350_v11 = vcombine.high %v626_v6, %v634_v7  ;;  %v681_v30 = vld [vmem:[%s2895_s15 + $0x450] sm:$0xff]  ;;  %v2304_v60 = vcombine.high %v579_v54, %v587_v55  ;;  %v603_v63 = vld [vmem:[%s2895_s15 + $0x1e0] sm:$0xff] }
  0x82   : > { %v2396_v35 = vcombine.high %v673_v29, %v681_v30 }
  0x83   : > { %1445 = vmatpush1.bf16.msra.mxu0 %v2359_v14  ;;  %1488 = vmatpush1.bf16.msra.mxu1 %v2361_v15  ;;  %v642_v14 = vld [vmem:[%s2895_s15 + $0x318] sm:$0xff] }
  0x84   : > { %1446 = vmatprep.subr.bf16.mxu0 %v2376_v17  ;;  %1489 = vmatprep.subr.bf16.mxu1 %v2378_v18  ;;  %v650_v15 = vld [vmem:[%s2895_s15 + $0x358] sm:$0xff]  ;;  %v2347_v17 = vcombine.low %v625_v4, %v633_v5  ;;  %v2349_v18 = vcombine.low %v626_v6, %v634_v7  ;;  %v2320_v4 = vcombine.high %v595_v62, %v603_v63  ;;  %v611_v6 = vld [vmem:[%s2895_s15 + $0x220] sm:$0xff] }
  0x85   : > { %v2366_v20 = vcombine.high %v642_v14, %v650_v15  ;;  %v619_v7 = vld [vmem:[%s2895_s15 + $0x260] sm:$0xff] }
  0x87   : > { %1447 = vmatpush1.bf16.msra.mxu0 %v2375_v23  ;;  %1490 = vmatpush1.bf16.msra.mxu1 %v2377_v24  ;;  %v658_v23 = vld [vmem:[%s2895_s15 + $0x398] sm:$0xff] }
  0x88   : > { %1448 = vmatprep.subr.bf16.mxu0 %v2392_v25  ;;  %1491 = vmatprep.subr.bf16.mxu1 %v2394_v26  ;;  %v666_v24 = vld [vmem:[%s2895_s15 + $0x3d8] sm:$0xff]  ;;  %v2363_v25 = vcombine.low %v641_v12, %v649_v13  ;;  %v2365_v26 = vcombine.low %v642_v14, %v650_v15  ;;  %v2336_v12 = vcombine.high %v611_v6, %v619_v7  ;;  %v627_v14 = vld [vmem:[%s2895_s15 + $0x2a0] sm:$0xff] }
  0x89   : > { %v2382_v28 = vcombine.high %v658_v23, %v666_v24  ;;  %v635_v15 = vld [vmem:[%s2895_s15 + $0x2e0] sm:$0xff] }
  0x8b   : > { %1449 = vmatpush1.bf16.msra.mxu0 %v2391_v31  ;;  %1492 = vmatpush1.bf16.msra.mxu1 %v2393_v32  ;;  %v674_v31 = vld [vmem:[%s2895_s15 + $0x418] sm:$0xff] }
  0x8c   : > { %1518 = vmatprep.subr.bf16.mxu0 %v2268_v33  ;;  %1561 = vmatprep.subr.bf16.mxu1 %v2270_v34  ;;  %v682_v32 = vld [vmem:[%s2895_s15 + $0x458] sm:$0xff]  ;;  %v2379_v33 = vcombine.low %v657_v21, %v665_v22  ;;  %v2381_v34 = vcombine.low %v658_v23, %v666_v24  ;;  %v2352_v21 = vcombine.high %v627_v14, %v635_v15  ;;  %v643_v23 = vld [vmem:[%s2895_s15 + $0x320] sm:$0xff] }
  0x8d   : > { %v2398_v36 = vcombine.high %v674_v31, %v682_v32  ;;  %v651_v24 = vld [vmem:[%s2895_s15 + $0x360] sm:$0xff] }
  0x8e   : > { %1465 = vmatmul.mubr.bf16.vlgmr.msra.gmra.mrb[0].mxu0 %v2945_v37  ;;  %1508 = vmatmul.mubr.bf16.vlgmr.msra.gmra.mrb[0].mxu1 %v2945_v37 }
  0x8f   : > { %1519 = vmatpush1.bf16.msra.mxu0 %v2267_v40  ;;  %1562 = vmatpush1.bf16.msra.mxu1 %v2269_v41  ;;  %v548_v40 = vld [vmem:[%s2895_s15 + $0x28] sm:$0xff] }
  0x90   : > { %1520 = vmatprep.subr.bf16.mxu0 %v2284_v42  ;;  %1563 = vmatprep.subr.bf16.mxu1 %v2286_v43  ;;  %v556_v41 = vld [vmem:[%s2895_s15 + $0x68] sm:$0xff]  ;;  %v2395_v42 = vcombine.low %v673_v29, %v681_v30  ;;  %v2397_v43 = vcombine.low %v674_v31, %v682_v32  ;;  %v2368_v29 = vcombine.high %v643_v23, %v651_v24  ;;  %v659_v31 = vld [vmem:[%s2895_s15 + $0x3a0] sm:$0xff] }
  0x91   : > { %2409 = vmatprep.mubr.msk.bf16.mxu0 %vm1428_vm0, %v2885_v16  ;;  %2410 = vmatprep.mubr.msk.bf16.mxu1 %vm1428_vm0, %v2885_v16  ;;  %v2274_v45 = vcombine.high %v548_v40, %v556_v41  ;;  %v667_v32 = vld [vmem:[%s2895_s15 + $0x3e0] sm:$0xff] }
  0x93   : > { %1521 = vmatpush1.bf16.msra.mxu0 %v2283_v48  ;;  %1564 = vmatpush1.bf16.msra.mxu1 %v2285_v49  ;;  %v564_v48 = vld [vmem:[%s2895_s15 + $0xa8] sm:$0xff] }
  0x94   : > { %1522 = vmatprep.subr.bf16.mxu0 %v2300_v50  ;;  %1565 = vmatprep.subr.bf16.mxu1 %v2302_v51  ;;  %v572_v49 = vld [vmem:[%s2895_s15 + $0xe8] sm:$0xff]  ;;  %v2271_v50 = vcombine.low %v547_v38, %v555_v39  ;;  %v2273_v51 = vcombine.low %v548_v40, %v556_v41  ;;  %v2384_v38 = vcombine.high %v659_v31, %v667_v32  ;;  %v675_v40 = vld [vmem:[%s2895_s15 + $0x420] sm:$0xff] }
  0x95   : > { %v2290_v53 = vcombine.high %v564_v48, %v572_v49  ;;  %v683_v41 = vld [vmem:[%s2895_s15 + $0x460] sm:$0xff] }
  0x97   : > { %1523 = vmatpush1.bf16.msra.mxu0 %v2299_v56  ;;  %1566 = vmatpush1.bf16.msra.mxu1 %v2301_v57  ;;  %v580_v56 = vld [vmem:[%s2895_s15 + $0x128] sm:$0xff] }
  0x98   : > { %1524 = vmatprep.subr.bf16.mxu0 %v2316_v58  ;;  %1567 = vmatprep.subr.bf16.mxu1 %v2318_v59  ;;  %v588_v57 = vld [vmem:[%s2895_s15 + $0x168] sm:$0xff]  ;;  %v2287_v58 = vcombine.low %v563_v46, %v571_v47  ;;  %v2289_v59 = vcombine.low %v564_v48, %v572_v49  ;;  %v2400_v46 = vcombine.high %v675_v40, %v683_v41  ;;  %v549_v48 = vld [vmem:[%s2895_s15 + $0x30] sm:$0xff] }
  0x99   : > { %v2306_v61 = vcombine.high %v580_v56, %v588_v57  ;;  %v557_v49 = vld [vmem:[%s2895_s15 + $0x70] sm:$0xff] }
  0x9b   : > { %1525 = vmatpush1.bf16.msra.mxu0 %v2315_v0  ;;  %1568 = vmatpush1.bf16.msra.mxu1 %v2317_v1  ;;  %v596_v0 = vld [vmem:[%s2895_s15 + $0x1a8] sm:$0xff] }
  0x9c   : > { %1526 = vmatprep.subr.bf16.mxu0 %v2332_v2  ;;  %1569 = vmatprep.subr.bf16.mxu1 %v2334_v3  ;;  %v604_v1 = vld [vmem:[%s2895_s15 + $0x1e8] sm:$0xff]  ;;  %v2303_v2 = vcombine.low %v579_v54, %v587_v55  ;;  %v2305_v3 = vcombine.low %v580_v56, %v588_v57  ;;  %v2276_v54 = vcombine.high %v549_v48, %v557_v49  ;;  %v565_v56 = vld [vmem:[%s2895_s15 + $0xb0] sm:$0xff] }
  0x9d   : > { %v2322_v5 = vcombine.high %v596_v0, %v604_v1  ;;  %v573_v57 = vld [vmem:[%s2895_s15 + $0xf0] sm:$0xff] }
  0x9f   : > { %1527 = vmatpush1.bf16.msra.mxu0 %v2331_v8  ;;  %1570 = vmatpush1.bf16.msra.mxu1 %v2333_v9  ;;  %v612_v8 = vld [vmem:[%s2895_s15 + $0x228] sm:$0xff] }
  0xa0   : > { %1528 = vmatprep.subr.bf16.mxu0 %v2348_v10  ;;  %1571 = vmatprep.subr.bf16.mxu1 %v2350_v11  ;;  %v620_v9 = vld [vmem:[%s2895_s15 + $0x268] sm:$0xff]  ;;  %v2319_v10 = vcombine.low %v595_v62, %v603_v63  ;;  %v2321_v11 = vcombine.low %v596_v0, %v604_v1  ;;  %v2292_v62 = vcombine.high %v565_v56, %v573_v57  ;;  %v581_v0 = vld [vmem:[%s2895_s15 + $0x130] sm:$0xff] }
  0xa1   : > { %v2338_v13 = vcombine.high %v612_v8, %v620_v9  ;;  %v589_v1 = vld [vmem:[%s2895_s15 + $0x170] sm:$0xff] }
  0xa3   : > { %1529 = vmatpush1.bf16.msra.mxu0 %v2347_v17  ;;  %1572 = vmatpush1.bf16.msra.mxu1 %v2349_v18  ;;  %v628_v17 = vld [vmem:[%s2895_s15 + $0x2a8] sm:$0xff] }
  0xa4   : > { %1530 = vmatprep.subr.bf16.mxu0 %v2364_v19  ;;  %1573 = vmatprep.subr.bf16.mxu1 %v2366_v20  ;;  %v636_v18 = vld [vmem:[%s2895_s15 + $0x2e8] sm:$0xff]  ;;  %v2335_v19 = vcombine.low %v611_v6, %v619_v7  ;;  %v2337_v20 = vcombine.low %v612_v8, %v620_v9  ;;  %v2308_v6 = vcombine.high %v581_v0, %v589_v1  ;;  %v597_v8 = vld [vmem:[%s2895_s15 + $0x1b0] sm:$0xff] }
  0xa5   : > { %v2354_v22 = vcombine.high %v628_v17, %v636_v18  ;;  %v605_v9 = vld [vmem:[%s2895_s15 + $0x1f0] sm:$0xff] }
  0xa7   : > { %1531 = vmatpush1.bf16.msra.mxu0 %v2363_v25  ;;  %1574 = vmatpush1.bf16.msra.mxu1 %v2365_v26  ;;  %v644_v25 = vld [vmem:[%s2895_s15 + $0x328] sm:$0xff] }
  0xa8   : > { %1532 = vmatprep.subr.bf16.mxu0 %v2380_v27  ;;  %1575 = vmatprep.subr.bf16.mxu1 %v2382_v28  ;;  %v652_v26 = vld [vmem:[%s2895_s15 + $0x368] sm:$0xff]  ;;  %v2351_v27 = vcombine.low %v627_v14, %v635_v15  ;;  %v2353_v28 = vcombine.low %v628_v17, %v636_v18  ;;  %v2324_v14 = vcombine.high %v597_v8, %v605_v9  ;;  %v613_v17 = vld [vmem:[%s2895_s15 + $0x230] sm:$0xff] }
  0xa9   : > { %v2370_v30 = vcombine.high %v644_v25, %v652_v26  ;;  %v621_v18 = vld [vmem:[%s2895_s15 + $0x270] sm:$0xff] }
  0xab   : > { %1533 = vmatpush1.bf16.msra.mxu0 %v2379_v33  ;;  %1576 = vmatpush1.bf16.msra.mxu1 %v2381_v34  ;;  %v660_v33 = vld [vmem:[%s2895_s15 + $0x3a8] sm:$0xff] }
  0xac   : > { %1534 = vmatprep.subr.bf16.mxu0 %v2396_v35  ;;  %1577 = vmatprep.subr.bf16.mxu1 %v2398_v36  ;;  %v668_v34 = vld [vmem:[%s2895_s15 + $0x3e8] sm:$0xff]  ;;  %v2367_v35 = vcombine.low %v643_v23, %v651_v24  ;;  %v2369_v36 = vcombine.low %v644_v25, %v652_v26  ;;  %v629_v24 = vld [vmem:[%s2895_s15 + $0x2b0] sm:$0xff]  ;;  %v630_v26 = vld [vmem:[%s2895_s15 + $0x2b8] sm:$0xff] }
  0xad   : > { %v2386_v39 = vcombine.high %v660_v33, %v668_v34  ;;  %v637_v25 = vld [vmem:[%s2895_s15 + $0x2f0] sm:$0xff] }
  0xaf   : > { %1535 = vmatpush1.bf16.msra.mxu0 %v2395_v42  ;;  %1578 = vmatpush1.bf16.msra.mxu1 %v2397_v43  ;;  %v676_v42 = vld [vmem:[%s2895_s15 + $0x428] sm:$0xff] }
  0xb0   : > { %1604 = vmatprep.subr.bf16.mxu0 %v2272_v44  ;;  %1647 = vmatprep.subr.bf16.mxu1 %v2274_v45  ;;  %v684_v43 = vld [vmem:[%s2895_s15 + $0x468] sm:$0xff]  ;;  %v2383_v44 = vcombine.low %v659_v31, %v667_v32  ;;  %v2385_v45 = vcombine.low %v660_v33, %v668_v34  ;;  %v645_v32 = vld [vmem:[%s2895_s15 + $0x330] sm:$0xff]  ;;  %v646_v34 = vld [vmem:[%s2895_s15 + $0x338] sm:$0xff] }
  0xb1   : > { %v2402_v47 = vcombine.high %v676_v42, %v684_v43  ;;  %v653_v33 = vld [vmem:[%s2895_s15 + $0x370] sm:$0xff] }
  0xb2   : > { %1551 = vmatmul.mubr.bf16.vlgmr.msra.gmra.mrb[4].mxu0 %v2945_v37  ;;  %1594 = vmatmul.mubr.bf16.vlgmr.msra.gmra.mrb[4].mxu1 %v2945_v37 }
  0xb3   : > { %1605 = vmatpush1.bf16.msra.mxu0 %v2271_v50  ;;  %1648 = vmatpush1.bf16.msra.mxu1 %v2273_v51  ;;  %v550_v50 = vld [vmem:[%s2895_s15 + $0x38] sm:$0xff] }
  0xb4   : > { %1606 = vmatprep.subr.bf16.mxu0 %v2288_v52  ;;  %1649 = vmatprep.subr.bf16.mxu1 %v2290_v53  ;;  %v558_v51 = vld [vmem:[%s2895_s15 + $0x78] sm:$0xff]  ;;  %v2399_v52 = vcombine.low %v675_v40, %v683_v41  ;;  %v2401_v53 = vcombine.low %v676_v42, %v684_v43  ;;  %v661_v41 = vld [vmem:[%s2895_s15 + $0x3b0] sm:$0xff] }
  0xb5   : > { %2411 = vmatprep.mubr.msk.bf16.mxu0 %vm1428_vm0, %v2885_v16  ;;  %2412 = vmatprep.mubr.msk.bf16.mxu1 %vm1428_vm0, %v2885_v16  ;;  %v2278_v55 = vcombine.high %v550_v50, %v558_v51  ;;  %v669_v42 = vld [vmem:[%s2895_s15 + $0x3f0] sm:$0xff]  ;;  %v662_v43 = vld [vmem:[%s2895_s15 + $0x3b8] sm:$0xff] }
  0xb7   : > { %1607 = vmatpush1.bf16.msra.mxu0 %v2287_v58  ;;  %1650 = vmatpush1.bf16.msra.mxu1 %v2289_v59  ;;  %v566_v58 = vld [vmem:[%s2895_s15 + $0xb8] sm:$0xff] }
  0xb8   : > { %1608 = vmatprep.subr.bf16.mxu0 %v2304_v60  ;;  %1651 = vmatprep.subr.bf16.mxu1 %v2306_v61  ;;  %v574_v59 = vld [vmem:[%s2895_s15 + $0xf8] sm:$0xff]  ;;  %v2275_v60 = vcombine.low %v549_v48, %v557_v49  ;;  %v2277_v61 = vcombine.low %v550_v50, %v558_v51  ;;  %v677_v49 = vld [vmem:[%s2895_s15 + $0x430] sm:$0xff] }
  0xb9   : > { %v2294_v63 = vcombine.high %v566_v58, %v574_v59  ;;  %v685_v50 = vld [vmem:[%s2895_s15 + $0x470] sm:$0xff]  ;;  %v678_v51 = vld [vmem:[%s2895_s15 + $0x438] sm:$0xff] }
  0xbb   : > { %1609 = vmatpush1.bf16.msra.mxu0 %v2303_v2  ;;  %1652 = vmatpush1.bf16.msra.mxu1 %v2305_v3  ;;  %v582_v2 = vld [vmem:[%s2895_s15 + $0x138] sm:$0xff] }
  0xbc   : > { %1610 = vmatprep.subr.bf16.mxu0 %v2320_v4  ;;  %1653 = vmatprep.subr.bf16.mxu1 %v2322_v5  ;;  %v590_v3 = vld [vmem:[%s2895_s15 + $0x178] sm:$0xff]  ;;  %v2291_v4 = vcombine.low %v565_v56, %v573_v57  ;;  %v2293_v5 = vcombine.low %v566_v58, %v574_v59  ;;  %v2403_v57 = vcombine.low %v677_v49, %v685_v50 }
  0xbd   : > { %v2310_v7 = vcombine.high %v582_v2, %v590_v3 }
  0xbf   : > { %1611 = vmatpush1.bf16.msra.mxu0 %v2319_v10  ;;  %1654 = vmatpush1.bf16.msra.mxu1 %v2321_v11  ;;  %v598_v10 = vld [vmem:[%s2895_s15 + $0x1b8] sm:$0xff] }
  0xc0   : > { %1612 = vmatprep.subr.bf16.mxu0 %v2336_v12  ;;  %1655 = vmatprep.subr.bf16.mxu1 %v2338_v13  ;;  %v606_v11 = vld [vmem:[%s2895_s15 + $0x1f8] sm:$0xff]  ;;  %v2307_v12 = vcombine.low %v581_v0, %v589_v1  ;;  %v2309_v13 = vcombine.low %v582_v2, %v590_v3 }
  0xc1   : > { %v2326_v15 = vcombine.high %v598_v10, %v606_v11 }
  0xc3   : > { %1613 = vmatpush1.bf16.msra.mxu0 %v2335_v19  ;;  %1656 = vmatpush1.bf16.msra.mxu1 %v2337_v20  ;;  %v614_v19 = vld [vmem:[%s2895_s15 + $0x238] sm:$0xff] }
  0xc4   : > { %1614 = vmatprep.subr.bf16.mxu0 %v2352_v21  ;;  %1657 = vmatprep.subr.bf16.mxu1 %v2354_v22  ;;  %v622_v20 = vld [vmem:[%s2895_s15 + $0x278] sm:$0xff]  ;;  %v2323_v21 = vcombine.low %v597_v8, %v605_v9  ;;  %v2340_v22 = vcombine.high %v613_v17, %v621_v18 }
  0xc5   : > { %v2342_v23 = vcombine.high %v614_v19, %v622_v20 }
  0xc7   : > { %1615 = vmatpush1.bf16.msra.mxu0 %v2351_v27  ;;  %1658 = vmatpush1.bf16.msra.mxu1 %v2353_v28  ;;  %v638_v27 = vld [vmem:[%s2895_s15 + $0x2f8] sm:$0xff]  ;;  %v2339_v28 = vcombine.low %v613_v17, %v621_v18 }
  0xc8   : > { %1616 = vmatprep.subr.bf16.mxu0 %v2368_v29  ;;  %1659 = vmatprep.subr.bf16.mxu1 %v2370_v30  ;;  %v2341_v29 = vcombine.low %v614_v19, %v622_v20  ;;  %v2356_v30 = vcombine.high %v629_v24, %v637_v25  ;;  %v2358_v31 = vcombine.high %v630_v26, %v638_v27 }
  0xcb   : > { %1617 = vmatpush1.bf16.msra.mxu0 %v2367_v35  ;;  %1660 = vmatpush1.bf16.msra.mxu1 %v2369_v36  ;;  %v654_v35 = vld [vmem:[%s2895_s15 + $0x378] sm:$0xff]  ;;  %v2355_v36 = vcombine.low %v629_v24, %v637_v25 }
  0xcc   : > { %1618 = vmatprep.subr.bf16.mxu0 %v2384_v38  ;;  %1661 = vmatprep.subr.bf16.mxu1 %v2386_v39  ;;  %v2357_v38 = vcombine.low %v630_v26, %v638_v27  ;;  %v2372_v39 = vcombine.high %v645_v32, %v653_v33  ;;  %v2374_v40 = vcombine.high %v646_v34, %v654_v35 }
  0xcf   : > { %1619 = vmatpush1.bf16.msra.mxu0 %v2383_v44  ;;  %1662 = vmatpush1.bf16.msra.mxu1 %v2385_v45  ;;  %v670_v44 = vld [vmem:[%s2895_s15 + $0x3f8] sm:$0xff]  ;;  %v2371_v45 = vcombine.low %v645_v32, %v653_v33 }
  0xd0   : > { %1620 = vmatprep.subr.bf16.mxu0 %v2400_v46  ;;  %1663 = vmatprep.subr.bf16.mxu1 %v2402_v47  ;;  %v2373_v46 = vcombine.low %v646_v34, %v654_v35  ;;  %v2388_v47 = vcombine.high %v661_v41, %v669_v42  ;;  %v2390_v48 = vcombine.high %v662_v43, %v670_v44 }
  0xd3   : > { %1621 = vmatpush1.bf16.msra.mxu0 %v2399_v52  ;;  %1664 = vmatpush1.bf16.msra.mxu1 %v2401_v53  ;;  %v686_v52 = vld [vmem:[%s2895_s15 + $0x478] sm:$0xff]  ;;  %v2387_v53 = vcombine.low %v661_v41, %v669_v42 }
  0xd4   : > { %1690 = vmatprep.subr.bf16.mxu0 %v2276_v54  ;;  %1733 = vmatprep.subr.bf16.mxu1 %v2278_v55  ;;  %v2389_v54 = vcombine.low %v662_v43, %v670_v44  ;;  %v2404_v55 = vcombine.high %v677_v49, %v685_v50  ;;  %v2406_v56 = vcombine.high %v678_v51, %v686_v52 }
  0xd5   : > { %v2405_v58 = vcombine.low %v678_v51, %v686_v52 }
  0xd6   : > { %1637 = vmatmul.mubr.bf16.vlgmr.msra.gmra.mrb[8].mxu0 %v2945_v37  ;;  %1680 = vmatmul.mubr.bf16.vlgmr.msra.gmra.mrb[8].mxu1 %v2945_v37 }
  0xd7   : > { %1691 = vmatpush1.bf16.msra.mxu0 %v2275_v60  ;;  %1734 = vmatpush1.bf16.msra.mxu1 %v2277_v61 }
  0xd8   : > { %1692 = vmatprep.subr.bf16.mxu0 %v2292_v62  ;;  %1735 = vmatprep.subr.bf16.mxu1 %v2294_v63 }
  0xd9   : > { %2413 = vmatprep.mubr.msk.bf16.mxu0 %vm1428_vm0, %v2885_v16  ;;  %2414 = vmatprep.mubr.msk.bf16.mxu1 %vm1428_vm0, %v2885_v16  ;;  %v2325_v16 = vcombine.low %v598_v10, %v606_v11 }
  0xdb   : > { %1693 = vmatpush1.bf16.msra.mxu0 %v2291_v4  ;;  %1736 = vmatpush1.bf16.msra.mxu1 %v2293_v5 }
  0xdc   : > { %1694 = vmatprep.subr.bf16.mxu0 %v2308_v6  ;;  %1737 = vmatprep.subr.bf16.mxu1 %v2310_v7 }
  0xdf   : > { %1695 = vmatpush1.bf16.msra.mxu0 %v2307_v12  ;;  %1738 = vmatpush1.bf16.msra.mxu1 %v2309_v13 }
  0xe0   : > { %1696 = vmatprep.subr.bf16.mxu0 %v2324_v14  ;;  %1739 = vmatprep.subr.bf16.mxu1 %v2326_v15 }
  0xe3   : > { %1697 = vmatpush1.bf16.msra.mxu0 %v2323_v21  ;;  %1740 = vmatpush1.bf16.msra.mxu1 %v2325_v16  ;;  %v3069_v59 = vpop.permute.xlu0 %691 }
  0xe4   : > { %1698 = vmatprep.subr.bf16.mxu0 %v2340_v22  ;;  %1741 = vmatprep.subr.bf16.mxu1 %v2342_v23 }
  0xe7   : > { %1699 = vmatpush1.bf16.msra.mxu0 %v2339_v28  ;;  %1742 = vmatpush1.bf16.msra.mxu1 %v2341_v29  ;;  %v3072_v61 = vpop.permute.xlu0 %696 }
  0xe8   : > { %1700 = vmatprep.subr.bf16.mxu0 %v2356_v30  ;;  %1743 = vmatprep.subr.bf16.mxu1 %v2358_v31 }
  0xeb   : > { %1701 = vmatpush1.bf16.msra.mxu0 %v2355_v36  ;;  %1744 = vmatpush1.bf16.msra.mxu1 %v2357_v38 }
  0xec   : > { %1702 = vmatprep.subr.bf16.mxu0 %v2372_v39  ;;  %1745 = vmatprep.subr.bf16.mxu1 %v2374_v40 }
  0xef   : > { %1703 = vmatpush1.bf16.msra.mxu0 %v2371_v45  ;;  %1746 = vmatpush1.bf16.msra.mxu1 %v2373_v46 }
  0xf0   : > { %1704 = vmatprep.subr.bf16.mxu0 %v2388_v47  ;;  %1747 = vmatprep.subr.bf16.mxu1 %v2390_v48 }
  0xf3   : > { %1705 = vmatpush1.bf16.msra.mxu0 %v2387_v53  ;;  %1748 = vmatpush1.bf16.msra.mxu1 %v2389_v54 }
  0xf4   : > { %1706 = vmatprep.subr.bf16.mxu0 %v2404_v55  ;;  %1749 = vmatprep.subr.bf16.mxu1 %v2406_v56 }
  0xf7   : > { %1707 = vmatpush1.bf16.msra.mxu0 %v2403_v57  ;;  %1750 = vmatpush1.bf16.msra.mxu1 %v2405_v58 }
  0xfa   : > { %1723 = vmatmul.mubr.bf16.vlgmr.msra.gmra.mrb[12].mxu0 %v2945_v37  ;;  %1766 = vmatmul.mubr.bf16.vlgmr.msra.gmra.mrb[12].mxu1 %v2945_v37 }
 0x161   : > { %v1466_v60 = vpop.f32.mrb[0].mxu0  ;;  %v1509_v0 = vpop.f32.mrb[0].mxu1 }
 0x162   : > { %v1467_v62 = vadd.f32 %v1466_v60, %v3069_v59  ;;  %v1468_v63 = vpop.f32.mrb[1].mxu0  ;;  %v1510_v3 = vadd.f32 %v1509_v0, %v3069_v59  ;;  %v1511_v4 = vpop.f32.mrb[1].mxu1 }
 0x163   : > { %v1469_v1 = vadd.f32 %v1468_v63, %v3069_v59  ;;  %v1470_v2 = vpop.f32.mrb[2].mxu0  ;;  %v1512_v7 = vadd.f32 %v1511_v4, %v3069_v59  ;;  %v1513_v8 = vpop.f32.mrb[2].mxu1 }
 0x164   : > { %v1922_v5 = vmul.f32 %v1467_v62, %v1467_v62  ;;  %v1471_v6 = vadd.f32 %v1470_v2, %v3072_v61  ;;  %v1472_v37 = vpop.f32.mrb[3].mxu0  ;;  %v1924_v12 = vmul.f32 %v1510_v3, %v1510_v3  ;;  %v1515_v13 = vpop.f32.mrb[3].mxu1  ;;  %v1514_v21 = vadd.f32 %v1513_v8, %v3072_v61 }
 0x165   : > { %v2441_v9 = vpack.c.bf16 %v1469_v1, %v1467_v62  ;;  %v1888_v10 = vadd.f32 %v1469_v1, %v1467_v62  ;;  %v1923_v11 = vmul.f32 %v1469_v1, %v1469_v1  ;;  %v1473_v15 = vadd.f32 %v1472_v37, %v3072_v61 }
 0x166   : > { %v1938_v14 = vmul.f32 %v1471_v6, %v1471_v6  ;;  %v2442_v17 = vpack.c.bf16 %v1512_v7, %v1510_v3  ;;  %v1925_v18 = vmul.f32 %v1512_v7, %v1512_v7  ;;  %v1516_v16 = vadd.f32 %v1515_v13, %v3072_v61 }
 0x167   : > { %1872 = vst [vmem:[%s3080_s24] sm:$0xff] %v2441_v9  ;;  %v1954_v19 = vadd.f32 %v1923_v11, %v1922_v5  ;;  %v1889_v20 = vadd.f32 %v1888_v10, %v1510_v3  ;;  %v2449_v22 = vpack.c.bf16 %v1473_v15, %v1471_v6  ;;  %v1905_v23 = vadd.f32 %v1473_v15, %v1471_v6 }
 0x168   : > { %v1939_v24 = vmul.f32 %v1473_v15, %v1473_v15  ;;  %1873 = vst [vmem:[%s3080_s24 + $0x8] sm:$0xff] %v2442_v17  ;;  %v1940_v27 = vmul.f32 %v1514_v21, %v1514_v21  ;;  %v2450_v28 = vpack.c.bf16 %v1516_v16, %v1514_v21  ;;  %v1941_v34 = vmul.f32 %v1516_v16, %v1516_v16 }
 0x169   : > { %v1955_v25 = vadd.f32 %v1954_v19, %v1924_v12  ;;  %v1890_v26 = vadd.f32 %v1889_v20, %v1512_v7  ;;  %1880 = vst [vmem:[%s3080_s24 + $0x40] sm:$0xff] %v2449_v22  ;;  %v1906_v30 = vadd.f32 %v1905_v23, %v1514_v21 }
 0x16a   : > { %v1971_v29 = vadd.f32 %v1939_v24, %v1938_v14  ;;  %1881 = vst [vmem:[%s3080_s24 + $0x48] sm:$0xff] %v2450_v28 }
 0x16b   : > { %v1956_v31 = vadd.f32 %v1955_v25, %v1925_v18  ;;  %v1907_v33 = vadd.f32 %v1906_v30, %v1516_v16 }
 0x16c   : > { %v1972_v32 = vadd.f32 %v1971_v29, %v1940_v27 }
 0x16e   : > { %v1973_v35 = vadd.f32 %v1972_v32, %v1941_v34 }
 0x185   : > { %v1552_v36 = vpop.f32.mrb[4].mxu0  ;;  %v1595_v40 = vpop.f32.mrb[4].mxu1 }
 0x186   : > { %v1553_v38 = vadd.f32 %v1552_v36, %v3069_v59  ;;  %v1554_v39 = vpop.f32.mrb[5].mxu0  ;;  %v1596_v43 = vadd.f32 %v1595_v40, %v3069_v59  ;;  %v1597_v44 = vpop.f32.mrb[5].mxu1 }
 0x187   : > { %v1555_v41 = vadd.f32 %v1554_v39, %v3069_v59  ;;  %v1556_v42 = vpop.f32.mrb[6].mxu0  ;;  %v1598_v49 = vadd.f32 %v1597_v44, %v3069_v59  ;;  %v1599_v50 = vpop.f32.mrb[6].mxu1 }
 0x188   : > { %v1891_v45 = vadd.f32 %v1890_v26, %v1553_v38  ;;  %v1926_v46 = vmul.f32 %v1553_v38, %v1553_v38  ;;  %v1557_v47 = vadd.f32 %v1556_v42, %v3072_v61  ;;  %v1558_v48 = vpop.f32.mrb[7].mxu0  ;;  %v1928_v53 = vmul.f32 %v1596_v43, %v1596_v43  ;;  %v1601_v55 = vpop.f32.mrb[7].mxu1 }
 0x189   : > { %v2443_v51 = vpack.c.bf16 %v1555_v41, %v1553_v38  ;;  %v1927_v52 = vmul.f32 %v1555_v41, %v1555_v41  ;;  %v1559_v54 = vadd.f32 %v1558_v48, %v3072_v61  ;;  %v2444_v0 = vpack.c.bf16 %v1598_v49, %v1596_v43 }
 0x18a   : > { %v1957_v56 = vadd.f32 %v1956_v31, %v1926_v46  ;;  %v1892_v57 = vadd.f32 %v1891_v45, %v1555_v41  ;;  %v1908_v58 = vadd.f32 %v1907_v33, %v1557_v47  ;;  %v1942_v60 = vmul.f32 %v1557_v47, %v1557_v47 }
 0x18b   : > { %1874 = vst [vmem:[%s3080_s24 + $0x10] sm:$0xff] %v2443_v51  ;;  %v2451_v62 = vpack.c.bf16 %v1559_v54, %v1557_v47  ;;  %v1943_v63 = vmul.f32 %v1559_v54, %v1559_v54  ;;  %v1929_v1 = vmul.f32 %v1598_v49, %v1598_v49  ;;  %1875 = vst [vmem:[%s3080_s24 + $0x18] sm:$0xff] %v2444_v0 }
 0x18c   : > { %v1958_v2 = vadd.f32 %v1957_v56, %v1927_v52  ;;  %v1974_v3 = vadd.f32 %v1973_v35, %v1942_v60  ;;  %v1893_v4 = vadd.f32 %v1892_v57, %v1596_v43  ;;  %v1909_v5 = vadd.f32 %v1908_v58, %v1559_v54 }
 0x18d   : > { %1882 = vst [vmem:[%s3080_s24 + $0x50] sm:$0xff] %v2451_v62  ;;  %v1600_v6 = vadd.f32 %v1599_v50, %v3072_v61  ;;  %v1602_v37 = vadd.f32 %v1601_v55, %v3072_v61 }
 0x18e   : > { %v1959_v7 = vadd.f32 %v1958_v2, %v1928_v53  ;;  %v1975_v8 = vadd.f32 %v1974_v3, %v1943_v63  ;;  %v1894_v9 = vadd.f32 %v1893_v4, %v1598_v49 }
 0x18f   : > { %v1910_v10 = vadd.f32 %v1909_v5, %v1600_v6  ;;  %v1944_v11 = vmul.f32 %v1600_v6, %v1600_v6  ;;  %v2452_v12 = vpack.c.bf16 %v1602_v37, %v1600_v6  ;;  %v1945_v17 = vmul.f32 %v1602_v37, %v1602_v37 }
 0x190   : > { %v1960_v13 = vadd.f32 %v1959_v7, %v1929_v1 }
 0x191   : > { %v1976_v14 = vadd.f32 %v1975_v8, %v1944_v11  ;;  %1883 = vst [vmem:[%s3080_s24 + $0x58] sm:$0xff] %v2452_v12  ;;  %v1911_v15 = vadd.f32 %v1910_v10, %v1602_v37 }
 0x193   : > { %v1977_v18 = vadd.f32 %v1976_v14, %v1945_v17 }
 0x1a9   : > { %v1638_v19 = vpop.f32.mrb[8].mxu0  ;;  %v1681_v16 = vpop.f32.mrb[8].mxu1 }
 0x1aa   : > { %v1639_v20 = vadd.f32 %v1638_v19, %v3069_v59  ;;  %v1640_v21 = vpop.f32.mrb[9].mxu0  ;;  %v1682_v24 = vadd.f32 %v1681_v16, %v3069_v59  ;;  %v1683_v25 = vpop.f32.mrb[9].mxu1 }
 0x1ab   : > { %v1641_v22 = vadd.f32 %v1640_v21, %v3069_v59  ;;  %v1642_v23 = vpop.f32.mrb[10].mxu0  ;;  %v1684_v30 = vadd.f32 %v1683_v25, %v3069_v59  ;;  %v1685_v31 = vpop.f32.mrb[10].mxu1 }
 0x1ac   : > { %v1895_v26 = vadd.f32 %v1894_v9, %v1639_v20  ;;  %v1930_v27 = vmul.f32 %v1639_v20, %v1639_v20  ;;  %v1643_v28 = vadd.f32 %v1642_v23, %v3072_v61  ;;  %v1644_v29 = vpop.f32.mrb[11].mxu0  ;;  %v1932_v34 = vmul.f32 %v1682_v24, %v1682_v24  ;;  %v1687_v36 = vpop.f32.mrb[11].mxu1 }
 0x1ad   : > { %v2445_v32 = vpack.c.bf16 %v1641_v22, %v1639_v20  ;;  %v1931_v33 = vmul.f32 %v1641_v22, %v1641_v22  ;;  %v1645_v35 = vadd.f32 %v1644_v29, %v3072_v61  ;;  %v2446_v44 = vpack.c.bf16 %v1684_v30, %v1682_v24 }
 0x1ae   : > { %v1961_v38 = vadd.f32 %v1960_v13, %v1930_v27  ;;  %v1896_v39 = vadd.f32 %v1895_v26, %v1641_v22  ;;  %v1912_v40 = vadd.f32 %v1911_v15, %v1643_v28  ;;  %v1946_v41 = vmul.f32 %v1643_v28, %v1643_v28 }
 0x1af   : > { %1876 = vst [vmem:[%s3080_s24 + $0x20] sm:$0xff] %v2445_v32  ;;  %v2453_v42 = vpack.c.bf16 %v1645_v35, %v1643_v28  ;;  %v1947_v43 = vmul.f32 %v1645_v35, %v1645_v35  ;;  %v1933_v45 = vmul.f32 %v1684_v30, %v1684_v30  ;;  %1877 = vst [vmem:[%s3080_s24 + $0x28] sm:$0xff] %v2446_v44 }
 0x1b0   : > { %v1962_v46 = vadd.f32 %v1961_v38, %v1931_v33  ;;  %v1978_v47 = vadd.f32 %v1977_v18, %v1946_v41  ;;  %v1897_v48 = vadd.f32 %v1896_v39, %v1682_v24  ;;  %v1913_v49 = vadd.f32 %v1912_v40, %v1645_v35 }
 0x1b1   : > { %1884 = vst [vmem:[%s3080_s24 + $0x60] sm:$0xff] %v2453_v42  ;;  %v1686_v50 = vadd.f32 %v1685_v31, %v3072_v61  ;;  %v1688_v51 = vadd.f32 %v1687_v36, %v3072_v61 }
 0x1b2   : > { %v1963_v52 = vadd.f32 %v1962_v46, %v1932_v34  ;;  %v1979_v53 = vadd.f32 %v1978_v47, %v1947_v43  ;;  %v1898_v54 = vadd.f32 %v1897_v48, %v1684_v30  ;;  %v2022_v47 = vld [vmem:[%s3080_s24] sm:$0xff] (%p2575_p5)  ;;  %v2024_v48 = vld [vmem:[%s3080_s24 + $0x8] sm:$0xff] (%p2575_p5) }
 0x1b3   : > { %v1914_v55 = vadd.f32 %v1913_v49, %v1686_v50  ;;  %v1948_v56 = vmul.f32 %v1686_v50, %v1686_v50  ;;  %v2454_v57 = vpack.c.bf16 %v1688_v51, %v1686_v50  ;;  %v1949_v63 = vmul.f32 %v1688_v51, %v1688_v51  ;;  %v2026_v49 = vld [vmem:[%s3080_s24 + $0x10] sm:$0xff] (%p2575_p5)  ;;  %v2028_v50 = vld [vmem:[%s3080_s24 + $0x18] sm:$0xff] (%p2575_p5)  ;;  %2023 = vst [vmem:[%s2009_s8] sm:$0xff] (%p2575_p5), %v2022_v47 }
 0x1b4   : > { %v1964_v58 = vadd.f32 %v1963_v52, %v1933_v45  ;;  %2025 = vst [vmem:[%s2009_s8 + $0x8] sm:$0xff] (%p2575_p5), %v2024_v48  ;;  %2027 = vst [vmem:[%s2009_s8 + $0x10] sm:$0xff] (%p2575_p5), %v2026_v49 }
 0x1b5   : > { %v1980_v60 = vadd.f32 %v1979_v53, %v1948_v56  ;;  %1885 = vst [vmem:[%s3080_s24 + $0x68] sm:$0xff] %v2454_v57  ;;  %v1915_v62 = vadd.f32 %v1914_v55, %v1688_v51  ;;  %2029 = vst [vmem:[%s2009_s8 + $0x18] sm:$0xff] (%p2575_p5), %v2028_v50  ;;  %v2038_v55 = vld [vmem:[%s3080_s24 + $0x40] sm:$0xff] (%p2575_p5)  ;;  %v2040_v56 = vld [vmem:[%s3080_s24 + $0x48] sm:$0xff] (%p2575_p5) }
 0x1b6   : > { %v2030_v51 = vld [vmem:[%s3080_s24 + $0x20] sm:$0xff] (%p2575_p5)  ;;  %v2032_v52 = vld [vmem:[%s3080_s24 + $0x28] sm:$0xff] (%p2575_p5)  ;;  %2039 = vst [vmem:[%s2009_s8 + $0x80] sm:$0xff] (%p2575_p5), %v2038_v55  ;;  %v2042_v57 = vld [vmem:[%s3080_s24 + $0x50] sm:$0xff] (%p2575_p5) }
 0x1b7   : > { %v1981_v0 = vadd.f32 %v1980_v60, %v1949_v63  ;;  %2031 = vst [vmem:[%s2009_s8 + $0x20] sm:$0xff] (%p2575_p5), %v2030_v51  ;;  %2033 = vst [vmem:[%s2009_s8 + $0x28] sm:$0xff] (%p2575_p5), %v2032_v52 }
 0x1b8   : > { %2041 = vst [vmem:[%s2009_s8 + $0x88] sm:$0xff] (%p2575_p5), %v2040_v56  ;;  %2043 = vst [vmem:[%s2009_s8 + $0x90] sm:$0xff] (%p2575_p5), %v2042_v57  ;;  %v2046_v60 = vld [vmem:[%s3080_s24 + $0x60] sm:$0xff] (%p2575_p5) }
 0x1b9   : > { %2047 = vst [vmem:[%s2009_s8 + $0xa0] sm:$0xff] (%p2575_p5), %v2046_v60 }
 0x1cd   : > { %v1724_v1 = vpop.f32.mrb[12].mxu0  ;;  %v1767_v3 = vpop.f32.mrb[12].mxu1 }
 0x1ce   : > { %v1725_v2 = vadd.f32 %v1724_v1, %v3069_v59  ;;  %v1726_v4 = vpop.f32.mrb[13].mxu0  ;;  %v1768_v5 = vadd.f32 %v1767_v3, %v3069_v59  ;;  %v1769_v37 = vpop.f32.mrb[13].mxu1 }
 0x1cf   : > { %v1727_v6 = vadd.f32 %v1726_v4, %v3069_v59  ;;  %v1728_v7 = vpop.f32.mrb[14].mxu0  ;;  %v1770_v10 = vadd.f32 %v1769_v37, %v3069_v59  ;;  %v1771_v12 = vpop.f32.mrb[14].mxu1 }
 0x1d0   : > { %v1899_v8 = vadd.f32 %v1898_v54, %v1725_v2  ;;  %v1934_v9 = vmul.f32 %v1725_v2, %v1725_v2  ;;  %v1729_v11 = vadd.f32 %v1728_v7, %v3072_v61  ;;  %v1730_v13 = vpop.f32.mrb[15].mxu0  ;;  %v1772_v17 = vadd.f32 %v1771_v12, %v3072_v61  ;;  %v1773_v18 = vpop.f32.mrb[15].mxu1 }
 0x1d1   : > { %v2447_v14 = vpack.c.bf16 %v1727_v6, %v1725_v2  ;;  %v1935_v15 = vmul.f32 %v1727_v6, %v1727_v6  ;;  %v2448_v20 = vpack.c.bf16 %v1770_v10, %v1768_v5  ;;  %v1731_v22 = vadd.f32 %v1730_v13, %v3072_v61 }
 0x1d2   : > { %v1965_v19 = vadd.f32 %v1964_v58, %v1934_v9  ;;  %v1916_v21 = vadd.f32 %v1915_v62, %v1729_v11  ;;  %v1950_v16 = vmul.f32 %v1729_v11, %v1729_v11  ;;  %v1774_v59 = vadd.f32 %v1773_v18, %v3072_v61  ;;  %v2044_v58 = vld [vmem:[%s3080_s24 + $0x58] sm:$0xff] (%p2575_p5)  ;;  %v2048_v62 = vld [vmem:[%s3080_s24 + $0x68] sm:$0xff] (%p2575_p5) }
 0x1d3   : > { %1878 = vst [vmem:[%s3080_s24 + $0x30] sm:$0xff] %v2447_v14  ;;  %v1900_v23 = vadd.f32 %v1899_v8, %v1727_v6  ;;  %v1936_v24 = vmul.f32 %v1768_v5, %v1768_v5  ;;  %1879 = vst [vmem:[%s3080_s24 + $0x38] sm:$0xff] %v2448_v20  ;;  %v2455_v27 = vpack.c.bf16 %v1731_v22, %v1729_v11 }
 0x1d4   : > { %v1982_v25 = vadd.f32 %v1981_v0, %v1950_v16  ;;  %v1966_v26 = vadd.f32 %v1965_v19, %v1935_v15  ;;  %v1917_v28 = vadd.f32 %v1916_v21, %v1731_v22  ;;  %v1951_v29 = vmul.f32 %v1731_v22, %v1731_v22  ;;  %2045 = vst [vmem:[%s2009_s8 + $0x98] sm:$0xff] (%p2575_p5), %v2044_v58 }
 0x1d5   : > { %v2456_v30 = vpack.c.bf16 %v1774_v59, %v1772_v17  ;;  %v1901_v31 = vadd.f32 %v1900_v23, %v1768_v5  ;;  %v1937_v32 = vmul.f32 %v1770_v10, %v1770_v10  ;;  %v1952_v34 = vmul.f32 %v1772_v17, %v1772_v17  ;;  %1886 = vst [vmem:[%s3080_s24 + $0x70] sm:$0xff] %v2455_v27 }
 0x1d6   : > { %v1967_v33 = vadd.f32 %v1966_v26, %v1936_v24  ;;  %v1918_v35 = vadd.f32 %v1917_v28, %v1772_v17  ;;  %v1983_v36 = vadd.f32 %v1982_v25, %v1951_v29  ;;  %v1953_v40 = vmul.f32 %v1774_v59, %v1774_v59  ;;  %2049 = vst [vmem:[%s2009_s8 + $0xa8] sm:$0xff] (%p2575_p5), %v2048_v62 }
 0x1d7   : > { %1887 = vst [vmem:[%s3080_s24 + $0x78] sm:$0xff] %v2456_v30  ;;  %v1902_v38 = vadd.f32 %v1901_v31, %v1770_v10 }
 0x1d8   : > { %v1968_v61 = vadd.f32 %v1967_v33, %v1937_v32  ;;  %v1919_v39 = vadd.f32 %v1918_v35, %v1774_v59  ;;  %v1984_v41 = vadd.f32 %v1983_v36, %v1952_v34 }
 0x1d9   : > { %1903 = vadd.xlane.f32.xlu1 %v1902_v38 }
 0x1da   : > { %1969 = vadd.xlane.f32.xlu0 %v1968_v61  ;;  %v1985_v42 = vadd.f32 %v1984_v41, %v1953_v40  ;;  %v2034_v53 = vld [vmem:[%s3080_s24 + $0x30] sm:$0xff] (%p2575_p5)  ;;  %v2036_v54 = vld [vmem:[%s3080_s24 + $0x38] sm:$0xff] (%p2575_p5) }
 0x1db   : > { %2035 = vst [vmem:[%s2009_s8 + $0x30] sm:$0xff] (%p2575_p5), %v2034_v53  ;;  %2037 = vst [vmem:[%s2009_s8 + $0x38] sm:$0xff] (%p2575_p5), %v2036_v54 }
 0x1dc   : > { %v2050_v63 = vld [vmem:[%s3080_s24 + $0x70] sm:$0xff] (%p2575_p5) }
 0x1dd   : > { %1920 = vadd.xlane.f32.xlu1 %v1919_v39  ;;  %2051 = vst [vmem:[%s2009_s8 + $0xb0] sm:$0xff] (%p2575_p5), %v2050_v63 }
 0x1de   : > { %v2052_v0 = vld [vmem:[%s3080_s24 + $0x78] sm:$0xff] (%p2575_p5) }
 0x1df   : > { %2053 = vst [vmem:[%s2009_s8 + $0xb8] sm:$0xff] (%p2575_p5), %v2052_v0 }
 0x1e1   : > { %1986 = vadd.xlane.f32.xlu1 %v1985_v42 }
 0x266   : > { %v1904_v43 = vpop.xlane.xlu1 %1903 }
 0x267   : > { %v1970_v44 = vpop.xlane.xlu0 %1969  ;;  %1988 = vst [vmem:[%s3125_s28] sm:$0xff] %v1904_v43 }
 0x268   : > { %1990 = vst [vmem:[%s3128_s29] sm:$0xff] %v1970_v44 }
 0x269   : > { %2006 = sbr.rel (!%p2575_p5) target bundleno = 624 (0x270), region = 59 }
 0x26a   : > { %v1921_v45 = vpop.xlane.xlu1 %1920 }
 0x26b   : > { %1989 = vst [vmem:[%s3125_s28 + $0x8] sm:$0xff] %v1921_v45 }
 0x26e   : > { %v1987_v46 = vpop.xlane.xlu1 %1986 }
 0x26f   : > { %1991 = vst [vmem:[%s3128_s29 + $0x8] sm:$0xff] %v1987_v46 }
 0x270 PF: > { %2059 = sbr.rel (!%p2575_p5) target bundleno = 631 (0x277), region = 82  ;;  %s2436_s9 = sshll.u32 (%p2575_p5), %s2560_s21, 3  ;;  %v2091_v1 = vld [vmem:[%s3125_s28] sm:$0xff] (%p2575_p5) }
 0x271   : > { %s2061_s12 = scalar_lea.vmem (%p2575_p5), %s3185_s4, %s2436_s9 }
 0x272   : > { %v2093_v2 = vld [vmem:[%s3125_s28 + $0x8] sm:$0xff] (%p2575_p5)  ;;  %2092 = vst [vmem:[%s2061_s12] sm:$0xff] (%p2575_p5), %v2091_v1 }
 0x273   : > { %2094 = vst [vmem:[%s2061_s12 + $0x10] sm:$0xff] (%p2575_p5), %v2093_v2 }
 0x277 PF: > { %2100 = sbr.rel (!%p2575_p5) target bundleno = 638 (0x27e), region = 120  ;;  %s2437_s13 = sshll.u32 (%p2575_p5), %s2560_s21, 3  ;;  %v2132_v3 = vld [vmem:[%s3128_s29] sm:$0xff] (%p2575_p5)  ;;  %v2134_v4 = vld [vmem:[%s3128_s29 + $0x8] sm:$0xff] (%p2575_p5) }
 0x278   : > { %s2102_s16 = scalar_lea.vmem (%p2575_p5), %s3186_s5, %s2437_s13 }
 0x279   : > { %2133 = vst [vmem:[%s2102_s16] sm:$0xff] (%p2575_p5), %v2132_v3  ;;  %2135 = vst [vmem:[%s2102_s16 + $0x10] sm:$0xff] (%p2575_p5), %v2134_v4 }
 0x27e PF: > { %p13_p10 = scmp.ge.s32.totalorder %s2563_s22, 4   ;;  %s3188_s18 = smov %s2507_s19 }
 0x27f   : > { %s3189_s19 = smov %s2573_s25  ;;  %s3190_s20 = smov %s2563_s22 }
 0x280   :  { %15 = sbr.rel (!%p13_p10) target bundleno = 2 (0x2), region = 213 }

// kernel: unet_forward.7
= control target key start
LH: loop header
LB: loop body
LE: loop exit
PB: predicated region body
PF: predicated region fallthrough
CT: control target
= control target key end

     0   :  { %11 = vsyncpa [#allocation4], 0  ;;  %s7086_s0 = inlined_call_operand.vmem [shape: bf16[4,72], index: 0, kind: input, shape index: {}]   ;;  %s7087_s1 = inlined_call_operand.vmem [shape: bf16[72,16384], index: 1, kind: input, shape index: {}]   ;;  %s7088_s2 = inlined_call_operand.vmem [shape: f32[4,1], index: 2, kind: input, shape index: {}]   ;;  %s7089_s3 = inlined_call_operand.vmem [shape: f32[4,16384], index: 3, kind: output, shape index: {0}]   ;;  %s7090_s4 = inlined_call_operand.hbm [shape: f32[4,256], index: 4, kind: output, shape index: {1}]   ;;  %s7091_s5 = inlined_call_operand.hbm [shape: f32[4,256], index: 5, kind: output, shape index: {2}]  }
   0x1   :  { %13 = vsyncpa [#allocation4 + $0x1], 0 }
   0x2   :  { %14 = vsyncpa [#allocation6], 0 }
   0x3   :  { %16 = vsyncpa [#allocation6 + $0x1], 0  ;;  %s5570_s18 = smov 0   ;;  %s5572_s19 = smov 0  }
   0x4   :  { %s5574_s20 = smov 0   ;;  %s5576_s21 = smov 0  }
   0x5 LB: > { %s4797_s22 = sadd.s32 4294967295, %s5535_s21   ;;  %s4798_s23 = sadd.s32 4294967294, %s5535_s21   ;;  %s5535_s21 = sphi %s5576_s21, %s7097_s21   ;;  %s5531_s20 = sphi %s5574_s20, %s7096_s20   ;;  %s5527_s19 = sphi %s5572_s19, %s7095_s19   ;;  %s5523_s18 = sphi %s5570_s18, %s7094_s18  }
   0x6   : > { %s5593_s24 = sadd.s32 1, %s5535_s21   ;;  %s50_s25 = sadd.s32 1, %s5531_s20 }
   0x7   : > { %s47_s26 = ssub.s32 %s5535_s21, %s5593_s24  ;;  %p57_p0 = scmp.ne.s32.totalorder %s5531_s20, %s5527_s19 }
   0x8   : > { %p48_p1 = scmp.eq.s32.totalorder %s47_s26, 0  ;;  %p58_p2 = scmp.eq.s32.totalorder %s5535_s21, 0 }
   0x9   : > { %p134_p3 = scmp.eq.s32.totalorder %s4797_s22, 1  ;;  %p139_p4 = scmp.ne.s32.totalorder %s5527_s19, %s5523_s18 }
   0xa   : > { %s5606_s27 = scalar_select %p48_p1, %s5531_s20, %s50_s25  }
   0xb   : > { %p59_p5 = por %p58_p2, %p57_p0  ;;  %p5608_p6 = por %p134_p3, %p57_p0 }
   0xc   : > { %p140_p7 = scmp.eq.s32.totalorder %s4798_s23, 1  ;;  %p4800_p9 = scmp.ge.s32.totalorder %s5535_s21, 2 }
   0xe   : > { %p5612_p8 = por %p140_p7, %p139_p4  ;;  %188 = sbr.rel (%p4800_p9) target bundleno = 170 (0xaa), region = 24 }
  0x15   : > { %191 = sbr.rel (!%p59_p5) target bundleno = 170 (0xaa), region = 28  ;;  %s193_s30 = sand.u32 (%p59_p5), 1, %s5531_s20  }
  0x16   : > { %s5198_s6 = sshll.u32 (%p59_p5), %s5535_s21, 8  ;;  %s5199_s7 = smul.u32 (%p59_p5), 2304, %s193_s30 }
  0x17   : > { %s5624_s10 = scalar_lea.vmem (%p59_p5), %s7087_s1, %s5198_s6 }
  0x18   : > { %v211_v0 = vld [vmem:[%s5624_s10] sm:$0xff] (%p59_p5)  ;;  %v213_v1 = vld [vmem:[%s5624_s10 + $0x8] sm:$0xff] (%p59_p5)  ;;  %v215_v2 = vld [vmem:[%s5624_s10 + $0x10] sm:$0xff] (%p59_p5)  ;;  %s5632_s11 = scalar_lea.vmem (%p59_p5), [#allocation2], %s5199_s7 }
  0x19   : > { %v217_v3 = vld [vmem:[%s5624_s10 + $0x18] sm:$0xff] (%p59_p5)  ;;  %v219_v4 = vld [vmem:[%s5624_s10 + $0x20] sm:$0xff] (%p59_p5)  ;;  %v221_v5 = vld [vmem:[%s5624_s10 + $0x28] sm:$0xff] (%p59_p5)  ;;  %212 = vst [vmem:[%s5632_s11] sm:$0xff] (%p59_p5), %v211_v0 }
  0x1a   : > { %214 = vst [vmem:[%s5632_s11 + $0x8] sm:$0xff] (%p59_p5), %v213_v1  ;;  %216 = vst [vmem:[%s5632_s11 + $0x10] sm:$0xff] (%p59_p5), %v215_v2  ;;  %v223_v6 = vld [vmem:[%s5624_s10 + $0x30] sm:$0xff] (%p59_p5)  ;;  %v225_v7 = vld [vmem:[%s5624_s10 + $0x38] sm:$0xff] (%p59_p5) }
  0x1b   : > { %218 = vst [vmem:[%s5632_s11 + $0x18] sm:$0xff] (%p59_p5), %v217_v3  ;;  %220 = vst [vmem:[%s5632_s11 + $0x20] sm:$0xff] (%p59_p5), %v219_v4  ;;  %v227_v8 = vld [vmem:[%s5624_s10 + $0x40] sm:$0xff] (%p59_p5)  ;;  %v229_v9 = vld [vmem:[%s5624_s10 + $0x48] sm:$0xff] (%p59_p5) }
  0x1c   : > { %222 = vst [vmem:[%s5632_s11 + $0x28] sm:$0xff] %v221_v5  ;;  %224 = vst [vmem:[%s5632_s11 + $0x30] sm:$0xff] %v223_v6  ;;  %v231_v10 = vld [vmem:[%s5624_s10 + $0x50] sm:$0xff]  ;;  %v233_v11 = vld [vmem:[%s5624_s10 + $0x58] sm:$0xff] }
  0x1d   : > { %226 = vst [vmem:[%s5632_s11 + $0x38] sm:$0xff] %v225_v7  ;;  %228 = vst [vmem:[%s5632_s11 + $0x40] sm:$0xff] %v227_v8  ;;  %v235_v12 = vld [vmem:[%s5624_s10 + $0x60] sm:$0xff]  ;;  %v237_v13 = vld [vmem:[%s5624_s10 + $0x68] sm:$0xff] }
  0x1e   : > { %230 = vst [vmem:[%s5632_s11 + $0x48] sm:$0xff] %v229_v9  ;;  %232 = vst [vmem:[%s5632_s11 + $0x50] sm:$0xff] %v231_v10  ;;  %v239_v14 = vld [vmem:[%s5624_s10 + $0x70] sm:$0xff]  ;;  %v241_v15 = vld [vmem:[%s5624_s10 + $0x78] sm:$0xff] }
  0x1f   : > { %234 = vst [vmem:[%s5632_s11 + $0x58] sm:$0xff] %v233_v11  ;;  %236 = vst [vmem:[%s5632_s11 + $0x60] sm:$0xff] %v235_v12  ;;  %v243_v16 = vld [vmem:[%s5624_s10 + $0x80] sm:$0xff]  ;;  %v245_v17 = vld [vmem:[%s5624_s10 + $0x88] sm:$0xff] }
  0x20   : > { %238 = vst [vmem:[%s5632_s11 + $0x68] sm:$0xff] %v237_v13  ;;  %240 = vst [vmem:[%s5632_s11 + $0x70] sm:$0xff] %v239_v14  ;;  %v247_v18 = vld [vmem:[%s5624_s10 + $0x90] sm:$0xff]  ;;  %v249_v19 = vld [vmem:[%s5624_s10 + $0x98] sm:$0xff] }
  0x21   : > { %242 = vst [vmem:[%s5632_s11 + $0x78] sm:$0xff] %v241_v15  ;;  %244 = vst [vmem:[%s5632_s11 + $0x80] sm:$0xff] %v243_v16  ;;  %v251_v20 = vld [vmem:[%s5624_s10 + $0xa0] sm:$0xff]  ;;  %v253_v21 = vld [vmem:[%s5624_s10 + $0xa8] sm:$0xff] }
  0x22   : > { %246 = vst [vmem:[%s5632_s11 + $0x88] sm:$0xff] %v245_v17  ;;  %248 = vst [vmem:[%s5632_s11 + $0x90] sm:$0xff] %v247_v18  ;;  %v255_v22 = vld [vmem:[%s5624_s10 + $0xb0] sm:$0xff]  ;;  %v257_v23 = vld [vmem:[%s5624_s10 + $0xb8] sm:$0xff] }
  0x23   : > { %250 = vst [vmem:[%s5632_s11 + $0x98] sm:$0xff] %v249_v19  ;;  %252 = vst [vmem:[%s5632_s11 + $0xa0] sm:$0xff] %v251_v20  ;;  %v259_v24 = vld [vmem:[%s5624_s10 + $0xc0] sm:$0xff]  ;;  %v261_v25 = vld [vmem:[%s5624_s10 + $0xc8] sm:$0xff] }
  0x24   : > { %254 = vst [vmem:[%s5632_s11 + $0xa8] sm:$0xff] %v253_v21  ;;  %256 = vst [vmem:[%s5632_s11 + $0xb0] sm:$0xff] %v255_v22  ;;  %v263_v26 = vld [vmem:[%s5624_s10 + $0xd0] sm:$0xff]  ;;  %v265_v27 = vld [vmem:[%s5624_s10 + $0xd8] sm:$0xff] }
  0x25   : > { %258 = vst [vmem:[%s5632_s11 + $0xb8] sm:$0xff] %v257_v23  ;;  %260 = vst [vmem:[%s5632_s11 + $0xc0] sm:$0xff] %v259_v24  ;;  %v267_v28 = vld [vmem:[%s5624_s10 + $0xe0] sm:$0xff]  ;;  %v269_v29 = vld [vmem:[%s5624_s10 + $0xe8] sm:$0xff] }
  0x26   : > { %262 = vst [vmem:[%s5632_s11 + $0xc8] sm:$0xff] %v261_v25  ;;  %264 = vst [vmem:[%s5632_s11 + $0xd0] sm:$0xff] %v263_v26  ;;  %v271_v30 = vld [vmem:[%s5624_s10 + $0xf0] sm:$0xff]  ;;  %v273_v31 = vld [vmem:[%s5624_s10 + $0xf8] sm:$0xff] }
  0x27   : > { %266 = vst [vmem:[%s5632_s11 + $0xd8] sm:$0xff] %v265_v27  ;;  %268 = vst [vmem:[%s5632_s11 + $0xe0] sm:$0xff] %v267_v28  ;;  %v275_v32 = vld [vmem:[%s5624_s10 + $0x200] sm:$0xff]  ;;  %v277_v33 = vld [vmem:[%s5624_s10 + $0x208] sm:$0xff] }
  0x28   : > { %270 = vst [vmem:[%s5632_s11 + $0xe8] sm:$0xff] %v269_v29  ;;  %272 = vst [vmem:[%s5632_s11 + $0xf0] sm:$0xff] %v271_v30  ;;  %v279_v34 = vld [vmem:[%s5624_s10 + $0x210] sm:$0xff]  ;;  %v281_v35 = vld [vmem:[%s5624_s10 + $0x218] sm:$0xff] }
  0x29   : > { %274 = vst [vmem:[%s5632_s11 + $0xf8] sm:$0xff] %v273_v31  ;;  %276 = vst [vmem:[%s5632_s11 + $0x100] sm:$0xff] %v275_v32  ;;  %v283_v36 = vld [vmem:[%s5624_s10 + $0x220] sm:$0xff]  ;;  %v285_v37 = vld [vmem:[%s5624_s10 + $0x228] sm:$0xff] }
  0x2a   : > { %278 = vst [vmem:[%s5632_s11 + $0x108] sm:$0xff] %v277_v33  ;;  %280 = vst [vmem:[%s5632_s11 + $0x110] sm:$0xff] %v279_v34  ;;  %v287_v38 = vld [vmem:[%s5624_s10 + $0x230] sm:$0xff]  ;;  %v289_v39 = vld [vmem:[%s5624_s10 + $0x238] sm:$0xff] }
  0x2b   : > { %282 = vst [vmem:[%s5632_s11 + $0x118] sm:$0xff] %v281_v35  ;;  %284 = vst [vmem:[%s5632_s11 + $0x120] sm:$0xff] %v283_v36  ;;  %v291_v40 = vld [vmem:[%s5624_s10 + $0x240] sm:$0xff]  ;;  %v293_v41 = vld [vmem:[%s5624_s10 + $0x248] sm:$0xff] }
  0x2c   : > { %286 = vst [vmem:[%s5632_s11 + $0x128] sm:$0xff] %v285_v37  ;;  %288 = vst [vmem:[%s5632_s11 + $0x130] sm:$0xff] %v287_v38  ;;  %v295_v42 = vld [vmem:[%s5624_s10 + $0x250] sm:$0xff]  ;;  %v297_v43 = vld [vmem:[%s5624_s10 + $0x258] sm:$0xff] }
  0x2d   : > { %290 = vst [vmem:[%s5632_s11 + $0x138] sm:$0xff] %v289_v39  ;;  %292 = vst [vmem:[%s5632_s11 + $0x140] sm:$0xff] %v291_v40  ;;  %v299_v44 = vld [vmem:[%s5624_s10 + $0x260] sm:$0xff]  ;;  %v301_v45 = vld [vmem:[%s5624_s10 + $0x268] sm:$0xff] }
  0x2e   : > { %294 = vst [vmem:[%s5632_s11 + $0x148] sm:$0xff] %v293_v41  ;;  %296 = vst [vmem:[%s5632_s11 + $0x150] sm:$0xff] %v295_v42  ;;  %v303_v46 = vld [vmem:[%s5624_s10 + $0x270] sm:$0xff]  ;;  %v305_v47 = vld [vmem:[%s5624_s10 + $0x278] sm:$0xff] }
  0x2f   : > { %298 = vst [vmem:[%s5632_s11 + $0x158] sm:$0xff] %v297_v43  ;;  %300 = vst [vmem:[%s5632_s11 + $0x160] sm:$0xff] %v299_v44  ;;  %v307_v48 = vld [vmem:[%s5624_s10 + $0x280] sm:$0xff]  ;;  %v309_v49 = vld [vmem:[%s5624_s10 + $0x288] sm:$0xff] }
  0x30   : > { %302 = vst [vmem:[%s5632_s11 + $0x168] sm:$0xff] %v301_v45  ;;  %304 = vst [vmem:[%s5632_s11 + $0x170] sm:$0xff] %v303_v46  ;;  %v311_v50 = vld [vmem:[%s5624_s10 + $0x290] sm:$0xff]  ;;  %v313_v51 = vld [vmem:[%s5624_s10 + $0x298] sm:$0xff] }
  0x31   : > { %306 = vst [vmem:[%s5632_s11 + $0x178] sm:$0xff] %v305_v47  ;;  %308 = vst [vmem:[%s5632_s11 + $0x180] sm:$0xff] %v307_v48  ;;  %v315_v52 = vld [vmem:[%s5624_s10 + $0x2a0] sm:$0xff]  ;;  %v317_v53 = vld [vmem:[%s5624_s10 + $0x2a8] sm:$0xff] }
  0x32   : > { %310 = vst [vmem:[%s5632_s11 + $0x188] sm:$0xff] %v309_v49  ;;  %312 = vst [vmem:[%s5632_s11 + $0x190] sm:$0xff] %v311_v50  ;;  %v319_v54 = vld [vmem:[%s5624_s10 + $0x2b0] sm:$0xff]  ;;  %v321_v55 = vld [vmem:[%s5624_s10 + $0x2b8] sm:$0xff] }
  0x33   : > { %314 = vst [vmem:[%s5632_s11 + $0x198] sm:$0xff] %v313_v51  ;;  %316 = vst [vmem:[%s5632_s11 + $0x1a0] sm:$0xff] %v315_v52  ;;  %v323_v56 = vld [vmem:[%s5624_s10 + $0x2c0] sm:$0xff]  ;;  %v325_v57 = vld [vmem:[%s5624_s10 + $0x2c8] sm:$0xff] }
  0x34   : > { %318 = vst [vmem:[%s5632_s11 + $0x1a8] sm:$0xff] %v317_v53  ;;  %320 = vst [vmem:[%s5632_s11 + $0x1b0] sm:$0xff] %v319_v54  ;;  %v327_v58 = vld [vmem:[%s5624_s10 + $0x2d0] sm:$0xff]  ;;  %v329_v59 = vld [vmem:[%s5624_s10 + $0x2d8] sm:$0xff] }
  0x35   : > { %322 = vst [vmem:[%s5632_s11 + $0x1b8] sm:$0xff] %v321_v55  ;;  %324 = vst [vmem:[%s5632_s11 + $0x1c0] sm:$0xff] %v323_v56  ;;  %v331_v60 = vld [vmem:[%s5624_s10 + $0x2e0] sm:$0xff]  ;;  %v333_v61 = vld [vmem:[%s5624_s10 + $0x2e8] sm:$0xff] }
  0x36   : > { %326 = vst [vmem:[%s5632_s11 + $0x1c8] sm:$0xff] %v325_v57  ;;  %328 = vst [vmem:[%s5632_s11 + $0x1d0] sm:$0xff] %v327_v58  ;;  %v335_v62 = vld [vmem:[%s5624_s10 + $0x2f0] sm:$0xff]  ;;  %v337_v63 = vld [vmem:[%s5624_s10 + $0x2f8] sm:$0xff] }
  0x37   : > { %330 = vst [vmem:[%s5632_s11 + $0x1d8] sm:$0xff] %v329_v59  ;;  %332 = vst [vmem:[%s5632_s11 + $0x1e0] sm:$0xff] %v331_v60  ;;  %v339_v0 = vld [vmem:[%s5624_s10 + $0x400] sm:$0xff]  ;;  %v341_v1 = vld [vmem:[%s5624_s10 + $0x408] sm:$0xff] }
  0x38   : > { %334 = vst [vmem:[%s5632_s11 + $0x1e8] sm:$0xff] %v333_v61  ;;  %336 = vst [vmem:[%s5632_s11 + $0x1f0] sm:$0xff] %v335_v62  ;;  %v343_v2 = vld [vmem:[%s5624_s10 + $0x410] sm:$0xff]  ;;  %v345_v3 = vld [vmem:[%s5624_s10 + $0x418] sm:$0xff] }
  0x39   : > { %338 = vst [vmem:[%s5632_s11 + $0x1f8] sm:$0xff] %v337_v63  ;;  %340 = vst [vmem:[%s5632_s11 + $0x200] sm:$0xff] %v339_v0  ;;  %v347_v4 = vld [vmem:[%s5624_s10 + $0x420] sm:$0xff]  ;;  %v349_v5 = vld [vmem:[%s5624_s10 + $0x428] sm:$0xff] }
  0x3a   : > { %342 = vst [vmem:[%s5632_s11 + $0x208] sm:$0xff] %v341_v1  ;;  %344 = vst [vmem:[%s5632_s11 + $0x210] sm:$0xff] %v343_v2  ;;  %v351_v6 = vld [vmem:[%s5624_s10 + $0x430] sm:$0xff]  ;;  %v353_v7 = vld [vmem:[%s5624_s10 + $0x438] sm:$0xff] }
  0x3b   : > { %346 = vst [vmem:[%s5632_s11 + $0x218] sm:$0xff] %v345_v3  ;;  %348 = vst [vmem:[%s5632_s11 + $0x220] sm:$0xff] %v347_v4  ;;  %v355_v8 = vld [vmem:[%s5624_s10 + $0x440] sm:$0xff]  ;;  %v357_v9 = vld [vmem:[%s5624_s10 + $0x448] sm:$0xff] }
  0x3c   : > { %350 = vst [vmem:[%s5632_s11 + $0x228] sm:$0xff] %v349_v5  ;;  %352 = vst [vmem:[%s5632_s11 + $0x230] sm:$0xff] %v351_v6  ;;  %v359_v10 = vld [vmem:[%s5624_s10 + $0x450] sm:$0xff]  ;;  %v361_v11 = vld [vmem:[%s5624_s10 + $0x458] sm:$0xff] }
  0x3d   : > { %354 = vst [vmem:[%s5632_s11 + $0x238] sm:$0xff] %v353_v7  ;;  %356 = vst [vmem:[%s5632_s11 + $0x240] sm:$0xff] %v355_v8  ;;  %v363_v12 = vld [vmem:[%s5624_s10 + $0x460] sm:$0xff]  ;;  %v365_v13 = vld [vmem:[%s5624_s10 + $0x468] sm:$0xff] }
  0x3e   : > { %358 = vst [vmem:[%s5632_s11 + $0x248] sm:$0xff] %v357_v9  ;;  %360 = vst [vmem:[%s5632_s11 + $0x250] sm:$0xff] %v359_v10  ;;  %v367_v14 = vld [vmem:[%s5624_s10 + $0x470] sm:$0xff]  ;;  %v369_v15 = vld [vmem:[%s5624_s10 + $0x478] sm:$0xff] }
  0x3f   : > { %362 = vst [vmem:[%s5632_s11 + $0x258] sm:$0xff] %v361_v11  ;;  %364 = vst [vmem:[%s5632_s11 + $0x260] sm:$0xff] %v363_v12  ;;  %v371_v16 = vld [vmem:[%s5624_s10 + $0x480] sm:$0xff]  ;;  %v373_v17 = vld [vmem:[%s5624_s10 + $0x488] sm:$0xff] }
  0x40   : > { %366 = vst [vmem:[%s5632_s11 + $0x268] sm:$0xff] %v365_v13  ;;  %368 = vst [vmem:[%s5632_s11 + $0x270] sm:$0xff] %v367_v14  ;;  %v375_v18 = vld [vmem:[%s5624_s10 + $0x490] sm:$0xff]  ;;  %v377_v19 = vld [vmem:[%s5624_s10 + $0x498] sm:$0xff] }
  0x41   : > { %370 = vst [vmem:[%s5632_s11 + $0x278] sm:$0xff] %v369_v15  ;;  %372 = vst [vmem:[%s5632_s11 + $0x280] sm:$0xff] %v371_v16  ;;  %v379_v20 = vld [vmem:[%s5624_s10 + $0x4a0] sm:$0xff]  ;;  %v381_v21 = vld [vmem:[%s5624_s10 + $0x4a8] sm:$0xff] }
  0x42   : > { %374 = vst [vmem:[%s5632_s11 + $0x288] sm:$0xff] %v373_v17  ;;  %376 = vst [vmem:[%s5632_s11 + $0x290] sm:$0xff] %v375_v18  ;;  %v383_v22 = vld [vmem:[%s5624_s10 + $0x4b0] sm:$0xff]  ;;  %v385_v23 = vld [vmem:[%s5624_s10 + $0x4b8] sm:$0xff] }
  0x43   : > { %378 = vst [vmem:[%s5632_s11 + $0x298] sm:$0xff] %v377_v19  ;;  %380 = vst [vmem:[%s5632_s11 + $0x2a0] sm:$0xff] %v379_v20  ;;  %v387_v24 = vld [vmem:[%s5624_s10 + $0x4c0] sm:$0xff]  ;;  %v389_v25 = vld [vmem:[%s5624_s10 + $0x4c8] sm:$0xff] }
  0x44   : > { %382 = vst [vmem:[%s5632_s11 + $0x2a8] sm:$0xff] %v381_v21  ;;  %384 = vst [vmem:[%s5632_s11 + $0x2b0] sm:$0xff] %v383_v22  ;;  %v391_v26 = vld [vmem:[%s5624_s10 + $0x4d0] sm:$0xff]  ;;  %v393_v27 = vld [vmem:[%s5624_s10 + $0x4d8] sm:$0xff] }
  0x45   : > { %386 = vst [vmem:[%s5632_s11 + $0x2b8] sm:$0xff] %v385_v23  ;;  %388 = vst [vmem:[%s5632_s11 + $0x2c0] sm:$0xff] %v387_v24  ;;  %v395_v28 = vld [vmem:[%s5624_s10 + $0x4e0] sm:$0xff]  ;;  %v397_v29 = vld [vmem:[%s5624_s10 + $0x4e8] sm:$0xff] }
  0x46   : > { %390 = vst [vmem:[%s5632_s11 + $0x2c8] sm:$0xff] %v389_v25  ;;  %392 = vst [vmem:[%s5632_s11 + $0x2d0] sm:$0xff] %v391_v26  ;;  %v399_v30 = vld [vmem:[%s5624_s10 + $0x4f0] sm:$0xff]  ;;  %v401_v31 = vld [vmem:[%s5624_s10 + $0x4f8] sm:$0xff] }
  0x47   : > { %394 = vst [vmem:[%s5632_s11 + $0x2d8] sm:$0xff] %v393_v27  ;;  %396 = vst [vmem:[%s5632_s11 + $0x2e0] sm:$0xff] %v395_v28  ;;  %v403_v32 = vld [vmem:[%s5624_s10 + $0x600] sm:$0xff]  ;;  %v405_v33 = vld [vmem:[%s5624_s10 + $0x608] sm:$0xff] }
  0x48   : > { %398 = vst [vmem:[%s5632_s11 + $0x2e8] sm:$0xff] %v397_v29  ;;  %400 = vst [vmem:[%s5632_s11 + $0x2f0] sm:$0xff] %v399_v30  ;;  %v407_v34 = vld [vmem:[%s5624_s10 + $0x610] sm:$0xff]  ;;  %v409_v35 = vld [vmem:[%s5624_s10 + $0x618] sm:$0xff] }
  0x49   : > { %402 = vst [vmem:[%s5632_s11 + $0x2f8] sm:$0xff] %v401_v31  ;;  %404 = vst [vmem:[%s5632_s11 + $0x300] sm:$0xff] %v403_v32  ;;  %v411_v36 = vld [vmem:[%s5624_s10 + $0x620] sm:$0xff]  ;;  %v413_v37 = vld [vmem:[%s5624_s10 + $0x628] sm:$0xff] }
  0x4a   : > { %406 = vst [vmem:[%s5632_s11 + $0x308] sm:$0xff] %v405_v33  ;;  %408 = vst [vmem:[%s5632_s11 + $0x310] sm:$0xff] %v407_v34  ;;  %v415_v38 = vld [vmem:[%s5624_s10 + $0x630] sm:$0xff]  ;;  %v417_v39 = vld [vmem:[%s5624_s10 + $0x638] sm:$0xff] }
  0x4b   : > { %410 = vst [vmem:[%s5632_s11 + $0x318] sm:$0xff] %v409_v35  ;;  %412 = vst [vmem:[%s5632_s11 + $0x320] sm:$0xff] %v411_v36  ;;  %v419_v40 = vld [vmem:[%s5624_s10 + $0x640] sm:$0xff]  ;;  %v421_v41 = vld [vmem:[%s5624_s10 + $0x648] sm:$0xff] }
  0x4c   : > { %414 = vst [vmem:[%s5632_s11 + $0x328] sm:$0xff] %v413_v37  ;;  %416 = vst [vmem:[%s5632_s11 + $0x330] sm:$0xff] %v415_v38  ;;  %v423_v42 = vld [vmem:[%s5624_s10 + $0x650] sm:$0xff]  ;;  %v425_v43 = vld [vmem:[%s5624_s10 + $0x658] sm:$0xff] }
  0x4d   : > { %418 = vst [vmem:[%s5632_s11 + $0x338] sm:$0xff] %v417_v39  ;;  %420 = vst [vmem:[%s5632_s11 + $0x340] sm:$0xff] %v419_v40  ;;  %v427_v44 = vld [vmem:[%s5624_s10 + $0x660] sm:$0xff]  ;;  %v429_v45 = vld [vmem:[%s5624_s10 + $0x668] sm:$0xff] }
  0x4e   : > { %422 = vst [vmem:[%s5632_s11 + $0x348] sm:$0xff] %v421_v41  ;;  %424 = vst [vmem:[%s5632_s11 + $0x350] sm:$0xff] %v423_v42  ;;  %v431_v46 = vld [vmem:[%s5624_s10 + $0x670] sm:$0xff]  ;;  %v433_v47 = vld [vmem:[%s5624_s10 + $0x678] sm:$0xff] }
  0x4f   : > { %426 = vst [vmem:[%s5632_s11 + $0x358] sm:$0xff] %v425_v43  ;;  %428 = vst [vmem:[%s5632_s11 + $0x360] sm:$0xff] %v427_v44  ;;  %v435_v48 = vld [vmem:[%s5624_s10 + $0x680] sm:$0xff]  ;;  %v437_v49 = vld [vmem:[%s5624_s10 + $0x688] sm:$0xff] }
  0x50   : > { %430 = vst [vmem:[%s5632_s11 + $0x368] sm:$0xff] %v429_v45  ;;  %432 = vst [vmem:[%s5632_s11 + $0x370] sm:$0xff] %v431_v46  ;;  %v439_v50 = vld [vmem:[%s5624_s10 + $0x690] sm:$0xff]  ;;  %v441_v51 = vld [vmem:[%s5624_s10 + $0x698] sm:$0xff] }
  0x51   : > { %434 = vst [vmem:[%s5632_s11 + $0x378] sm:$0xff] %v433_v47  ;;  %436 = vst [vmem:[%s5632_s11 + $0x380] sm:$0xff] %v435_v48  ;;  %v443_v52 = vld [vmem:[%s5624_s10 + $0x6a0] sm:$0xff]  ;;  %v445_v53 = vld [vmem:[%s5624_s10 + $0x6a8] sm:$0xff] }
  0x52   : > { %438 = vst [vmem:[%s5632_s11 + $0x388] sm:$0xff] %v437_v49  ;;  %440 = vst [vmem:[%s5632_s11 + $0x390] sm:$0xff] %v439_v50  ;;  %v447_v54 = vld [vmem:[%s5624_s10 + $0x6b0] sm:$0xff]  ;;  %v449_v55 = vld [vmem:[%s5624_s10 + $0x6b8] sm:$0xff] }
  0x53   : > { %442 = vst [vmem:[%s5632_s11 + $0x398] sm:$0xff] %v441_v51  ;;  %444 = vst [vmem:[%s5632_s11 + $0x3a0] sm:$0xff] %v443_v52  ;;  %v451_v56 = vld [vmem:[%s5624_s10 + $0x6c0] sm:$0xff]  ;;  %v453_v57 = vld [vmem:[%s5624_s10 + $0x6c8] sm:$0xff] }
  0x54   : > { %446 = vst [vmem:[%s5632_s11 + $0x3a8] sm:$0xff] %v445_v53  ;;  %448 = vst [vmem:[%s5632_s11 + $0x3b0] sm:$0xff] %v447_v54  ;;  %v455_v58 = vld [vmem:[%s5624_s10 + $0x6d0] sm:$0xff]  ;;  %v457_v59 = vld [vmem:[%s5624_s10 + $0x6d8] sm:$0xff] }
  0x55   : > { %450 = vst [vmem:[%s5632_s11 + $0x3b8] sm:$0xff] %v449_v55  ;;  %452 = vst [vmem:[%s5632_s11 + $0x3c0] sm:$0xff] %v451_v56  ;;  %v459_v60 = vld [vmem:[%s5624_s10 + $0x6e0] sm:$0xff]  ;;  %v461_v61 = vld [vmem:[%s5624_s10 + $0x6e8] sm:$0xff] }
  0x56   : > { %454 = vst [vmem:[%s5632_s11 + $0x3c8] sm:$0xff] %v453_v57  ;;  %456 = vst [vmem:[%s5632_s11 + $0x3d0] sm:$0xff] %v455_v58  ;;  %v463_v62 = vld [vmem:[%s5624_s10 + $0x6f0] sm:$0xff]  ;;  %v465_v63 = vld [vmem:[%s5624_s10 + $0x6f8] sm:$0xff] }
  0x57   : > { %458 = vst [vmem:[%s5632_s11 + $0x3d8] sm:$0xff] %v457_v59  ;;  %460 = vst [vmem:[%s5632_s11 + $0x3e0] sm:$0xff] %v459_v60  ;;  %v467_v0 = vld [vmem:[%s5624_s10 + $0x800] sm:$0xff]  ;;  %v469_v1 = vld [vmem:[%s5624_s10 + $0x808] sm:$0xff] }
  0x58   : > { %462 = vst [vmem:[%s5632_s11 + $0x3e8] sm:$0xff] %v461_v61  ;;  %464 = vst [vmem:[%s5632_s11 + $0x3f0] sm:$0xff] %v463_v62  ;;  %v471_v2 = vld [vmem:[%s5624_s10 + $0x810] sm:$0xff]  ;;  %v473_v3 = vld [vmem:[%s5624_s10 + $0x818] sm:$0xff] }
  0x59   : > { %466 = vst [vmem:[%s5632_s11 + $0x3f8] sm:$0xff] %v465_v63  ;;  %468 = vst [vmem:[%s5632_s11 + $0x400] sm:$0xff] %v467_v0  ;;  %v475_v4 = vld [vmem:[%s5624_s10 + $0x820] sm:$0xff]  ;;  %v477_v5 = vld [vmem:[%s5624_s10 + $0x828] sm:$0xff] }
  0x5a   : > { %470 = vst [vmem:[%s5632_s11 + $0x408] sm:$0xff] %v469_v1  ;;  %472 = vst [vmem:[%s5632_s11 + $0x410] sm:$0xff] %v471_v2  ;;  %v479_v6 = vld [vmem:[%s5624_s10 + $0x830] sm:$0xff]  ;;  %v481_v7 = vld [vmem:[%s5624_s10 + $0x838] sm:$0xff] }
  0x5b   : > { %474 = vst [vmem:[%s5632_s11 + $0x418] sm:$0xff] %v473_v3  ;;  %476 = vst [vmem:[%s5632_s11 + $0x420] sm:$0xff] %v475_v4  ;;  %v483_v8 = vld [vmem:[%s5624_s10 + $0x840] sm:$0xff]  ;;  %v485_v9 = vld [vmem:[%s5624_s10 + $0x848] sm:$0xff] }
  0x5c   : > { %478 = vst [vmem:[%s5632_s11 + $0x428] sm:$0xff] %v477_v5  ;;  %480 = vst [vmem:[%s5632_s11 + $0x430] sm:$0xff] %v479_v6  ;;  %v487_v10 = vld [vmem:[%s5624_s10 + $0x850] sm:$0xff]  ;;  %v489_v11 = vld [vmem:[%s5624_s10 + $0x858] sm:$0xff] }
  0x5d   : > { %482 = vst [vmem:[%s5632_s11 + $0x438] sm:$0xff] %v481_v7  ;;  %484 = vst [vmem:[%s5632_s11 + $0x440] sm:$0xff] %v483_v8  ;;  %v491_v12 = vld [vmem:[%s5624_s10 + $0x860] sm:$0xff]  ;;  %v493_v13 = vld [vmem:[%s5624_s10 + $0x868] sm:$0xff] }
  0x5e   : > { %486 = vst [vmem:[%s5632_s11 + $0x448] sm:$0xff] %v485_v9  ;;  %488 = vst [vmem:[%s5632_s11 + $0x450] sm:$0xff] %v487_v10  ;;  %v495_v14 = vld [vmem:[%s5624_s10 + $0x870] sm:$0xff]  ;;  %v497_v15 = vld [vmem:[%s5624_s10 + $0x878] sm:$0xff] }
  0x5f   : > { %490 = vst [vmem:[%s5632_s11 + $0x458] sm:$0xff] %v489_v11  ;;  %492 = vst [vmem:[%s5632_s11 + $0x460] sm:$0xff] %v491_v12  ;;  %v499_v16 = vld [vmem:[%s5624_s10 + $0x880] sm:$0xff]  ;;  %v501_v17 = vld [vmem:[%s5624_s10 + $0x888] sm:$0xff] }
  0x60   : > { %494 = vst [vmem:[%s5632_s11 + $0x468] sm:$0xff] %v493_v13  ;;  %496 = vst [vmem:[%s5632_s11 + $0x470] sm:$0xff] %v495_v14  ;;  %v503_v18 = vld [vmem:[%s5624_s10 + $0x890] sm:$0xff]  ;;  %v505_v19 = vld [vmem:[%s5624_s10 + $0x898] sm:$0xff] }
  0x61   : > { %498 = vst [vmem:[%s5632_s11 + $0x478] sm:$0xff] %v497_v15  ;;  %500 = vst [vmem:[%s5632_s11 + $0x480] sm:$0xff] %v499_v16  ;;  %v507_v20 = vld [vmem:[%s5624_s10 + $0x8a0] sm:$0xff]  ;;  %v509_v21 = vld [vmem:[%s5624_s10 + $0x8a8] sm:$0xff] }
  0x62   : > { %502 = vst [vmem:[%s5632_s11 + $0x488] sm:$0xff] %v501_v17  ;;  %504 = vst [vmem:[%s5632_s11 + $0x490] sm:$0xff] %v503_v18  ;;  %v511_v22 = vld [vmem:[%s5624_s10 + $0x8b0] sm:$0xff]  ;;  %v513_v23 = vld [vmem:[%s5624_s10 + $0x8b8] sm:$0xff] }
  0x63   : > { %506 = vst [vmem:[%s5632_s11 + $0x498] sm:$0xff] %v505_v19  ;;  %508 = vst [vmem:[%s5632_s11 + $0x4a0] sm:$0xff] %v507_v20  ;;  %v515_v24 = vld [vmem:[%s5624_s10 + $0x8c0] sm:$0xff]  ;;  %v517_v25 = vld [vmem:[%s5624_s10 + $0x8c8] sm:$0xff] }
  0x64   : > { %510 = vst [vmem:[%s5632_s11 + $0x4a8] sm:$0xff] %v509_v21  ;;  %512 = vst [vmem:[%s5632_s11 + $0x4b0] sm:$0xff] %v511_v22  ;;  %v519_v26 = vld [vmem:[%s5624_s10 + $0x8d0] sm:$0xff]  ;;  %v521_v27 = vld [vmem:[%s5624_s10 + $0x8d8] sm:$0xff] }
  0x65   : > { %514 = vst [vmem:[%s5632_s11 + $0x4b8] sm:$0xff] %v513_v23  ;;  %516 = vst [vmem:[%s5632_s11 + $0x4c0] sm:$0xff] %v515_v24  ;;  %v523_v28 = vld [vmem:[%s5624_s10 + $0x8e0] sm:$0xff]  ;;  %v525_v29 = vld [vmem:[%s5624_s10 + $0x8e8] sm:$0xff] }
  0x66   : > { %518 = vst [vmem:[%s5632_s11 + $0x4c8] sm:$0xff] %v517_v25  ;;  %520 = vst [vmem:[%s5632_s11 + $0x4d0] sm:$0xff] %v519_v26  ;;  %v527_v30 = vld [vmem:[%s5624_s10 + $0x8f0] sm:$0xff]  ;;  %v529_v31 = vld [vmem:[%s5624_s10 + $0x8f8] sm:$0xff] }
  0x67   : > { %522 = vst [vmem:[%s5632_s11 + $0x4d8] sm:$0xff] %v521_v27  ;;  %524 = vst [vmem:[%s5632_s11 + $0x4e0] sm:$0xff] %v523_v28  ;;  %v531_v32 = vld [vmem:[%s5624_s10 + $0xa00] sm:$0xff]  ;;  %v533_v33 = vld [vmem:[%s5624_s10 + $0xa08] sm:$0xff] }
  0x68   : > { %526 = vst [vmem:[%s5632_s11 + $0x4e8] sm:$0xff] %v525_v29  ;;  %528 = vst [vmem:[%s5632_s11 + $0x4f0] sm:$0xff] %v527_v30  ;;  %v535_v34 = vld [vmem:[%s5624_s10 + $0xa10] sm:$0xff]  ;;  %v537_v35 = vld [vmem:[%s5624_s10 + $0xa18] sm:$0xff] }
  0x69   : > { %530 = vst [vmem:[%s5632_s11 + $0x4f8] sm:$0xff] %v529_v31  ;;  %532 = vst [vmem:[%s5632_s11 + $0x500] sm:$0xff] %v531_v32  ;;  %v539_v36 = vld [vmem:[%s5624_s10 + $0xa20] sm:$0xff]  ;;  %v541_v37 = vld [vmem:[%s5624_s10 + $0xa28] sm:$0xff] }
  0x6a   : > { %534 = vst [vmem:[%s5632_s11 + $0x508] sm:$0xff] %v533_v33  ;;  %536 = vst [vmem:[%s5632_s11 + $0x510] sm:$0xff] %v535_v34  ;;  %v543_v38 = vld [vmem:[%s5624_s10 + $0xa30] sm:$0xff]  ;;  %v545_v39 = vld [vmem:[%s5624_s10 + $0xa38] sm:$0xff] }
  0x6b   : > { %538 = vst [vmem:[%s5632_s11 + $0x518] sm:$0xff] %v537_v35  ;;  %540 = vst [vmem:[%s5632_s11 + $0x520] sm:$0xff] %v539_v36  ;;  %v547_v40 = vld [vmem:[%s5624_s10 + $0xa40] sm:$0xff]  ;;  %v549_v41 = vld [vmem:[%s5624_s10 + $0xa48] sm:$0xff] }
  0x6c   : > { %542 = vst [vmem:[%s5632_s11 + $0x528] sm:$0xff] %v541_v37  ;;  %544 = vst [vmem:[%s5632_s11 + $0x530] sm:$0xff] %v543_v38  ;;  %v551_v42 = vld [vmem:[%s5624_s10 + $0xa50] sm:$0xff]  ;;  %v553_v43 = vld [vmem:[%s5624_s10 + $0xa58] sm:$0xff] }
  0x6d   : > { %546 = vst [vmem:[%s5632_s11 + $0x538] sm:$0xff] %v545_v39  ;;  %548 = vst [vmem:[%s5632_s11 + $0x540] sm:$0xff] %v547_v40  ;;  %v555_v44 = vld [vmem:[%s5624_s10 + $0xa60] sm:$0xff]  ;;  %v557_v45 = vld [vmem:[%s5624_s10 + $0xa68] sm:$0xff] }
  0x6e   : > { %550 = vst [vmem:[%s5632_s11 + $0x548] sm:$0xff] %v549_v41  ;;  %552 = vst [vmem:[%s5632_s11 + $0x550] sm:$0xff] %v551_v42  ;;  %v559_v46 = vld [vmem:[%s5624_s10 + $0xa70] sm:$0xff]  ;;  %v561_v47 = vld [vmem:[%s5624_s10 + $0xa78] sm:$0xff] }
  0x6f   : > { %554 = vst [vmem:[%s5632_s11 + $0x558] sm:$0xff] %v553_v43  ;;  %556 = vst [vmem:[%s5632_s11 + $0x560] sm:$0xff] %v555_v44  ;;  %v563_v48 = vld [vmem:[%s5624_s10 + $0xa80] sm:$0xff]  ;;  %v565_v49 = vld [vmem:[%s5624_s10 + $0xa88] sm:$0xff] }
  0x70   : > { %558 = vst [vmem:[%s5632_s11 + $0x568] sm:$0xff] %v557_v45  ;;  %560 = vst [vmem:[%s5632_s11 + $0x570] sm:$0xff] %v559_v46  ;;  %v567_v50 = vld [vmem:[%s5624_s10 + $0xa90] sm:$0xff]  ;;  %v569_v51 = vld [vmem:[%s5624_s10 + $0xa98] sm:$0xff] }
  0x71   : > { %562 = vst [vmem:[%s5632_s11 + $0x578] sm:$0xff] %v561_v47  ;;  %564 = vst [vmem:[%s5632_s11 + $0x580] sm:$0xff] %v563_v48  ;;  %v571_v52 = vld [vmem:[%s5624_s10 + $0xaa0] sm:$0xff]  ;;  %v573_v53 = vld [vmem:[%s5624_s10 + $0xaa8] sm:$0xff] }
  0x72   : > { %566 = vst [vmem:[%s5632_s11 + $0x588] sm:$0xff] %v565_v49  ;;  %568 = vst [vmem:[%s5632_s11 + $0x590] sm:$0xff] %v567_v50  ;;  %v575_v54 = vld [vmem:[%s5624_s10 + $0xab0] sm:$0xff]  ;;  %v577_v55 = vld [vmem:[%s5624_s10 + $0xab8] sm:$0xff] }
  0x73   : > { %570 = vst [vmem:[%s5632_s11 + $0x598] sm:$0xff] %v569_v51  ;;  %572 = vst [vmem:[%s5632_s11 + $0x5a0] sm:$0xff] %v571_v52  ;;  %v579_v56 = vld [vmem:[%s5624_s10 + $0xac0] sm:$0xff]  ;;  %v581_v57 = vld [vmem:[%s5624_s10 + $0xac8] sm:$0xff] }
  0x74   : > { %574 = vst [vmem:[%s5632_s11 + $0x5a8] sm:$0xff] %v573_v53  ;;  %576 = vst [vmem:[%s5632_s11 + $0x5b0] sm:$0xff] %v575_v54  ;;  %v583_v58 = vld [vmem:[%s5624_s10 + $0xad0] sm:$0xff]  ;;  %v585_v59 = vld [vmem:[%s5624_s10 + $0xad8] sm:$0xff] }
  0x75   : > { %578 = vst [vmem:[%s5632_s11 + $0x5b8] sm:$0xff] %v577_v55  ;;  %580 = vst [vmem:[%s5632_s11 + $0x5c0] sm:$0xff] %v579_v56  ;;  %v587_v60 = vld [vmem:[%s5624_s10 + $0xae0] sm:$0xff]  ;;  %v589_v61 = vld [vmem:[%s5624_s10 + $0xae8] sm:$0xff] }
  0x76   : > { %582 = vst [vmem:[%s5632_s11 + $0x5c8] sm:$0xff] %v581_v57  ;;  %584 = vst [vmem:[%s5632_s11 + $0x5d0] sm:$0xff] %v583_v58  ;;  %v591_v62 = vld [vmem:[%s5624_s10 + $0xaf0] sm:$0xff]  ;;  %v593_v63 = vld [vmem:[%s5624_s10 + $0xaf8] sm:$0xff] }
  0x77   : > { %586 = vst [vmem:[%s5632_s11 + $0x5d8] sm:$0xff] %v585_v59  ;;  %588 = vst [vmem:[%s5632_s11 + $0x5e0] sm:$0xff] %v587_v60  ;;  %v595_v0 = vld [vmem:[%s5624_s10 + $0xc00] sm:$0xff]  ;;  %v597_v1 = vld [vmem:[%s5624_s10 + $0xc08] sm:$0xff] }
  0x78   : > { %590 = vst [vmem:[%s5632_s11 + $0x5e8] sm:$0xff] %v589_v61  ;;  %592 = vst [vmem:[%s5632_s11 + $0x5f0] sm:$0xff] %v591_v62  ;;  %v599_v2 = vld [vmem:[%s5624_s10 + $0xc10] sm:$0xff]  ;;  %v601_v3 = vld [vmem:[%s5624_s10 + $0xc18] sm:$0xff] }
  0x79   : > { %594 = vst [vmem:[%s5632_s11 + $0x5f8] sm:$0xff] %v593_v63  ;;  %596 = vst [vmem:[%s5632_s11 + $0x600] sm:$0xff] %v595_v0  ;;  %v603_v4 = vld [vmem:[%s5624_s10 + $0xc20] sm:$0xff]  ;;  %v605_v5 = vld [vmem:[%s5624_s10 + $0xc28] sm:$0xff] }
  0x7a   : > { %598 = vst [vmem:[%s5632_s11 + $0x608] sm:$0xff] %v597_v1  ;;  %600 = vst [vmem:[%s5632_s11 + $0x610] sm:$0xff] %v599_v2  ;;  %v607_v6 = vld [vmem:[%s5624_s10 + $0xc30] sm:$0xff]  ;;  %v609_v7 = vld [vmem:[%s5624_s10 + $0xc38] sm:$0xff] }
  0x7b   : > { %602 = vst [vmem:[%s5632_s11 + $0x618] sm:$0xff] %v601_v3  ;;  %604 = vst [vmem:[%s5632_s11 + $0x620] sm:$0xff] %v603_v4  ;;  %v611_v8 = vld [vmem:[%s5624_s10 + $0xc40] sm:$0xff]  ;;  %v613_v9 = vld [vmem:[%s5624_s10 + $0xc48] sm:$0xff] }
  0x7c   : > { %606 = vst [vmem:[%s5632_s11 + $0x628] sm:$0xff] %v605_v5  ;;  %608 = vst [vmem:[%s5632_s11 + $0x630] sm:$0xff] %v607_v6  ;;  %v615_v10 = vld [vmem:[%s5624_s10 + $0xc50] sm:$0xff]  ;;  %v617_v11 = vld [vmem:[%s5624_s10 + $0xc58] sm:$0xff] }
  0x7d   : > { %610 = vst [vmem:[%s5632_s11 + $0x638] sm:$0xff] %v609_v7  ;;  %612 = vst [vmem:[%s5632_s11 + $0x640] sm:$0xff] %v611_v8  ;;  %v619_v12 = vld [vmem:[%s5624_s10 + $0xc60] sm:$0xff]  ;;  %v621_v13 = vld [vmem:[%s5624_s10 + $0xc68] sm:$0xff] }
  0x7e   : > { %614 = vst [vmem:[%s5632_s11 + $0x648] sm:$0xff] %v613_v9  ;;  %616 = vst [vmem:[%s5632_s11 + $0x650] sm:$0xff] %v615_v10  ;;  %v623_v14 = vld [vmem:[%s5624_s10 + $0xc70] sm:$0xff]  ;;  %v625_v15 = vld [vmem:[%s5624_s10 + $0xc78] sm:$0xff] }
  0x7f   : > { %618 = vst [vmem:[%s5632_s11 + $0x658] sm:$0xff] %v617_v11  ;;  %620 = vst [vmem:[%s5632_s11 + $0x660] sm:$0xff] %v619_v12  ;;  %v627_v16 = vld [vmem:[%s5624_s10 + $0xc80] sm:$0xff]  ;;  %v629_v17 = vld [vmem:[%s5624_s10 + $0xc88] sm:$0xff] }
  0x80   : > { %622 = vst [vmem:[%s5632_s11 + $0x668] sm:$0xff] %v621_v13  ;;  %624 = vst [vmem:[%s5632_s11 + $0x670] sm:$0xff] %v623_v14  ;;  %v631_v18 = vld [vmem:[%s5624_s10 + $0xc90] sm:$0xff]  ;;  %v633_v19 = vld [vmem:[%s5624_s10 + $0xc98] sm:$0xff] }
  0x81   : > { %626 = vst [vmem:[%s5632_s11 + $0x678] sm:$0xff] %v625_v15  ;;  %628 = vst [vmem:[%s5632_s11 + $0x680] sm:$0xff] %v627_v16  ;;  %v635_v20 = vld [vmem:[%s5624_s10 + $0xca0] sm:$0xff]  ;;  %v637_v21 = vld [vmem:[%s5624_s10 + $0xca8] sm:$0xff] }
  0x82   : > { %630 = vst [vmem:[%s5632_s11 + $0x688] sm:$0xff] %v629_v17  ;;  %632 = vst [vmem:[%s5632_s11 + $0x690] sm:$0xff] %v631_v18  ;;  %v639_v22 = vld [vmem:[%s5624_s10 + $0xcb0] sm:$0xff]  ;;  %v641_v23 = vld [vmem:[%s5624_s10 + $0xcb8] sm:$0xff] }
  0x83   : > { %634 = vst [vmem:[%s5632_s11 + $0x698] sm:$0xff] %v633_v19  ;;  %636 = vst [vmem:[%s5632_s11 + $0x6a0] sm:$0xff] %v635_v20  ;;  %v643_v24 = vld [vmem:[%s5624_s10 + $0xcc0] sm:$0xff]  ;;  %v645_v25 = vld [vmem:[%s5624_s10 + $0xcc8] sm:$0xff] }
  0x84   : > { %638 = vst [vmem:[%s5632_s11 + $0x6a8] sm:$0xff] %v637_v21  ;;  %640 = vst [vmem:[%s5632_s11 + $0x6b0] sm:$0xff] %v639_v22  ;;  %v647_v26 = vld [vmem:[%s5624_s10 + $0xcd0] sm:$0xff]  ;;  %v649_v27 = vld [vmem:[%s5624_s10 + $0xcd8] sm:$0xff] }
  0x85   : > { %642 = vst [vmem:[%s5632_s11 + $0x6b8] sm:$0xff] %v641_v23  ;;  %644 = vst [vmem:[%s5632_s11 + $0x6c0] sm:$0xff] %v643_v24  ;;  %v651_v28 = vld [vmem:[%s5624_s10 + $0xce0] sm:$0xff]  ;;  %v653_v29 = vld [vmem:[%s5624_s10 + $0xce8] sm:$0xff] }
  0x86   : > { %646 = vst [vmem:[%s5632_s11 + $0x6c8] sm:$0xff] %v645_v25  ;;  %648 = vst [vmem:[%s5632_s11 + $0x6d0] sm:$0xff] %v647_v26  ;;  %v655_v30 = vld [vmem:[%s5624_s10 + $0xcf0] sm:$0xff]  ;;  %v657_v31 = vld [vmem:[%s5624_s10 + $0xcf8] sm:$0xff] }
  0x87   : > { %650 = vst [vmem:[%s5632_s11 + $0x6d8] sm:$0xff] %v649_v27  ;;  %652 = vst [vmem:[%s5632_s11 + $0x6e0] sm:$0xff] %v651_v28  ;;  %v659_v32 = vld [vmem:[%s5624_s10 + $0xe00] sm:$0xff]  ;;  %v661_v33 = vld [vmem:[%s5624_s10 + $0xe08] sm:$0xff] }
  0x88   : > { %654 = vst [vmem:[%s5632_s11 + $0x6e8] sm:$0xff] %v653_v29  ;;  %656 = vst [vmem:[%s5632_s11 + $0x6f0] sm:$0xff] %v655_v30  ;;  %v663_v34 = vld [vmem:[%s5624_s10 + $0xe10] sm:$0xff]  ;;  %v665_v35 = vld [vmem:[%s5624_s10 + $0xe18] sm:$0xff] }
  0x89   : > { %658 = vst [vmem:[%s5632_s11 + $0x6f8] sm:$0xff] %v657_v31  ;;  %660 = vst [vmem:[%s5632_s11 + $0x700] sm:$0xff] %v659_v32  ;;  %v667_v36 = vld [vmem:[%s5624_s10 + $0xe20] sm:$0xff]  ;;  %v669_v37 = vld [vmem:[%s5624_s10 + $0xe28] sm:$0xff] }
  0x8a   : > { %662 = vst [vmem:[%s5632_s11 + $0x708] sm:$0xff] %v661_v33  ;;  %664 = vst [vmem:[%s5632_s11 + $0x710] sm:$0xff] %v663_v34  ;;  %v671_v38 = vld [vmem:[%s5624_s10 + $0xe30] sm:$0xff]  ;;  %v673_v39 = vld [vmem:[%s5624_s10 + $0xe38] sm:$0xff] }
  0x8b   : > { %666 = vst [vmem:[%s5632_s11 + $0x718] sm:$0xff] %v665_v35  ;;  %668 = vst [vmem:[%s5632_s11 + $0x720] sm:$0xff] %v667_v36  ;;  %v675_v40 = vld [vmem:[%s5624_s10 + $0xe40] sm:$0xff]  ;;  %v677_v41 = vld [vmem:[%s5624_s10 + $0xe48] sm:$0xff] }
  0x8c   : > { %670 = vst [vmem:[%s5632_s11 + $0x728] sm:$0xff] %v669_v37  ;;  %672 = vst [vmem:[%s5632_s11 + $0x730] sm:$0xff] %v671_v38  ;;  %v679_v42 = vld [vmem:[%s5624_s10 + $0xe50] sm:$0xff]  ;;  %v681_v43 = vld [vmem:[%s5624_s10 + $0xe58] sm:$0xff] }
  0x8d   : > { %674 = vst [vmem:[%s5632_s11 + $0x738] sm:$0xff] %v673_v39  ;;  %676 = vst [vmem:[%s5632_s11 + $0x740] sm:$0xff] %v675_v40  ;;  %v683_v44 = vld [vmem:[%s5624_s10 + $0xe60] sm:$0xff]  ;;  %v685_v45 = vld [vmem:[%s5624_s10 + $0xe68] sm:$0xff] }
  0x8e   : > { %678 = vst [vmem:[%s5632_s11 + $0x748] sm:$0xff] %v677_v41  ;;  %680 = vst [vmem:[%s5632_s11 + $0x750] sm:$0xff] %v679_v42  ;;  %v687_v46 = vld [vmem:[%s5624_s10 + $0xe70] sm:$0xff]  ;;  %v689_v47 = vld [vmem:[%s5624_s10 + $0xe78] sm:$0xff] }
  0x8f   : > { %682 = vst [vmem:[%s5632_s11 + $0x758] sm:$0xff] %v681_v43  ;;  %684 = vst [vmem:[%s5632_s11 + $0x760] sm:$0xff] %v683_v44  ;;  %v691_v48 = vld [vmem:[%s5624_s10 + $0xe80] sm:$0xff]  ;;  %v693_v49 = vld [vmem:[%s5624_s10 + $0xe88] sm:$0xff] }
  0x90   : > { %686 = vst [vmem:[%s5632_s11 + $0x768] sm:$0xff] %v685_v45  ;;  %688 = vst [vmem:[%s5632_s11 + $0x770] sm:$0xff] %v687_v46  ;;  %v695_v50 = vld [vmem:[%s5624_s10 + $0xe90] sm:$0xff]  ;;  %v697_v51 = vld [vmem:[%s5624_s10 + $0xe98] sm:$0xff] }
  0x91   : > { %690 = vst [vmem:[%s5632_s11 + $0x778] sm:$0xff] %v689_v47  ;;  %692 = vst [vmem:[%s5632_s11 + $0x780] sm:$0xff] %v691_v48  ;;  %v699_v52 = vld [vmem:[%s5624_s10 + $0xea0] sm:$0xff]  ;;  %v701_v53 = vld [vmem:[%s5624_s10 + $0xea8] sm:$0xff] }
  0x92   : > { %694 = vst [vmem:[%s5632_s11 + $0x788] sm:$0xff] %v693_v49  ;;  %696 = vst [vmem:[%s5632_s11 + $0x790] sm:$0xff] %v695_v50  ;;  %v703_v54 = vld [vmem:[%s5624_s10 + $0xeb0] sm:$0xff]  ;;  %v705_v55 = vld [vmem:[%s5624_s10 + $0xeb8] sm:$0xff] }
  0x93   : > { %698 = vst [vmem:[%s5632_s11 + $0x798] sm:$0xff] %v697_v51  ;;  %700 = vst [vmem:[%s5632_s11 + $0x7a0] sm:$0xff] %v699_v52  ;;  %v707_v56 = vld [vmem:[%s5624_s10 + $0xec0] sm:$0xff]  ;;  %v709_v57 = vld [vmem:[%s5624_s10 + $0xec8] sm:$0xff] }
  0x94   : > { %702 = vst [vmem:[%s5632_s11 + $0x7a8] sm:$0xff] %v701_v53  ;;  %704 = vst [vmem:[%s5632_s11 + $0x7b0] sm:$0xff] %v703_v54  ;;  %v711_v58 = vld [vmem:[%s5624_s10 + $0xed0] sm:$0xff]  ;;  %v713_v59 = vld [vmem:[%s5624_s10 + $0xed8] sm:$0xff] }
  0x95   : > { %706 = vst [vmem:[%s5632_s11 + $0x7b8] sm:$0xff] %v705_v55  ;;  %708 = vst [vmem:[%s5632_s11 + $0x7c0] sm:$0xff] %v707_v56  ;;  %v715_v60 = vld [vmem:[%s5624_s10 + $0xee0] sm:$0xff]  ;;  %v717_v61 = vld [vmem:[%s5624_s10 + $0xee8] sm:$0xff] }
  0x96   : > { %710 = vst [vmem:[%s5632_s11 + $0x7c8] sm:$0xff] %v709_v57  ;;  %712 = vst [vmem:[%s5632_s11 + $0x7d0] sm:$0xff] %v711_v58  ;;  %v719_v62 = vld [vmem:[%s5624_s10 + $0xef0] sm:$0xff]  ;;  %v721_v63 = vld [vmem:[%s5624_s10 + $0xef8] sm:$0xff] }
  0x97   : > { %714 = vst [vmem:[%s5632_s11 + $0x7d8] sm:$0xff] %v713_v59  ;;  %716 = vst [vmem:[%s5632_s11 + $0x7e0] sm:$0xff] %v715_v60  ;;  %v723_v0 = vld [vmem:[%s5624_s10 + $0x1000] sm:$0xff]  ;;  %v725_v1 = vld [vmem:[%s5624_s10 + $0x1008] sm:$0xff] }
  0x98   : > { %718 = vst [vmem:[%s5632_s11 + $0x7e8] sm:$0xff] %v717_v61  ;;  %720 = vst [vmem:[%s5632_s11 + $0x7f0] sm:$0xff] %v719_v62  ;;  %v727_v2 = vld [vmem:[%s5624_s10 + $0x1010] sm:$0xff]  ;;  %v729_v3 = vld [vmem:[%s5624_s10 + $0x1018] sm:$0xff] }
  0x99   : > { %722 = vst [vmem:[%s5632_s11 + $0x7f8] sm:$0xff] %v721_v63  ;;  %724 = vst [vmem:[%s5632_s11 + $0x800] sm:$0xff] %v723_v0  ;;  %v731_v4 = vld [vmem:[%s5624_s10 + $0x1020] sm:$0xff]  ;;  %v733_v5 = vld [vmem:[%s5624_s10 + $0x1028] sm:$0xff] }
  0x9a   : > { %726 = vst [vmem:[%s5632_s11 + $0x808] sm:$0xff] %v725_v1  ;;  %728 = vst [vmem:[%s5632_s11 + $0x810] sm:$0xff] %v727_v2  ;;  %v735_v6 = vld [vmem:[%s5624_s10 + $0x1030] sm:$0xff]  ;;  %v737_v7 = vld [vmem:[%s5624_s10 + $0x1038] sm:$0xff] }
  0x9b   : > { %730 = vst [vmem:[%s5632_s11 + $0x818] sm:$0xff] %v729_v3  ;;  %732 = vst [vmem:[%s5632_s11 + $0x820] sm:$0xff] %v731_v4  ;;  %v739_v8 = vld [vmem:[%s5624_s10 + $0x1040] sm:$0xff]  ;;  %v741_v9 = vld [vmem:[%s5624_s10 + $0x1048] sm:$0xff] }
  0x9c   : > { %734 = vst [vmem:[%s5632_s11 + $0x828] sm:$0xff] %v733_v5  ;;  %736 = vst [vmem:[%s5632_s11 + $0x830] sm:$0xff] %v735_v6  ;;  %v743_v10 = vld [vmem:[%s5624_s10 + $0x1050] sm:$0xff]  ;;  %v745_v11 = vld [vmem:[%s5624_s10 + $0x1058] sm:$0xff] }
  0x9d   : > { %738 = vst [vmem:[%s5632_s11 + $0x838] sm:$0xff] %v737_v7  ;;  %740 = vst [vmem:[%s5632_s11 + $0x840] sm:$0xff] %v739_v8  ;;  %v747_v12 = vld [vmem:[%s5624_s10 + $0x1060] sm:$0xff]  ;;  %v749_v13 = vld [vmem:[%s5624_s10 + $0x1068] sm:$0xff] }
  0x9e   : > { %742 = vst [vmem:[%s5632_s11 + $0x848] sm:$0xff] %v741_v9  ;;  %744 = vst [vmem:[%s5632_s11 + $0x850] sm:$0xff] %v743_v10  ;;  %v751_v14 = vld [vmem:[%s5624_s10 + $0x1070] sm:$0xff]  ;;  %v753_v15 = vld [vmem:[%s5624_s10 + $0x1078] sm:$0xff] }
  0x9f   : > { %746 = vst [vmem:[%s5632_s11 + $0x858] sm:$0xff] %v745_v11  ;;  %748 = vst [vmem:[%s5632_s11 + $0x860] sm:$0xff] %v747_v12  ;;  %v755_v16 = vld [vmem:[%s5624_s10 + $0x1080] sm:$0xff]  ;;  %v757_v17 = vld [vmem:[%s5624_s10 + $0x1088] sm:$0xff] }
  0xa0   : > { %750 = vst [vmem:[%s5632_s11 + $0x868] sm:$0xff] %v749_v13  ;;  %752 = vst [vmem:[%s5632_s11 + $0x870] sm:$0xff] %v751_v14  ;;  %v759_v18 = vld [vmem:[%s5624_s10 + $0x1090] sm:$0xff]  ;;  %v761_v19 = vld [vmem:[%s5624_s10 + $0x1098] sm:$0xff] }
  0xa1   : > { %754 = vst [vmem:[%s5632_s11 + $0x878] sm:$0xff] %v753_v15  ;;  %756 = vst [vmem:[%s5632_s11 + $0x880] sm:$0xff] %v755_v16  ;;  %v763_v20 = vld [vmem:[%s5624_s10 + $0x10a0] sm:$0xff]  ;;  %v765_v21 = vld [vmem:[%s5624_s10 + $0x10a8] sm:$0xff] }
  0xa2   : > { %758 = vst [vmem:[%s5632_s11 + $0x888] sm:$0xff] %v757_v17  ;;  %760 = vst [vmem:[%s5632_s11 + $0x890] sm:$0xff] %v759_v18  ;;  %v767_v22 = vld [vmem:[%s5624_s10 + $0x10b0] sm:$0xff]  ;;  %v769_v23 = vld [vmem:[%s5624_s10 + $0x10b8] sm:$0xff] }
  0xa3   : > { %762 = vst [vmem:[%s5632_s11 + $0x898] sm:$0xff] %v761_v19  ;;  %764 = vst [vmem:[%s5632_s11 + $0x8a0] sm:$0xff] %v763_v20  ;;  %v771_v24 = vld [vmem:[%s5624_s10 + $0x10c0] sm:$0xff]  ;;  %v773_v25 = vld [vmem:[%s5624_s10 + $0x10c8] sm:$0xff] }
  0xa4   : > { %766 = vst [vmem:[%s5632_s11 + $0x8a8] sm:$0xff] %v765_v21  ;;  %768 = vst [vmem:[%s5632_s11 + $0x8b0] sm:$0xff] %v767_v22  ;;  %v775_v26 = vld [vmem:[%s5624_s10 + $0x10d0] sm:$0xff]  ;;  %v777_v27 = vld [vmem:[%s5624_s10 + $0x10d8] sm:$0xff] }
  0xa5   : > { %770 = vst [vmem:[%s5632_s11 + $0x8b8] sm:$0xff] %v769_v23  ;;  %772 = vst [vmem:[%s5632_s11 + $0x8c0] sm:$0xff] %v771_v24  ;;  %v779_v28 = vld [vmem:[%s5624_s10 + $0x10e0] sm:$0xff]  ;;  %v781_v29 = vld [vmem:[%s5624_s10 + $0x10e8] sm:$0xff] }
  0xa6   : > { %774 = vst [vmem:[%s5632_s11 + $0x8c8] sm:$0xff] %v773_v25  ;;  %776 = vst [vmem:[%s5632_s11 + $0x8d0] sm:$0xff] %v775_v26  ;;  %v783_v30 = vld [vmem:[%s5624_s10 + $0x10f0] sm:$0xff]  ;;  %v785_v31 = vld [vmem:[%s5624_s10 + $0x10f8] sm:$0xff] }
  0xa7   : > { %778 = vst [vmem:[%s5632_s11 + $0x8d8] sm:$0xff] %v777_v27  ;;  %780 = vst [vmem:[%s5632_s11 + $0x8e0] sm:$0xff] %v779_v28 }
  0xa8   : > { %782 = vst [vmem:[%s5632_s11 + $0x8e8] sm:$0xff] %v781_v29  ;;  %784 = vst [vmem:[%s5632_s11 + $0x8f0] sm:$0xff] %v783_v30 }
  0xa9   : > { %786 = vst [vmem:[%s5632_s11 + $0x8f8] sm:$0xff] %v785_v31 }
  0xaa PF: > { %p4803_p10 = scmp.ge.s32.totalorder %s5535_s21, 1  ;;  %p791_p11 = scmp.lt.s32.totalorder %s5535_s21, 3 }
  0xac   : > { %p792_p12 = pnand %p4803_p10, %p791_p11 }
  0xad   : > { %s6207_s12 = sand.u32 (!%p792_p12), 1, %s5527_s19   ;;  %v5537_v32 = vmov (!%p792_p12), 0   ;;  %v1132_v33 = vld [vmem:[%s7088_s2] sm:$0xf] (!%p792_p12)  ;;  %vm2582_vm0 = vcmask (!%p792_p12), 1043456   ;;  %vm2578_vm1 = vcmask (!%p792_p12), 588800  }
  0xae   : > { %795 = sbr.rel (%p792_p12) target bundleno = 915 (0x393), region = 51  ;;  %2807 = vmatprep.mubr.bf16.mxu0 (!%p792_p12), %v5537_v32  ;;  %2848 = vmatprep.mubr.bf16.mxu1 (!%p792_p12), %v5537_v32  ;;  %v6251_v20 = vld [vmem:[%s7086_s0] sm:$0x3] (!%p792_p12)  ;;  %s6560_s30 = sshll.u32 (!%p792_p12), %s4797_s22, 6 }
  0xaf   : > { %s5200_s13 = smul.u32 (!%p792_p12), 2304, %s6207_s12  ;;  %5246 = vset.pattern.permute.xlu0 (!%p792_p12), %v5537_v32  ;;  %p837_p13 = scmp.lt.s32.totalorder (!%p792_p12), %s6560_s30, 127 }
  0xb0   : > { %1135 = vperm.xlu0 (!%p792_p12), %5246, %v1132_v33   ;;  %s7013_s26 = scalar_lea.hbm (!%p792_p12), %s7090_s4, %s6560_s30  ;;  %s7021_s7 = scalar_lea.hbm (!%p792_p12), %s7091_s5, %s6560_s30 }
  0xb1   : > { %s6216_s16 = scalar_lea.vmem (!%p792_p12), [#allocation2], %s5200_s13  ;;  %s4804_s13 = sshll.u32 (!%p792_p12), %s6207_s12, 2 }
  0xb2   : > { %v844_v34 = vld [vmem:[%s6216_s16] sm:$0xff] (!%p792_p12)  ;;  %v845_v36 = vld [vmem:[%s6216_s16 + $0x8] sm:$0xff] (!%p792_p12)  ;;  %v846_v8 = vld [vmem:[%s6216_s16 + $0x10] sm:$0xff] (!%p792_p12)  ;;  %s827_s14 = scalar_lea.vmem (!%p792_p12), [#allocation3], %s4804_s13  ;;  %s4641_s8 = scalar_lea.sflag (!%p792_p12), [#allocation4], %s6207_s12 }
  0xb3   : > { %v876_v35 = vld [vmem:[%s6216_s16 + $0x100] sm:$0xff] (!%p792_p12)  ;;  %v877_v38 = vld [vmem:[%s6216_s16 + $0x108] sm:$0xff] (!%p792_p12)  ;;  %v878_v9 = vld [vmem:[%s6216_s16 + $0x110] sm:$0xff] (!%p792_p12)  ;;  %s4663_s15 = sshll.u32 (!%p792_p12), %s827_s14, 4  ;;  %s5538_s10 = smov (!%p792_p12), [#allocation3]   ;;  %s7007_s15 = int_to_ptr.vmem [resolvable:$true] %s4663_s15 }
  0xb4   : > { %v4809_v37 = vcombine.high (!%p792_p12), %v844_v34, %v876_v35  ;;  %v4808_v39 = vcombine.low (!%p792_p12), %v844_v34, %v876_v35  ;;  %v908_v40 = vld [vmem:[%s6216_s16 + $0x200] sm:$0xff] (!%p792_p12)  ;;  %v4811_v42 = vcombine.high (!%p792_p12), %v845_v36, %v877_v38  ;;  %v4810_v43 = vcombine.low (!%p792_p12), %v845_v36, %v877_v38  ;;  %v909_v45 = vld [vmem:[%s6216_s16 + $0x208] sm:$0xff] (!%p792_p12)  ;;  %v847_v10 = vld [vmem:[%s6216_s16 + $0x18] sm:$0xff] (!%p792_p12)  ;;  %s5445_s11 = sshll.u32 (!%p792_p12), %s5538_s10, 4  ;;  %s5446_s11 = int_to_ptr.vmem [resolvable:$false] %s5445_s11 }
  0xb5   : > { %v940_v41 = vld [vmem:[%s6216_s16 + $0x300] sm:$0xff]  ;;  %v941_v46 = vld [vmem:[%s6216_s16 + $0x308] sm:$0xff]  ;;  %v879_v11 = vld [vmem:[%s6216_s16 + $0x118] sm:$0xff]  ;;  %v4813_v13 = vcombine.high %v846_v8, %v878_v9  ;;  %v4812_v21 = vcombine.low %v846_v8, %v878_v9  ;;  %s6580_s22 = scalar_select %p837_p13, %s6560_s30, 127 }
  0xb6   : > { %v4873_v44 = vcombine.high %v908_v40, %v940_v41  ;;  %v972_v47 = vld [vmem:[%s6216_s16 + $0x400] sm:$0xff]  ;;  %2775 = vmatprep.subr.bf16.mxu0 %v4809_v37  ;;  %v4875_v48 = vcombine.high %v909_v45, %v941_v46  ;;  %v973_v50 = vld [vmem:[%s6216_s16 + $0x408] sm:$0xff]  ;;  %2816 = vmatprep.subr.bf16.mxu1 %v4811_v42  ;;  %v4872_v52 = vcombine.low %v908_v40, %v940_v41  ;;  %v910_v16 = vld [vmem:[%s6216_s16 + $0x210] sm:$0xff]  ;;  %p5448_p3 = scmp.lt.s32.totalorder %s7007_s15, %s5446_s11 }
  0xb7   : > { %v1004_v49 = vld [vmem:[%s6216_s16 + $0x500] sm:$0xff]  ;;  %v1005_v51 = vld [vmem:[%s6216_s16 + $0x508] sm:$0xff]  ;;  %2776 = vmatpush1.bf16.msra.mxu0 %v4808_v39  ;;  %2817 = vmatpush1.bf16.msra.mxu1 %v4810_v43  ;;  %v4874_v53 = vcombine.low %v909_v45, %v941_v46  ;;  %v4815_v15 = vcombine.high %v847_v10, %v879_v11  ;;  %v942_v17 = vld [vmem:[%s6216_s16 + $0x310] sm:$0xff]  ;;  %v4814_v22 = vcombine.low %v847_v10, %v879_v11  ;;  %s4807_s6 = sshll.u32 %s6580_s22, 2 }
  0xb8   : > { %2777 = vmatprep.subr.bf16.mxu0 %v4873_v44  ;;  %v4937_v54 = vcombine.high %v972_v47, %v1004_v49  ;;  %2818 = vmatprep.subr.bf16.mxu1 %v4875_v48  ;;  %v4939_v55 = vcombine.high %v973_v50, %v1005_v51  ;;  %v1036_v56 = vld [vmem:[%s6216_s16 + $0x600] sm:$0xff]  ;;  %v1037_v58 = vld [vmem:[%s6216_s16 + $0x608] sm:$0xff]  ;;  %v4936_v60 = vcombine.low %v972_v47, %v1004_v49  ;;  %v911_v18 = vld [vmem:[%s6216_s16 + $0x218] sm:$0xff]  ;;  %s6611_s9 = scalar_lea.vmem %s7089_s3, %s4807_s6 }
  0xb9   : > { %v1068_v57 = vld [vmem:[%s6216_s16 + $0x700] sm:$0xff]  ;;  %v1069_v59 = vld [vmem:[%s6216_s16 + $0x708] sm:$0xff]  ;;  %v4938_v61 = vcombine.low %v973_v50, %v1005_v51  ;;  %v943_v19 = vld [vmem:[%s6216_s16 + $0x318] sm:$0xff]  ;;  %v4877_v23 = vcombine.high %v910_v16, %v942_v17  ;;  %v4876_v29 = vcombine.low %v910_v16, %v942_v17 }
  0xba   : > { %v5001_v62 = vcombine.high %v1036_v56, %v1068_v57  ;;  %v5003_v63 = vcombine.high %v1037_v58, %v1069_v59  ;;  %v1100_v0 = vld [vmem:[%s6216_s16 + $0x800] sm:$0xff]  ;;  %v1101_v1 = vld [vmem:[%s6216_s16 + $0x808] sm:$0xff]  ;;  %v5000_v2 = vcombine.low %v1036_v56, %v1068_v57  ;;  %v5002_v3 = vcombine.low %v1037_v58, %v1069_v59  ;;  %v974_v25 = vld [vmem:[%s6216_s16 + $0x410] sm:$0xff] }
  0xbb   : > { %2778 = vmatpush1.bf16.msra.mxu0 %v4872_v52  ;;  %2819 = vmatpush1.bf16.msra.mxu1 %v4874_v53  ;;  %v5065_v4 = vcombine.high %v1100_v0, %v1100_v0  ;;  %v5064_v5 = vcombine.low %v1100_v0, %v1100_v0  ;;  %v5067_v6 = vcombine.high %v1101_v1, %v1101_v1  ;;  %v1006_v26 = vld [vmem:[%s6216_s16 + $0x510] sm:$0xff]  ;;  %v975_v27 = vld [vmem:[%s6216_s16 + $0x418] sm:$0xff]  ;;  %v848_v50 = vld [vmem:[%s6216_s16 + $0x20] sm:$0xff] }
  0xbc   : > { %2779 = vmatprep.subr.bf16.mxu0 %v4937_v54  ;;  %2820 = vmatprep.subr.bf16.mxu1 %v4939_v55  ;;  %v5066_v7 = vcombine.low %v1101_v1, %v1101_v1  ;;  %v4879_v24 = vcombine.high %v911_v18, %v943_v19  ;;  %v1007_v28 = vld [vmem:[%s6216_s16 + $0x518] sm:$0xff]  ;;  %v4878_v30 = vcombine.low %v911_v18, %v943_v19  ;;  %v1038_v34 = vld [vmem:[%s6216_s16 + $0x610] sm:$0xff]  ;;  %v880_v51 = vld [vmem:[%s6216_s16 + $0x120] sm:$0xff] }
  0xbd   : > { %v2584_v12 = vsel %vm2582_vm0, %v5064_v5, 0  ;;  %v4941_v31 = vcombine.high %v974_v25, %v1006_v26  ;;  %v4943_v33 = vcombine.high %v975_v27, %v1007_v28  ;;  %v1070_v35 = vld [vmem:[%s6216_s16 + $0x710] sm:$0xff]  ;;  %v1039_v36 = vld [vmem:[%s6216_s16 + $0x618] sm:$0xff]  ;;  %v4940_v38 = vcombine.low %v974_v25, %v1006_v26  ;;  %v849_v52 = vld [vmem:[%s6216_s16 + $0x28] sm:$0xff] }
  0xbe   : > { %v2590_v14 = vsel %vm2582_vm0, %v5066_v7, 0  ;;  %v1071_v37 = vld [vmem:[%s6216_s16 + $0x718] sm:$0xff]  ;;  %v4942_v39 = vcombine.low %v975_v27, %v1007_v28  ;;  %v5005_v40 = vcombine.high %v1038_v34, %v1070_v35  ;;  %v1102_v42 = vld [vmem:[%s6216_s16 + $0x810] sm:$0xff]  ;;  %v5004_v44 = vcombine.low %v1038_v34, %v1070_v35  ;;  %v881_v53 = vld [vmem:[%s6216_s16 + $0x128] sm:$0xff] }
  0xbf   : > { %2780 = vmatpush1.bf16.msra.mxu0 %v4936_v60  ;;  %2821 = vmatpush1.bf16.msra.mxu1 %v4938_v61  ;;  %v5007_v41 = vcombine.high %v1039_v36, %v1071_v37  ;;  %v1103_v43 = vld [vmem:[%s6216_s16 + $0x818] sm:$0xff]  ;;  %v5006_v45 = vcombine.low %v1039_v36, %v1071_v37  ;;  %v5069_v46 = vcombine.high %v1102_v42, %v1102_v42  ;;  %v912_v58 = vld [vmem:[%s6216_s16 + $0x220] sm:$0xff]  ;;  %v913_v60 = vld [vmem:[%s6216_s16 + $0x228] sm:$0xff] }
  0xc0   : > { %2781 = vmatprep.subr.bf16.mxu0 %v5001_v62  ;;  %2822 = vmatprep.subr.bf16.mxu1 %v5003_v63  ;;  %v5068_v47 = vcombine.low %v1102_v42, %v1102_v42  ;;  %v5071_v48 = vcombine.high %v1103_v43, %v1103_v43  ;;  %v5070_v49 = vcombine.low %v1103_v43, %v1103_v43  ;;  %v944_v59 = vld [vmem:[%s6216_s16 + $0x320] sm:$0xff]  ;;  %v945_v61 = vld [vmem:[%s6216_s16 + $0x328] sm:$0xff]  ;;  %v850_v27 = vld [vmem:[%s6216_s16 + $0x30] sm:$0xff] }
  0xc1   : > { %v4817_v55 = vcombine.high %v848_v50, %v880_v51  ;;  %v4819_v57 = vcombine.high %v849_v52, %v881_v53  ;;  %v4816_v62 = vcombine.low %v848_v50, %v880_v51  ;;  %v4818_v63 = vcombine.low %v849_v52, %v881_v53  ;;  %v1009_v5 = vld [vmem:[%s6216_s16 + $0x528] sm:$0xff]  ;;  %v1040_v10 = vld [vmem:[%s6216_s16 + $0x620] sm:$0xff]  ;;  %v882_v28 = vld [vmem:[%s6216_s16 + $0x130] sm:$0xff] }
  0xc2   : > { %v2596_v54 = vsel %vm2582_vm0, %v5068_v47, 0  ;;  %v2602_v56 = vsel %vm2582_vm0, %v5070_v49, 0  ;;  %v4881_v0 = vcombine.high %v912_v58, %v944_v59  ;;  %v4883_v1 = vcombine.high %v913_v60, %v945_v61  ;;  %v1072_v11 = vld [vmem:[%s6216_s16 + $0x720] sm:$0xff]  ;;  %v1105_v19 = vld [vmem:[%s6216_s16 + $0x828] sm:$0xff]  ;;  %v914_v36 = vld [vmem:[%s6216_s16 + $0x230] sm:$0xff] }
  0xc3   : > { %2782 = vmatpush1.bf16.msra.mxu0 %v5000_v2  ;;  %2823 = vmatpush1.bf16.msra.mxu1 %v5002_v3  ;;  %v976_v2 = vld [vmem:[%s6216_s16 + $0x420] sm:$0xff]  ;;  %v4882_v7 = vcombine.low %v913_v60, %v945_v61  ;;  %v5009_v16 = vcombine.high %v1040_v10, %v1072_v11  ;;  %v5075_v25 = vcombine.high %v1105_v19, %v1105_v19  ;;  %v946_v37 = vld [vmem:[%s6216_s16 + $0x330] sm:$0xff]  ;;  %v1011_v47 = vld [vmem:[%s6216_s16 + $0x538] sm:$0xff] }
  0xc4   : > { %5128 = vmatprep.subr.msk.bf16.mxu0 %vm2582_vm0, %v5065_v4  ;;  %5130 = vmatprep.subr.msk.bf16.mxu1 %vm2582_vm0, %v5067_v6  ;;  %v1008_v3 = vld [vmem:[%s6216_s16 + $0x520] sm:$0xff]  ;;  %v977_v4 = vld [vmem:[%s6216_s16 + $0x428] sm:$0xff]  ;;  %v4880_v6 = vcombine.low %v912_v58, %v944_v59  ;;  %v5074_v26 = vcombine.low %v1105_v19, %v1105_v19  ;;  %v4885_v42 = vcombine.high %v914_v36, %v946_v37  ;;  %v1042_v52 = vld [vmem:[%s6216_s16 + $0x630] sm:$0xff] }
  0xc5   : > { %v4945_v8 = vcombine.high %v976_v2, %v1008_v3  ;;  %v4947_v9 = vcombine.high %v977_v4, %v1009_v5  ;;  %v1104_v18 = vld [vmem:[%s6216_s16 + $0x820] sm:$0xff]  ;;  %v1074_v53 = vld [vmem:[%s6216_s16 + $0x730] sm:$0xff]  ;;  %v1107_v61 = vld [vmem:[%s6216_s16 + $0x838] sm:$0xff] }
  0xc6   : > { %v2614_v34 = vsel %vm2582_vm0, %v5074_v26, 0  ;;  %v5013_v58 = vcombine.high %v1042_v52, %v1074_v53  ;;  %v1106_v60 = vld [vmem:[%s6216_s16 + $0x830] sm:$0xff] }
  0xc7   : > { %2784 = vmatpush1.bf16.msra.mxu0 %v2584_v12  ;;  %2825 = vmatpush1.bf16.msra.mxu1 %v2590_v14  ;;  %v1041_v12 = vld [vmem:[%s6216_s16 + $0x628] sm:$0xff]  ;;  %v4944_v14 = vcombine.low %v976_v2, %v1008_v3  ;;  %v5079_v2 = vcombine.high %v1107_v61, %v1107_v61  ;;  %v5078_v3 = vcombine.low %v1107_v61, %v1107_v61 }
  0xc8   : > { %2857 = vmatprep.subr.bf16.mxu0 %v4813_v13  ;;  %2898 = vmatprep.subr.bf16.mxu1 %v4815_v15  ;;  %v1073_v13 = vld [vmem:[%s6216_s16 + $0x728] sm:$0xff]  ;;  %v4946_v15 = vcombine.low %v977_v4, %v1009_v5  ;;  %v852_v4 = vld [vmem:[%s6216_s16 + $0x40] sm:$0xff] }
  0xc9   : > { %v5011_v17 = vcombine.high %v1041_v12, %v1073_v13  ;;  %v884_v5 = vld [vmem:[%s6216_s16 + $0x140] sm:$0xff] }
  0xca   : > { %5129 = vmatmul.mubr.msk.bf16.vlgmr.msra.gmra.mrb[0].mxu0 %vm2578_vm1, %v6251_v20  ;;  %5131 = vmatmul.mubr.msk.bf16.vlgmr.msra.gmra.mrb[0].mxu1 %vm2578_vm1, %v6251_v20 }
  0xcb   : > { %2858 = vmatpush1.bf16.msra.mxu0 %v4812_v21  ;;  %2899 = vmatpush1.bf16.msra.mxu1 %v4814_v22  ;;  %v5008_v21 = vcombine.low %v1040_v10, %v1072_v11  ;;  %v5010_v22 = vcombine.low %v1041_v12, %v1073_v13  ;;  %v2626_v10 = vsel %vm2582_vm0, %v5078_v3, 0  ;;  %v916_v12 = vld [vmem:[%s6216_s16 + $0x240] sm:$0xff] }
  0xcc   : > { %2859 = vmatprep.subr.bf16.mxu0 %v4877_v23  ;;  %2900 = vmatprep.subr.bf16.mxu1 %v4879_v24  ;;  %v5073_v23 = vcombine.high %v1104_v18, %v1104_v18  ;;  %v5072_v24 = vcombine.low %v1104_v18, %v1104_v18  ;;  %v948_v13 = vld [vmem:[%s6216_s16 + $0x340] sm:$0xff] }
  0xcd   : > { %2889 = vmatprep.mubr.bf16.mxu0 %v5537_v32  ;;  %2930 = vmatprep.mubr.bf16.mxu1 %v5537_v32  ;;  %v4889_v18 = vcombine.high %v916_v12, %v948_v13 }
  0xcf   : > { %2860 = vmatpush1.bf16.msra.mxu0 %v4876_v29  ;;  %2901 = vmatpush1.bf16.msra.mxu1 %v4878_v30  ;;  %v851_v29 = vld [vmem:[%s6216_s16 + $0x38] sm:$0xff] }
  0xd0   : > { %2861 = vmatprep.subr.bf16.mxu0 %v4941_v31  ;;  %2902 = vmatprep.subr.bf16.mxu1 %v4943_v33  ;;  %v883_v30 = vld [vmem:[%s6216_s16 + $0x138] sm:$0xff]  ;;  %v2608_v31 = vsel %vm2582_vm0, %v5072_v24, 0  ;;  %v4821_v33 = vcombine.high %v850_v27, %v882_v28  ;;  %v1013_v24 = vld [vmem:[%s6216_s16 + $0x548] sm:$0xff] }
  0xd1   : > { %v4823_v35 = vcombine.high %v851_v29, %v883_v30 }
  0xd3   : > { %2862 = vmatpush1.bf16.msra.mxu0 %v4940_v38  ;;  %2903 = vmatpush1.bf16.msra.mxu1 %v4942_v39  ;;  %v915_v38 = vld [vmem:[%s6216_s16 + $0x238] sm:$0xff] }
  0xd4   : > { %2863 = vmatprep.subr.bf16.mxu0 %v5005_v40  ;;  %2904 = vmatprep.subr.bf16.mxu1 %v5007_v41  ;;  %v947_v39 = vld [vmem:[%s6216_s16 + $0x338] sm:$0xff]  ;;  %v4820_v40 = vcombine.low %v850_v27, %v882_v28  ;;  %v4822_v41 = vcombine.low %v851_v29, %v883_v30  ;;  %v1044_v29 = vld [vmem:[%s6216_s16 + $0x640] sm:$0xff] }
  0xd5   : > { %v4887_v43 = vcombine.high %v915_v38, %v947_v39  ;;  %v4886_v49 = vcombine.low %v915_v38, %v947_v39  ;;  %v1076_v30 = vld [vmem:[%s6216_s16 + $0x740] sm:$0xff]  ;;  %v1109_v39 = vld [vmem:[%s6216_s16 + $0x848] sm:$0xff] }
  0xd6   : > { %v1108_v38 = vld [vmem:[%s6216_s16 + $0x840] sm:$0xff] }
  0xd7   : > { %2864 = vmatpush1.bf16.msra.mxu0 %v5004_v44  ;;  %2905 = vmatpush1.bf16.msra.mxu1 %v5006_v45  ;;  %v978_v44 = vld [vmem:[%s6216_s16 + $0x430] sm:$0xff] }
  0xd8   : > { %5132 = vmatprep.subr.msk.bf16.mxu0 %vm2582_vm0, %v5069_v46  ;;  %5134 = vmatprep.subr.msk.bf16.mxu1 %vm2582_vm0, %v5071_v48  ;;  %v1010_v45 = vld [vmem:[%s6216_s16 + $0x530] sm:$0xff]  ;;  %v979_v46 = vld [vmem:[%s6216_s16 + $0x438] sm:$0xff]  ;;  %v4884_v48 = vcombine.low %v914_v36, %v946_v37  ;;  %v5017_v36 = vcombine.high %v1044_v29, %v1076_v30 }
  0xd9   : > { %v4949_v50 = vcombine.high %v978_v44, %v1010_v45  ;;  %v4951_v51 = vcombine.high %v979_v46, %v1011_v47 }
  0xdb   : > { %2866 = vmatpush1.bf16.msra.mxu0 %v2596_v54  ;;  %2907 = vmatpush1.bf16.msra.mxu1 %v2602_v56  ;;  %v1043_v54 = vld [vmem:[%s6216_s16 + $0x638] sm:$0xff]  ;;  %v4948_v56 = vcombine.low %v978_v44, %v1010_v45  ;;  %v5083_v44 = vcombine.high %v1109_v39, %v1109_v39  ;;  %v5082_v45 = vcombine.low %v1109_v39, %v1109_v39 }
  0xdc   : > { %2939 = vmatprep.subr.bf16.mxu0 %v4817_v55  ;;  %2980 = vmatprep.subr.bf16.mxu1 %v4819_v57  ;;  %v1075_v55 = vld [vmem:[%s6216_s16 + $0x738] sm:$0xff]  ;;  %v4950_v57 = vcombine.low %v979_v46, %v1011_v47  ;;  %v854_v46 = vld [vmem:[%s6216_s16 + $0x50] sm:$0xff] }
  0xdd   : > { %v5015_v59 = vcombine.high %v1043_v54, %v1075_v55  ;;  %v886_v47 = vld [vmem:[%s6216_s16 + $0x150] sm:$0xff] }
  0xde   : > { %5133 = vmatmul.mubr.msk.bf16.vlgmr.msra.gmra.mrb[4].mxu0 %vm2578_vm1, %v6251_v20  ;;  %5135 = vmatmul.mubr.msk.bf16.vlgmr.msra.gmra.mrb[4].mxu1 %vm2578_vm1, %v6251_v20 }
  0xdf   : > { %2940 = vmatpush1.bf16.msra.mxu0 %v4816_v62  ;;  %2981 = vmatpush1.bf16.msra.mxu1 %v4818_v63  ;;  %v5012_v62 = vcombine.low %v1042_v52, %v1074_v53  ;;  %v5014_v63 = vcombine.low %v1043_v54, %v1075_v55  ;;  %v2638_v52 = vsel %vm2582_vm0, %v5082_v45, 0  ;;  %v918_v54 = vld [vmem:[%s6216_s16 + $0x250] sm:$0xff] }
  0xe0   : > { %2941 = vmatprep.subr.bf16.mxu0 %v4881_v0  ;;  %2982 = vmatprep.subr.bf16.mxu1 %v4883_v1  ;;  %v5077_v0 = vcombine.high %v1106_v60, %v1106_v60  ;;  %v5076_v1 = vcombine.low %v1106_v60, %v1106_v60  ;;  %v950_v55 = vld [vmem:[%s6216_s16 + $0x350] sm:$0xff] }
  0xe1   : > { %2971 = vmatprep.mubr.bf16.mxu0 %v5537_v32  ;;  %3012 = vmatprep.mubr.bf16.mxu1 %v5537_v32  ;;  %v4893_v60 = vcombine.high %v918_v54, %v950_v55 }
  0xe3   : > { %2942 = vmatpush1.bf16.msra.mxu0 %v4880_v6  ;;  %2983 = vmatpush1.bf16.msra.mxu1 %v4882_v7  ;;  %v853_v6 = vld [vmem:[%s6216_s16 + $0x48] sm:$0xff] }
  0xe4   : > { %2943 = vmatprep.subr.bf16.mxu0 %v4945_v8  ;;  %2984 = vmatprep.subr.bf16.mxu1 %v4947_v9  ;;  %v885_v7 = vld [vmem:[%s6216_s16 + $0x148] sm:$0xff]  ;;  %v2620_v8 = vsel %vm2582_vm0, %v5076_v1, 0  ;;  %v4825_v9 = vcombine.high %v852_v4, %v884_v5  ;;  %v1015_v1 = vld [vmem:[%s6216_s16 + $0x558] sm:$0xff] }
  0xe5   : > { %v4827_v11 = vcombine.high %v853_v6, %v885_v7 }
  0xe7   : > { %2944 = vmatpush1.bf16.msra.mxu0 %v4944_v14  ;;  %2985 = vmatpush1.bf16.msra.mxu1 %v4946_v15  ;;  %v917_v14 = vld [vmem:[%s6216_s16 + $0x248] sm:$0xff] }
  0xe8   : > { %2945 = vmatprep.subr.bf16.mxu0 %v5009_v16  ;;  %2986 = vmatprep.subr.bf16.mxu1 %v5011_v17  ;;  %v949_v15 = vld [vmem:[%s6216_s16 + $0x348] sm:$0xff]  ;;  %v4824_v16 = vcombine.low %v852_v4, %v884_v5  ;;  %v4826_v17 = vcombine.low %v853_v6, %v885_v7  ;;  %v1046_v6 = vld [vmem:[%s6216_s16 + $0x650] sm:$0xff] }
  0xe9   : > { %v4891_v19 = vcombine.high %v917_v14, %v949_v15  ;;  %v4890_v26 = vcombine.low %v917_v14, %v949_v15  ;;  %v1078_v7 = vld [vmem:[%s6216_s16 + $0x750] sm:$0xff]  ;;  %v1111_v15 = vld [vmem:[%s6216_s16 + $0x858] sm:$0xff] }
  0xea   : > { %v1110_v14 = vld [vmem:[%s6216_s16 + $0x850] sm:$0xff] }
  0xeb   : > { %2946 = vmatpush1.bf16.msra.mxu0 %v5008_v21  ;;  %2987 = vmatpush1.bf16.msra.mxu1 %v5010_v22  ;;  %v980_v21 = vld [vmem:[%s6216_s16 + $0x440] sm:$0xff] }
  0xec   : > { %5136 = vmatprep.subr.msk.bf16.mxu0 %vm2582_vm0, %v5073_v23  ;;  %5138 = vmatprep.subr.msk.bf16.mxu1 %vm2582_vm0, %v5075_v25  ;;  %v1012_v22 = vld [vmem:[%s6216_s16 + $0x540] sm:$0xff]  ;;  %v981_v23 = vld [vmem:[%s6216_s16 + $0x448] sm:$0xff]  ;;  %v4888_v25 = vcombine.low %v916_v12, %v948_v13  ;;  %v5021_v12 = vcombine.high %v1046_v6, %v1078_v7 }
  0xed   : > { %v4953_v27 = vcombine.high %v980_v21, %v1012_v22  ;;  %v4955_v28 = vcombine.high %v981_v23, %v1013_v24 }
  0xef   : > { %2948 = vmatpush1.bf16.msra.mxu0 %v2608_v31  ;;  %2989 = vmatpush1.bf16.msra.mxu1 %v2614_v34  ;;  %v1045_v31 = vld [vmem:[%s6216_s16 + $0x648] sm:$0xff]  ;;  %v4952_v34 = vcombine.low %v980_v21, %v1012_v22  ;;  %v5087_v21 = vcombine.high %v1111_v15, %v1111_v15  ;;  %v5086_v22 = vcombine.low %v1111_v15, %v1111_v15 }
  0xf0   : > { %3021 = vmatprep.subr.bf16.mxu0 %v4821_v33  ;;  %3062 = vmatprep.subr.bf16.mxu1 %v4823_v35  ;;  %v1077_v33 = vld [vmem:[%s6216_s16 + $0x748] sm:$0xff]  ;;  %v4954_v35 = vcombine.low %v981_v23, %v1013_v24  ;;  %v856_v23 = vld [vmem:[%s6216_s16 + $0x60] sm:$0xff] }
  0xf1   : > { %v5019_v37 = vcombine.high %v1045_v31, %v1077_v33  ;;  %v888_v24 = vld [vmem:[%s6216_s16 + $0x160] sm:$0xff] }
  0xf2   : > { %5137 = vmatmul.mubr.msk.bf16.vlgmr.msra.gmra.mrb[8].mxu0 %vm2578_vm1, %v6251_v20  ;;  %5139 = vmatmul.mubr.msk.bf16.vlgmr.msra.gmra.mrb[8].mxu1 %vm2578_vm1, %v6251_v20 }
  0xf3   : > { %3022 = vmatpush1.bf16.msra.mxu0 %v4820_v40  ;;  %3063 = vmatpush1.bf16.msra.mxu1 %v4822_v41  ;;  %v5016_v40 = vcombine.low %v1044_v29, %v1076_v30  ;;  %v5018_v41 = vcombine.low %v1045_v31, %v1077_v33  ;;  %v2650_v29 = vsel %vm2582_vm0, %v5086_v22, 0  ;;  %v920_v31 = vld [vmem:[%s6216_s16 + $0x260] sm:$0xff] }
  0xf4   : > { %3023 = vmatprep.subr.bf16.mxu0 %v4885_v42  ;;  %3064 = vmatprep.subr.bf16.mxu1 %v4887_v43  ;;  %v5081_v42 = vcombine.high %v1108_v38, %v1108_v38  ;;  %v5080_v43 = vcombine.low %v1108_v38, %v1108_v38  ;;  %v952_v33 = vld [vmem:[%s6216_s16 + $0x360] sm:$0xff] }
  0xf5   : > { %3053 = vmatprep.mubr.bf16.mxu0 %v5537_v32  ;;  %3094 = vmatprep.mubr.bf16.mxu1 %v5537_v32  ;;  %v4897_v38 = vcombine.high %v920_v31, %v952_v33 }
  0xf7   : > { %3024 = vmatpush1.bf16.msra.mxu0 %v4884_v48  ;;  %3065 = vmatpush1.bf16.msra.mxu1 %v4886_v49  ;;  %v855_v48 = vld [vmem:[%s6216_s16 + $0x58] sm:$0xff] }
  0xf8   : > { %3025 = vmatprep.subr.bf16.mxu0 %v4949_v50  ;;  %3066 = vmatprep.subr.bf16.mxu1 %v4951_v51  ;;  %v887_v49 = vld [vmem:[%s6216_s16 + $0x158] sm:$0xff]  ;;  %v2632_v50 = vsel %vm2582_vm0, %v5080_v43, 0  ;;  %v4829_v51 = vcombine.high %v854_v46, %v886_v47  ;;  %v1017_v43 = vld [vmem:[%s6216_s16 + $0x568] sm:$0xff] }
  0xf9   : > { %v4831_v53 = vcombine.high %v855_v48, %v887_v49 }
  0xfb   : > { %3026 = vmatpush1.bf16.msra.mxu0 %v4948_v56  ;;  %3067 = vmatpush1.bf16.msra.mxu1 %v4950_v57  ;;  %v919_v56 = vld [vmem:[%s6216_s16 + $0x258] sm:$0xff] }
  0xfc   : > { %3027 = vmatprep.subr.bf16.mxu0 %v5013_v58  ;;  %3068 = vmatprep.subr.bf16.mxu1 %v5015_v59  ;;  %v951_v57 = vld [vmem:[%s6216_s16 + $0x358] sm:$0xff]  ;;  %v4828_v58 = vcombine.low %v854_v46, %v886_v47  ;;  %v4830_v59 = vcombine.low %v855_v48, %v887_v49  ;;  %v1048_v48 = vld [vmem:[%s6216_s16 + $0x660] sm:$0xff] }
  0xfd   : > { %v4895_v61 = vcombine.high %v919_v56, %v951_v57  ;;  %v4894_v3 = vcombine.low %v919_v56, %v951_v57  ;;  %v1080_v49 = vld [vmem:[%s6216_s16 + $0x760] sm:$0xff]  ;;  %v1113_v57 = vld [vmem:[%s6216_s16 + $0x868] sm:$0xff] }
  0xfe   : > { %v1112_v56 = vld [vmem:[%s6216_s16 + $0x860] sm:$0xff] }
  0xff   : > { %3028 = vmatpush1.bf16.msra.mxu0 %v5012_v62  ;;  %3069 = vmatpush1.bf16.msra.mxu1 %v5014_v63  ;;  %v982_v62 = vld [vmem:[%s6216_s16 + $0x450] sm:$0xff] }
 0x100   : > { %5140 = vmatprep.subr.msk.bf16.mxu0 %vm2582_vm0, %v5077_v0  ;;  %5142 = vmatprep.subr.msk.bf16.mxu1 %vm2582_vm0, %v5079_v2  ;;  %v1014_v63 = vld [vmem:[%s6216_s16 + $0x550] sm:$0xff]  ;;  %v983_v0 = vld [vmem:[%s6216_s16 + $0x458] sm:$0xff]  ;;  %v4892_v2 = vcombine.low %v918_v54, %v950_v55  ;;  %v5025_v54 = vcombine.high %v1048_v48, %v1080_v49 }
 0x101   : > { %v4957_v4 = vcombine.high %v982_v62, %v1014_v63  ;;  %v4959_v5 = vcombine.high %v983_v0, %v1015_v1 }
 0x103   : > { %3030 = vmatpush1.bf16.msra.mxu0 %v2620_v8  ;;  %3071 = vmatpush1.bf16.msra.mxu1 %v2626_v10  ;;  %v1047_v8 = vld [vmem:[%s6216_s16 + $0x658] sm:$0xff]  ;;  %v4956_v10 = vcombine.low %v982_v62, %v1014_v63  ;;  %v5091_v62 = vcombine.high %v1113_v57, %v1113_v57  ;;  %v5090_v63 = vcombine.low %v1113_v57, %v1113_v57 }
 0x104   : > { %3103 = vmatprep.subr.bf16.mxu0 %v4825_v9  ;;  %3144 = vmatprep.subr.bf16.mxu1 %v4827_v11  ;;  %v1079_v9 = vld [vmem:[%s6216_s16 + $0x758] sm:$0xff]  ;;  %v4958_v11 = vcombine.low %v983_v0, %v1015_v1  ;;  %v858_v0 = vld [vmem:[%s6216_s16 + $0x70] sm:$0xff] }
 0x105   : > { %v5023_v13 = vcombine.high %v1047_v8, %v1079_v9  ;;  %v890_v1 = vld [vmem:[%s6216_s16 + $0x170] sm:$0xff] }
 0x106   : > { %5141 = vmatmul.mubr.msk.bf16.vlgmr.msra.gmra.mrb[12].mxu0 %vm2578_vm1, %v6251_v20  ;;  %5143 = vmatmul.mubr.msk.bf16.vlgmr.msra.gmra.mrb[12].mxu1 %vm2578_vm1, %v6251_v20 }
 0x107   : > { %3104 = vmatpush1.bf16.msra.mxu0 %v4824_v16  ;;  %3145 = vmatpush1.bf16.msra.mxu1 %v4826_v17  ;;  %v5020_v16 = vcombine.low %v1046_v6, %v1078_v7  ;;  %v5022_v17 = vcombine.low %v1047_v8, %v1079_v9  ;;  %v2662_v6 = vsel %vm2582_vm0, %v5090_v63, 0  ;;  %v922_v8 = vld [vmem:[%s6216_s16 + $0x270] sm:$0xff] }
 0x108   : > { %3105 = vmatprep.subr.bf16.mxu0 %v4889_v18  ;;  %3146 = vmatprep.subr.bf16.mxu1 %v4891_v19  ;;  %v5085_v18 = vcombine.high %v1110_v14, %v1110_v14  ;;  %v5084_v19 = vcombine.low %v1110_v14, %v1110_v14  ;;  %v954_v9 = vld [vmem:[%s6216_s16 + $0x370] sm:$0xff] }
 0x109   : > { %3135 = vmatprep.mubr.bf16.mxu0 %v5537_v32  ;;  %3176 = vmatprep.mubr.bf16.mxu1 %v5537_v32  ;;  %v4901_v14 = vcombine.high %v922_v8, %v954_v9 }
 0x10b   : > { %3106 = vmatpush1.bf16.msra.mxu0 %v4888_v25  ;;  %3147 = vmatpush1.bf16.msra.mxu1 %v4890_v26  ;;  %v857_v25 = vld [vmem:[%s6216_s16 + $0x68] sm:$0xff] }
 0x10c   : > { %3107 = vmatprep.subr.bf16.mxu0 %v4953_v27  ;;  %3148 = vmatprep.subr.bf16.mxu1 %v4955_v28  ;;  %v889_v26 = vld [vmem:[%s6216_s16 + $0x168] sm:$0xff]  ;;  %v2644_v27 = vsel %vm2582_vm0, %v5084_v19, 0  ;;  %v4833_v28 = vcombine.high %v856_v23, %v888_v24  ;;  %v1019_v19 = vld [vmem:[%s6216_s16 + $0x578] sm:$0xff] }
 0x10d   : > { %v4835_v30 = vcombine.high %v857_v25, %v889_v26 }
 0x10f   : > { %3108 = vmatpush1.bf16.msra.mxu0 %v4952_v34  ;;  %3149 = vmatpush1.bf16.msra.mxu1 %v4954_v35  ;;  %v921_v34 = vld [vmem:[%s6216_s16 + $0x268] sm:$0xff] }
 0x110   : > { %3109 = vmatprep.subr.bf16.mxu0 %v5017_v36  ;;  %3150 = vmatprep.subr.bf16.mxu1 %v5019_v37  ;;  %v953_v35 = vld [vmem:[%s6216_s16 + $0x368] sm:$0xff]  ;;  %v4832_v36 = vcombine.low %v856_v23, %v888_v24  ;;  %v4834_v37 = vcombine.low %v857_v25, %v889_v26  ;;  %v1050_v25 = vld [vmem:[%s6216_s16 + $0x670] sm:$0xff] }
 0x111   : > { %v4899_v39 = vcombine.high %v921_v34, %v953_v35  ;;  %v4898_v45 = vcombine.low %v921_v34, %v953_v35  ;;  %v1082_v26 = vld [vmem:[%s6216_s16 + $0x770] sm:$0xff]  ;;  %v1115_v35 = vld [vmem:[%s6216_s16 + $0x878] sm:$0xff] }
 0x112   : > { %v1114_v34 = vld [vmem:[%s6216_s16 + $0x870] sm:$0xff] }
 0x113   : > { %3110 = vmatpush1.bf16.msra.mxu0 %v5016_v40  ;;  %3151 = vmatpush1.bf16.msra.mxu1 %v5018_v41  ;;  %v984_v40 = vld [vmem:[%s6216_s16 + $0x460] sm:$0xff] }
 0x114   : > { %5144 = vmatprep.subr.msk.bf16.mxu0 %vm2582_vm0, %v5081_v42  ;;  %5146 = vmatprep.subr.msk.bf16.mxu1 %vm2582_vm0, %v5083_v44  ;;  %v1016_v41 = vld [vmem:[%s6216_s16 + $0x560] sm:$0xff]  ;;  %v985_v42 = vld [vmem:[%s6216_s16 + $0x468] sm:$0xff]  ;;  %v4896_v44 = vcombine.low %v920_v31, %v952_v33  ;;  %v5029_v31 = vcombine.high %v1050_v25, %v1082_v26 }
 0x115   : > { %v4961_v46 = vcombine.high %v984_v40, %v1016_v41  ;;  %v4963_v47 = vcombine.high %v985_v42, %v1017_v43 }
 0x117   : > { %3112 = vmatpush1.bf16.msra.mxu0 %v2632_v50  ;;  %3153 = vmatpush1.bf16.msra.mxu1 %v2638_v52  ;;  %v1049_v50 = vld [vmem:[%s6216_s16 + $0x668] sm:$0xff]  ;;  %v4960_v52 = vcombine.low %v984_v40, %v1016_v41  ;;  %v5095_v40 = vcombine.high %v1115_v35, %v1115_v35  ;;  %v5094_v41 = vcombine.low %v1115_v35, %v1115_v35  ;;  %v990_v35 = vld [vmem:[%s6216_s16 + $0x490] sm:$0xff] }
 0x118   : > { %3185 = vmatprep.subr.bf16.mxu0 %v4829_v51  ;;  %3226 = vmatprep.subr.bf16.mxu1 %v4831_v53  ;;  %v1081_v51 = vld [vmem:[%s6216_s16 + $0x768] sm:$0xff]  ;;  %v4962_v53 = vcombine.low %v985_v42, %v1017_v43  ;;  %v860_v42 = vld [vmem:[%s6216_s16 + $0x80] sm:$0xff] }
 0x119   : > { %v5027_v55 = vcombine.high %v1049_v50, %v1081_v51  ;;  %v892_v43 = vld [vmem:[%s6216_s16 + $0x180] sm:$0xff] }
 0x11a   : > { %5145 = vmatmul.mubr.msk.bf16.vlgmr.msra.gmra.mrb[16].mxu0 %vm2578_vm1, %v6251_v20  ;;  %5147 = vmatmul.mubr.msk.bf16.vlgmr.msra.gmra.mrb[16].mxu1 %vm2578_vm1, %v6251_v20 }
 0x11b   : > { %3186 = vmatpush1.bf16.msra.mxu0 %v4828_v58  ;;  %3227 = vmatpush1.bf16.msra.mxu1 %v4830_v59  ;;  %v5024_v58 = vcombine.low %v1048_v48, %v1080_v49  ;;  %v5026_v59 = vcombine.low %v1049_v50, %v1081_v51  ;;  %v2674_v48 = vsel %vm2582_vm0, %v5094_v41, 0  ;;  %v924_v50 = vld [vmem:[%s6216_s16 + $0x280] sm:$0xff] }
 0x11c   : > { %3187 = vmatprep.subr.bf16.mxu0 %v4893_v60  ;;  %3228 = vmatprep.subr.bf16.mxu1 %v4895_v61  ;;  %v5089_v60 = vcombine.high %v1112_v56, %v1112_v56  ;;  %v5088_v61 = vcombine.low %v1112_v56, %v1112_v56  ;;  %v956_v51 = vld [vmem:[%s6216_s16 + $0x380] sm:$0xff] }
 0x11d   : > { %3217 = vmatprep.mubr.bf16.mxu0 %v5537_v32  ;;  %3258 = vmatprep.mubr.bf16.mxu1 %v5537_v32  ;;  %v4905_v56 = vcombine.high %v924_v50, %v956_v51 }
 0x11f   : > { %3188 = vmatpush1.bf16.msra.mxu0 %v4892_v2  ;;  %3229 = vmatpush1.bf16.msra.mxu1 %v4894_v3  ;;  %v859_v2 = vld [vmem:[%s6216_s16 + $0x78] sm:$0xff] }
 0x120   : > { %3189 = vmatprep.subr.bf16.mxu0 %v4957_v4  ;;  %3230 = vmatprep.subr.bf16.mxu1 %v4959_v5  ;;  %v891_v3 = vld [vmem:[%s6216_s16 + $0x178] sm:$0xff]  ;;  %v2656_v4 = vsel %vm2582_vm0, %v5088_v61, 0  ;;  %v4837_v5 = vcombine.high %v858_v0, %v890_v1  ;;  %v1021_v61 = vld [vmem:[%s6216_s16 + $0x588] sm:$0xff] }
 0x121   : > { %v4839_v7 = vcombine.high %v859_v2, %v891_v3 }
 0x123   : > { %3190 = vmatpush1.bf16.msra.mxu0 %v4956_v10  ;;  %3231 = vmatpush1.bf16.msra.mxu1 %v4958_v11  ;;  %v923_v10 = vld [vmem:[%s6216_s16 + $0x278] sm:$0xff] }
 0x124   : > { %3191 = vmatprep.subr.bf16.mxu0 %v5021_v12  ;;  %3232 = vmatprep.subr.bf16.mxu1 %v5023_v13  ;;  %v955_v11 = vld [vmem:[%s6216_s16 + $0x378] sm:$0xff]  ;;  %v4836_v12 = vcombine.low %v858_v0, %v890_v1  ;;  %v4838_v13 = vcombine.low %v859_v2, %v891_v3  ;;  %v1052_v2 = vld [vmem:[%s6216_s16 + $0x680] sm:$0xff] }
 0x125   : > { %v4903_v15 = vcombine.high %v923_v10, %v955_v11  ;;  %v4902_v22 = vcombine.low %v923_v10, %v955_v11  ;;  %v1084_v3 = vld [vmem:[%s6216_s16 + $0x780] sm:$0xff]  ;;  %v1117_v10 = vld [vmem:[%s6216_s16 + $0x888] sm:$0xff] }
 0x126   : > { %v5032_v11 = vcombine.low %v1052_v2, %v1084_v3 }
 0x127   : > { %3192 = vmatpush1.bf16.msra.mxu0 %v5020_v16  ;;  %3233 = vmatpush1.bf16.msra.mxu1 %v5022_v17  ;;  %v986_v16 = vld [vmem:[%s6216_s16 + $0x470] sm:$0xff] }
 0x128   : > { %5148 = vmatprep.subr.msk.bf16.mxu0 %vm2582_vm0, %v5085_v18  ;;  %5150 = vmatprep.subr.msk.bf16.mxu1 %vm2582_vm0, %v5087_v21  ;;  %v1018_v17 = vld [vmem:[%s6216_s16 + $0x570] sm:$0xff]  ;;  %v987_v18 = vld [vmem:[%s6216_s16 + $0x478] sm:$0xff]  ;;  %v4900_v21 = vcombine.low %v922_v8, %v954_v9  ;;  %v1116_v9 = vld [vmem:[%s6216_s16 + $0x880] sm:$0xff] }
 0x129   : > { %v4965_v23 = vcombine.high %v986_v16, %v1018_v17  ;;  %v4967_v24 = vcombine.high %v987_v18, %v1019_v19 }
 0x12b   : > { %3194 = vmatpush1.bf16.msra.mxu0 %v2644_v27  ;;  %3235 = vmatpush1.bf16.msra.mxu1 %v2650_v29  ;;  %v1051_v27 = vld [vmem:[%s6216_s16 + $0x678] sm:$0xff]  ;;  %v4964_v29 = vcombine.low %v986_v16, %v1018_v17  ;;  %v5098_v16 = vcombine.low %v1117_v10, %v1117_v10  ;;  %v862_v17 = vld [vmem:[%s6216_s16 + $0x90] sm:$0xff] }
 0x12c   : > { %3267 = vmatprep.subr.bf16.mxu0 %v4833_v28  ;;  %3308 = vmatprep.subr.bf16.mxu1 %v4835_v30  ;;  %v1083_v28 = vld [vmem:[%s6216_s16 + $0x778] sm:$0xff]  ;;  %v4966_v30 = vcombine.low %v987_v18, %v1019_v19  ;;  %v894_v18 = vld [vmem:[%s6216_s16 + $0x190] sm:$0xff] }
 0x12d   : > { %v5031_v33 = vcombine.high %v1051_v27, %v1083_v28  ;;  %v863_v19 = vld [vmem:[%s6216_s16 + $0x98] sm:$0xff] }
 0x12e   : > { %5149 = vmatmul.mubr.msk.bf16.vlgmr.msra.gmra.mrb[20].mxu0 %vm2578_vm1, %v6251_v20  ;;  %5151 = vmatmul.mubr.msk.bf16.vlgmr.msra.gmra.mrb[20].mxu1 %vm2578_vm1, %v6251_v20 }
 0x12f   : > { %3268 = vmatpush1.bf16.msra.mxu0 %v4832_v36  ;;  %3309 = vmatpush1.bf16.msra.mxu1 %v4834_v37  ;;  %v5028_v36 = vcombine.low %v1050_v25, %v1082_v26  ;;  %v5030_v37 = vcombine.low %v1051_v27, %v1083_v28  ;;  %v926_v26 = vld [vmem:[%s6216_s16 + $0x290] sm:$0xff]  ;;  %v927_v28 = vld [vmem:[%s6216_s16 + $0x298] sm:$0xff] }
 0x130   : > { %3269 = vmatprep.subr.bf16.mxu0 %v4897_v38  ;;  %3310 = vmatprep.subr.bf16.mxu1 %v4899_v39  ;;  %v5093_v38 = vcombine.high %v1114_v34, %v1114_v34  ;;  %v5092_v39 = vcombine.low %v1114_v34, %v1114_v34  ;;  %v958_v27 = vld [vmem:[%s6216_s16 + $0x390] sm:$0xff] }
 0x131   : > { %3299 = vmatprep.mubr.bf16.mxu0 %v5537_v32  ;;  %3340 = vmatprep.mubr.bf16.mxu1 %v5537_v32 }
 0x133   : > { %3270 = vmatpush1.bf16.msra.mxu0 %v4896_v44  ;;  %3311 = vmatpush1.bf16.msra.mxu1 %v4898_v45  ;;  %v861_v44 = vld [vmem:[%s6216_s16 + $0x88] sm:$0xff] }
 0x134   : > { %3271 = vmatprep.subr.bf16.mxu0 %v4961_v46  ;;  %3312 = vmatprep.subr.bf16.mxu1 %v4963_v47  ;;  %v893_v45 = vld [vmem:[%s6216_s16 + $0x188] sm:$0xff]  ;;  %v2668_v46 = vsel %vm2582_vm0, %v5092_v39, 0  ;;  %v4841_v47 = vcombine.high %v860_v42, %v892_v43  ;;  %v1023_v39 = vld [vmem:[%s6216_s16 + $0x598] sm:$0xff] }
 0x135   : > { %v4843_v49 = vcombine.high %v861_v44, %v893_v45 }
 0x137   : > { %3272 = vmatpush1.bf16.msra.mxu0 %v4960_v52  ;;  %3313 = vmatpush1.bf16.msra.mxu1 %v4962_v53  ;;  %v925_v52 = vld [vmem:[%s6216_s16 + $0x288] sm:$0xff] }
 0x138   : > { %3273 = vmatprep.subr.bf16.mxu0 %v5025_v54  ;;  %3314 = vmatprep.subr.bf16.mxu1 %v5027_v55  ;;  %v957_v53 = vld [vmem:[%s6216_s16 + $0x388] sm:$0xff]  ;;  %v4840_v54 = vcombine.low %v860_v42, %v892_v43  ;;  %v4842_v55 = vcombine.low %v861_v44, %v893_v45  ;;  %v1054_v44 = vld [vmem:[%s6216_s16 + $0x690] sm:$0xff] }
 0x139   : > { %v4907_v57 = vcombine.high %v925_v52, %v957_v53  ;;  %v4906_v63 = vcombine.low %v925_v52, %v957_v53  ;;  %v1086_v45 = vld [vmem:[%s6216_s16 + $0x790] sm:$0xff]  ;;  %v1119_v53 = vld [vmem:[%s6216_s16 + $0x898] sm:$0xff] }
 0x13a   : > { %v1118_v52 = vld [vmem:[%s6216_s16 + $0x890] sm:$0xff] }
 0x13b   : > { %3274 = vmatpush1.bf16.msra.mxu0 %v5024_v58  ;;  %3315 = vmatpush1.bf16.msra.mxu1 %v5026_v59  ;;  %v988_v58 = vld [vmem:[%s6216_s16 + $0x480] sm:$0xff] }
 0x13c   : > { %5152 = vmatprep.subr.msk.bf16.mxu0 %vm2582_vm0, %v5089_v60  ;;  %5154 = vmatprep.subr.msk.bf16.mxu1 %vm2582_vm0, %v5091_v62  ;;  %v1020_v59 = vld [vmem:[%s6216_s16 + $0x580] sm:$0xff]  ;;  %v989_v60 = vld [vmem:[%s6216_s16 + $0x488] sm:$0xff]  ;;  %v4904_v62 = vcombine.low %v924_v50, %v956_v51  ;;  %v5037_v50 = vcombine.high %v1054_v44, %v1086_v45 }
 0x13d   : > { %v4969_v0 = vcombine.high %v988_v58, %v1020_v59  ;;  %v4971_v1 = vcombine.high %v989_v60, %v1021_v61 }
 0x13f   : > { %3276 = vmatpush1.bf16.msra.mxu0 %v2656_v4  ;;  %3317 = vmatpush1.bf16.msra.mxu1 %v2662_v6  ;;  %v1053_v4 = vld [vmem:[%s6216_s16 + $0x688] sm:$0xff]  ;;  %v4970_v6 = vcombine.low %v989_v60, %v1021_v61  ;;  %v864_v60 = vld [vmem:[%s6216_s16 + $0xa0] sm:$0xff] }
 0x140   : > { %3349 = vmatprep.subr.bf16.mxu0 %v4837_v5  ;;  %3390 = vmatprep.subr.bf16.mxu1 %v4839_v7  ;;  %v1085_v5 = vld [vmem:[%s6216_s16 + $0x788] sm:$0xff]  ;;  %v5033_v7 = vcombine.high %v1052_v2, %v1084_v3  ;;  %v896_v61 = vld [vmem:[%s6216_s16 + $0x1a0] sm:$0xff] }
 0x141   : > { %v5035_v8 = vcombine.high %v1053_v4, %v1085_v5 }
 0x142   : > { %5153 = vmatmul.mubr.msk.bf16.vlgmr.msra.gmra.mrb[24].mxu0 %vm2578_vm1, %v6251_v20  ;;  %5155 = vmatmul.mubr.msk.bf16.vlgmr.msra.gmra.mrb[24].mxu1 %vm2578_vm1, %v6251_v20 }
 0x143   : > { %3350 = vmatpush1.bf16.msra.mxu0 %v4836_v12  ;;  %3391 = vmatpush1.bf16.msra.mxu1 %v4838_v13  ;;  %v5034_v12 = vcombine.low %v1053_v4, %v1085_v5  ;;  %v5097_v13 = vcombine.high %v1116_v9, %v1116_v9  ;;  %v928_v4 = vld [vmem:[%s6216_s16 + $0x2a0] sm:$0xff] }
 0x144   : > { %3351 = vmatprep.subr.bf16.mxu0 %v4901_v14  ;;  %3392 = vmatprep.subr.bf16.mxu1 %v4903_v15  ;;  %v5096_v14 = vcombine.low %v1116_v9, %v1116_v9  ;;  %v5099_v15 = vcombine.high %v1117_v10, %v1117_v10  ;;  %v960_v5 = vld [vmem:[%s6216_s16 + $0x3a0] sm:$0xff] }
 0x145   : > { %3381 = vmatprep.mubr.bf16.mxu0 %v5537_v32  ;;  %3422 = vmatprep.mubr.bf16.mxu1 %v5537_v32  ;;  %v4913_v9 = vcombine.high %v928_v4, %v960_v5 }
 0x147   : > { %3352 = vmatpush1.bf16.msra.mxu0 %v4900_v21  ;;  %3393 = vmatpush1.bf16.msra.mxu1 %v4902_v22  ;;  %v895_v21 = vld [vmem:[%s6216_s16 + $0x198] sm:$0xff]  ;;  %v2680_v22 = vsel %vm2582_vm0, %v5096_v14, 0  ;;  %v1025_v14 = vld [vmem:[%s6216_s16 + $0x5a8] sm:$0xff] }
 0x148   : > { %3353 = vmatprep.subr.bf16.mxu0 %v4965_v23  ;;  %3394 = vmatprep.subr.bf16.mxu1 %v4967_v24  ;;  %v4845_v23 = vcombine.high %v862_v17, %v894_v18  ;;  %v2686_v24 = vsel %vm2582_vm0, %v5098_v16, 0  ;;  %v4847_v25 = vcombine.high %v863_v19, %v895_v21 }
 0x14b   : > { %3354 = vmatpush1.bf16.msra.mxu0 %v4964_v29  ;;  %3395 = vmatpush1.bf16.msra.mxu1 %v4966_v30  ;;  %v959_v29 = vld [vmem:[%s6216_s16 + $0x398] sm:$0xff]  ;;  %v4844_v30 = vcombine.low %v862_v17, %v894_v18 }
 0x14c   : > { %3355 = vmatprep.subr.bf16.mxu0 %v5029_v31  ;;  %3396 = vmatprep.subr.bf16.mxu1 %v5031_v33  ;;  %v4846_v31 = vcombine.low %v863_v19, %v895_v21  ;;  %v4909_v33 = vcombine.high %v926_v26, %v958_v27  ;;  %v4911_v34 = vcombine.high %v927_v28, %v959_v29  ;;  %v1056_v19 = vld [vmem:[%s6216_s16 + $0x6a0] sm:$0xff] }
 0x14d   : > { %v4910_v41 = vcombine.low %v927_v28, %v959_v29  ;;  %v1088_v21 = vld [vmem:[%s6216_s16 + $0x7a0] sm:$0xff]  ;;  %v1121_v29 = vld [vmem:[%s6216_s16 + $0x8a8] sm:$0xff] }
 0x14e   : > { %v1120_v28 = vld [vmem:[%s6216_s16 + $0x8a0] sm:$0xff] }
 0x14f   : > { %3356 = vmatpush1.bf16.msra.mxu0 %v5028_v36  ;;  %3397 = vmatpush1.bf16.msra.mxu1 %v5030_v37  ;;  %v1022_v36 = vld [vmem:[%s6216_s16 + $0x590] sm:$0xff]  ;;  %v6482_v37 = vld [vmem:[%s7086_s0] sm:$0x3] }
 0x150   : > { %5156 = vmatprep.subr.msk.bf16.mxu0 %vm2582_vm0, %v5093_v38  ;;  %5158 = vmatprep.subr.msk.bf16.mxu1 %vm2582_vm0, %v5095_v40  ;;  %v991_v38 = vld [vmem:[%s6216_s16 + $0x498] sm:$0xff]  ;;  %v4908_v40 = vcombine.low %v926_v26, %v958_v27  ;;  %v4973_v42 = vcombine.high %v990_v35, %v1022_v36  ;;  %v5041_v26 = vcombine.high %v1056_v19, %v1088_v21 }
 0x151   : > { %v4975_v43 = vcombine.high %v991_v38, %v1023_v39 }
 0x153   : > { %3358 = vmatpush1.bf16.msra.mxu0 %v2668_v46  ;;  %3399 = vmatpush1.bf16.msra.mxu1 %v2674_v48  ;;  %v1055_v46 = vld [vmem:[%s6216_s16 + $0x698] sm:$0xff]  ;;  %v4972_v48 = vcombine.low %v990_v35, %v1022_v36  ;;  %v5107_v35 = vcombine.high %v1121_v29, %v1121_v29  ;;  %v5106_v36 = vcombine.low %v1121_v29, %v1121_v29 }
 0x154   : > { %3431 = vmatprep.subr.bf16.mxu0 %v4841_v47  ;;  %3472 = vmatprep.subr.bf16.mxu1 %v4843_v49  ;;  %v1087_v47 = vld [vmem:[%s6216_s16 + $0x798] sm:$0xff]  ;;  %v4974_v49 = vcombine.low %v991_v38, %v1023_v39  ;;  %v866_v38 = vld [vmem:[%s6216_s16 + $0xb0] sm:$0xff] }
 0x155   : > { %v5039_v51 = vcombine.high %v1055_v46, %v1087_v47  ;;  %v898_v39 = vld [vmem:[%s6216_s16 + $0x1b0] sm:$0xff] }
 0x156   : > { %5157 = vmatmul.mubr.msk.bf16.vlgmr.msra.gmra.mrb[28].mxu0 %vm2578_vm1, %v6251_v20  ;;  %5159 = vmatmul.mubr.msk.bf16.vlgmr.msra.gmra.mrb[28].mxu1 %vm2578_vm1, %v6251_v20  ;;  %v4968_v20 = vcombine.low %v988_v58, %v1020_v59  ;;  %v5103_v58 = vcombine.high %v1119_v53, %v1119_v53  ;;  %v5102_v59 = vcombine.low %v1119_v53, %v1119_v53 }
 0x157   : > { %3432 = vmatpush1.bf16.msra.mxu0 %v4840_v54  ;;  %3473 = vmatpush1.bf16.msra.mxu1 %v4842_v55  ;;  %v5036_v54 = vcombine.low %v1054_v44, %v1086_v45  ;;  %v5038_v55 = vcombine.low %v1055_v46, %v1087_v47  ;;  %v2710_v44 = vsel %vm2582_vm0, %v5106_v36, 0  ;;  %v930_v46 = vld [vmem:[%s6216_s16 + $0x2b0] sm:$0xff]  ;;  %v932_v36 = vld [vmem:[%s6216_s16 + $0x2c0] sm:$0xff] }
 0x158   : > { %3433 = vmatprep.subr.bf16.mxu0 %v4905_v56  ;;  %3474 = vmatprep.subr.bf16.mxu1 %v4907_v57  ;;  %v5101_v56 = vcombine.high %v1118_v52, %v1118_v52  ;;  %v5100_v57 = vcombine.low %v1118_v52, %v1118_v52  ;;  %v2698_v2 = vsel %vm2582_vm0, %v5102_v59, 0  ;;  %v962_v47 = vld [vmem:[%s6216_s16 + $0x3b0] sm:$0xff] }
 0x159   : > { %3463 = vmatprep.mubr.bf16.mxu0 %v5537_v32  ;;  %3504 = vmatprep.mubr.bf16.mxu1 %v5537_v32  ;;  %v4917_v52 = vcombine.high %v930_v46, %v962_v47 }
 0x15b   : > { %3434 = vmatpush1.bf16.msra.mxu0 %v4904_v62  ;;  %3475 = vmatpush1.bf16.msra.mxu1 %v4906_v63  ;;  %v865_v62 = vld [vmem:[%s6216_s16 + $0xa8] sm:$0xff] }
 0x15c   : > { %3435 = vmatprep.subr.bf16.mxu0 %v4969_v0  ;;  %3476 = vmatprep.subr.bf16.mxu1 %v4971_v1  ;;  %v897_v63 = vld [vmem:[%s6216_s16 + $0x1a8] sm:$0xff]  ;;  %v2692_v0 = vsel %vm2582_vm0, %v5100_v57, 0  ;;  %v4849_v1 = vcombine.high %v864_v60, %v896_v61  ;;  %v1027_v57 = vld [vmem:[%s6216_s16 + $0x5b8] sm:$0xff] }
 0x15d   : > { %v4851_v3 = vcombine.high %v865_v62, %v897_v63 }
 0x15f   : > { %3436 = vmatpush1.bf16.msra.mxu0 %v4968_v20  ;;  %3477 = vmatpush1.bf16.msra.mxu1 %v4970_v6  ;;  %v929_v20 = vld [vmem:[%s6216_s16 + $0x2a8] sm:$0xff] }
 0x160   : > { %3437 = vmatprep.subr.bf16.mxu0 %v5033_v7  ;;  %3478 = vmatprep.subr.bf16.mxu1 %v5035_v8  ;;  %v961_v6 = vld [vmem:[%s6216_s16 + $0x3a8] sm:$0xff]  ;;  %v4848_v7 = vcombine.low %v864_v60, %v896_v61  ;;  %v4850_v8 = vcombine.low %v865_v62, %v897_v63  ;;  %v1058_v62 = vld [vmem:[%s6216_s16 + $0x6b0] sm:$0xff] }
 0x161   : > { %v4915_v10 = vcombine.high %v929_v20, %v961_v6  ;;  %v4914_v16 = vcombine.low %v929_v20, %v961_v6  ;;  %v1090_v63 = vld [vmem:[%s6216_s16 + $0x7b0] sm:$0xff]  ;;  %v1123_v6 = vld [vmem:[%s6216_s16 + $0x8b8] sm:$0xff] }
 0x162   : > { %v1122_v20 = vld [vmem:[%s6216_s16 + $0x8b0] sm:$0xff] }
 0x163   : > { %3438 = vmatpush1.bf16.msra.mxu0 %v5032_v11  ;;  %3479 = vmatpush1.bf16.msra.mxu1 %v5034_v12  ;;  %v992_v11 = vld [vmem:[%s6216_s16 + $0x4a0] sm:$0xff] }
 0x164   : > { %5160 = vmatprep.subr.msk.bf16.mxu0 %vm2582_vm0, %v5097_v13  ;;  %5162 = vmatprep.subr.msk.bf16.mxu1 %vm2582_vm0, %v5099_v15  ;;  %v1024_v12 = vld [vmem:[%s6216_s16 + $0x5a0] sm:$0xff]  ;;  %v993_v13 = vld [vmem:[%s6216_s16 + $0x4a8] sm:$0xff]  ;;  %v4912_v15 = vcombine.low %v928_v4, %v960_v5  ;;  %v5045_v4 = vcombine.high %v1058_v62, %v1090_v63 }
 0x165   : > { %v4977_v17 = vcombine.high %v992_v11, %v1024_v12  ;;  %v4979_v18 = vcombine.high %v993_v13, %v1025_v14 }
 0x167   : > { %3440 = vmatpush1.bf16.msra.mxu0 %v2680_v22  ;;  %3481 = vmatpush1.bf16.msra.mxu1 %v2686_v24  ;;  %v1057_v22 = vld [vmem:[%s6216_s16 + $0x6a8] sm:$0xff]  ;;  %v4976_v24 = vcombine.low %v992_v11, %v1024_v12  ;;  %v5108_v11 = vcombine.low %v1122_v20, %v1122_v20 }
 0x168   : > { %3513 = vmatprep.subr.bf16.mxu0 %v4845_v23  ;;  %3554 = vmatprep.subr.bf16.mxu1 %v4847_v25  ;;  %v1089_v23 = vld [vmem:[%s6216_s16 + $0x7a8] sm:$0xff]  ;;  %v4978_v25 = vcombine.low %v993_v13, %v1025_v14  ;;  %v5111_v13 = vcombine.high %v1123_v6, %v1123_v6  ;;  %v5110_v14 = vcombine.low %v1123_v6, %v1123_v6 }
 0x169   : > { %v5043_v27 = vcombine.high %v1057_v22, %v1089_v23 }
 0x16a   : > { %5161 = vmatmul.mubr.msk.bf16.vlgmr.msra.gmra.mrb[32].mxu0 %vm2578_vm1, %v6482_v37  ;;  %5163 = vmatmul.mubr.msk.bf16.vlgmr.msra.gmra.mrb[32].mxu1 %vm2578_vm1, %v6482_v37 }
 0x16b   : > { %3514 = vmatpush1.bf16.msra.mxu0 %v4844_v30  ;;  %3555 = vmatpush1.bf16.msra.mxu1 %v4846_v31  ;;  %v5040_v30 = vcombine.low %v1056_v19, %v1088_v21  ;;  %v5042_v31 = vcombine.low %v1057_v22, %v1089_v23  ;;  %v869_v21 = vld [vmem:[%s6216_s16 + $0xc8] sm:$0xff] }
 0x16c   : > { %3515 = vmatprep.subr.bf16.mxu0 %v4909_v33  ;;  %3556 = vmatprep.subr.bf16.mxu1 %v4911_v34  ;;  %v5105_v33 = vcombine.high %v1120_v28, %v1120_v28  ;;  %v5104_v34 = vcombine.low %v1120_v28, %v1120_v28  ;;  %v901_v22 = vld [vmem:[%s6216_s16 + $0x1c8] sm:$0xff] }
 0x16d   : > { %3545 = vmatprep.mubr.bf16.mxu0 %v5537_v32  ;;  %3586 = vmatprep.mubr.bf16.mxu1 %v5537_v32 }
 0x16f   : > { %3516 = vmatpush1.bf16.msra.mxu0 %v4908_v40  ;;  %3557 = vmatpush1.bf16.msra.mxu1 %v4910_v41  ;;  %v867_v40 = vld [vmem:[%s6216_s16 + $0xb8] sm:$0xff] }
 0x170   : > { %3517 = vmatprep.subr.bf16.mxu0 %v4973_v42  ;;  %3558 = vmatprep.subr.bf16.mxu1 %v4975_v43  ;;  %v899_v41 = vld [vmem:[%s6216_s16 + $0x1b8] sm:$0xff]  ;;  %v2704_v42 = vsel %vm2582_vm0, %v5104_v34, 0  ;;  %v4853_v43 = vcombine.high %v866_v38, %v898_v39  ;;  %v2722_v34 = vsel %vm2582_vm0, %v5110_v14, 0 }
 0x171   : > { %v4855_v45 = vcombine.high %v867_v40, %v899_v41 }
 0x173   : > { %3518 = vmatpush1.bf16.msra.mxu0 %v4972_v48  ;;  %3559 = vmatpush1.bf16.msra.mxu1 %v4974_v49  ;;  %v931_v48 = vld [vmem:[%s6216_s16 + $0x2b8] sm:$0xff] }
 0x174   : > { %3519 = vmatprep.subr.bf16.mxu0 %v5037_v50  ;;  %3560 = vmatprep.subr.bf16.mxu1 %v5039_v51  ;;  %v963_v49 = vld [vmem:[%s6216_s16 + $0x3b8] sm:$0xff]  ;;  %v4852_v50 = vcombine.low %v866_v38, %v898_v39  ;;  %v4854_v51 = vcombine.low %v867_v40, %v899_v41  ;;  %v964_v38 = vld [vmem:[%s6216_s16 + $0x3c0] sm:$0xff]  ;;  %v933_v39 = vld [vmem:[%s6216_s16 + $0x2c8] sm:$0xff] }
 0x175   : > { %v4919_v53 = vcombine.high %v931_v48, %v963_v49  ;;  %v4918_v59 = vcombine.low %v931_v48, %v963_v49  ;;  %v965_v40 = vld [vmem:[%s6216_s16 + $0x3c8] sm:$0xff]  ;;  %v4920_v49 = vcombine.low %v932_v36, %v964_v38 }
 0x176   : > { %v1029_v48 = vld [vmem:[%s6216_s16 + $0x5c8] sm:$0xff] }
 0x177   : > { %3520 = vmatpush1.bf16.msra.mxu0 %v5036_v54  ;;  %3561 = vmatpush1.bf16.msra.mxu1 %v5038_v55  ;;  %v994_v54 = vld [vmem:[%s6216_s16 + $0x4b0] sm:$0xff] }
 0x178   : > { %5164 = vmatprep.subr.msk.bf16.mxu0 %vm2582_vm0, %v5101_v56  ;;  %5166 = vmatprep.subr.msk.bf16.mxu1 %vm2582_vm0, %v5103_v58  ;;  %v1026_v55 = vld [vmem:[%s6216_s16 + $0x5b0] sm:$0xff]  ;;  %v995_v56 = vld [vmem:[%s6216_s16 + $0x4b8] sm:$0xff]  ;;  %v4916_v58 = vcombine.low %v930_v46, %v962_v47  ;;  %v1028_v46 = vld [vmem:[%s6216_s16 + $0x5c0] sm:$0xff] }
 0x179   : > { %v4981_v60 = vcombine.high %v994_v54, %v1026_v55  ;;  %v4983_v61 = vcombine.high %v995_v56, %v1027_v57  ;;  %v997_v47 = vld [vmem:[%s6216_s16 + $0x4c8] sm:$0xff] }
 0x17b   : > { %3522 = vmatpush1.bf16.msra.mxu0 %v2692_v0  ;;  %3563 = vmatpush1.bf16.msra.mxu1 %v2698_v2  ;;  %v1059_v0 = vld [vmem:[%s6216_s16 + $0x6b8] sm:$0xff]  ;;  %v4980_v2 = vcombine.low %v994_v54, %v1026_v55  ;;  %v4987_v54 = vcombine.high %v997_v47, %v1029_v48  ;;  %v6598_v55 = vld [vmem:[%s6216_s16 + $0x6c8] sm:$0xff] }
 0x17c   : > { %3595 = vmatprep.subr.bf16.mxu0 %v4849_v1  ;;  %3636 = vmatprep.subr.bf16.mxu1 %v4851_v3  ;;  %v1091_v1 = vld [vmem:[%s6216_s16 + $0x7b8] sm:$0xff]  ;;  %v4982_v3 = vcombine.low %v995_v56, %v1027_v57  ;;  %v6601_v56 = vld [vmem:[%s6216_s16 + $0x7c8] sm:$0xff] }
 0x17d   : > { %v5047_v5 = vcombine.high %v1059_v0, %v1091_v1 }
 0x17e   : > { %5165 = vmatmul.mubr.msk.bf16.vlgmr.msra.gmra.mrb[36].mxu0 %vm2578_vm1, %v6482_v37  ;;  %5167 = vmatmul.mubr.msk.bf16.vlgmr.msra.gmra.mrb[36].mxu1 %vm2578_vm1, %v6482_v37 }
 0x17f   : > { %3596 = vmatpush1.bf16.msra.mxu0 %v4848_v7  ;;  %3637 = vmatpush1.bf16.msra.mxu1 %v4850_v8  ;;  %v6554_v7 = vpop.permute.xlu0 %1135  ;;  %v5044_v8 = vcombine.low %v1058_v62, %v1090_v63  ;;  %v4986_v62 = vcombine.low %v997_v47, %v1029_v48 }
 0x180   : > { %3597 = vmatprep.subr.bf16.mxu0 %v4913_v9  ;;  %3638 = vmatprep.subr.bf16.mxu1 %v4915_v10  ;;  %v5046_v9 = vcombine.low %v1059_v0, %v1091_v1  ;;  %v5109_v10 = vcombine.high %v1122_v20, %v1122_v20 }
 0x181   : > { %3627 = vmatprep.mubr.bf16.mxu0 %v5537_v32  ;;  %3668 = vmatprep.mubr.bf16.mxu1 %v5537_v32 }
 0x183   : > { %3598 = vmatpush1.bf16.msra.mxu0 %v4912_v15  ;;  %3639 = vmatpush1.bf16.msra.mxu1 %v4914_v16  ;;  %v868_v15 = vld [vmem:[%s6216_s16 + $0xc0] sm:$0xff] }
 0x184   : > { %3599 = vmatprep.subr.bf16.mxu0 %v4977_v17  ;;  %3640 = vmatprep.subr.bf16.mxu1 %v4979_v18  ;;  %v900_v16 = vld [vmem:[%s6216_s16 + $0x1c0] sm:$0xff] }
 0x185   : > { %v4856_v41 = vcombine.low %v868_v15, %v900_v16 }
 0x187   : > { %3600 = vmatpush1.bf16.msra.mxu0 %v4976_v24  ;;  %3641 = vmatpush1.bf16.msra.mxu1 %v4978_v25 }
 0x188   : > { %3601 = vmatprep.subr.bf16.mxu0 %v5041_v26  ;;  %3642 = vmatprep.subr.bf16.mxu1 %v5043_v27 }
 0x18b   : > { %3602 = vmatpush1.bf16.msra.mxu0 %v5040_v30  ;;  %3643 = vmatpush1.bf16.msra.mxu1 %v5042_v31  ;;  %v2716_v30 = vsel %vm2582_vm0, %v5108_v11, 0  ;;  %v4857_v31 = vcombine.high %v868_v15, %v900_v16  ;;  %v1125_v15 = vld [vmem:[%s6216_s16 + $0x8c8] sm:$0xff] }
 0x18c   : > { %5168 = vmatprep.subr.msk.bf16.mxu0 %vm2582_vm0, %v5105_v33  ;;  %5170 = vmatprep.subr.msk.bf16.mxu1 %vm2582_vm0, %v5107_v35  ;;  %v4859_v35 = vcombine.high %v869_v21, %v901_v22 }
 0x18f   : > { %3604 = vmatpush1.bf16.msra.mxu0 %v2704_v42  ;;  %3645 = vmatpush1.bf16.msra.mxu1 %v2710_v44  ;;  %v4858_v42 = vcombine.low %v869_v21, %v901_v22  ;;  %v4923_v44 = vcombine.high %v933_v39, %v965_v40  ;;  %v5050_v22 = vcombine.low %v6598_v55, %v6601_v56 }
 0x190   : > { %3677 = vmatprep.subr.bf16.mxu0 %v4853_v43  ;;  %3718 = vmatprep.subr.bf16.mxu1 %v4855_v45  ;;  %v4921_v43 = vcombine.high %v932_v36, %v964_v38  ;;  %v996_v45 = vld [vmem:[%s6216_s16 + $0x4c0] sm:$0xff]  ;;  %v871_v36 = vld [vmem:[%s6216_s16 + $0xd8] sm:$0xff] }
 0x191   : > { %v903_v38 = vld [vmem:[%s6216_s16 + $0x1d8] sm:$0xff] }
 0x192   : > { %5169 = vmatmul.mubr.msk.bf16.vlgmr.msra.gmra.mrb[40].mxu0 %vm2578_vm1, %v6482_v37  ;;  %5171 = vmatmul.mubr.msk.bf16.vlgmr.msra.gmra.mrb[40].mxu1 %vm2578_vm1, %v6482_v37 }
 0x193   : > { %3678 = vmatpush1.bf16.msra.mxu0 %v4852_v50  ;;  %3719 = vmatpush1.bf16.msra.mxu1 %v4854_v51  ;;  %v4922_v50 = vcombine.low %v933_v39, %v965_v40  ;;  %v4985_v51 = vcombine.high %v996_v45, %v1028_v46 }
 0x194   : > { %3679 = vmatprep.subr.bf16.mxu0 %v4917_v52  ;;  %3720 = vmatprep.subr.bf16.mxu1 %v4919_v53  ;;  %v6591_v52 = vld [vmem:[%s6216_s16 + $0x6c0] sm:$0xff] }
 0x195   : > { %3709 = vmatprep.mubr.bf16.mxu0 %v5537_v32  ;;  %3750 = vmatprep.mubr.bf16.mxu1 %v5537_v32  ;;  %v6594_v53 = vld [vmem:[%s6216_s16 + $0x7c0] sm:$0xff] }
 0x196   : > { %v5049_v63 = vcombine.high %v6591_v52, %v6594_v53 }
 0x197   : > { %3680 = vmatpush1.bf16.msra.mxu0 %v4916_v58  ;;  %3721 = vmatpush1.bf16.msra.mxu1 %v4918_v59  ;;  %v4984_v58 = vcombine.low %v996_v45, %v1028_v46 }
 0x198   : > { %3681 = vmatprep.subr.bf16.mxu0 %v4981_v60  ;;  %3722 = vmatprep.subr.bf16.mxu1 %v4983_v61 }
 0x19b   : > { %3682 = vmatpush1.bf16.msra.mxu0 %v4980_v2  ;;  %3723 = vmatpush1.bf16.msra.mxu1 %v4982_v3 }
 0x19c   : > { %3683 = vmatprep.subr.bf16.mxu0 %v5045_v4  ;;  %3724 = vmatprep.subr.bf16.mxu1 %v5047_v5  ;;  %v5051_v4 = vcombine.high %v6598_v55, %v6601_v56  ;;  %v967_v55 = vld [vmem:[%s6216_s16 + $0x3d8] sm:$0xff] }
 0x19d   : > { %v2809_v12 = vpop.f32.mrb[0].mxu0  ;;  %v2850_v19 = vpop.f32.mrb[0].mxu1 }
 0x19e   : > { %v2810_v17 = vadd.f32 %v2809_v12, %v6554_v7  ;;  %v2811_v18 = vpop.f32.mrb[1].mxu0  ;;  %v2851_v25 = vadd.f32 %v2850_v19, %v6554_v7  ;;  %v2852_v26 = vpop.f32.mrb[1].mxu1  ;;  %v5048_v19 = vcombine.low %v6591_v52, %v6594_v53  ;;  %v934_v52 = vld [vmem:[%s6216_s16 + $0x2d0] sm:$0xff] }
 0x19f   : > { %v2812_v23 = vadd.f32 %v2811_v18, %v6554_v7  ;;  %v2813_v24 = vpop.f32.mrb[2].mxu0  ;;  %3684 = vmatpush1.bf16.msra.mxu0 %v5044_v8  ;;  %3725 = vmatpush1.bf16.msra.mxu1 %v5046_v9  ;;  %v2853_v28 = vadd.f32 %v2852_v26, %v6554_v7  ;;  %v2854_v29 = vpop.f32.mrb[2].mxu1  ;;  %v966_v53 = vld [vmem:[%s6216_s16 + $0x3d0] sm:$0xff] }
 0x1a0   : > { %5311 = vtanh.f32 %v2810_v17  ;;  %v2814_v27 = vpop.f32.mrb[3].mxu0  ;;  %5172 = vmatprep.subr.msk.bf16.mxu0 %vm2582_vm0, %v5109_v10  ;;  %v2855_v33 = vpop.f32.mrb[3].mxu1  ;;  %5174 = vmatprep.subr.msk.bf16.mxu1 %vm2582_vm0, %v5111_v13  ;;  %v1124_v10 = vld [vmem:[%s6216_s16 + $0x8c0] sm:$0xff]  ;;  %v5114_v29 = vcombine.low %v1125_v15, %v1125_v15 }
 0x1a1   : > { %5313 = vtanh.f32 %v2812_v23  ;;  %v5113_v23 = vcombine.high %v1124_v10, %v1124_v10  ;;  %v5112_v24 = vcombine.low %v1124_v10, %v1124_v10 }
 0x1a2   : > { %5315 = vtanh.f32 %v2851_v25 }
 0x1a3   : > { %5317 = vtanh.f32 %v2853_v28  ;;  %3686 = vmatpush1.bf16.msra.mxu0 %v2716_v30  ;;  %3727 = vmatpush1.bf16.msra.mxu1 %v2722_v34  ;;  %v5115_v28 = vcombine.high %v1125_v15, %v1125_v15  ;;  %v870_v30 = vld [vmem:[%s6216_s16 + $0xd0] sm:$0xff]  ;;  %v2728_v47 = vsel %vm2582_vm0, %v5112_v24, 0 }
 0x1a4   : > { %3759 = vmatprep.subr.bf16.mxu0 %v4857_v31  ;;  %3800 = vmatprep.subr.bf16.mxu1 %v4859_v35  ;;  %v902_v31 = vld [vmem:[%s6216_s16 + $0x1d0] sm:$0xff] }
 0x1a5   : > { %v4861_v48 = vcombine.high %v870_v30, %v902_v31  ;;  %v4860_v56 = vcombine.low %v870_v30, %v902_v31 }
 0x1a6   : > { %5173 = vmatmul.mubr.msk.bf16.vlgmr.msra.gmra.mrb[44].mxu0 %vm2578_vm1, %v6482_v37  ;;  %5175 = vmatmul.mubr.msk.bf16.vlgmr.msra.gmra.mrb[44].mxu1 %vm2578_vm1, %v6482_v37 }
 0x1a7   : > { %3760 = vmatpush1.bf16.msra.mxu0 %v4856_v41  ;;  %3801 = vmatpush1.bf16.msra.mxu1 %v4858_v42 }
 0x1a8   : > { %3761 = vmatprep.subr.bf16.mxu0 %v4921_v43  ;;  %3802 = vmatprep.subr.bf16.mxu1 %v4923_v44 }
 0x1a9   : > { %3791 = vmatprep.mubr.bf16.mxu0 %v5537_v32  ;;  %3832 = vmatprep.mubr.bf16.mxu1 %v5537_v32 }
 0x1aa   : > { %v5312_v57 = vpop.eup %5311 }
 0x1ab   : > { %v5314_v59 = vpop.eup %5313  ;;  %v4311_v60 = vsel %vm2582_vm0, %v5312_v57, 0.0  ;;  %v4440_v61 = vmul.f32 %v5312_v57, %v5312_v57  ;;  %3762 = vmatpush1.bf16.msra.mxu0 %v4920_v49  ;;  %3803 = vmatpush1.bf16.msra.mxu1 %v4922_v50  ;;  %v2734_v50 = vsel %vm2582_vm0, %v5114_v29, 0 }
 0x1ac   : > { %v5316_v0 = vpop.eup %5315  ;;  %v4215_v1 = vcombine.low %v5312_v57, %v5314_v59  ;;  %v4312_v2 = vsel %vm2582_vm0, %v5314_v59, 0.0  ;;  %v4441_v3 = vmul.f32 %v5314_v59, %v5314_v59  ;;  %3763 = vmatprep.subr.bf16.mxu0 %v4985_v51  ;;  %3804 = vmatprep.subr.bf16.mxu1 %v4987_v54  ;;  %v4863_v51 = vcombine.high %v871_v36, %v903_v38  ;;  %v935_v54 = vld [vmem:[%s6216_s16 + $0x2d8] sm:$0xff] }
 0x1ad   : > { %v5318_v5 = vpop.eup %5317  ;;  %v4313_v20 = vadd.f32 %v4312_v2, %v4311_v60  ;;  %v4504_v6 = vsel %vm2582_vm0, %v4440_v61, 0.0  ;;  %v4314_v8 = vsel %vm2582_vm0, %v5316_v0, 0.0  ;;  %v4442_v9 = vmul.f32 %v5316_v0, %v5316_v0  ;;  %v998_v60 = vld [vmem:[%s6216_s16 + $0x4d0] sm:$0xff] }
 0x1ae   : > { %v4505_v11 = vsel %vm2582_vm0, %v4441_v3, 0.0  ;;  %v4216_v12 = vcombine.low %v5316_v0, %v5318_v5  ;;  %v4316_v13 = vsel %vm2582_vm0, %v5318_v5, 0.0  ;;  %v4443_v14 = vmul.f32 %v5318_v5, %v5318_v5  ;;  %4279 = vst [vmem:[%s6611_s9] sm:$0xff] %v4215_v1  ;;  %v1030_v61 = vld [vmem:[%s6216_s16 + $0x5d0] sm:$0xff]  ;;  %v6665_v5 = vld [vmem:[%s6216_s16 + $0x6d8] sm:$0xff] }
 0x1af   : > { %v4506_v16 = vadd.f32 %v4505_v11, %v4504_v6  ;;  %v4315_v17 = vadd.f32 %v4314_v8, %v4313_v20  ;;  %v4507_v18 = vsel %vm2582_vm0, %v4442_v9, 0.0  ;;  %3764 = vmatpush1.bf16.msra.mxu0 %v4984_v58  ;;  %3805 = vmatpush1.bf16.msra.mxu1 %v4986_v62  ;;  %v4862_v57 = vcombine.low %v871_v36, %v903_v38  ;;  %v999_v62 = vld [vmem:[%s6216_s16 + $0x4d8] sm:$0xff]  ;;  %v6659_v1 = vld [vmem:[%s6216_s16 + $0x6d0] sm:$0xff] }
 0x1b0   : > { %v4509_v21 = vsel %vm2582_vm0, %v4443_v14, 0.0  ;;  %3765 = vmatprep.subr.bf16.mxu0 %v5049_v63  ;;  %4280 = vst [vmem:[%s6611_s9 + $0x8] sm:$0xff] %v4216_v12  ;;  %3806 = vmatprep.subr.bf16.mxu1 %v5051_v4  ;;  %v4925_v58 = vcombine.high %v934_v52, %v966_v53  ;;  %v4927_v59 = vcombine.high %v935_v54, %v967_v55  ;;  %v1031_v63 = vld [vmem:[%s6216_s16 + $0x5d8] sm:$0xff]  ;;  %v6662_v2 = vld [vmem:[%s6216_s16 + $0x7d0] sm:$0xff] }
 0x1b1   : > { %v4508_v25 = vadd.f32 %v4507_v18, %v4506_v16  ;;  %v6630_v26 = vadd.f32 %v4316_v13, %v4315_v17  ;;  %v2891_v27 = vpop.f32.mrb[4].mxu0  ;;  %v2932_v35 = vpop.f32.mrb[4].mxu1  ;;  %v4924_v0 = vcombine.low %v934_v52, %v966_v53  ;;  %v4926_v3 = vcombine.low %v935_v54, %v967_v55  ;;  %v6668_v20 = vld [vmem:[%s6216_s16 + $0x7d8] sm:$0xff]  ;;  %v873_v54 = vld [vmem:[%s6216_s16 + $0xe8] sm:$0xff] }
 0x1b2   : > { %v2892_v33 = vadd.f32 %v2891_v27, %v6554_v7  ;;  %v2893_v34 = vpop.f32.mrb[5].mxu0  ;;  %v2933_v42 = vadd.f32 %v2932_v35, %v6554_v7  ;;  %v2934_v43 = vpop.f32.mrb[5].mxu1  ;;  %v4989_v4 = vcombine.high %v998_v60, %v1030_v61  ;;  %v4991_v6 = vcombine.high %v999_v62, %v1031_v63  ;;  %v905_v55 = vld [vmem:[%s6216_s16 + $0x1e8] sm:$0xff] }
 0x1b3   : > { %v6637_v39 = vadd.f32 %v4509_v21, %v4508_v25  ;;  %v2894_v40 = vadd.f32 %v2893_v34, %v6554_v7  ;;  %v2895_v41 = vpop.f32.mrb[6].mxu0  ;;  %3766 = vmatpush1.bf16.msra.mxu0 %v5048_v19  ;;  %3807 = vmatpush1.bf16.msra.mxu1 %v5050_v22  ;;  %v2935_v45 = vadd.f32 %v2934_v43, %v6554_v7  ;;  %v2936_v46 = vpop.f32.mrb[6].mxu1  ;;  %v1127_v34 = vld [vmem:[%s6216_s16 + $0x8d8] sm:$0xff] }
 0x1b4   : > { %5319 = vtanh.f32 %v2892_v33  ;;  %v2896_v44 = vpop.f32.mrb[7].mxu0  ;;  %5176 = vmatprep.subr.msk.bf16.mxu0 %vm2582_vm0, %v5113_v23  ;;  %v2937_v49 = vpop.f32.mrb[7].mxu1  ;;  %5178 = vmatprep.subr.msk.bf16.mxu1 %vm2582_vm0, %v5115_v28  ;;  %v4988_v9 = vcombine.low %v998_v60, %v1030_v61  ;;  %v4990_v10 = vcombine.low %v999_v62, %v1031_v63  ;;  %v5053_v11 = vcombine.high %v6659_v1, %v6662_v2  ;;  %v1126_v23 = vld [vmem:[%s6216_s16 + $0x8d0] sm:$0xff] }
 0x1b5   : > { %5321 = vtanh.f32 %v2894_v40  ;;  %v5052_v15 = vcombine.low %v6659_v1, %v6662_v2  ;;  %v5054_v16 = vcombine.low %v6665_v5, %v6668_v20  ;;  %v5055_v29 = vcombine.high %v6665_v5, %v6668_v20  ;;  %v936_v5 = vld [vmem:[%s6216_s16 + $0x2e0] sm:$0xff] }
 0x1b6   : > { %5323 = vtanh.f32 %v2933_v42  ;;  %v5116_v40 = vcombine.low %v1126_v23, %v1126_v23  ;;  %v5118_v46 = vcombine.low %v1127_v34, %v1127_v34  ;;  %v968_v20 = vld [vmem:[%s6216_s16 + $0x3e0] sm:$0xff] }
 0x1b7   : > { %5325 = vtanh.f32 %v2935_v45  ;;  %3768 = vmatpush1.bf16.msra.mxu0 %v2728_v47  ;;  %3809 = vmatpush1.bf16.msra.mxu1 %v2734_v50  ;;  %v5119_v45 = vcombine.high %v1127_v34, %v1127_v34  ;;  %v872_v47 = vld [vmem:[%s6216_s16 + $0xe0] sm:$0xff] }
 0x1b8   : > { %3841 = vmatprep.subr.bf16.mxu0 %v4861_v48  ;;  %3882 = vmatprep.subr.bf16.mxu1 %v4863_v51  ;;  %v904_v48 = vld [vmem:[%s6216_s16 + $0x1e0] sm:$0xff]  ;;  %v2740_v60 = vsel %vm2582_vm0, %v5116_v40, 0 }
 0x1b9   : > { %v4865_v1 = vcombine.high %v872_v47, %v904_v48 }
 0x1ba   : > { %5177 = vmatmul.mubr.msk.bf16.vlgmr.msra.gmra.mrb[48].mxu0 %vm2578_vm1, %v6482_v37  ;;  %5179 = vmatmul.mubr.msk.bf16.vlgmr.msra.gmra.mrb[48].mxu1 %vm2578_vm1, %v6482_v37 }
 0x1bb   : > { %3842 = vmatpush1.bf16.msra.mxu0 %v4860_v56  ;;  %3883 = vmatpush1.bf16.msra.mxu1 %v4862_v57 }
 0x1bc   : > { %3843 = vmatprep.subr.bf16.mxu0 %v4925_v58  ;;  %3884 = vmatprep.subr.bf16.mxu1 %v4927_v59 }
 0x1bd   : > { %3873 = vmatprep.mubr.bf16.mxu0 %v5537_v32  ;;  %3914 = vmatprep.mubr.bf16.mxu1 %v5537_v32 }
 0x1be   : > { %v5320_v8 = vpop.eup %5319 }
 0x1bf   : > { %v5322_v12 = vpop.eup %5321  ;;  %v4318_v13 = vsel %vm2582_vm0, %v5320_v8, 0.0  ;;  %v4444_v14 = vmul.f32 %v5320_v8, %v5320_v8  ;;  %3844 = vmatpush1.bf16.msra.mxu0 %v4924_v0  ;;  %3885 = vmatpush1.bf16.msra.mxu1 %v4926_v3  ;;  %v2746_v3 = vsel %vm2582_vm0, %v5118_v46, 0 }
 0x1c0   : > { %v5324_v17 = vpop.eup %5323  ;;  %v4319_v18 = vadd.f32 %v4318_v13, %v6630_v26  ;;  %v4217_v19 = vcombine.low %v5320_v8, %v5322_v12  ;;  %v4320_v21 = vsel %vm2582_vm0, %v5322_v12, 0.0  ;;  %v4445_v22 = vmul.f32 %v5322_v12, %v5322_v12  ;;  %3845 = vmatprep.subr.bf16.mxu0 %v4989_v4  ;;  %3886 = vmatprep.subr.bf16.mxu1 %v4991_v6  ;;  %v937_v6 = vld [vmem:[%s6216_s16 + $0x2e8] sm:$0xff]  ;;  %v1000_v13 = vld [vmem:[%s6216_s16 + $0x4e0] sm:$0xff] }
 0x1c1   : > { %v5326_v24 = vpop.eup %5325  ;;  %v4511_v25 = vsel %vm2582_vm0, %v4444_v14, 0.0  ;;  %v4322_v27 = vsel %vm2582_vm0, %v5324_v17, 0.0  ;;  %v4446_v28 = vmul.f32 %v5324_v17, %v5324_v17  ;;  %v4867_v4 = vcombine.high %v873_v54, %v905_v55  ;;  %v969_v8 = vld [vmem:[%s6216_s16 + $0x3e8] sm:$0xff]  ;;  %v1032_v14 = vld [vmem:[%s6216_s16 + $0x5e0] sm:$0xff] }
 0x1c2   : > { %v4512_v26 = vadd.f32 %v4511_v25, %v6637_v39  ;;  %v4321_v30 = vadd.f32 %v4320_v21, %v4319_v18  ;;  %v4513_v31 = vsel %vm2582_vm0, %v4445_v22, 0.0  ;;  %v4218_v33 = vcombine.low %v5324_v17, %v5326_v24  ;;  %4281 = vst [vmem:[%s6611_s9 + $0x10] sm:$0xff] %v4217_v19  ;;  %v6723_v18 = vld [vmem:[%s6216_s16 + $0x6e0] sm:$0xff] }
 0x1c3   : > { %v4515_v35 = vsel %vm2582_vm0, %v4446_v28, 0.0  ;;  %v4324_v36 = vsel %vm2582_vm0, %v5326_v24, 0.0  ;;  %v4447_v38 = vmul.f32 %v5326_v24, %v5326_v24  ;;  %3846 = vmatpush1.bf16.msra.mxu0 %v4988_v9  ;;  %3887 = vmatpush1.bf16.msra.mxu1 %v4990_v10  ;;  %v5117_v39 = vcombine.high %v1126_v23, %v1126_v23  ;;  %v6726_v19 = vld [vmem:[%s6216_s16 + $0x7e0] sm:$0xff]  ;;  %v6729_v23 = vld [vmem:[%s6216_s16 + $0x6e8] sm:$0xff] }
 0x1c4   : > { %v4514_v41 = vadd.f32 %v4513_v31, %v4512_v26  ;;  %v4323_v42 = vadd.f32 %v4322_v27, %v4321_v30  ;;  %3847 = vmatprep.subr.bf16.mxu0 %v5053_v11  ;;  %4282 = vst [vmem:[%s6611_s9 + $0x18] sm:$0xff] %v4218_v33  ;;  %3888 = vmatprep.subr.bf16.mxu1 %v5055_v29  ;;  %v6732_v24 = vld [vmem:[%s6216_s16 + $0x7e8] sm:$0xff] }
 0x1c5   : > { %v4517_v43 = vsel %vm2582_vm0, %v4447_v38, 0.0  ;;  %v2973_v44 = vpop.f32.mrb[8].mxu0  ;;  %v3014_v53 = vpop.f32.mrb[8].mxu1  ;;  %v4864_v9 = vcombine.low %v872_v47, %v904_v48  ;;  %v4866_v10 = vcombine.low %v873_v54, %v905_v55  ;;  %v4929_v11 = vcombine.high %v936_v5, %v968_v20 }
 0x1c6   : > { %v4516_v49 = vadd.f32 %v4515_v35, %v4514_v41  ;;  %v6696_v50 = vadd.f32 %v4324_v36, %v4323_v42  ;;  %v2974_v51 = vadd.f32 %v2973_v44, %v6554_v7  ;;  %v2975_v52 = vpop.f32.mrb[9].mxu0  ;;  %v3015_v58 = vadd.f32 %v3014_v53, %v6554_v7  ;;  %v3016_v59 = vpop.f32.mrb[9].mxu1  ;;  %v1128_v42 = vld [vmem:[%s6216_s16 + $0x8e0] sm:$0xff] }
 0x1c7   : > { %v2976_v56 = vadd.f32 %v2975_v52, %v6554_v7  ;;  %v2977_v57 = vpop.f32.mrb[10].mxu0  ;;  %3848 = vmatpush1.bf16.msra.mxu0 %v5052_v15  ;;  %3889 = vmatpush1.bf16.msra.mxu1 %v5054_v16  ;;  %v3017_v63 = vadd.f32 %v3016_v59, %v6554_v7  ;;  %v3018_v0 = vpop.f32.mrb[10].mxu1  ;;  %v4931_v12 = vcombine.high %v937_v6, %v969_v8  ;;  %v1001_v15 = vld [vmem:[%s6216_s16 + $0x4e8] sm:$0xff] }
 0x1c8   : > { %v6704_v61 = vadd.f32 %v4517_v43, %v4516_v49  ;;  %5327 = vtanh.f32 %v2974_v51  ;;  %v2978_v62 = vpop.f32.mrb[11].mxu0  ;;  %5180 = vmatprep.subr.msk.bf16.mxu0 %vm2582_vm0, %v5117_v39  ;;  %v3019_v2 = vpop.f32.mrb[11].mxu1  ;;  %5182 = vmatprep.subr.msk.bf16.mxu1 %vm2582_vm0, %v5119_v45  ;;  %v1033_v16 = vld [vmem:[%s6216_s16 + $0x5e8] sm:$0xff]  ;;  %v4928_v17 = vcombine.low %v936_v5, %v968_v20  ;;  %v4930_v21 = vcombine.low %v937_v6, %v969_v8  ;;  %v906_v0 = vld [vmem:[%s6216_s16 + $0x1f0] sm:$0xff]  ;;  %v875_v20 = vld [vmem:[%s6216_s16 + $0xf8] sm:$0xff] }
 0x1c9   : > { %5329 = vtanh.f32 %v2976_v56  ;;  %v4993_v22 = vcombine.high %v1000_v13, %v1032_v14  ;;  %v4995_v25 = vcombine.high %v1001_v15, %v1033_v16  ;;  %v4994_v28 = vcombine.low %v1001_v15, %v1033_v16  ;;  %v1129_v51 = vld [vmem:[%s6216_s16 + $0x8e8] sm:$0xff]  ;;  %v907_v6 = vld [vmem:[%s6216_s16 + $0x1f8] sm:$0xff] }
 0x1ca   : > { %5331 = vtanh.f32 %v3015_v58  ;;  %v5057_v29 = vcombine.high %v6723_v18, %v6726_v19  ;;  %v5056_v33 = vcombine.low %v6723_v18, %v6726_v19  ;;  %v5058_v34 = vcombine.low %v6729_v23, %v6732_v24 }
 0x1cb   : > { %5333 = vtanh.f32 %v3017_v63  ;;  %3850 = vmatpush1.bf16.msra.mxu0 %v2740_v60  ;;  %3891 = vmatpush1.bf16.msra.mxu1 %v2746_v3  ;;  %v5059_v46 = vcombine.high %v6729_v23, %v6732_v24  ;;  %v5120_v55 = vcombine.low %v1128_v42, %v1128_v42  ;;  %v5121_v58 = vcombine.high %v1128_v42, %v1128_v42  ;;  %v874_v63 = vld [vmem:[%s6216_s16 + $0xf0] sm:$0xff]  ;;  %v939_v24 = vld [vmem:[%s6216_s16 + $0x2f8] sm:$0xff] }
 0x1cc   : > { %3923 = vmatprep.subr.bf16.mxu0 %v4865_v1  ;;  %3964 = vmatprep.subr.bf16.mxu1 %v4867_v4  ;;  %v5122_v62 = vcombine.low %v1129_v51, %v1129_v51  ;;  %v970_v23 = vld [vmem:[%s6216_s16 + $0x3f0] sm:$0xff]  ;;  %v6798_v42 = vld [vmem:[%s6216_s16 + $0x6f8] sm:$0xff] }
 0x1ce   : > { %5181 = vmatmul.mubr.msk.bf16.vlgmr.msra.gmra.mrb[52].mxu0 %vm2578_vm1, %v6482_v37  ;;  %5183 = vmatmul.mubr.msk.bf16.vlgmr.msra.gmra.mrb[52].mxu1 %vm2578_vm1, %v6482_v37  ;;  %v4992_v37 = vcombine.low %v1000_v13, %v1032_v14  ;;  %v2758_v19 = vsel %vm2582_vm0, %v5122_v62, 0 }
 0x1cf   : > { %3924 = vmatpush1.bf16.msra.mxu0 %v4864_v9  ;;  %3965 = vmatpush1.bf16.msra.mxu1 %v4866_v10 }
 0x1d0   : > { %3925 = vmatprep.subr.bf16.mxu0 %v4929_v11  ;;  %3966 = vmatprep.subr.bf16.mxu1 %v4931_v12  ;;  %v2752_v12 = vsel %vm2582_vm0, %v5120_v55, 0 }
 0x1d1   : > { %3955 = vmatprep.mubr.bf16.mxu0 %v5537_v32  ;;  %3996 = vmatprep.mubr.bf16.mxu1 %v5537_v32 }
 0x1d2   : > { %v5328_v27 = vpop.eup %5327 }
 0x1d3   : > { %v5330_v26 = vpop.eup %5329  ;;  %v4326_v30 = vsel %vm2582_vm0, %v5328_v27, 0.0  ;;  %v4448_v31 = vmul.f32 %v5328_v27, %v5328_v27  ;;  %3926 = vmatpush1.bf16.msra.mxu0 %v4928_v17  ;;  %3967 = vmatpush1.bf16.msra.mxu1 %v4930_v21  ;;  %v4869_v17 = vcombine.high %v874_v63, %v906_v0  ;;  %v4871_v21 = vcombine.high %v875_v20, %v907_v6 }
 0x1d4   : > { %v5332_v35 = vpop.eup %5331  ;;  %v4327_v36 = vadd.f32 %v4326_v30, %v6696_v50  ;;  %v4219_v38 = vcombine.low %v5328_v27, %v5330_v26  ;;  %v4328_v40 = vsel %vm2582_vm0, %v5330_v26, 0.0  ;;  %v4449_v41 = vmul.f32 %v5330_v26, %v5330_v26  ;;  %3927 = vmatprep.subr.bf16.mxu0 %v4993_v22  ;;  %3968 = vmatprep.subr.bf16.mxu1 %v4995_v25  ;;  %v938_v22 = vld [vmem:[%s6216_s16 + $0x2f0] sm:$0xff]  ;;  %v971_v25 = vld [vmem:[%s6216_s16 + $0x3f8] sm:$0xff] }
 0x1d5   : > { %v5334_v39 = vpop.eup %5333  ;;  %v4519_v43 = vsel %vm2582_vm0, %v4448_v31, 0.0  ;;  %v4330_v44 = vsel %vm2582_vm0, %v5332_v35, 0.0  ;;  %v4450_v45 = vmul.f32 %v5332_v35, %v5332_v35  ;;  %v4868_v27 = vcombine.low %v874_v63, %v906_v0  ;;  %v1002_v26 = vld [vmem:[%s6216_s16 + $0x4f0] sm:$0xff]  ;;  %v6783_v31 = vld [vmem:[%s7086_s0] sm:$0x3] }
 0x1d6   : > { %v4520_v47 = vadd.f32 %v4519_v43, %v6704_v61  ;;  %v4329_v48 = vadd.f32 %v4328_v40, %v4327_v36  ;;  %v4521_v49 = vsel %vm2582_vm0, %v4449_v41, 0.0  ;;  %v4220_v50 = vcombine.low %v5332_v35, %v5334_v39  ;;  %4283 = vst [vmem:[%s6611_s9 + $0x20] sm:$0xff] %v4219_v38  ;;  %v1034_v30 = vld [vmem:[%s6216_s16 + $0x5f0] sm:$0xff] }
 0x1d7   : > { %v4523_v52 = vsel %vm2582_vm0, %v4450_v45, 0.0  ;;  %v4332_v53 = vsel %vm2582_vm0, %v5334_v39, 0.0  ;;  %v4451_v54 = vmul.f32 %v5334_v39, %v5334_v39  ;;  %3928 = vmatpush1.bf16.msra.mxu0 %v4992_v37  ;;  %3969 = vmatpush1.bf16.msra.mxu1 %v4994_v28  ;;  %v5123_v61 = vcombine.high %v1129_v51, %v1129_v51  ;;  %v6792_v36 = vld [vmem:[%s6216_s16 + $0x6f0] sm:$0xff]  ;;  %v6801_v39 = vld [vmem:[%s6216_s16 + $0x7f8] sm:$0xff] }
 0x1d8   : > { %v4522_v56 = vadd.f32 %v4521_v49, %v4520_v47  ;;  %v4331_v57 = vadd.f32 %v4330_v44, %v4329_v48  ;;  %3929 = vmatprep.subr.bf16.mxu0 %v5057_v29  ;;  %4284 = vst [vmem:[%s6611_s9 + $0x28] sm:$0xff] %v4220_v50  ;;  %3970 = vmatprep.subr.bf16.mxu1 %v5059_v46  ;;  %v6795_v38 = vld [vmem:[%s6216_s16 + $0x7f0] sm:$0xff] }
 0x1d9   : > { %v4525_v59 = vsel %vm2582_vm0, %v4451_v54, 0.0  ;;  %v3055_v60 = vpop.f32.mrb[12].mxu0  ;;  %v3096_v5 = vpop.f32.mrb[12].mxu1  ;;  %v4870_v37 = vcombine.low %v875_v20, %v907_v6  ;;  %v4933_v28 = vcombine.high %v938_v22, %v970_v23  ;;  %v4935_v29 = vcombine.high %v939_v24, %v971_v25 }
 0x1da   : > { %v4524_v1 = vadd.f32 %v4523_v52, %v4522_v56  ;;  %v6760_v2 = vadd.f32 %v4332_v53, %v4331_v57  ;;  %v3056_v3 = vadd.f32 %v3055_v60, %v6554_v7  ;;  %v3057_v4 = vpop.f32.mrb[13].mxu0  ;;  %v3097_v10 = vadd.f32 %v3096_v5, %v6554_v7  ;;  %v3098_v11 = vpop.f32.mrb[13].mxu1  ;;  %v1130_v57 = vld [vmem:[%s6216_s16 + $0x8f0] sm:$0xff] }
 0x1db   : > { %v3058_v8 = vadd.f32 %v3057_v4, %v6554_v7  ;;  %v3059_v9 = vpop.f32.mrb[14].mxu0  ;;  %3930 = vmatpush1.bf16.msra.mxu0 %v5056_v33  ;;  %3971 = vmatpush1.bf16.msra.mxu1 %v5058_v34  ;;  %v3099_v15 = vadd.f32 %v3098_v11, %v6554_v7  ;;  %v3100_v16 = vpop.f32.mrb[14].mxu1  ;;  %v1003_v33 = vld [vmem:[%s6216_s16 + $0x4f8] sm:$0xff]  ;;  %v4932_v35 = vcombine.low %v938_v22, %v970_v23 }
 0x1dc   : > { %v6768_v13 = vadd.f32 %v4525_v59, %v4524_v1  ;;  %5335 = vtanh.f32 %v3056_v3  ;;  %v3060_v14 = vpop.f32.mrb[15].mxu0  ;;  %5184 = vmatprep.subr.msk.bf16.mxu0 %vm2582_vm0, %v5121_v58  ;;  %v3101_v18 = vpop.f32.mrb[15].mxu1  ;;  %5186 = vmatprep.subr.msk.bf16.mxu1 %vm2582_vm0, %v5123_v61  ;;  %v1035_v34 = vld [vmem:[%s6216_s16 + $0x5f8] sm:$0xff]  ;;  %v4934_v40 = vcombine.low %v939_v24, %v971_v25  ;;  %v4997_v41 = vcombine.high %v1002_v26, %v1034_v30 }
 0x1dd   : > { %5337 = vtanh.f32 %v3058_v8  ;;  %v4999_v43 = vcombine.high %v1003_v33, %v1035_v34  ;;  %v4996_v45 = vcombine.low %v1002_v26, %v1034_v30  ;;  %v4998_v46 = vcombine.low %v1003_v33, %v1035_v34  ;;  %v1131_v3 = vld [vmem:[%s6216_s16 + $0x8f8] sm:$0xff]  ;;  %s7004_s16 = scalar_lea.vmem [#allocation5], %s4804_s13  ;;  %s5447_s13 = scalar_lea.vmem %s5446_s11, 128 }
 0x1de   : > { %5339 = vtanh.f32 %v3097_v10  ;;  %v5061_v47 = vcombine.high %v6792_v36, %v6795_v38  ;;  %v5060_v51 = vcombine.low %v6792_v36, %v6795_v38  ;;  %v5062_v52 = vcombine.low %v6798_v42, %v6801_v39  ;;  %s4676_s17 = sshll.u32 %s7004_s16, 4  ;;  %s7015_s17 = int_to_ptr.vmem [resolvable:$true] %s4676_s17 }
 0x1df   : > { %5341 = vtanh.f32 %v3099_v15  ;;  %3932 = vmatpush1.bf16.msra.mxu0 %v2752_v12  ;;  %3973 = vmatpush1.bf16.msra.mxu1 %v2758_v19  ;;  %v5063_v62 = vcombine.high %v6798_v42, %v6801_v39  ;;  %v5125_v6 = vcombine.high %v1130_v57, %v1130_v57  ;;  %v5124_v10 = vcombine.low %v1130_v57, %v1130_v57 }
 0x1e0   : > { %4005 = vmatprep.subr.bf16.mxu0 %v4869_v17  ;;  %4046 = vmatprep.subr.bf16.mxu1 %v4871_v21  ;;  %v5126_v14 = vcombine.low %v1131_v3, %v1131_v3 }
 0x1e2   : > { %5185 = vmatmul.mubr.msk.bf16.vlgmr.msra.gmra.mrb[56].mxu0 %vm2578_vm1, %v6783_v31  ;;  %5187 = vmatmul.mubr.msk.bf16.vlgmr.msra.gmra.mrb[56].mxu1 %vm2578_vm1, %v6783_v31  ;;  %v2770_v30 = vsel %vm2582_vm0, %v5126_v14, 0 }
 0x1e3   : > { %4006 = vmatpush1.bf16.msra.mxu0 %v4868_v27  ;;  %4047 = vmatpush1.bf16.msra.mxu1 %v4870_v37 }
 0x1e4   : > { %4007 = vmatprep.subr.bf16.mxu0 %v4933_v28  ;;  %4048 = vmatprep.subr.bf16.mxu1 %v4935_v29  ;;  %v2764_v29 = vsel %vm2582_vm0, %v5124_v10, 0 }
 0x1e5   : > { %4037 = vmatprep.mubr.bf16.mxu0 %v5537_v32  ;;  %4078 = vmatprep.mubr.bf16.mxu1 %v5537_v32 }
 0x1e6   : > { %v5336_v44 = vpop.eup %5335 }
 0x1e7   : > { %v5338_v48 = vpop.eup %5337  ;;  %v4334_v49 = vsel %vm2582_vm0, %v5336_v44, 0.0  ;;  %v4452_v50 = vmul.f32 %v5336_v44, %v5336_v44  ;;  %4008 = vmatpush1.bf16.msra.mxu0 %v4932_v35  ;;  %4049 = vmatpush1.bf16.msra.mxu1 %v4934_v40 }
 0x1e8   : > { %v5340_v53 = vpop.eup %5339  ;;  %v4335_v54 = vadd.f32 %v4334_v49, %v6760_v2  ;;  %v4221_v55 = vcombine.low %v5336_v44, %v5338_v48  ;;  %v4336_v56 = vsel %vm2582_vm0, %v5338_v48, 0.0  ;;  %v4453_v32 = vmul.f32 %v5338_v48, %v5338_v48  ;;  %4009 = vmatprep.subr.bf16.mxu0 %v4997_v41  ;;  %4050 = vmatprep.subr.bf16.mxu1 %v4999_v43 }
 0x1e9   : > { %v5342_v58 = vpop.eup %5341  ;;  %v4527_v59 = vsel %vm2582_vm0, %v4452_v50, 0.0  ;;  %v4338_v60 = vsel %vm2582_vm0, %v5340_v53, 0.0  ;;  %v4454_v61 = vmul.f32 %v5340_v53, %v5340_v53 }
 0x1ea   : > { %v4528_v63 = vadd.f32 %v4527_v59, %v6768_v13  ;;  %v4337_v0 = vadd.f32 %v4336_v56, %v4335_v54  ;;  %v4529_v1 = vsel %vm2582_vm0, %v4453_v32, 0.0  ;;  %v4222_v2 = vcombine.low %v5340_v53, %v5342_v58  ;;  %4285 = vst [vmem:[%s6611_s9 + $0x30] sm:$0xff] %v4221_v55 }
 0x1eb   : > { %v4531_v4 = vsel %vm2582_vm0, %v4454_v61, 0.0  ;;  %v4340_v5 = vsel %vm2582_vm0, %v5342_v58, 0.0  ;;  %v4455_v20 = vmul.f32 %v5342_v58, %v5342_v58  ;;  %4010 = vmatpush1.bf16.msra.mxu0 %v4996_v45  ;;  %4051 = vmatpush1.bf16.msra.mxu1 %v4998_v46  ;;  %v5127_v13 = vcombine.high %v1131_v3, %v1131_v3 }
 0x1ec   : > { %v4530_v8 = vadd.f32 %v4529_v1, %v4528_v63  ;;  %v4339_v9 = vadd.f32 %v4338_v60, %v4337_v0  ;;  %4011 = vmatprep.subr.bf16.mxu0 %v5061_v47  ;;  %4286 = vst [vmem:[%s6611_s9 + $0x38] sm:$0xff] %v4222_v2  ;;  %4052 = vmatprep.subr.bf16.mxu1 %v5063_v62 }
 0x1ed   : > { %v4533_v11 = vsel %vm2582_vm0, %v4455_v20, 0.0  ;;  %v3137_v12 = vpop.f32.mrb[16].mxu0  ;;  %v3178_v19 = vpop.f32.mrb[16].mxu1 }
 0x1ee   : > { %v4532_v15 = vadd.f32 %v4531_v4, %v4530_v8  ;;  %v4341_v16 = vadd.f32 %v4340_v5, %v4339_v9  ;;  %v3138_v17 = vadd.f32 %v3137_v12, %v6554_v7  ;;  %v3139_v18 = vpop.f32.mrb[17].mxu0  ;;  %v3179_v23 = vadd.f32 %v3178_v19, %v6554_v7  ;;  %v3180_v24 = vpop.f32.mrb[17].mxu1 }
 0x1ef   : > { %v3140_v21 = vadd.f32 %v3139_v18, %v6554_v7  ;;  %v3141_v22 = vpop.f32.mrb[18].mxu0  ;;  %4012 = vmatpush1.bf16.msra.mxu0 %v5060_v51  ;;  %4053 = vmatpush1.bf16.msra.mxu1 %v5062_v52  ;;  %v3181_v37 = vadd.f32 %v3180_v24, %v6554_v7  ;;  %v3182_v28 = vpop.f32.mrb[18].mxu1 }
 0x1f0   : > { %v4534_v25 = vadd.f32 %v4533_v11, %v4532_v15  ;;  %5343 = vtanh.f32 %v3138_v17  ;;  %v3142_v27 = vpop.f32.mrb[19].mxu0  ;;  %5188 = vmatprep.subr.msk.bf16.mxu0 %vm2582_vm0, %v5125_v6  ;;  %v3183_v26 = vpop.f32.mrb[19].mxu1  ;;  %5190 = vmatprep.subr.msk.bf16.mxu1 %vm2582_vm0, %v5127_v13 }
 0x1f1   : > { %5345 = vtanh.f32 %v3140_v21 }
 0x1f2   : > { %5347 = vtanh.f32 %v3179_v23 }
 0x1f3   : > { %5349 = vtanh.f32 %v3181_v37  ;;  %4014 = vmatpush1.bf16.msra.mxu0 %v2764_v29  ;;  %4055 = vmatpush1.bf16.msra.mxu1 %v2770_v30 }
 0x1f6   : > { %5189 = vmatmul.mubr.msk.bf16.vlgmr.msra.gmra.mrb[60].mxu0 %vm2578_vm1, %v6783_v31  ;;  %5191 = vmatmul.mubr.msk.bf16.vlgmr.msra.gmra.mrb[60].mxu1 %vm2578_vm1, %v6783_v31 }
 0x1fa   : > { %v5344_v33 = vpop.eup %5343 }
 0x1fb   : > { %v5346_v34 = vpop.eup %5345  ;;  %v4342_v35 = vsel %vm2582_vm0, %v5344_v33, 0.0  ;;  %v4456_v36 = vmul.f32 %v5344_v33, %v5344_v33 }
 0x1fc   : > { %v5348_v38 = vpop.eup %5347  ;;  %v4343_v40 = vadd.f32 %v4342_v35, %v4341_v16  ;;  %v4223_v41 = vcombine.low %v5344_v33, %v5346_v34  ;;  %v4344_v42 = vsel %vm2582_vm0, %v5346_v34, 0.0  ;;  %v4457_v39 = vmul.f32 %v5346_v34, %v5346_v34 }
 0x1fd   : > { %v5350_v43 = vpop.eup %5349  ;;  %v4535_v44 = vsel %vm2582_vm0, %v4456_v36, 0.0  ;;  %v4346_v45 = vsel %vm2582_vm0, %v5348_v38, 0.0  ;;  %v4458_v46 = vmul.f32 %v5348_v38, %v5348_v38 }
 0x1fe   : > { %v4536_v31 = vadd.f32 %v4535_v44, %v4534_v25  ;;  %v4345_v47 = vadd.f32 %v4344_v42, %v4343_v40  ;;  %v4537_v48 = vsel %vm2582_vm0, %v4457_v39, 0.0  ;;  %v4224_v49 = vcombine.low %v5348_v38, %v5350_v43  ;;  %4287 = vst [vmem:[%s6611_s9 + $0x40] sm:$0xff] %v4223_v41 }
 0x1ff   : > { %v4539_v50 = vsel %vm2582_vm0, %v4458_v46, 0.0  ;;  %v4348_v51 = vsel %vm2582_vm0, %v5350_v43, 0.0  ;;  %v4459_v52 = vmul.f32 %v5350_v43, %v5350_v43 }
 0x200   : > { %v4538_v53 = vadd.f32 %v4537_v48, %v4536_v31  ;;  %v4347_v54 = vadd.f32 %v4346_v45, %v4345_v47  ;;  %4288 = vst [vmem:[%s6611_s9 + $0x48] sm:$0xff] %v4224_v49 }
 0x201   : > { %v4541_v55 = vsel %vm2582_vm0, %v4459_v52, 0.0  ;;  %v3219_v56 = vpop.f32.mrb[20].mxu0  ;;  %v3260_v60 = vpop.f32.mrb[20].mxu1 }
 0x202   : > { %v4540_v32 = vadd.f32 %v4539_v50, %v4538_v53  ;;  %v4349_v57 = vadd.f32 %v4348_v51, %v4347_v54  ;;  %v3220_v58 = vadd.f32 %v3219_v56, %v6554_v7  ;;  %v3221_v59 = vpop.f32.mrb[21].mxu0  ;;  %v3261_v63 = vadd.f32 %v3260_v60, %v6554_v7  ;;  %v3262_v0 = vpop.f32.mrb[21].mxu1 }
 0x203   : > { %v3222_v61 = vadd.f32 %v3221_v59, %v6554_v7  ;;  %v3223_v62 = vpop.f32.mrb[22].mxu0  ;;  %v3263_v3 = vadd.f32 %v3262_v0, %v6554_v7  ;;  %v3264_v4 = vpop.f32.mrb[22].mxu1 }
 0x204   : > { %v4542_v1 = vadd.f32 %v4541_v55, %v4540_v32  ;;  %5351 = vtanh.f32 %v3220_v58  ;;  %v3224_v2 = vpop.f32.mrb[23].mxu0  ;;  %v3265_v5 = vpop.f32.mrb[23].mxu1 }
 0x205   : > { %5353 = vtanh.f32 %v3222_v61 }
 0x206   : > { %5355 = vtanh.f32 %v3261_v63 }
 0x207   : > { %5357 = vtanh.f32 %v3263_v3 }
 0x20e   : > { %v5352_v20 = vpop.eup %5351 }
 0x20f   : > { %v5354_v6 = vpop.eup %5353  ;;  %v4350_v8 = vsel %vm2582_vm0, %v5352_v20, 0.0  ;;  %v4460_v9 = vmul.f32 %v5352_v20, %v5352_v20 }
 0x210   : > { %v5356_v10 = vpop.eup %5355  ;;  %v4351_v11 = vadd.f32 %v4350_v8, %v4349_v57  ;;  %v4225_v12 = vcombine.low %v5352_v20, %v5354_v6  ;;  %v4352_v13 = vsel %vm2582_vm0, %v5354_v6, 0.0  ;;  %v4461_v14 = vmul.f32 %v5354_v6, %v5354_v6 }
 0x211   : > { %v5358_v15 = vpop.eup %5357  ;;  %v4543_v16 = vsel %vm2582_vm0, %v4460_v9, 0.0  ;;  %v4354_v17 = vsel %vm2582_vm0, %v5356_v10, 0.0  ;;  %v4462_v18 = vmul.f32 %v5356_v10, %v5356_v10 }
 0x212   : > { %v4544_v19 = vadd.f32 %v4543_v16, %v4542_v1  ;;  %v4353_v21 = vadd.f32 %v4352_v13, %v4351_v11  ;;  %v4545_v22 = vsel %vm2582_vm0, %v4461_v14, 0.0  ;;  %v4226_v23 = vcombine.low %v5356_v10, %v5358_v15  ;;  %4289 = vst [vmem:[%s6611_s9 + $0x50] sm:$0xff] %v4225_v12 }
 0x213   : > { %v4547_v24 = vsel %vm2582_vm0, %v4462_v18, 0.0  ;;  %v4356_v25 = vsel %vm2582_vm0, %v5358_v15, 0.0  ;;  %v4463_v27 = vmul.f32 %v5358_v15, %v5358_v15 }
 0x214   : > { %v4546_v37 = vadd.f32 %v4545_v22, %v4544_v19  ;;  %v4355_v28 = vadd.f32 %v4354_v17, %v4353_v21  ;;  %4290 = vst [vmem:[%s6611_s9 + $0x58] sm:$0xff] %v4226_v23 }
 0x215   : > { %v4549_v29 = vsel %vm2582_vm0, %v4463_v27, 0.0  ;;  %v3301_v26 = vpop.f32.mrb[24].mxu0  ;;  %v3342_v36 = vpop.f32.mrb[24].mxu1 }
 0x216   : > { %v4548_v30 = vadd.f32 %v4547_v24, %v4546_v37  ;;  %v4357_v33 = vadd.f32 %v4356_v25, %v4355_v28  ;;  %v3302_v34 = vadd.f32 %v3301_v26, %v6554_v7  ;;  %v3303_v35 = vpop.f32.mrb[25].mxu0  ;;  %v3343_v41 = vadd.f32 %v3342_v36, %v6554_v7  ;;  %v3344_v42 = vpop.f32.mrb[25].mxu1 }
 0x217   : > { %v3304_v38 = vadd.f32 %v3303_v35, %v6554_v7  ;;  %v3305_v40 = vpop.f32.mrb[26].mxu0  ;;  %v3345_v44 = vadd.f32 %v3344_v42, %v6554_v7  ;;  %v3346_v45 = vpop.f32.mrb[26].mxu1 }
 0x218   : > { %v4550_v39 = vadd.f32 %v4549_v29, %v4548_v30  ;;  %5359 = vtanh.f32 %v3302_v34  ;;  %v3306_v43 = vpop.f32.mrb[27].mxu0  ;;  %v3347_v46 = vpop.f32.mrb[27].mxu1 }
 0x219   : > { %5361 = vtanh.f32 %v3304_v38 }
 0x21a   : > { %5363 = vtanh.f32 %v3343_v41 }
 0x21b   : > { %5365 = vtanh.f32 %v3345_v44 }
 0x222   : > { %v5360_v31 = vpop.eup %5359 }
 0x223   : > { %v5362_v47 = vpop.eup %5361  ;;  %v4358_v48 = vsel %vm2582_vm0, %v5360_v31, 0.0  ;;  %v4464_v49 = vmul.f32 %v5360_v31, %v5360_v31 }
 0x224   : > { %v5364_v50 = vpop.eup %5363  ;;  %v4359_v51 = vadd.f32 %v4358_v48, %v4357_v33  ;;  %v4227_v52 = vcombine.low %v5360_v31, %v5362_v47  ;;  %v4360_v53 = vsel %vm2582_vm0, %v5362_v47, 0.0  ;;  %v4465_v54 = vmul.f32 %v5362_v47, %v5362_v47 }
 0x225   : > { %v5366_v55 = vpop.eup %5365  ;;  %v4551_v56 = vsel %vm2582_vm0, %v4464_v49, 0.0  ;;  %v4362_v32 = vsel %vm2582_vm0, %v5364_v50, 0.0  ;;  %v4466_v57 = vmul.f32 %v5364_v50, %v5364_v50 }
 0x226   : > { %v4552_v58 = vadd.f32 %v4551_v56, %v4550_v39  ;;  %v4361_v59 = vadd.f32 %v4360_v53, %v4359_v51  ;;  %v4553_v60 = vsel %vm2582_vm0, %v4465_v54, 0.0  ;;  %v4228_v61 = vcombine.low %v5364_v50, %v5366_v55  ;;  %4291 = vst [vmem:[%s6611_s9 + $0x60] sm:$0xff] %v4227_v52 }
 0x227   : > { %v4555_v62 = vsel %vm2582_vm0, %v4466_v57, 0.0  ;;  %v4364_v63 = vsel %vm2582_vm0, %v5366_v55, 0.0  ;;  %v4467_v0 = vmul.f32 %v5366_v55, %v5366_v55 }
 0x228   : > { %v4554_v1 = vadd.f32 %v4553_v60, %v4552_v58  ;;  %v4363_v2 = vadd.f32 %v4362_v32, %v4361_v59  ;;  %4292 = vst [vmem:[%s6611_s9 + $0x68] sm:$0xff] %v4228_v61 }
 0x229   : > { %v4557_v3 = vsel %vm2582_vm0, %v4467_v0, 0.0  ;;  %v3383_v4 = vpop.f32.mrb[28].mxu0  ;;  %v3424_v9 = vpop.f32.mrb[28].mxu1 }
 0x22a   : > { %v4556_v5 = vadd.f32 %v4555_v62, %v4554_v1  ;;  %v4365_v20 = vadd.f32 %v4364_v63, %v4363_v2  ;;  %v3384_v6 = vadd.f32 %v3383_v4, %v6554_v7  ;;  %v3385_v8 = vpop.f32.mrb[29].mxu0  ;;  %v3425_v12 = vadd.f32 %v3424_v9, %v6554_v7  ;;  %v3426_v13 = vpop.f32.mrb[29].mxu1 }
 0x22b   : > { %v3386_v10 = vadd.f32 %v3385_v8, %v6554_v7  ;;  %v3387_v11 = vpop.f32.mrb[30].mxu0  ;;  %v3427_v16 = vadd.f32 %v3426_v13, %v6554_v7  ;;  %v3428_v17 = vpop.f32.mrb[30].mxu1 }
 0x22c   : > { %v4558_v14 = vadd.f32 %v4557_v3, %v4556_v5  ;;  %5367 = vtanh.f32 %v3384_v6  ;;  %v3388_v15 = vpop.f32.mrb[31].mxu0  ;;  %v3429_v18 = vpop.f32.mrb[31].mxu1 }
 0x22d   : > { %5369 = vtanh.f32 %v3386_v10 }
 0x22e   : > { %5371 = vtanh.f32 %v3425_v12 }
 0x22f   : > { %5373 = vtanh.f32 %v3427_v16 }
 0x236   : > { %v5368_v19 = vpop.eup %5367 }
 0x237   : > { %v5370_v21 = vpop.eup %5369  ;;  %v4366_v22 = vsel %vm2582_vm0, %v5368_v19, 0.0  ;;  %v4468_v23 = vmul.f32 %v5368_v19, %v5368_v19 }
 0x238   : > { %v5372_v24 = vpop.eup %5371  ;;  %v4367_v25 = vadd.f32 %v4366_v22, %v4365_v20  ;;  %v4229_v27 = vcombine.low %v5368_v19, %v5370_v21  ;;  %v4368_v37 = vsel %vm2582_vm0, %v5370_v21, 0.0  ;;  %v4469_v28 = vmul.f32 %v5370_v21, %v5370_v21 }
 0x239   : > { %v5374_v29 = vpop.eup %5373  ;;  %v4559_v26 = vsel %vm2582_vm0, %v4468_v23, 0.0  ;;  %v4370_v30 = vsel %vm2582_vm0, %v5372_v24, 0.0  ;;  %v4470_v33 = vmul.f32 %v5372_v24, %v5372_v24 }
 0x23a   : > { %v4560_v34 = vadd.f32 %v4559_v26, %v4558_v14  ;;  %v4369_v35 = vadd.f32 %v4368_v37, %v4367_v25  ;;  %v4561_v36 = vsel %vm2582_vm0, %v4469_v28, 0.0  ;;  %v4230_v38 = vcombine.low %v5372_v24, %v5374_v29  ;;  %4293 = vst [vmem:[%s6611_s9 + $0x70] sm:$0xff] %v4229_v27 }
 0x23b   : > { %v4563_v40 = vsel %vm2582_vm0, %v4470_v33, 0.0  ;;  %v4372_v41 = vsel %vm2582_vm0, %v5374_v29, 0.0  ;;  %v4471_v42 = vmul.f32 %v5374_v29, %v5374_v29 }
 0x23c   : > { %v4562_v39 = vadd.f32 %v4561_v36, %v4560_v34  ;;  %v4371_v43 = vadd.f32 %v4370_v30, %v4369_v35  ;;  %4294 = vst [vmem:[%s6611_s9 + $0x78] sm:$0xff] %v4230_v38 }
 0x23d   : > { %v4565_v44 = vsel %vm2582_vm0, %v4471_v42, 0.0  ;;  %v3465_v45 = vpop.f32.mrb[32].mxu0  ;;  %v3506_v49 = vpop.f32.mrb[32].mxu1 }
 0x23e   : > { %v4564_v46 = vadd.f32 %v4563_v40, %v4562_v39  ;;  %v4373_v31 = vadd.f32 %v4372_v41, %v4371_v43  ;;  %v3466_v47 = vadd.f32 %v3465_v45, %v6554_v7  ;;  %v3467_v48 = vpop.f32.mrb[33].mxu0  ;;  %v3507_v52 = vadd.f32 %v3506_v49, %v6554_v7  ;;  %v3508_v53 = vpop.f32.mrb[33].mxu1 }
 0x23f   : > { %v3468_v50 = vadd.f32 %v3467_v48, %v6554_v7  ;;  %v3469_v51 = vpop.f32.mrb[34].mxu0  ;;  %v3509_v56 = vadd.f32 %v3508_v53, %v6554_v7  ;;  %v3510_v32 = vpop.f32.mrb[34].mxu1 }
 0x240   : > { %v4566_v54 = vadd.f32 %v4565_v44, %v4564_v46  ;;  %5375 = vtanh.f32 %v3466_v47  ;;  %v3470_v55 = vpop.f32.mrb[35].mxu0  ;;  %v3511_v57 = vpop.f32.mrb[35].mxu1 }
 0x241   : > { %5377 = vtanh.f32 %v3468_v50 }
 0x242   : > { %5379 = vtanh.f32 %v3507_v52 }
 0x243   : > { %5381 = vtanh.f32 %v3509_v56 }
 0x24a   : > { %v5376_v58 = vpop.eup %5375 }
 0x24b   : > { %v5378_v59 = vpop.eup %5377  ;;  %v4374_v60 = vsel %vm2582_vm0, %v5376_v58, 0.0  ;;  %v4472_v61 = vmul.f32 %v5376_v58, %v5376_v58 }
 0x24c   : > { %v5380_v62 = vpop.eup %5379  ;;  %v4375_v63 = vadd.f32 %v4374_v60, %v4373_v31  ;;  %v4231_v0 = vcombine.low %v5376_v58, %v5378_v59  ;;  %v4376_v1 = vsel %vm2582_vm0, %v5378_v59, 0.0  ;;  %v4473_v2 = vmul.f32 %v5378_v59, %v5378_v59 }
 0x24d   : > { %v5382_v3 = vpop.eup %5381  ;;  %v4567_v4 = vsel %vm2582_vm0, %v4472_v61, 0.0  ;;  %v4378_v5 = vsel %vm2582_vm0, %v5380_v62, 0.0  ;;  %v4474_v20 = vmul.f32 %v5380_v62, %v5380_v62 }
 0x24e   : > { %v4568_v6 = vadd.f32 %v4567_v4, %v4566_v54  ;;  %v4377_v8 = vadd.f32 %v4376_v1, %v4375_v63  ;;  %v4569_v9 = vsel %vm2582_vm0, %v4473_v2, 0.0  ;;  %v4232_v10 = vcombine.low %v5380_v62, %v5382_v3  ;;  %4295 = vst [vmem:[%s6611_s9 + $0x80] sm:$0xff] %v4231_v0 }
 0x24f   : > { %v4571_v11 = vsel %vm2582_vm0, %v4474_v20, 0.0  ;;  %v4380_v12 = vsel %vm2582_vm0, %v5382_v3, 0.0  ;;  %v4475_v13 = vmul.f32 %v5382_v3, %v5382_v3 }
 0x250   : > { %v4570_v14 = vadd.f32 %v4569_v9, %v4568_v6  ;;  %v4379_v15 = vadd.f32 %v4378_v5, %v4377_v8  ;;  %4296 = vst [vmem:[%s6611_s9 + $0x88] sm:$0xff] %v4232_v10 }
 0x251   : > { %v4573_v16 = vsel %vm2582_vm0, %v4475_v13, 0.0  ;;  %v3547_v17 = vpop.f32.mrb[36].mxu0  ;;  %v3588_v23 = vpop.f32.mrb[36].mxu1 }
 0x252   : > { %v4572_v18 = vadd.f32 %v4571_v11, %v4570_v14  ;;  %v4381_v19 = vadd.f32 %v4380_v12, %v4379_v15  ;;  %v3548_v21 = vadd.f32 %v3547_v17, %v6554_v7  ;;  %v3549_v22 = vpop.f32.mrb[37].mxu0  ;;  %v3589_v25 = vadd.f32 %v3588_v23, %v6554_v7  ;;  %v3590_v37 = vpop.f32.mrb[37].mxu1 }
 0x253   : > { %v3550_v24 = vadd.f32 %v3549_v22, %v6554_v7  ;;  %v3551_v27 = vpop.f32.mrb[38].mxu0  ;;  %v3591_v29 = vadd.f32 %v3590_v37, %v6554_v7  ;;  %v3592_v30 = vpop.f32.mrb[38].mxu1 }
 0x254   : > { %v4574_v28 = vadd.f32 %v4573_v16, %v4572_v18  ;;  %5383 = vtanh.f32 %v3548_v21  ;;  %v3552_v26 = vpop.f32.mrb[39].mxu0  ;;  %v3593_v33 = vpop.f32.mrb[39].mxu1 }
 0x255   : > { %5385 = vtanh.f32 %v3550_v24 }
 0x256   : > { %5387 = vtanh.f32 %v3589_v25 }
 0x257   : > { %5389 = vtanh.f32 %v3591_v29 }
 0x25e   : > { %v5384_v34 = vpop.eup %5383 }
 0x25f   : > { %v5386_v35 = vpop.eup %5385  ;;  %v4382_v36 = vsel %vm2582_vm0, %v5384_v34, 0.0  ;;  %v4476_v38 = vmul.f32 %v5384_v34, %v5384_v34 }
 0x260   : > { %v5388_v40 = vpop.eup %5387  ;;  %v4383_v41 = vadd.f32 %v4382_v36, %v4381_v19  ;;  %v4233_v42 = vcombine.low %v5384_v34, %v5386_v35  ;;  %v4384_v39 = vsel %vm2582_vm0, %v5386_v35, 0.0  ;;  %v4477_v43 = vmul.f32 %v5386_v35, %v5386_v35 }
 0x261   : > { %v5390_v44 = vpop.eup %5389  ;;  %v4575_v45 = vsel %vm2582_vm0, %v4476_v38, 0.0  ;;  %v4478_v46 = vmul.f32 %v5388_v40, %v5388_v40  ;;  %v4386_v50 = vsel %vm2582_vm0, %v5388_v40, 0.0 }
 0x262   : > { %v4576_v31 = vadd.f32 %v4575_v45, %v4574_v28  ;;  %v4385_v47 = vadd.f32 %v4384_v39, %v4383_v41  ;;  %v4577_v48 = vsel %vm2582_vm0, %v4477_v43, 0.0  ;;  %v4234_v49 = vcombine.low %v5388_v40, %v5390_v44  ;;  %4297 = vst [vmem:[%s6611_s9 + $0x90] sm:$0xff] %v4233_v42 }
 0x263   : > { %v4479_v51 = vmul.f32 %v5390_v44, %v5390_v44  ;;  %v4579_v54 = vsel %vm2582_vm0, %v4478_v46, 0.0  ;;  %v4388_v55 = vsel %vm2582_vm0, %v5390_v44, 0.0 }
 0x264   : > { %v4578_v52 = vadd.f32 %v4577_v48, %v4576_v31  ;;  %v4387_v53 = vadd.f32 %v4386_v50, %v4385_v47  ;;  %4298 = vst [vmem:[%s6611_s9 + $0x98] sm:$0xff] %v4234_v49 }
 0x265   : > { %v3629_v56 = vpop.f32.mrb[40].mxu0  ;;  %v3670_v59 = vpop.f32.mrb[40].mxu1  ;;  %v4581_v61 = vsel %vm2582_vm0, %v4479_v51, 0.0 }
 0x266   : > { %v4580_v32 = vadd.f32 %v4579_v54, %v4578_v52  ;;  %v4389_v57 = vadd.f32 %v4388_v55, %v4387_v53  ;;  %v3630_v58 = vadd.f32 %v3629_v56, %v6554_v7  ;;  %v3631_v60 = vpop.f32.mrb[41].mxu0  ;;  %v3671_v62 = vadd.f32 %v3670_v59, %v6554_v7  ;;  %v3672_v0 = vpop.f32.mrb[41].mxu1 }
 0x267   : > { %v3632_v63 = vadd.f32 %v3631_v60, %v6554_v7  ;;  %v3633_v1 = vpop.f32.mrb[42].mxu0  ;;  %v3673_v3 = vadd.f32 %v3672_v0, %v6554_v7  ;;  %v3674_v5 = vpop.f32.mrb[42].mxu1 }
 0x268   : > { %v4582_v2 = vadd.f32 %v4581_v61, %v4580_v32  ;;  %5391 = vtanh.f32 %v3630_v58  ;;  %v3634_v4 = vpop.f32.mrb[43].mxu0  ;;  %v3675_v20 = vpop.f32.mrb[43].mxu1 }
 0x269   : > { %5393 = vtanh.f32 %v3671_v62 }
 0x26a   : > { %5395 = vtanh.f32 %v3632_v63 }
 0x26b   : > { %5397 = vtanh.f32 %v3673_v3 }
 0x272   : > { %v5392_v6 = vpop.eup %5391 }
 0x273   : > { %v5394_v8 = vpop.eup %5393  ;;  %v4390_v9 = vsel %vm2582_vm0, %v5392_v6, 0.0  ;;  %v4480_v10 = vmul.f32 %v5392_v6, %v5392_v6 }
 0x274   : > { %v5396_v11 = vpop.eup %5395  ;;  %v4391_v12 = vadd.f32 %v4390_v9, %v4389_v57  ;;  %v4482_v13 = vmul.f32 %v5394_v8, %v5394_v8  ;;  %v4394_v23 = vsel %vm2582_vm0, %v5394_v8, 0.0 }
 0x275   : > { %v5398_v14 = vpop.eup %5397  ;;  %v4583_v15 = vsel %vm2582_vm0, %v4480_v10, 0.0  ;;  %v4235_v16 = vcombine.low %v5392_v6, %v5396_v11  ;;  %v4392_v17 = vsel %vm2582_vm0, %v5396_v11, 0.0  ;;  %v4481_v18 = vmul.f32 %v5396_v11, %v5396_v11 }
 0x276   : > { %v4584_v19 = vadd.f32 %v4583_v15, %v4582_v2  ;;  %v4393_v21 = vadd.f32 %v4392_v17, %v4391_v12  ;;  %v4236_v22 = vcombine.low %v5394_v8, %v5398_v14  ;;  %v4483_v25 = vmul.f32 %v5398_v14, %v5398_v14 }
 0x277   : > { %v4585_v24 = vsel %vm2582_vm0, %v4481_v18, 0.0  ;;  %4299 = vst [vmem:[%s6611_s9 + $0xa0] sm:$0xff] %v4235_v16  ;;  %v4587_v28 = vsel %vm2582_vm0, %v4482_v13, 0.0  ;;  %v4396_v29 = vsel %vm2582_vm0, %v5398_v14, 0.0 }
 0x278   : > { %v4586_v27 = vadd.f32 %v4585_v24, %v4584_v19  ;;  %v4395_v37 = vadd.f32 %v4394_v23, %v4393_v21  ;;  %4300 = vst [vmem:[%s6611_s9 + $0xa8] sm:$0xff] %v4236_v22  ;;  %v4589_v38 = vsel %vm2582_vm0, %v4483_v25, 0.0 }
 0x279   : > { %v3711_v26 = vpop.f32.mrb[44].mxu0  ;;  %v3752_v35 = vpop.f32.mrb[44].mxu1 }
 0x27a   : > { %v4397_v30 = vadd.f32 %v4396_v29, %v4395_v37  ;;  %v4588_v33 = vadd.f32 %v4587_v28, %v4586_v27  ;;  %v3712_v34 = vadd.f32 %v3711_v26, %v6554_v7  ;;  %v3713_v36 = vpop.f32.mrb[45].mxu0  ;;  %v3753_v40 = vadd.f32 %v3752_v35, %v6554_v7  ;;  %v3754_v42 = vpop.f32.mrb[45].mxu1 }
 0x27b   : > { %v3714_v41 = vadd.f32 %v3713_v36, %v6554_v7  ;;  %v3715_v39 = vpop.f32.mrb[46].mxu0  ;;  %v3755_v44 = vadd.f32 %v3754_v42, %v6554_v7  ;;  %v3756_v46 = vpop.f32.mrb[46].mxu1 }
 0x27c   : > { %v4590_v43 = vadd.f32 %v4589_v38, %v4588_v33  ;;  %5399 = vtanh.f32 %v3712_v34  ;;  %v3716_v45 = vpop.f32.mrb[47].mxu0  ;;  %v3757_v31 = vpop.f32.mrb[47].mxu1 }
 0x27d   : > { %5401 = vtanh.f32 %v3753_v40 }
 0x27e   : > { %5403 = vtanh.f32 %v3714_v41 }
 0x27f   : > { %5405 = vtanh.f32 %v3755_v44 }
 0x286   : > { %v5400_v47 = vpop.eup %5399 }
 0x287   : > { %v5402_v48 = vpop.eup %5401  ;;  %v4398_v49 = vsel %vm2582_vm0, %v5400_v47, 0.0  ;;  %v4484_v50 = vmul.f32 %v5400_v47, %v5400_v47 }
 0x288   : > { %v5404_v51 = vpop.eup %5403  ;;  %v4399_v52 = vadd.f32 %v4398_v49, %v4397_v30  ;;  %v4486_v53 = vmul.f32 %v5402_v48, %v5402_v48  ;;  %v4402_v61 = vsel %vm2582_vm0, %v5402_v48, 0.0 }
 0x289   : > { %v5406_v54 = vpop.eup %5405  ;;  %v4591_v55 = vsel %vm2582_vm0, %v4484_v50, 0.0  ;;  %v4237_v56 = vcombine.low %v5400_v47, %v5404_v51  ;;  %v4400_v32 = vsel %vm2582_vm0, %v5404_v51, 0.0  ;;  %v4485_v57 = vmul.f32 %v5404_v51, %v5404_v51 }
 0x28a   : > { %v4592_v58 = vadd.f32 %v4591_v55, %v4590_v43  ;;  %v4401_v59 = vadd.f32 %v4400_v32, %v4399_v52  ;;  %v4238_v60 = vcombine.low %v5402_v48, %v5406_v54  ;;  %v4487_v63 = vmul.f32 %v5406_v54, %v5406_v54 }
 0x28b   : > { %v4593_v62 = vsel %vm2582_vm0, %v4485_v57, 0.0  ;;  %4301 = vst [vmem:[%s6611_s9 + $0xb0] sm:$0xff] %v4237_v56  ;;  %v4595_v2 = vsel %vm2582_vm0, %v4486_v53, 0.0  ;;  %v4404_v3 = vsel %vm2582_vm0, %v5406_v54, 0.0 }
 0x28c   : > { %v4594_v0 = vadd.f32 %v4593_v62, %v4592_v58  ;;  %v4403_v1 = vadd.f32 %v4402_v61, %v4401_v59  ;;  %4302 = vst [vmem:[%s6611_s9 + $0xb8] sm:$0xff] %v4238_v60  ;;  %v4597_v10 = vsel %vm2582_vm0, %v4487_v63, 0.0 }
 0x28d   : > { %v3793_v4 = vpop.f32.mrb[48].mxu0  ;;  %v3834_v8 = vpop.f32.mrb[48].mxu1 }
 0x28e   : > { %v4405_v5 = vadd.f32 %v4404_v3, %v4403_v1  ;;  %v4596_v20 = vadd.f32 %v4595_v2, %v4594_v0  ;;  %v3794_v6 = vadd.f32 %v3793_v4, %v6554_v7  ;;  %v3795_v9 = vpop.f32.mrb[49].mxu0  ;;  %v3835_v11 = vadd.f32 %v3834_v8, %v6554_v7  ;;  %v3836_v13 = vpop.f32.mrb[49].mxu1 }
 0x28f   : > { %v3796_v12 = vadd.f32 %v3795_v9, %v6554_v7  ;;  %v3797_v14 = vpop.f32.mrb[50].mxu0  ;;  %v3837_v16 = vadd.f32 %v3836_v13, %v6554_v7  ;;  %v3838_v18 = vpop.f32.mrb[50].mxu1 }
 0x290   : > { %v4598_v15 = vadd.f32 %v4597_v10, %v4596_v20  ;;  %5407 = vtanh.f32 %v3794_v6  ;;  %v3798_v17 = vpop.f32.mrb[51].mxu0  ;;  %v3839_v19 = vpop.f32.mrb[51].mxu1 }
 0x291   : > { %5409 = vtanh.f32 %v3835_v11 }
 0x292   : > { %5411 = vtanh.f32 %v3796_v12 }
 0x293   : > { %5413 = vtanh.f32 %v3837_v16 }
 0x29a   : > { %v5408_v21 = vpop.eup %5407 }
 0x29b   : > { %v5410_v22 = vpop.eup %5409  ;;  %v4406_v23 = vsel %vm2582_vm0, %v5408_v21, 0.0  ;;  %v4488_v24 = vmul.f32 %v5408_v21, %v5408_v21 }
 0x29c   : > { %v5412_v25 = vpop.eup %5411  ;;  %v4407_v27 = vadd.f32 %v4406_v23, %v4405_v5  ;;  %v4490_v37 = vmul.f32 %v5410_v22, %v5410_v22  ;;  %v4410_v38 = vsel %vm2582_vm0, %v5410_v22, 0.0 }
 0x29d   : > { %v5414_v28 = vpop.eup %5413  ;;  %v4599_v29 = vsel %vm2582_vm0, %v4488_v24, 0.0  ;;  %v4239_v26 = vcombine.low %v5408_v21, %v5412_v25  ;;  %v4408_v30 = vsel %vm2582_vm0, %v5412_v25, 0.0  ;;  %v4489_v33 = vmul.f32 %v5412_v25, %v5412_v25 }
 0x29e   : > { %v4600_v34 = vadd.f32 %v4599_v29, %v4598_v15  ;;  %v4409_v35 = vadd.f32 %v4408_v30, %v4407_v27  ;;  %v4240_v36 = vcombine.low %v5410_v22, %v5414_v28  ;;  %v4491_v41 = vmul.f32 %v5414_v28, %v5414_v28 }
 0x29f   : > { %v4601_v40 = vsel %vm2582_vm0, %v4489_v33, 0.0  ;;  %4303 = vst [vmem:[%s6611_s9 + $0xc0] sm:$0xff] %v4239_v26  ;;  %v4412_v43 = vsel %vm2582_vm0, %v5414_v28, 0.0  ;;  %v4603_v45 = vsel %vm2582_vm0, %v4490_v37, 0.0 }
 0x2a0   : > { %v4411_v42 = vadd.f32 %v4410_v38, %v4409_v35  ;;  %v4602_v39 = vadd.f32 %v4601_v40, %v4600_v34  ;;  %4304 = vst [vmem:[%s6611_s9 + $0xc8] sm:$0xff] %v4240_v36  ;;  %v4605_v54 = vsel %vm2582_vm0, %v4491_v41, 0.0 }
 0x2a1   : > { %v3875_v44 = vpop.f32.mrb[52].mxu0  ;;  %v3916_v31 = vpop.f32.mrb[52].mxu1 }
 0x2a2   : > { %v3876_v46 = vadd.f32 %v3875_v44, %v6554_v7  ;;  %v3877_v47 = vpop.f32.mrb[53].mxu0  ;;  %v4413_v48 = vadd.f32 %v4412_v43, %v4411_v42  ;;  %v4604_v49 = vadd.f32 %v4603_v45, %v4602_v39  ;;  %v3917_v50 = vadd.f32 %v3916_v31, %v6554_v7  ;;  %v3918_v52 = vpop.f32.mrb[53].mxu1 }
 0x2a3   : > { %v3878_v51 = vadd.f32 %v3877_v47, %v6554_v7  ;;  %v3879_v53 = vpop.f32.mrb[54].mxu0  ;;  %v3919_v55 = vadd.f32 %v3918_v52, %v6554_v7  ;;  %v3920_v32 = vpop.f32.mrb[54].mxu1 }
 0x2a4   : > { %5415 = vtanh.f32 %v3876_v46  ;;  %v3880_v56 = vpop.f32.mrb[55].mxu0  ;;  %v4606_v57 = vadd.f32 %v4605_v54, %v4604_v49  ;;  %v3921_v58 = vpop.f32.mrb[55].mxu1 }
 0x2a5   : > { %5417 = vtanh.f32 %v3917_v50 }
 0x2a6   : > { %5419 = vtanh.f32 %v3878_v51 }
 0x2a7   : > { %5421 = vtanh.f32 %v3919_v55 }
 0x2ae   : > { %v5416_v59 = vpop.eup %5415 }
 0x2af   : > { %v5418_v60 = vpop.eup %5417  ;;  %v4414_v61 = vsel %vm2582_vm0, %v5416_v59, 0.0  ;;  %v4492_v62 = vmul.f32 %v5416_v59, %v5416_v59 }
 0x2b0   : > { %v5420_v63 = vpop.eup %5419  ;;  %v4415_v0 = vadd.f32 %v4414_v61, %v4413_v48  ;;  %v4494_v8 = vmul.f32 %v5418_v60, %v5418_v60  ;;  %v4418_v9 = vsel %vm2582_vm0, %v5418_v60, 0.0 }
 0x2b1   : > { %v5422_v1 = vpop.eup %5421  ;;  %v4241_v2 = vcombine.low %v5416_v59, %v5420_v63  ;;  %v4416_v3 = vsel %vm2582_vm0, %v5420_v63, 0.0  ;;  %v4493_v4 = vmul.f32 %v5420_v63, %v5420_v63  ;;  %v4607_v5 = vsel %vm2582_vm0, %v4492_v62, 0.0 }
 0x2b2   : > { %v4242_v20 = vcombine.low %v5418_v60, %v5422_v1  ;;  %v4417_v6 = vadd.f32 %v4416_v3, %v4415_v0  ;;  %v4608_v10 = vadd.f32 %v4607_v5, %v4606_v57  ;;  %v4495_v13 = vmul.f32 %v5422_v1, %v5422_v1 }
 0x2b3   : > { %v4609_v11 = vsel %vm2582_vm0, %v4493_v4, 0.0  ;;  %4305 = vst [vmem:[%s6611_s9 + $0xd0] sm:$0xff] %v4241_v2  ;;  %v4420_v15 = vsel %vm2582_vm0, %v5422_v1, 0.0  ;;  %v4611_v22 = vsel %vm2582_vm0, %v4494_v8, 0.0 }
 0x2b4   : > { %v4419_v12 = vadd.f32 %v4418_v9, %v4417_v6  ;;  %4306 = vst [vmem:[%s6611_s9 + $0xd8] sm:$0xff] %v4242_v20  ;;  %v4610_v16 = vadd.f32 %v4609_v11, %v4608_v10  ;;  %v4613_v30 = vsel %vm2582_vm0, %v4495_v13, 0.0 }
 0x2b5   : > { %v3957_v14 = vpop.f32.mrb[56].mxu0  ;;  %v3998_v18 = vpop.f32.mrb[56].mxu1 }
 0x2b6   : > { %v3958_v17 = vadd.f32 %v3957_v14, %v6554_v7  ;;  %v3959_v19 = vpop.f32.mrb[57].mxu0  ;;  %v4421_v21 = vadd.f32 %v4420_v15, %v4419_v12  ;;  %v3999_v23 = vadd.f32 %v3998_v18, %v6554_v7  ;;  %v4000_v25 = vpop.f32.mrb[57].mxu1  ;;  %v4612_v37 = vadd.f32 %v4611_v22, %v4610_v16 }
 0x2b7   : > { %v3960_v24 = vadd.f32 %v3959_v19, %v6554_v7  ;;  %v3961_v27 = vpop.f32.mrb[58].mxu0  ;;  %v4001_v28 = vadd.f32 %v4000_v25, %v6554_v7  ;;  %v4002_v26 = vpop.f32.mrb[58].mxu1 }
 0x2b8   : > { %5423 = vtanh.f32 %v3958_v17  ;;  %v3962_v29 = vpop.f32.mrb[59].mxu0  ;;  %v4003_v33 = vpop.f32.mrb[59].mxu1  ;;  %v4614_v34 = vadd.f32 %v4613_v30, %v4612_v37 }
 0x2b9   : > { %5425 = vtanh.f32 %v3999_v23 }
 0x2ba   : > { %5427 = vtanh.f32 %v3960_v24 }
 0x2bb   : > { %5429 = vtanh.f32 %v4001_v28 }
 0x2c2   : > { %v5424_v35 = vpop.eup %5423 }
 0x2c3   : > { %v5426_v36 = vpop.eup %5425  ;;  %v4422_v38 = vsel %vm2582_vm0, %v5424_v35, 0.0  ;;  %v4496_v40 = vmul.f32 %v5424_v35, %v5424_v35 }
 0x2c4   : > { %v5428_v41 = vpop.eup %5427  ;;  %v4423_v42 = vadd.f32 %v4422_v38, %v4421_v21  ;;  %v4498_v48 = vmul.f32 %v5426_v36, %v5426_v36  ;;  %v4426_v49 = vsel %vm2582_vm0, %v5426_v36, 0.0 }
 0x2c5   : > { %v5430_v39 = vpop.eup %5429  ;;  %v4243_v43 = vcombine.low %v5424_v35, %v5428_v41  ;;  %v4424_v44 = vsel %vm2582_vm0, %v5428_v41, 0.0  ;;  %v4497_v45 = vmul.f32 %v5428_v41, %v5428_v41  ;;  %v4615_v46 = vsel %vm2582_vm0, %v4496_v40, 0.0 }
 0x2c6   : > { %v4244_v31 = vcombine.low %v5426_v36, %v5430_v39  ;;  %v4425_v47 = vadd.f32 %v4424_v44, %v4423_v42  ;;  %v4616_v50 = vadd.f32 %v4615_v46, %v4614_v34  ;;  %v4499_v53 = vmul.f32 %v5430_v39, %v5430_v39 }
 0x2c7   : > { %v4617_v51 = vsel %vm2582_vm0, %v4497_v45, 0.0  ;;  %4307 = vst [vmem:[%s6611_s9 + $0xe0] sm:$0xff] %v4243_v43  ;;  %v4428_v55 = vsel %vm2582_vm0, %v5430_v39, 0.0  ;;  %v4619_v60 = vsel %vm2582_vm0, %v4498_v48, 0.0 }
 0x2c8   : > { %v4427_v52 = vadd.f32 %v4426_v49, %v4425_v47  ;;  %4308 = vst [vmem:[%s6611_s9 + $0xe8] sm:$0xff] %v4244_v31  ;;  %v4618_v56 = vadd.f32 %v4617_v51, %v4616_v50  ;;  %v4621_v5 = vsel %vm2582_vm0, %v4499_v53, 0.0 }
 0x2c9   : > { %v4039_v54 = vpop.f32.mrb[60].mxu0  ;;  %v4080_v57 = vpop.f32.mrb[60].mxu1 }
 0x2ca   : > { %v4040_v32 = vadd.f32 %v4039_v54, %v6554_v7  ;;  %v4041_v58 = vpop.f32.mrb[61].mxu0  ;;  %v4429_v59 = vadd.f32 %v4428_v55, %v4427_v52  ;;  %v4081_v61 = vadd.f32 %v4080_v57, %v6554_v7  ;;  %v4082_v63 = vpop.f32.mrb[61].mxu1  ;;  %v4620_v1 = vadd.f32 %v4619_v60, %v4618_v56 }
 0x2cb   : > { %v4042_v62 = vadd.f32 %v4041_v58, %v6554_v7  ;;  %v4043_v0 = vpop.f32.mrb[62].mxu0  ;;  %v4083_v2 = vadd.f32 %v4082_v63, %v6554_v7  ;;  %v4084_v4 = vpop.f32.mrb[62].mxu1 }
 0x2cc   : > { %5431 = vtanh.f32 %v4040_v32  ;;  %v4044_v3 = vpop.f32.mrb[63].mxu0  ;;  %v4085_v20 = vpop.f32.mrb[63].mxu1  ;;  %v4622_v6 = vadd.f32 %v4621_v5, %v4620_v1 }
 0x2cd   : > { %5433 = vtanh.f32 %v4081_v61 }
 0x2ce   : > { %5435 = vtanh.f32 %v4042_v62 }
 0x2cf   : > { %5437 = vtanh.f32 %v4083_v2 }
 0x2d6   : > { %v5432_v8 = vpop.eup %5431 }
 0x2d7   : > { %v5434_v9 = vpop.eup %5433  ;;  %v4430_v10 = vsel %vm2582_vm0, %v5432_v8, 0.0  ;;  %v4500_v11 = vmul.f32 %v5432_v8, %v5432_v8 }
 0x2d8   : > { %v5436_v12 = vpop.eup %5435  ;;  %v4431_v13 = vadd.f32 %v4430_v10, %v4429_v59  ;;  %v4502_v21 = vmul.f32 %v5434_v9, %v5434_v9  ;;  %v4434_v22 = vsel %vm2582_vm0, %v5434_v9, 0.0 }
 0x2d9   : > { %v5438_v14 = vpop.eup %5437  ;;  %v4245_v7 = vcombine.low %v5432_v8, %v5436_v12  ;;  %v4432_v15 = vsel %vm2582_vm0, %v5436_v12, 0.0  ;;  %v4501_v16 = vmul.f32 %v5436_v12, %v5436_v12  ;;  %v4623_v17 = vsel %vm2582_vm0, %v4500_v11, 0.0 }
 0x2da   : > { %v4246_v18 = vcombine.low %v5434_v9, %v5438_v14  ;;  %v4433_v19 = vadd.f32 %v4432_v15, %v4431_v13  ;;  %v4624_v23 = vadd.f32 %v4623_v17, %v4622_v6  ;;  %v4503_v27 = vmul.f32 %v5438_v14, %v5438_v14 }
 0x2db   : > { %v4625_v24 = vsel %vm2582_vm0, %v4501_v16, 0.0  ;;  %4309 = vst [vmem:[%s6611_s9 + $0xf0] sm:$0xff] %v4245_v7  ;;  %v4436_v37 = vsel %vm2582_vm0, %v5438_v14, 0.0  ;;  %v4627_v26 = vsel %vm2582_vm0, %v4502_v21, 0.0 }
 0x2dc   : > { %v4435_v25 = vadd.f32 %v4434_v22, %v4433_v19  ;;  %4310 = vst [vmem:[%s6611_s9 + $0xf8] sm:$0xff] %v4246_v18  ;;  %v4626_v28 = vadd.f32 %v4625_v24, %v4624_v23  ;;  %v4629_v33 = vsel %vm2582_vm0, %v4503_v27, 0.0  ;;  %s5441_s9 = scalar_lea.vmem %s7007_s15, 64 }
 0x2dd   : > { %p5442_p0 = scmp.ne.s32.totalorder %s7007_s15, %s5441_s9  ;;  %p5449_p4 = scmp.lt.s32.totalorder %s5447_s13, %s5441_s9 }
 0x2de   : > { %v4437_v29 = vadd.f32 %v4436_v37, %v4435_v25  ;;  %v4628_v30 = vadd.f32 %v4627_v26, %v4626_v28 }
 0x2df   : > { %p5443_p1 = pnand %p5442_p0, %p5608_p6  ;;  %p5450_p5 = por %p5449_p4, %p5448_p3 }
 0x2e0   : > { %4438 = vadd.xlane.f32.xlu0 %v4437_v29  ;;  %v4630_v34 = vadd.f32 %v4629_v33, %v4628_v30 }
 0x2e1   : > { %p5444_p2 = pneg %p5443_p1 }
 0x2e2   : > { %4631 = vadd.xlane.f32.xlu1 %v4630_v34 }
 0x2e3   : > { %p5451_p7 = pnand %p5450_p5, %p5444_p2 }
 0x36d   : > { %v4439_v35 = vpop.xlane.xlu0 %4438 }
 0x36e   : > { %4633 = vst [vmem:[%s827_s14] sm:$0xf] %v4439_v35 }
 0x36f   : > { %5454 = shalt.err (!%p5451_p7)
}
 0x370   : > { %s5455_s30 = scalar_lea.hbm %s7013_s26, 64  ;;  %s5459_s25 = scalar_lea.hbm %s7090_s4, 128 }
 0x371   : > { %p5456_p10 = scmp.ne.s32.totalorder %s7013_s26, %s5455_s30  ;;  %p5460_p13 = scmp.lt.u32.totalorder %s7013_s26, %s7090_s4 }
 0x372   : > { %p5461_p0 = scmp.lt.u32.totalorder %s5459_s25, %s5455_s30  ;;  %p5463_p2 = scmp.lt.u32.totalorder %s5455_s30, %s7013_s26 }
 0x373   : > { %p5457_p11 = pnand %p5456_p10, %p5608_p6 }
 0x374   : > { %p5462_p1 = por %p5461_p0, %p5460_p13 }
 0x375   : > { %p5458_p12 = pneg %p5457_p11 }
 0x376   : > { %p5464_p3 = por %p5463_p2, %p5462_p1 }
 0x378   : > { %p5465_p4 = pnand %p5464_p3, %p5458_p12 }
 0x37a   : > { %5468 = shalt.err (!%p5465_p4)
}
 0x37b   : > { %5201 = dma.vmem_to_hbm [thread:$0]  (%p5608_p6), %s7007_s15, 64, %s7013_s26, %s4641_s8   ;;  %v4632_v36 = vpop.xlane.xlu1 %4631 }
 0x37c   : > { %4634 = vst [vmem:[%s7004_s16] sm:$0xf] %v4632_v36  ;;  %s4646_s9 = scalar_lea.sflag [#allocation6], %s6207_s12  ;;  %s5469_s10 = scalar_lea.vmem %s7015_s17, 64 }
 0x37d   : > { %p5470_p5 = scmp.ne.s32.totalorder %s7015_s17, %s5469_s10  ;;  %s5539_s11 = smov [#allocation5]  }
 0x37e   : > { %s5473_s13 = sshll.u32 %s5539_s11, 4  ;;  %s5474_s13 = int_to_ptr.vmem [resolvable:$false] %s5473_s13 }
 0x37f   : > { %p5471_p7 = pnand %p5470_p5, %p5608_p6  ;;  %s5475_s30 = scalar_lea.vmem %s5474_s13, 128 }
 0x380   : > { %p5476_p11 = scmp.lt.s32.totalorder %s7015_s17, %s5474_s13  ;;  %p5477_p12 = scmp.lt.s32.totalorder %s5475_s30, %s5469_s10 }
 0x381   : > { %p5472_p10 = pneg %p5471_p7 }
 0x382   : > { %p5478_p13 = por %p5477_p12, %p5476_p11 }
 0x384   : > { %p5479_p0 = pnand %p5478_p13, %p5472_p10 }
 0x386   : > { %5482 = shalt.err (!%p5479_p0)
}
 0x387   : > { %s5483_s12 = scalar_lea.hbm %s7021_s7, 64  ;;  %s5487_s26 = scalar_lea.hbm %s7091_s5, 128 }
 0x388   : > { %p5484_p1 = scmp.ne.s32.totalorder %s7021_s7, %s5483_s12  ;;  %p5488_p4 = scmp.lt.u32.totalorder %s7021_s7, %s7091_s5 }
 0x389   : > { %p5489_p5 = scmp.lt.u32.totalorder %s5487_s26, %s5483_s12  ;;  %p5491_p10 = scmp.lt.u32.totalorder %s5483_s12, %s7021_s7 }
 0x38a   : > { %p5485_p2 = pnand %p5484_p1, %p5608_p6 }
 0x38b   : > { %p5490_p7 = por %p5489_p5, %p5488_p4 }
 0x38c   : > { %p5486_p3 = pneg %p5485_p2 }
 0x38d   : > { %p5492_p11 = por %p5491_p10, %p5490_p7 }
 0x38f   : > { %p5493_p12 = pnand %p5492_p11, %p5486_p3 }
 0x391   : > { %5496 = shalt.err (!%p5493_p12)
}
 0x392   : > { %5202 = dma.vmem_to_hbm [thread:$0]  (%p5608_p6), %s7015_s17, 64, %s7021_s7, %s4646_s9  }
 0x393 PF: > { %s4696_s23 = sand.u32 1, %s5523_s18   ;;  %p5206_p13 = pnand %p4800_p9, %p5612_p8 }
 0x394   : > { %s4697_s25 = scalar_lea.sflag [#allocation4], %s4696_s23 }
 0x395   : > { %5514 = dma.done.wait (!%p5206_p13), %s4697_s25, 64  }
 0x396   : > { %5516 = vsyncadd (!%p5206_p13), %s4697_s25, 4294967232  ;;  %s4706_s22 = scalar_lea.sflag [#allocation6], %s4696_s23 }
 0x397   : > { %5518 = dma.done.wait (!%p5206_p13), %s4706_s22, 64  }
 0x398   : > { %5520 = vsyncadd (!%p5206_p13), %s4706_s22, 4294967232  ;;  %p19_p6 = scmp.ge.s32.totalorder %s5593_s24, 4   ;;  %s7094_s18 = smov %s5527_s19 }
 0x399   : > { %s7095_s19 = smov %s5531_s20  ;;  %s7096_s20 = smov %s5606_s27 }
 0x39a   : > { %s7097_s21 = smov %s5593_s24  ;;  %21 = sbr.rel (!%p19_p6) target bundleno = 5 (0x5), region = 124 }
 0x3a1   :  { %4711 = vsyncpa [#allocation4], 1 }
 0x3a2   :  { %4713 = vsyncpa [#allocation4 + $0x1], 1 }
 0x3a3   :  { %4714 = vsyncpa [#allocation6], 1 }
 0x3a4   :  { %4716 = vsyncpa [#allocation6 + $0x1], 1 }

</bundles_post_ra>
